<compile_context>
chip_gen: v5e
topology: v5e:2x2
jax: 0.10.0
libtpu: 0.0.40
codegen_flags: <defaults>
</compile_context>

<pallas_src>
import functools

import jax
import jax.numpy as jnp
from jax.experimental import pallas as pl
from jax.experimental.pallas import tpu as pltpu


# ----------------------------------------------------------------------------
# helpers
# ----------------------------------------------------------------------------
def _round_up(x, m):
    return ((x + m - 1) // m) * m


def _pick_row_tile(n_rows, cap=1024):
    """Row tile for the matmul grid.

    * tiny inputs (<=16 rows, e.g. the FC layers at small batch) use a single
      full-extent block (block dim == array dim is always a legal TPU block);
    * otherwise split into >=2 row tiles (so v7x's two TensorCores both get
      work through the 'parallel' grid axis) of at most `cap` rows each,
      rounded up to a multiple of 16 (bf16 sublane packing).
    The last tile may be ragged; Pallas clips edge-block reads/writes.
    """
    if n_rows <= 16:
        return n_rows, 1
    n_tiles = max(-(-n_rows // cap), 2)
    tile = _round_up(-(-n_rows // n_tiles), 16)
    n_tiles = -(-n_rows // tile)
    return tile, n_tiles


# ----------------------------------------------------------------------------
# Pallas kernel: single-K, single-N matmul + bias (+ fused ReLU) (+ optional
#   fused per-row-tile BN partial sums: rows 0/1 of an (8, N) stats block hold
#   the channel sum / sum-of-squares of the valid post-ReLU output rows).
#   Used for every conv (via im2col) and both fully-connected layers.
# ----------------------------------------------------------------------------
def _matmul_bias_act_kernel(x_ref, w_ref, b_ref, o_ref, *maybe_stats,
                            relu, rows_valid, tm):
    y = jnp.dot(x_ref[...], w_ref[...], preferred_element_type=jnp.float32)
    y = y + b_ref[...]
    if relu:
        y = jnp.maximum(y, 0.0)
    o_ref[...] = y.astype(o_ref.dtype)

    if maybe_stats:
        st_ref = maybe_stats[0]

        def write_stats(yy):
            # Rows 0/1 of the (8, N) stats block hold sum / sum-of-squares;
            # rows 2..7 are never read downstream and are left untouched.
            st_ref[0:1, :] = jnp.sum(yy, axis=0, keepdims=True)
            st_ref[1:2, :] = jnp.sum(yy * yy, axis=0, keepdims=True)

        if rows_valid % tm == 0:
            # No ragged row tile exists: every row of every tile is valid,
            # so skip the mask entirely (static specialization).
            write_stats(y)
        else:
            i = pl.program_id(0)
            last = pl.num_programs(0) - 1

            @pl.when(i != last)
            def _():
                write_stats(y)          # only the last tile can hold padding

            @pl.when(i == last)
            def _():
                ridx = i * tm + jax.lax.broadcasted_iota(jnp.int32, y.shape, 0)
                write_stats(jnp.where(ridx < rows_valid, y, 0.0))


def pallas_matmul_bias(x, w, b, *, relu=False, with_stats=False,
                       out_dtype=jnp.float32, row_cap=1024):
    """y = relu?(x @ w + b).  x:(M,K), w:(K,N), b:(N,).

    bf16 operands, f32 MXU accumulate, single K tile, single N tile, row-tiled
    'parallel' grid.  No XLA pad/slice copies: K and N are full-extent blocks
    and the last row tile is ragged (Pallas clips edge reads/writes).
    If with_stats, also returns per-row-tile channel sum / sum-sq partials.
    """
    M, K = x.shape
    K2, N = w.shape
    assert K == K2
    tm, n_row_tiles = _pick_row_tile(M, row_cap)

    xb = x.astype(jnp.bfloat16)
    wb = w.astype(jnp.bfloat16)
    b2 = b.astype(jnp.float32).reshape(1, N)

    kernel = functools.partial(_matmul_bias_act_kernel, relu=relu,
                               rows_valid=M, tm=tm)

    in_specs = [
        pl.BlockSpec((tm, K), lambda i: (i, 0)),   # row tile, full K extent
        pl.BlockSpec((K, N), lambda i: (0, 0)),    # whole weight, stays resident
        pl.BlockSpec((1, N), lambda i: (0, 0)),    # bias row
    ]
    if with_stats:
        out_shape = (jax.ShapeDtypeStruct((M, N), out_dtype),
                     jax.ShapeDtypeStruct((n_row_tiles * 8, N), jnp.float32))
        out_specs = [pl.BlockSpec((tm, N), lambda i: (i, 0)),
                     pl.BlockSpec((8, N), lambda i: (i, 0))]
    else:
        out_shape = jax.ShapeDtypeStruct((M, N), out_dtype)
        out_specs = pl.BlockSpec((tm, N), lambda i: (i, 0))

    return pl.pallas_call(
        kernel,
        out_shape=out_shape,
        grid_spec=pltpu.PrefetchScalarGridSpec(
            num_scalar_prefetch=0,
            grid=(n_row_tiles,),
            in_specs=in_specs,
            out_specs=out_specs,
        ),
        compiler_params=pltpu.CompilerParams(
            dimension_semantics=("parallel",)),
    )(xb, wb, b2)


# ----------------------------------------------------------------------------
# XLA glue: im2col (same padding), 2x2 avg-pool (strided adds, fuses with the
#           BN affine), BN stat finish, rotation-group weight build.
# ----------------------------------------------------------------------------
def im2col_same(x_nhwc, ksize=5):
    bs, H, W, C = x_nhwc.shape
    p = ksize // 2
    xp = jnp.pad(x_nhwc, ((0, 0), (p, p), (p, p), (0, 0)))
    patches = [xp[:, ki:ki + H, kj:kj + W, :]
               for ki in range(ksize) for kj in range(ksize)]
    P = jnp.stack(patches, axis=-1)            # (bs,H,W,C,k*k)
    return P.reshape(bs * H * W, C * ksize * ksize)


def avgpool2x2(x_nhwc):
    """PyTorch AvgPool2d(2,2), ceil_mode=False, via 3 strided adds (f32 math)."""
    bs, H, W, C = x_nhwc.shape
    x = x_nhwc[:, :2 * (H // 2), :2 * (W // 2), :].astype(jnp.float32)
    return 0.25 * (x[:, 0::2, 0::2, :] + x[:, 0::2, 1::2, :] +
                   x[:, 1::2, 0::2, :] + x[:, 1::2, 1::2, :])


def finish_bn_stats(stats, *, n_rows, C, Ntheta, gamma, beta, eps=1e-5):
    """Turn per-row-tile channel partial sums into per-channel scale/shift.
    Statistics per rotational feature m are reduced over (batch, H, W, Ntheta)."""
    Mfeat = C // Ntheta
    csum = jnp.sum(stats[0::8, :C], axis=0)    # (C,)
    cssq = jnp.sum(stats[1::8, :C], axis=0)    # (C,)
    gsum = csum.reshape(Mfeat, Ntheta).sum(axis=1)
    gssq = cssq.reshape(Mfeat, Ntheta).sum(axis=1)
    n = float(n_rows * Ntheta)
    mean = gsum / n
    var = jnp.maximum(gssq / n - mean * mean, 0.0)   # clamp >= 0 before rsqrt
    inv = jax.lax.rsqrt(var + eps)
    scale_m = gamma * inv
    shift_m = beta - mean * scale_m
    # expand per rotational feature -> per channel (c = m*Ntheta + theta)
    return jnp.repeat(scale_m, Ntheta), jnp.repeat(shift_m, Ntheta)
    # TODO(synk): batch statistics only; PyTorch eval() would use running stats.


def build_rot_weight(base, Ntheta):
    """base: (Cout, Cin, Ntheta, kh, kw) -> (Cout*Ntheta, Cin*Ntheta, kh, kw)
       with W[co*Nt+a, ci*Nt+b] = base[co, ci, (b - a) % Nt]."""
    Cout, Cin, Nt, kh, kw = base.shape
    ws = [jnp.roll(base, shift=a, axis=2) for a in range(Nt)]
    W = jnp.stack(ws, axis=1)                  # (Cout, Nt_out, Cin, Nt_in, kh, kw)
    return W.reshape(Cout * Nt, Cin * Nt, kh, kw)


# ----------------------------------------------------------------------------
# one "rot block": conv(5x5 same)+bias+ReLU (+BN reduction) -> pool+BN affine
#   (BN is a per-channel affine, so it commutes with the average pool; the pool
#    and the affine fuse into a single XLA pass over the bf16 conv output).
# ----------------------------------------------------------------------------
def rot_block(x_nhwc, w2d, bias, gamma, beta, Ntheta):
    bs, H, W, _ = x_nhwc.shape
    Cout = w2d.shape[1]
    # TODO(synk): im2col materialized in XLA; see fused halo-conv TODO above.
    X = im2col_same(x_nhwc.astype(jnp.bfloat16), 5)        # (bs*H*W, Cin*25)
    Y, stats = pallas_matmul_bias(X, w2d, bias, relu=True, with_stats=True,
                                  out_dtype=jnp.bfloat16)
    scale_c, shift_c = finish_bn_stats(stats, n_rows=bs * H * W, C=Cout,
                                       Ntheta=Ntheta, gamma=gamma, beta=beta)
    y = avgpool2x2(Y.reshape(bs, H, W, Cout))              # fuses with affine
    y = y * scale_c + shift_c
    return y.astype(jnp.bfloat16)


# ----------------------------------------------------------------------------
# parameters
# ----------------------------------------------------------------------------
def init_params(key, M=8, Ntheta=8):
    ks = jax.random.split(key, 10)

    def rnd(k, shape, scale=0.05):
        return scale * jax.random.normal(k, shape, dtype=jnp.float32)

    p = {}
    p["w1"] = rnd(ks[0], (M * Ntheta, 1, 5, 5))             # Rot_DCF_Init
    p["b1"] = rnd(ks[1], (M * Ntheta,))
    p["g1"] = jnp.ones((M,), jnp.float32)
    p["be1"] = jnp.zeros((M,), jnp.float32)
    p["w2_base"] = rnd(ks[2], (2 * M, M, Ntheta, 5, 5))     # Rot_DCF
    p["b2"] = rnd(ks[3], (2 * M * Ntheta,))
    p["g2"] = jnp.ones((2 * M,), jnp.float32)
    p["be2"] = jnp.zeros((2 * M,), jnp.float32)
    p["w3_base"] = rnd(ks[4], (4 * M, 2 * M, Ntheta, 5, 5))  # Rot_DCF
    p["b3"] = rnd(ks[5], (4 * M * Ntheta,))
    p["g3"] = jnp.ones((4 * M,), jnp.float32)
    p["be3"] = jnp.zeros((4 * M,), jnp.float32)
    fc1_in = 3 * 3 * Ntheta * 4 * M
    p["fc1_w"] = rnd(ks[6], (64, fc1_in))
    p["fc1_b"] = rnd(ks[7], (64,))
    p["fc2_w"] = rnd(ks[8], (10, 64))
    p["fc2_b"] = rnd(ks[9], (10,))
    return p


def prepare_params(p, M=8, Ntheta=8):
    """Hoisted parameter-only preprocessing (weight build / reshape / transpose
    / bf16 cast) done once, outside the jitted forward.  No N/K padding needed:
    the kernels take full-extent K and N blocks."""
    q = {}
    q["w1"] = p["w1"].reshape(M * Ntheta, -1).T.astype(jnp.bfloat16)   # (25, M*Nt)
    q["b1"] = p["b1"].astype(jnp.float32)
    w2 = build_rot_weight(p["w2_base"], Ntheta)
    q["w2"] = w2.reshape(2 * M * Ntheta, -1).T.astype(jnp.bfloat16)    # (1600, 128)
    q["b2"] = p["b2"].astype(jnp.float32)
    w3 = build_rot_weight(p["w3_base"], Ntheta)
    q["w3"] = w3.reshape(4 * M * Ntheta, -1).T.astype(jnp.bfloat16)    # (3200, 256)
    q["b3"] = p["b3"].astype(jnp.float32)
    q["fc1_w"] = p["fc1_w"].T.astype(jnp.bfloat16)                     # (2304, 64)
    q["fc1_b"] = p["fc1_b"].astype(jnp.float32)
    q["fc2_w"] = p["fc2_w"].T.astype(jnp.bfloat16)                     # (64, 10)
    q["fc2_b"] = p["fc2_b"].astype(jnp.float32)
    for k in ("g1", "be1", "g2", "be2", "g3", "be3"):
        q[k] = p[k].astype(jnp.float32)
    return q


# ----------------------------------------------------------------------------
# full network forward
# ----------------------------------------------------------------------------
def mnist_rotdcf_forward(pp, x_nchw, Ntheta=8):
    bs = x_nchw.shape[0]
    x = jnp.transpose(x_nchw, (0, 2, 3, 1)).astype(jnp.bfloat16)  # NCHW -> NHWC

    x = rot_block(x, pp["w1"], pp["b1"], pp["g1"], pp["be1"], Ntheta)
    x = rot_block(x, pp["w2"], pp["b2"], pp["g2"], pp["be2"], Ntheta)
    x = rot_block(x, pp["w3"], pp["b3"], pp["g3"], pp["be3"], Ntheta)

    # flatten exactly like torch .view(bs, -1) on NCHW
    x = jnp.transpose(x, (0, 3, 1, 2)).reshape(bs, -1)

    x = pallas_matmul_bias(x, pp["fc1_w"], pp["fc1_b"], relu=True,
                           out_dtype=jnp.bfloat16)
    # TODO(synk): dropout(0.5) treated as identity (eval mode).
    x = pallas_matmul_bias(x, pp["fc2_w"], pp["fc2_b"], relu=False,
                           out_dtype=jnp.float32)
    return x


if __name__ == "__main__":
    M, Ntheta = 8, 8                       # module defaults
    key = jax.random.PRNGKey(0)
    kx, kp = jax.random.split(key)

    # MNIST-like input: batch=2, 1 channel, 28x28 (required for the 3x3 fc1 geometry)
    x = jax.random.normal(kx, (2, 1, 28, 28), dtype=jnp.float32)
    raw_params = init_params(kp, M=M, Ntheta=Ntheta)
    params = prepare_params(raw_params, M=M, Ntheta=Ntheta)   # hoisted prep

    fwd = jax.jit(functools.partial(mnist_rotdcf_forward, Ntheta=Ntheta))
    logits = fwd(params, x)
    jax.block_until_ready(logits)

    assert logits.shape == (2, 10), logits.shape
    assert bool(jnp.all(jnp.isfinite(logits)))
    print("KERNEL_OK")
</pallas_src>

<mosaic_0001>
module attributes {stable_mosaic.version = 11 : i64} {
  func.func @_matmul_bias_act_kernel(%arg0: i32, %arg1: memref<784x25xbf16, #tpu.memory_space<vmem>>, %arg2: memref<25x64xbf16, #tpu.memory_space<vmem>>, %arg3: memref<1x64xf32, #tpu.memory_space<vmem>>, %arg4: memref<784x64xbf16, #tpu.memory_space<vmem>>, %arg5: memref<8x64xf32, #tpu.memory_space<vmem>>) attributes {dimension_semantics = [#tpu.dimension_semantics<parallel>], iteration_bounds = array<i64: 2>, scalar_prefetch = 0 : i64, scratch_operands = 0 : i64, tpu.core_type = #tpu.core_type<tc>, window_params = [{transform_indices = @transform_0, window_bounds = array<i64: 784, 25>}, {pipeline_mode = #tpu.pipeline_mode<synchronous>, transform_indices = @transform_1, window_bounds = array<i64: 25, 64>}, {pipeline_mode = #tpu.pipeline_mode<synchronous>, transform_indices = @transform_2, window_bounds = array<i64: 1, 64>}, {transform_indices = @transform_3, window_bounds = array<i64: 784, 64>}, {transform_indices = @transform_4, window_bounds = array<i64: 8, 64>}]} {
    %c0 = arith.constant 0 : index
    %c0_0 = arith.constant 0 : index
    %0 = vector.load %arg1[%c0, %c0_0] : memref<784x25xbf16, #tpu.memory_space<vmem>>, vector<784x25xbf16>
    %c0_1 = arith.constant 0 : index
    %c0_2 = arith.constant 0 : index
    %1 = vector.load %arg2[%c0_1, %c0_2] : memref<25x64xbf16, #tpu.memory_space<vmem>>, vector<25x64xbf16>
    %cst = arith.constant dense<0.000000e+00> : vector<784x64xf32>
    %2 = tpu.matmul %0, %1, %cst {dimension_numbers = #tpu.dot_dimension_numbers<[1], [0], [0], [1], [0, 0, 1, 1], [], []>} : vector<784x25xbf16>, vector<25x64xbf16>, vector<784x64xf32> -> vector<784x64xf32>
    %c0_3 = arith.constant 0 : index
    %c0_4 = arith.constant 0 : index
    %3 = vector.load %arg3[%c0_3, %c0_4] : memref<1x64xf32, #tpu.memory_space<vmem>>, vector<1x64xf32>
    %4 = vector.broadcast %3 : vector<1x64xf32> to vector<784x64xf32>
    %5 = arith.addf %2, %4 : vector<784x64xf32>
    %cst_5 = arith.constant 0.000000e+00 : f32
    %6 = vector.broadcast %cst_5 : f32 to vector<784x64xf32>
    %7 = arith.maximumf %5, %6 : vector<784x64xf32>
    %8 = arith.truncf %7 : vector<784x64xf32> to vector<784x64xbf16>
    %c0_6 = arith.constant 0 : index
    %c0_7 = arith.constant 0 : index
    %9 = vector.load %arg4[%c0_6, %c0_7] : memref<784x64xbf16, #tpu.memory_space<vmem>>, vector<784x64xbf16>
    tpu.vector_store %arg4[%c0_6, %c0_7], %8 {strides = array<i32>} : memref<784x64xbf16, #tpu.memory_space<vmem>>, vector<784x64xbf16>,
    %cst_8 = arith.constant dense<0.000000e+00> : vector<64xf32>
    %10 = vector.multi_reduction <add>, %7, %cst_8 [0] : vector<784x64xf32> to vector<64xf32>
    %11 = vector.shape_cast %10 : vector<64xf32> to vector<1x64xf32>
    %c0_9 = arith.constant 0 : index
    %c0_10 = arith.constant 0 : index
    %12 = vector.load %arg5[%c0_9, %c0_10] : memref<8x64xf32, #tpu.memory_space<vmem>>, vector<1x64xf32>
    tpu.vector_store %arg5[%c0_9, %c0_10], %11 {strides = array<i32>} : memref<8x64xf32, #tpu.memory_space<vmem>>, vector<1x64xf32>,
    %13 = arith.mulf %7, %7 : vector<784x64xf32>
    %cst_11 = arith.constant dense<0.000000e+00> : vector<64xf32>
    %14 = vector.multi_reduction <add>, %13, %cst_11 [0] : vector<784x64xf32> to vector<64xf32>
    %15 = vector.shape_cast %14 : vector<64xf32> to vector<1x64xf32>
    %c1 = arith.constant 1 : index
    %c0_12 = arith.constant 0 : index
    %16 = vector.load %arg5[%c1, %c0_12] : memref<8x64xf32, #tpu.memory_space<vmem>>, vector<1x64xf32>
    tpu.vector_store %arg5[%c1, %c0_12], %15 {strides = array<i32>} : memref<8x64xf32, #tpu.memory_space<vmem>>, vector<1x64xf32>,
    return
  }
  func.func @transform_0(%arg0: i32) -> (i32, i32) {
    %c0_i32 = arith.constant 0 : i32
    %c0_i32_0 = arith.constant 0 : i32
    return %arg0, %c0_i32 : i32, i32
  }
  func.func @transform_1(%arg0: i32) -> (i32, i32) {
    %c0_i32 = arith.constant 0 : i32
    %c0_i32_0 = arith.constant 0 : i32
    %c0_i32_1 = arith.constant 0 : i32
    return %c0_i32, %c0_i32_0 : i32, i32
  }
  func.func @transform_2(%arg0: i32) -> (i32, i32) {
    %c0_i32 = arith.constant 0 : i32
    %c0_i32_0 = arith.constant 0 : i32
    %c0_i32_1 = arith.constant 0 : i32
    return %c0_i32, %c0_i32_0 : i32, i32
  }
  func.func @transform_3(%arg0: i32) -> (i32, i32) {
    %c0_i32 = arith.constant 0 : i32
    %c0_i32_0 = arith.constant 0 : i32
    return %arg0, %c0_i32 : i32, i32
  }
  func.func @transform_4(%arg0: i32) -> (i32, i32) {
    %c0_i32 = arith.constant 0 : i32
    %c0_i32_0 = arith.constant 0 : i32
    return %arg0, %c0_i32 : i32, i32
  }
}

module attributes {stable_mosaic.version = 11 : i64} {
  func.func @_matmul_bias_act_kernel(%arg0: i32, %arg1: memref<208x1600xbf16, #tpu.memory_space<vmem>>, %arg2: memref<1600x128xbf16, #tpu.memory_space<vmem>>, %arg3: memref<1x128xf32, #tpu.memory_space<vmem>>, %arg4: memref<208x128xbf16, #tpu.memory_space<vmem>>, %arg5: memref<8x128xf32, #tpu.memory_space<vmem>>) attributes {dimension_semantics = [#tpu.dimension_semantics<parallel>], iteration_bounds = array<i64: 2>, scalar_prefetch = 0 : i64, scratch_operands = 0 : i64, tpu.core_type = #tpu.core_type<tc>, window_params = [{transform_indices = @transform_0, window_bounds = array<i64: 208, 1600>}, {pipeline_mode = #tpu.pipeline_mode<synchronous>, transform_indices = @transform_1, window_bounds = array<i64: 1600, 128>}, {pipeline_mode = #tpu.pipeline_mode<synchronous>, transform_indices = @transform_2, window_bounds = array<i64: 1, 128>}, {transform_indices = @transform_3, window_bounds = array<i64: 208, 128>}, {transform_indices = @transform_4, window_bounds = array<i64: 8, 128>}]} {
    %c0 = arith.constant 0 : index
    %c0_0 = arith.constant 0 : index
    %0 = vector.load %arg1[%c0, %c0_0] : memref<208x1600xbf16, #tpu.memory_space<vmem>>, vector<208x1600xbf16>
    %c0_1 = arith.constant 0 : index
    %c0_2 = arith.constant 0 : index
    %1 = vector.load %arg2[%c0_1, %c0_2] : memref<1600x128xbf16, #tpu.memory_space<vmem>>, vector<1600x128xbf16>
    %cst = arith.constant dense<0.000000e+00> : vector<208x128xf32>
    %2 = tpu.matmul %0, %1, %cst {dimension_numbers = #tpu.dot_dimension_numbers<[1], [0], [0], [1], [0, 0, 1, 1], [], []>} : vector<208x1600xbf16>, vector<1600x128xbf16>, vector<208x128xf32> -> vector<208x128xf32>
    %c0_3 = arith.constant 0 : index
    %c0_4 = arith.constant 0 : index
    %3 = vector.load %arg3[%c0_3, %c0_4] : memref<1x128xf32, #tpu.memory_space<vmem>>, vector<1x128xf32>
    %4 = vector.broadcast %3 : vector<1x128xf32> to vector<208x128xf32>
    %5 = arith.addf %2, %4 : vector<208x128xf32>
    %cst_5 = arith.constant 0.000000e+00 : f32
    %6 = vector.broadcast %cst_5 : f32 to vector<208x128xf32>
    %7 = arith.maximumf %5, %6 : vector<208x128xf32>
    %8 = arith.truncf %7 : vector<208x128xf32> to vector<208x128xbf16>
    %c0_6 = arith.constant 0 : index
    %c0_7 = arith.constant 0 : index
    %9 = vector.load %arg4[%c0_6, %c0_7] : memref<208x128xbf16, #tpu.memory_space<vmem>>, vector<208x128xbf16>
    tpu.vector_store %arg4[%c0_6, %c0_7], %8 {strides = array<i32>} : memref<208x128xbf16, #tpu.memory_space<vmem>>, vector<208x128xbf16>,
    %c1_i32 = arith.constant 1 : i32
    %10 = arith.cmpi ne, %arg0, %c1_i32 : i32
    %11 = arith.extui %10 : i1 to i32
    %c0_i32 = arith.constant 0 : i32
    %12 = arith.cmpi ne, %11, %c0_i32 : i32
    scf.if %12 {
      %cst_10 = arith.constant dense<0.000000e+00> : vector<128xf32>
      %16 = vector.multi_reduction <add>, %7, %cst_10 [0] : vector<208x128xf32> to vector<128xf32>
      %17 = vector.shape_cast %16 : vector<128xf32> to vector<1x128xf32>
      %c0_11 = arith.constant 0 : index
      %c0_12 = arith.constant 0 : index
      %18 = vector.load %arg5[%c0_11, %c0_12] : memref<8x128xf32, #tpu.memory_space<vmem>>, vector<1x128xf32>
      tpu.vector_store %arg5[%c0_11, %c0_12], %17 {strides = array<i32>} : memref<8x128xf32, #tpu.memory_space<vmem>>, vector<1x128xf32>,
      %19 = arith.mulf %7, %7 : vector<208x128xf32>
      %cst_13 = arith.constant dense<0.000000e+00> : vector<128xf32>
      %20 = vector.multi_reduction <add>, %19, %cst_13 [0] : vector<208x128xf32> to vector<128xf32>
      %21 = vector.shape_cast %20 : vector<128xf32> to vector<1x128xf32>
      %c1 = arith.constant 1 : index
      %c0_14 = arith.constant 0 : index
      %22 = vector.load %arg5[%c1, %c0_14] : memref<8x128xf32, #tpu.memory_space<vmem>>, vector<1x128xf32>
      tpu.vector_store %arg5[%c1, %c0_14], %21 {strides = array<i32>} : memref<8x128xf32, #tpu.memory_space<vmem>>, vector<1x128xf32>,
    } else {
    }
    %c1_i32_8 = arith.constant 1 : i32
    %13 = arith.cmpi eq, %arg0, %c1_i32_8 : i32
    %14 = arith.extui %13 : i1 to i32
    %c0_i32_9 = arith.constant 0 : i32
    %15 = arith.cmpi ne, %14, %c0_i32_9 : i32
    scf.if %15 {
      %c208_i32 = arith.constant 208 : i32
      %16 = arith.muli %arg0, %c208_i32 : i32
      %17 = tpu.iota {dimensions = array<i32: 0>} : vector<208x128xi32>
      %18 = vector.broadcast %16 : i32 to vector<208x128xi32>
      %19 = arith.addi %18, %17 : vector<208x128xi32>
      %c392_i32 = arith.constant 392 : i32
      %20 = vector.broadcast %c392_i32 : i32 to vector<208x128xi32>
      %21 = arith.cmpi slt, %19, %20 : vector<208x128xi32>
      %cst_10 = arith.constant 0.000000e+00 : f32
      %22 = vector.broadcast %cst_10 : f32 to vector<208x128xf32>
      %23 = arith.select %21, %7, %22 : vector<208x128xi1>, vector<208x128xf32>
      %cst_11 = arith.constant dense<0.000000e+00> : vector<128xf32>
      %24 = vector.multi_reduction <add>, %23, %cst_11 [0] : vector<208x128xf32> to vector<128xf32>
      %25 = vector.shape_cast %24 : vector<128xf32> to vector<1x128xf32>
      %c0_12 = arith.constant 0 : index
      %c0_13 = arith.constant 0 : index
      %26 = vector.load %arg5[%c0_12, %c0_13] : memref<8x128xf32, #tpu.memory_space<vmem>>, vector<1x128xf32>
      tpu.vector_store %arg5[%c0_12, %c0_13], %25 {strides = array<i32>} : memref<8x128xf32, #tpu.memory_space<vmem>>, vector<1x128xf32>,
      %27 = arith.mulf %23, %23 : vector<208x128xf32>
      %cst_14 = arith.constant dense<0.000000e+00> : vector<128xf32>
      %28 = vector.multi_reduction <add>, %27, %cst_14 [0] : vector<208x128xf32> to vector<128xf32>
      %29 = vector.shape_cast %28 : vector<128xf32> to vector<1x128xf32>
      %c1 = arith.constant 1 : index
      %c0_15 = arith.constant 0 : index
      %30 = vector.load %arg5[%c1, %c0_15] : memref<8x128xf32, #tpu.memory_space<vmem>>, vector<1x128xf32>
      tpu.vector_store %arg5[%c1, %c0_15], %29 {strides = array<i32>} : memref<8x128xf32, #tpu.memory_space<vmem>>, vector<1x128xf32>,
    } else {
    }
    return
  }
  func.func @transform_0(%arg0: i32) -> (i32, i32) {
    %c0_i32 = arith.constant 0 : i32
    %c0_i32_0 = arith.constant 0 : i32
    return %arg0, %c0_i32 : i32, i32
  }
  func.func @transform_1(%arg0: i32) -> (i32, i32) {
    %c0_i32 = arith.constant 0 : i32
    %c0_i32_0 = arith.constant 0 : i32
    %c0_i32_1 = arith.constant 0 : i32
    return %c0_i32, %c0_i32_0 : i32, i32
  }
  func.func @transform_2(%arg0: i32) -> (i32, i32) {
    %c0_i32 = arith.constant 0 : i32
    %c0_i32_0 = arith.constant 0 : i32
    %c0_i32_1 = arith.constant 0 : i32
    return %c0_i32, %c0_i32_0 : i32, i32
  }
  func.func @transform_3(%arg0: i32) -> (i32, i32) {
    %c0_i32 = arith.constant 0 : i32
    %c0_i32_0 = arith.constant 0 : i32
    return %arg0, %c0_i32 : i32, i32
  }
  func.func @transform_4(%arg0: i32) -> (i32, i32) {
    %c0_i32 = arith.constant 0 : i32
    %c0_i32_0 = arith.constant 0 : i32
    return %arg0, %c0_i32 : i32, i32
  }
}

module attributes {stable_mosaic.version = 11 : i64} {
  func.func @_matmul_bias_act_kernel(%arg0: i32, %arg1: memref<64x3200xbf16, #tpu.memory_space<vmem>>, %arg2: memref<3200x256xbf16, #tpu.memory_space<vmem>>, %arg3: memref<1x256xf32, #tpu.memory_space<vmem>>, %arg4: memref<64x256xbf16, #tpu.memory_space<vmem>>, %arg5: memref<8x256xf32, #tpu.memory_space<vmem>>) attributes {dimension_semantics = [#tpu.dimension_semantics<parallel>], iteration_bounds = array<i64: 2>, scalar_prefetch = 0 : i64, scratch_operands = 0 : i64, tpu.core_type = #tpu.core_type<tc>, window_params = [{transform_indices = @transform_0, window_bounds = array<i64: 64, 3200>}, {pipeline_mode = #tpu.pipeline_mode<synchronous>, transform_indices = @transform_1, window_bounds = array<i64: 3200, 256>}, {pipeline_mode = #tpu.pipeline_mode<synchronous>, transform_indices = @transform_2, window_bounds = array<i64: 1, 256>}, {transform_indices = @transform_3, window_bounds = array<i64: 64, 256>}, {transform_indices = @transform_4, window_bounds = array<i64: 8, 256>}]} {
    %c0 = arith.constant 0 : index
    %c0_0 = arith.constant 0 : index
    %0 = vector.load %arg1[%c0, %c0_0] : memref<64x3200xbf16, #tpu.memory_space<vmem>>, vector<64x3200xbf16>
    %c0_1 = arith.constant 0 : index
    %c0_2 = arith.constant 0 : index
    %1 = vector.load %arg2[%c0_1, %c0_2] : memref<3200x256xbf16, #tpu.memory_space<vmem>>, vector<3200x256xbf16>
    %cst = arith.constant dense<0.000000e+00> : vector<64x256xf32>
    %2 = tpu.matmul %0, %1, %cst {dimension_numbers = #tpu.dot_dimension_numbers<[1], [0], [0], [1], [0, 0, 1, 1], [], []>} : vector<64x3200xbf16>, vector<3200x256xbf16>, vector<64x256xf32> -> vector<64x256xf32>
    %c0_3 = arith.constant 0 : index
    %c0_4 = arith.constant 0 : index
    %3 = vector.load %arg3[%c0_3, %c0_4] : memref<1x256xf32, #tpu.memory_space<vmem>>, vector<1x256xf32>
    %4 = vector.broadcast %3 : vector<1x256xf32> to vector<64x256xf32>
    %5 = arith.addf %2, %4 : vector<64x256xf32>
    %cst_5 = arith.constant 0.000000e+00 : f32
    %6 = vector.broadcast %cst_5 : f32 to vector<64x256xf32>
    %7 = arith.maximumf %5, %6 : vector<64x256xf32>
    %8 = arith.truncf %7 : vector<64x256xf32> to vector<64x256xbf16>
    %c0_6 = arith.constant 0 : index
    %c0_7 = arith.constant 0 : index
    %9 = vector.load %arg4[%c0_6, %c0_7] : memref<64x256xbf16, #tpu.memory_space<vmem>>, vector<64x256xbf16>
    tpu.vector_store %arg4[%c0_6, %c0_7], %8 {strides = array<i32>} : memref<64x256xbf16, #tpu.memory_space<vmem>>, vector<64x256xbf16>,
    %c1_i32 = arith.constant 1 : i32
    %10 = arith.cmpi ne, %arg0, %c1_i32 : i32
    %11 = arith.extui %10 : i1 to i32
    %c0_i32 = arith.constant 0 : i32
    %12 = arith.cmpi ne, %11, %c0_i32 : i32
    scf.if %12 {
      %cst_10 = arith.constant dense<0.000000e+00> : vector<256xf32>
      %16 = vector.multi_reduction <add>, %7, %cst_10 [0] : vector<64x256xf32> to vector<256xf32>
      %17 = vector.shape_cast %16 : vector<256xf32> to vector<1x256xf32>
      %c0_11 = arith.constant 0 : index
      %c0_12 = arith.constant 0 : index
      %18 = vector.load %arg5[%c0_11, %c0_12] : memref<8x256xf32, #tpu.memory_space<vmem>>, vector<1x256xf32>
      tpu.vector_store %arg5[%c0_11, %c0_12], %17 {strides = array<i32>} : memref<8x256xf32, #tpu.memory_space<vmem>>, vector<1x256xf32>,
      %19 = arith.mulf %7, %7 : vector<64x256xf32>
      %cst_13 = arith.constant dense<0.000000e+00> : vector<256xf32>
      %20 = vector.multi_reduction <add>, %19, %cst_13 [0] : vector<64x256xf32> to vector<256xf32>
      %21 = vector.shape_cast %20 : vector<256xf32> to vector<1x256xf32>
      %c1 = arith.constant 1 : index
      %c0_14 = arith.constant 0 : index
      %22 = vector.load %arg5[%c1, %c0_14] : memref<8x256xf32, #tpu.memory_space<vmem>>, vector<1x256xf32>
      tpu.vector_store %arg5[%c1, %c0_14], %21 {strides = array<i32>} : memref<8x256xf32, #tpu.memory_space<vmem>>, vector<1x256xf32>,
    } else {
    }
    %c1_i32_8 = arith.constant 1 : i32
    %13 = arith.cmpi eq, %arg0, %c1_i32_8 : i32
    %14 = arith.extui %13 : i1 to i32
    %c0_i32_9 = arith.constant 0 : i32
    %15 = arith.cmpi ne, %14, %c0_i32_9 : i32
    scf.if %15 {
      %c64_i32 = arith.constant 64 : i32
      %16 = arith.muli %arg0, %c64_i32 : i32
      %17 = tpu.iota {dimensions = array<i32: 0>} : vector<64x256xi32>
      %18 = vector.broadcast %16 : i32 to vector<64x256xi32>
      %19 = arith.addi %18, %17 : vector<64x256xi32>
      %c98_i32 = arith.constant 98 : i32
      %20 = vector.broadcast %c98_i32 : i32 to vector<64x256xi32>
      %21 = arith.cmpi slt, %19, %20 : vector<64x256xi32>
      %cst_10 = arith.constant 0.000000e+00 : f32
      %22 = vector.broadcast %cst_10 : f32 to vector<64x256xf32>
      %23 = arith.select %21, %7, %22 : vector<64x256xi1>, vector<64x256xf32>
      %cst_11 = arith.constant dense<0.000000e+00> : vector<256xf32>
      %24 = vector.multi_reduction <add>, %23, %cst_11 [0] : vector<64x256xf32> to vector<256xf32>
      %25 = vector.shape_cast %24 : vector<256xf32> to vector<1x256xf32>
      %c0_12 = arith.constant 0 : index
      %c0_13 = arith.constant 0 : index
      %26 = vector.load %arg5[%c0_12, %c0_13] : memref<8x256xf32, #tpu.memory_space<vmem>>, vector<1x256xf32>
      tpu.vector_store %arg5[%c0_12, %c0_13], %25 {strides = array<i32>} : memref<8x256xf32, #tpu.memory_space<vmem>>, vector<1x256xf32>,
      %27 = arith.mulf %23, %23 : vector<64x256xf32>
      %cst_14 = arith.constant dense<0.000000e+00> : vector<256xf32>
      %28 = vector.multi_reduction <add>, %27, %cst_14 [0] : vector<64x256xf32> to vector<256xf32>
      %29 = vector.shape_cast %28 : vector<256xf32> to vector<1x256xf32>
      %c1 = arith.constant 1 : index
      %c0_15 = arith.constant 0 : index
      %30 = vector.load %arg5[%c1, %c0_15] : memref<8x256xf32, #tpu.memory_space<vmem>>, vector<1x256xf32>
      tpu.vector_store %arg5[%c1, %c0_15], %29 {strides = array<i32>} : memref<8x256xf32, #tpu.memory_space<vmem>>, vector<1x256xf32>,
    } else {
    }
    return
  }
  func.func @transform_0(%arg0: i32) -> (i32, i32) {
    %c0_i32 = arith.constant 0 : i32
    %c0_i32_0 = arith.constant 0 : i32
    return %arg0, %c0_i32 : i32, i32
  }
  func.func @transform_1(%arg0: i32) -> (i32, i32) {
    %c0_i32 = arith.constant 0 : i32
    %c0_i32_0 = arith.constant 0 : i32
    %c0_i32_1 = arith.constant 0 : i32
    return %c0_i32, %c0_i32_0 : i32, i32
  }
  func.func @transform_2(%arg0: i32) -> (i32, i32) {
    %c0_i32 = arith.constant 0 : i32
    %c0_i32_0 = arith.constant 0 : i32
    %c0_i32_1 = arith.constant 0 : i32
    return %c0_i32, %c0_i32_0 : i32, i32
  }
  func.func @transform_3(%arg0: i32) -> (i32, i32) {
    %c0_i32 = arith.constant 0 : i32
    %c0_i32_0 = arith.constant 0 : i32
    return %arg0, %c0_i32 : i32, i32
  }
  func.func @transform_4(%arg0: i32) -> (i32, i32) {
    %c0_i32 = arith.constant 0 : i32
    %c0_i32_0 = arith.constant 0 : i32
    return %arg0, %c0_i32 : i32, i32
  }
}

module attributes {stable_mosaic.version = 11 : i64} {
  func.func @_matmul_bias_act_kernel(%arg0: i32, %arg1: memref<2x2304xbf16, #tpu.memory_space<vmem>>, %arg2: memref<2304x64xbf16, #tpu.memory_space<vmem>>, %arg3: memref<1x64xf32, #tpu.memory_space<vmem>>, %arg4: memref<2x64xbf16, #tpu.memory_space<vmem>>) attributes {dimension_semantics = [#tpu.dimension_semantics<parallel>], iteration_bounds = array<i64: 1>, scalar_prefetch = 0 : i64, scratch_operands = 0 : i64, tpu.core_type = #tpu.core_type<tc>, window_params = [{transform_indices = @transform_0, window_bounds = array<i64: 2, 2304>}, {pipeline_mode = #tpu.pipeline_mode<synchronous>, transform_indices = @transform_1, window_bounds = array<i64: 2304, 64>}, {pipeline_mode = #tpu.pipeline_mode<synchronous>, transform_indices = @transform_2, window_bounds = array<i64: 1, 64>}, {transform_indices = @transform_3, window_bounds = array<i64: 2, 64>}]} {
    %c0 = arith.constant 0 : index
    %c0_0 = arith.constant 0 : index
    %0 = vector.load %arg1[%c0, %c0_0] : memref<2x2304xbf16, #tpu.memory_space<vmem>>, vector<2x2304xbf16>
    %c0_1 = arith.constant 0 : index
    %c0_2 = arith.constant 0 : index
    %1 = vector.load %arg2[%c0_1, %c0_2] : memref<2304x64xbf16, #tpu.memory_space<vmem>>, vector<2304x64xbf16>
    %cst = arith.constant dense<0.000000e+00> : vector<2x64xf32>
    %2 = tpu.matmul %0, %1, %cst {dimension_numbers = #tpu.dot_dimension_numbers<[1], [0], [0], [1], [0, 0, 1, 1], [], []>} : vector<2x2304xbf16>, vector<2304x64xbf16>, vector<2x64xf32> -> vector<2x64xf32>
    %c0_3 = arith.constant 0 : index
    %c0_4 = arith.constant 0 : index
    %3 = vector.load %arg3[%c0_3, %c0_4] : memref<1x64xf32, #tpu.memory_space<vmem>>, vector<1x64xf32>
    %4 = vector.broadcast %3 : vector<1x64xf32> to vector<2x64xf32>
    %5 = arith.addf %2, %4 : vector<2x64xf32>
    %cst_5 = arith.constant 0.000000e+00 : f32
    %6 = vector.broadcast %cst_5 : f32 to vector<2x64xf32>
    %7 = arith.maximumf %5, %6 : vector<2x64xf32>
    %8 = arith.truncf %7 : vector<2x64xf32> to vector<2x64xbf16>
    %c0_6 = arith.constant 0 : index
    %c0_7 = arith.constant 0 : index
    %9 = vector.load %arg4[%c0_6, %c0_7] : memref<2x64xbf16, #tpu.memory_space<vmem>>, vector<2x64xbf16>
    tpu.vector_store %arg4[%c0_6, %c0_7], %8 {strides = array<i32>} : memref<2x64xbf16, #tpu.memory_space<vmem>>, vector<2x64xbf16>,
    return
  }
  func.func @transform_0(%arg0: i32) -> (i32, i32) {
    %c0_i32 = arith.constant 0 : i32
    %c0_i32_0 = arith.constant 0 : i32
    return %arg0, %c0_i32 : i32, i32
  }
  func.func @transform_1(%arg0: i32) -> (i32, i32) {
    %c0_i32 = arith.constant 0 : i32
    %c0_i32_0 = arith.constant 0 : i32
    %c0_i32_1 = arith.constant 0 : i32
    return %c0_i32, %c0_i32_0 : i32, i32
  }
  func.func @transform_2(%arg0: i32) -> (i32, i32) {
    %c0_i32 = arith.constant 0 : i32
    %c0_i32_0 = arith.constant 0 : i32
    %c0_i32_1 = arith.constant 0 : i32
    return %c0_i32, %c0_i32_0 : i32, i32
  }
  func.func @transform_3(%arg0: i32) -> (i32, i32) {
    %c0_i32 = arith.constant 0 : i32
    %c0_i32_0 = arith.constant 0 : i32
    return %arg0, %c0_i32 : i32, i32
  }
}

module attributes {stable_mosaic.version = 11 : i64} {
  func.func @_matmul_bias_act_kernel(%arg0: i32, %arg1: memref<2x64xbf16, #tpu.memory_space<vmem>>, %arg2: memref<64x10xbf16, #tpu.memory_space<vmem>>, %arg3: memref<1x10xf32, #tpu.memory_space<vmem>>, %arg4: memref<2x10xf32, #tpu.memory_space<vmem>>) attributes {dimension_semantics = [#tpu.dimension_semantics<parallel>], iteration_bounds = array<i64: 1>, scalar_prefetch = 0 : i64, scratch_operands = 0 : i64, tpu.core_type = #tpu.core_type<tc>, window_params = [{transform_indices = @transform_0, window_bounds = array<i64: 2, 64>}, {pipeline_mode = #tpu.pipeline_mode<synchronous>, transform_indices = @transform_1, window_bounds = array<i64: 64, 10>}, {pipeline_mode = #tpu.pipeline_mode<synchronous>, transform_indices = @transform_2, window_bounds = array<i64: 1, 10>}, {transform_indices = @transform_3, window_bounds = array<i64: 2, 10>}]} {
    %c0 = arith.constant 0 : index
    %c0_0 = arith.constant 0 : index
    %0 = vector.load %arg1[%c0, %c0_0] : memref<2x64xbf16, #tpu.memory_space<vmem>>, vector<2x64xbf16>
    %c0_1 = arith.constant 0 : index
    %c0_2 = arith.constant 0 : index
    %1 = vector.load %arg2[%c0_1, %c0_2] : memref<64x10xbf16, #tpu.memory_space<vmem>>, vector<64x10xbf16>
    %cst = arith.constant dense<0.000000e+00> : vector<2x10xf32>
    %2 = tpu.matmul %0, %1, %cst {dimension_numbers = #tpu.dot_dimension_numbers<[1], [0], [0], [1], [0, 0, 1, 1], [], []>} : vector<2x64xbf16>, vector<64x10xbf16>, vector<2x10xf32> -> vector<2x10xf32>
    %c0_3 = arith.constant 0 : index
    %c0_4 = arith.constant 0 : index
    %3 = vector.load %arg3[%c0_3, %c0_4] : memref<1x10xf32, #tpu.memory_space<vmem>>, vector<1x10xf32>
    %4 = vector.broadcast %3 : vector<1x10xf32> to vector<2x10xf32>
    %5 = arith.addf %2, %4 : vector<2x10xf32>
    %c0_5 = arith.constant 0 : index
    %c0_6 = arith.constant 0 : index
    %6 = vector.load %arg4[%c0_5, %c0_6] : memref<2x10xf32, #tpu.memory_space<vmem>>, vector<2x10xf32>
    tpu.vector_store %arg4[%c0_5, %c0_6], %5 {strides = array<i32>} : memref<2x10xf32, #tpu.memory_space<vmem>>, vector<2x10xf32>,
    return
  }
  func.func @transform_0(%arg0: i32) -> (i32, i32) {
    %c0_i32 = arith.constant 0 : i32
    %c0_i32_0 = arith.constant 0 : i32
    return %arg0, %c0_i32 : i32, i32
  }
  func.func @transform_1(%arg0: i32) -> (i32, i32) {
    %c0_i32 = arith.constant 0 : i32
    %c0_i32_0 = arith.constant 0 : i32
    %c0_i32_1 = arith.constant 0 : i32
    return %c0_i32, %c0_i32_0 : i32, i32
  }
  func.func @transform_2(%arg0: i32) -> (i32, i32) {
    %c0_i32 = arith.constant 0 : i32
    %c0_i32_0 = arith.constant 0 : i32
    %c0_i32_1 = arith.constant 0 : i32
    return %c0_i32, %c0_i32_0 : i32, i32
  }
  func.func @transform_3(%arg0: i32) -> (i32, i32) {
    %c0_i32 = arith.constant 0 : i32
    %c0_i32_0 = arith.constant 0 : i32
    return %arg0, %c0_i32 : i32, i32
  }
}

</mosaic_0001>

<bundles_post_ra>
// kernel: mnist_rotdcf_forward.5
= control target key start
LH: loop header
LB: loop body
LE: loop exit
PB: predicated region body
PF: predicated region fallthrough
CT: control target
= control target key end

     0   :  { %10 = vsyncpa [#allocation3], 0  ;;  %s3621_s0 = inlined_call_operand.vmem [shape: bf16[1568,25], index: 0, kind: input, shape index: {}]   ;;  %s3622_s1 = inlined_call_operand.hbm [shape: bf16[25,64], index: 1, kind: input, shape index: {}]   ;;  %s3623_s2 = inlined_call_operand.hbm [shape: f32[1,64], index: 2, kind: input, shape index: {}]   ;;  %s3624_s3 = inlined_call_operand.vmem [shape: bf16[1568,64], index: 3, kind: output, shape index: {0}]   ;;  %s3625_s4 = inlined_call_operand.vmem [shape: f32[16,64], index: 4, kind: output, shape index: {1}]  }
   0x1   :  { %11 = vsyncpa [#allocation5], 0  ;;  %s2388_s15 = smov 0  }
   0x2 LB: > { %s153_s18 = sshll.u32 %s3622_s1, 4  ;;  %s2397_s19 = sadd.s32 4294967295, %s2356_s15   ;;  %s2356_s15 = sphi %s2388_s15, %s17_s15   ;;  %s154_s18 = int_to_ptr.hbm [resolvable:$true] %s153_s18 }
   0x3   : > { %p1926_p0 = scmp.ge.s32.totalorder %s2356_s15, 1  ;;  %p142_p1 = scmp.lt.s32.totalorder %s2356_s15, 3 }
   0x4   : > { %p2263_p2 = scmp.eq.s32.totalorder %s2397_s19, 0  ;;  %s2358_s21 = smov [#allocation2]  }
   0x5   : > { %p2402_p3 = pnand %p1926_p0, %p142_p1  ;;  %s155_s22 = sshll.u32 %s2358_s21, 4  ;;  %s156_s22 = int_to_ptr.vmem [resolvable:$true] %s155_s22 }
   0x6   : > { %s168_s25 = sshll.u32 %s3623_s2, 4  ;;  %s2359_s26 = smov [#allocation4]   ;;  %s169_s25 = int_to_ptr.hbm [resolvable:$true] %s168_s25 }
   0x7   : > { %p2256_p4 = pneg %p2402_p3  ;;  %s170_s27 = sshll.u32 %s2359_s26, 4  ;;  %s171_s27 = int_to_ptr.vmem [resolvable:$true] %s170_s27 }
   0x8   : > { %s2360_s28 = smov 64   ;;  %s2361_s29 = smov 4  }
   0x9   : > { %p2257_p5 = pnand %p2263_p2, %p2256_p4  ;;  %192 = sbr.rel (%p2402_p3) target bundleno = 510 (0x1fe), region = 32 }
   0xb   : > { %2259 = dma.hbm_to_vmem [thread:$0]  (!%p2257_p5), %s154_s18, 256, %s156_s22, [#allocation3], %s2360_s28, %s2360_s28, %s2361_s29  }
   0xc   : > { %2262 = dma.hbm_to_vmem [thread:$0]  (!%p2257_p5), %s169_s25, 16, %s171_s27, [#allocation5]  }
   0xe   : > { %2347 = dma.done.wait (%p2263_p2), [#allocation3], 256  }
   0xf   : > { %2349 = vsyncadd (%p2263_p2), [#allocation3], 4294967040 }
  0x10   : > { %2351 = dma.done.wait (%p2263_p2), [#allocation5], 16  }
  0x11   : > { %2353 = vsyncadd (%p2263_p2), [#allocation5], 4294967280  ;;  %s228_s30 = smul.u32 98, %s2397_s19  ;;  %vm755_vm0 = vcmask 1043456   ;;  %vm756_vm1 = vcmask 1044480   ;;  %v2362_v0 = vmov 65535  }
  0x12   : > { %v757_v1 = vsel %vm755_vm0, 4294967295, %v2362_v0  ;;  %v2138_v2 = vld [vmem:[#allocation2 + $0x8] sm:$0xf]  ;;  %v2241_v3 = vld [vmem:[#allocation2 + $0x8] sm:$0x10]  ;;  %v2240_v7 = vld [vmem:[#allocation2] sm:$0xff] }
  0x13   : > { %p229_p6 = scmp.lt.s32.totalorder %s228_s30, 195  ;;  %v758_v4 = vsel %vm756_vm1, %v757_v1, 0  ;;  %v2139_v5 = vor.u32 %v2241_v3, %v2138_v2  ;;  %vm607_vm2 = vcmask 203776   ;;  %v2479_v31 = vld [vmem:[#allocation4] ss:$0 sm:$0xff]  ;;  %vm1212_vm3 = vcmask 519168  }
  0x14   : > { %vm1311_vm4 = vcmask 523264   ;;  %p240_p7 = scmp.lt.s32.totalorder %s2397_s19, 1  ;;  %vm1513_vm5 = vcmask 516096  }
  0x15   : > { %s3660_s30 = smov (!%p229_p6, %s228_s30), 195  ;;  %v760_v6 = vand.u32 %v2139_v5, %v758_v4 }
  0x16   : > { %s1933_s5 = sshll.u32 %s3660_s30, 2  ;;  %s3662_s19 = smov (!%p240_p7, %s2397_s19), 1 }
  0x17   : > { %768 = vmatpush.bf16.msra.mxu0 %v760_v6  ;;  %s2432_s8 = scalar_lea.vmem %s3621_s0, %s1933_s5  ;;  %2242 = vmatpush.bf16.msra.mxu1 %v760_v6  ;;  %s2495_s11 = scalar_lea.vmem %s3624_s3, %s1933_s5 }
  0x18   : > { %2243 = vmatpush.bf16.msra.mxu2 %v760_v6  ;;  %2244 = vmatpush.bf16.msra.mxu3 %v760_v6  ;;  %v2191_v8 = vld [vmem:[%s2432_s8] sm:$0xff]  ;;  %v2192_v10 = vld [vmem:[%s2432_s8 + $0x8] sm:$0xff]  ;;  %v2193_v12 = vld [vmem:[%s2432_s8 + $0x10] sm:$0xff]  ;;  %s1935_s12 = sshll.u32 %s3662_s19, 3 }
  0x19   : > { %v2203_v9 = vld [vmem:[%s2432_s8 + $0x60] sm:$0xff]  ;;  %v2204_v11 = vld [vmem:[%s2432_s8 + $0x68] sm:$0xff]  ;;  %v2205_v13 = vld [vmem:[%s2432_s8 + $0x70] sm:$0xff]  ;;  %s243_s16 = scalar_lea.vmem %s3625_s4, %s1935_s12 }
  0x1a   : > { %v2216_v14 = vld [vmem:[%s2432_s8 + $0xc8] sm:$0xff]  ;;  %v2194_v15 = vld [vmem:[%s2432_s8 + $0x18] sm:$0xff]  ;;  %v2217_v17 = vld [vmem:[%s2432_s8 + $0xd0] sm:$0xff] }
  0x1b   : > { %769 = vmatpush.bf16.msra.mxu0 %v2240_v7  ;;  %2245 = vmatpush.bf16.msra.mxu1 %v2240_v7  ;;  %v2206_v16 = vld [vmem:[%s2432_s8 + $0x78] sm:$0xff]  ;;  %v2195_v18 = vld [vmem:[%s2432_s8 + $0x20] sm:$0xff]  ;;  %v2196_v21 = vld [vmem:[%s2432_s8 + $0x28] sm:$0xff] }
  0x1c   : > { %2246 = vmatpush.bf16.msra.mxu2 %v2240_v7  ;;  %2247 = vmatpush.bf16.msra.mxu3 %v2240_v7  ;;  %v2207_v19 = vld [vmem:[%s2432_s8 + $0x80] sm:$0xff]  ;;  %v2218_v20 = vld [vmem:[%s2432_s8 + $0xd8] sm:$0xff]  ;;  %v2208_v22 = vld [vmem:[%s2432_s8 + $0x88] sm:$0xff] }
  0x1d   : > { %v2219_v23 = vld [vmem:[%s2432_s8 + $0xe0] sm:$0xff]  ;;  %v2197_v24 = vld [vmem:[%s2432_s8 + $0x30] sm:$0xff]  ;;  %v2220_v26 = vld [vmem:[%s2432_s8 + $0xe8] sm:$0xff] }
  0x1e   : > { %2140 = vmatmul.msk.bf16.vlgmr.msra.gmra.mxu0 %vm607_vm2, %v2191_v8  ;;  %2152 = vmatmul.msk.bf16.vlgmr.msra.gmra.mxu1 %vm607_vm2, %v2203_v9  ;;  %v2209_v25 = vld [vmem:[%s2432_s8 + $0x90] sm:$0xff]  ;;  %v2198_v27 = vld [vmem:[%s2432_s8 + $0x38] sm:$0xff]  ;;  %v2199_v32 = vld [vmem:[%s2432_s8 + $0x40] sm:$0xff] }
  0x1f   : > { %2165 = vmatmul.msk.bf16.vlgmr.msra.gmra.mxu2 %vm607_vm2, %v2216_v14  ;;  %v2210_v28 = vld [vmem:[%s2432_s8 + $0x98] sm:$0xff]  ;;  %v2229_v29 = vld [vmem:[%s2432_s8 + $0x130] sm:$0xff]  ;;  %v2211_v33 = vld [vmem:[%s2432_s8 + $0xa0] sm:$0xff] }
  0x20   : > { %2178 = vmatmul.msk.bf16.vlgmr.msra.gmra.mxu3 %vm607_vm2, %v2229_v29  ;;  %v2221_v30 = vld [vmem:[%s2432_s8 + $0xf0] sm:$0xff]  ;;  %v2230_v42 = vld [vmem:[%s2432_s8 + $0x138] sm:$0xff]  ;;  %v2200_v59 = vld [vmem:[%s2432_s8 + $0x48] sm:$0xff] }
  0x21   : > { %v2222_v50 = vld [vmem:[%s2432_s8 + $0xf8] sm:$0xff]  ;;  %v2212_v60 = vld [vmem:[%s2432_s8 + $0xa8] sm:$0xff] }
  0x2e   : > { %2141 = vmatmul.msk.bf16.gmra.mxu0 %vm607_vm2, %v2192_v10  ;;  %2153 = vmatmul.msk.bf16.gmra.mxu1 %vm607_vm2, %v2204_v11  ;;  %v2231_v10 = vld [vmem:[%s2432_s8 + $0x140] sm:$0xff] }
  0x2f   : > { %2166 = vmatmul.msk.bf16.gmra.mxu2 %vm607_vm2, %v2217_v17 }
  0x30   : > { %2179 = vmatmul.msk.bf16.gmra.mxu3 %vm607_vm2, %v2230_v42  ;;  %v2232_v42 = vld [vmem:[%s2432_s8 + $0x148] sm:$0xff] }
  0x3e   : > { %2142 = vmatmul.msk.bf16.gmra.mxu0 %vm607_vm2, %v2193_v12  ;;  %2154 = vmatmul.msk.bf16.gmra.mxu1 %vm607_vm2, %v2205_v13 }
  0x3f   : > { %2167 = vmatmul.msk.bf16.gmra.mxu2 %vm607_vm2, %v2218_v20 }
  0x40   : > { %2180 = vmatmul.msk.bf16.gmra.mxu3 %vm607_vm2, %v2231_v10 }
  0x4e   : > { %2143 = vmatmul.msk.bf16.gmra.mxu0 %vm607_vm2, %v2194_v15  ;;  %2155 = vmatmul.msk.bf16.gmra.mxu1 %vm607_vm2, %v2206_v16 }
  0x4f   : > { %2168 = vmatmul.msk.bf16.gmra.mxu2 %vm607_vm2, %v2219_v23 }
  0x50   : > { %2181 = vmatmul.msk.bf16.gmra.mxu3 %vm607_vm2, %v2232_v42 }
  0x5e   : > { %2144 = vmatmul.msk.bf16.gmra.mxu0 %vm607_vm2, %v2195_v18  ;;  %2156 = vmatmul.msk.bf16.gmra.mxu1 %vm607_vm2, %v2207_v19  ;;  %v2223_v18 = vld [vmem:[%s2432_s8 + $0x100] sm:$0xff] }
  0x5f   : > { %2169 = vmatmul.msk.bf16.gmra.mxu2 %vm607_vm2, %v2220_v26  ;;  %v2213_v26 = vld [vmem:[%s2432_s8 + $0xb0] sm:$0xff] }
  0x6e   : > { %2145 = vmatmul.msk.bf16.gmra.mxu0 %vm607_vm2, %v2196_v21  ;;  %2157 = vmatmul.msk.bf16.gmra.mxu1 %vm607_vm2, %v2208_v22 }
  0x6f   : > { %2170 = vmatmul.msk.bf16.gmra.mxu2 %vm607_vm2, %v2221_v30 }
  0x7e   : > { %2146 = vmatmul.msk.bf16.gmra.mxu0 %vm607_vm2, %v2197_v24  ;;  %2158 = vmatmul.msk.bf16.gmra.mxu1 %vm607_vm2, %v2209_v25  ;;  %v2201_v25 = vld [vmem:[%s2432_s8 + $0x50] sm:$0xff] }
  0x7f   : > { %2171 = vmatmul.msk.bf16.gmra.mxu2 %vm607_vm2, %v2222_v50 }
  0x8e   : > { %2147 = vmatmul.msk.bf16.gmra.mxu0 %vm607_vm2, %v2198_v27  ;;  %2159 = vmatmul.msk.bf16.gmra.mxu1 %vm607_vm2, %v2210_v28 }
  0x8f   : > { %2172 = vmatmul.msk.bf16.gmra.mxu2 %vm607_vm2, %v2223_v18 }
  0x9b   : > { %v771_v34 = vpop.f32.mrf.mxu0  ;;  %v831_v35 = vpop.f32.mrf.mxu1 }
  0x9c   : > { %v772_v36 = vadd.f32 %v2479_v31, %v771_v34  ;;  %v832_v37 = vadd.f32 %v2479_v31, %v831_v35 }
  0x9e   : > { %v1016_v38 = vmax.f32 %v772_v36, 0.0  ;;  %2148 = vmatmul.msk.bf16.gmra.mxu0 %vm607_vm2, %v2199_v32  ;;  %v2487_v39 = vmax.f32 %v832_v37, 0.0  ;;  %2160 = vmatmul.msk.bf16.gmra.mxu1 %vm607_vm2, %v2211_v33 }
  0xa0   : > { %v1114_v40 = vpack.c.bf16 %v1016_v38, %v1016_v38  ;;  %v1138_v41 = vpack.c.bf16 %v2487_v39, %v2487_v39  ;;  %v1515_v47 = vmul.f32 %v1016_v38, %v1016_v38  ;;  %v1312_v51 = vsel %vm1311_vm4, %v1016_v38, 0.0 }
  0xa2   : > { %1213 = vst.msk [vmem:[%s2495_s11] sm:$0xf] %vm1212_vm3, %v1114_v40  ;;  %v1613_v57 = vsel %vm1311_vm4, %v1515_v47, 0.0 }
  0xa3   : > { %v773_v43 = vpop.f32.mrf.mxu0  ;;  %1237 = vst.msk [vmem:[%s2495_s11 + $0x60] sm:$0xf] %vm1212_vm3, %v1138_v41  ;;  %v833_v44 = vpop.f32.mrf.mxu1 }
  0xa4   : > { %v774_v45 = vadd.f32 %v2479_v31, %v773_v43  ;;  %v834_v46 = vadd.f32 %v2479_v31, %v833_v44 }
  0xa6   : > { %v1017_v48 = vmax.f32 %v774_v45, 0.0  ;;  %v2507_v49 = vmax.f32 %v834_v46, 0.0 }
  0xa8   : > { %v1115_v52 = vpack.c.bf16 %v1017_v48, %v1017_v48  ;;  %v1313_v53 = vsel %vm1311_vm4, %v1017_v48, 0.0  ;;  %v1516_v54 = vmul.f32 %v1017_v48, %v1017_v48  ;;  %v1139_v55 = vpack.c.bf16 %v2507_v49, %v2507_v49 }
  0xa9   : > { %v1314_v56 = vadd.f32 %v1313_v53, %v1312_v51  ;;  %v2224_v51 = vld [vmem:[%s2432_s8 + $0x108] sm:$0xff] }
  0xaa   : > { %1214 = vst.msk [vmem:[%s2495_s11 + $0x4] sm:$0xf] %vm1212_vm3, %v1115_v52  ;;  %v1614_v58 = vsel %vm1311_vm4, %v1516_v54, 0.0  ;;  %2173 = vmatmul.msk.bf16.gmra.mxu2 %vm607_vm2, %v2224_v51 }
  0xab   : > { %v1615_v61 = vadd.f32 %v1614_v58, %v1613_v57  ;;  %v776_v62 = vpop.f32.mrf.mxu0  ;;  %1238 = vst.msk [vmem:[%s2495_s11 + $0x64] sm:$0xf] %vm1212_vm3, %v1139_v55  ;;  %v836_v63 = vpop.f32.mrf.mxu1  ;;  %v2202_v58 = vld [vmem:[%s2432_s8 + $0x58] sm:$0xff] }
  0xac   : > { %v777_v0 = vadd.f32 %v2479_v31, %v776_v62  ;;  %v837_v1 = vadd.f32 %v2479_v31, %v836_v63 }
  0xae   : > { %v1018_v2 = vmax.f32 %v777_v0, 0.0  ;;  %2149 = vmatmul.msk.bf16.gmra.mxu0 %vm607_vm2, %v2200_v59  ;;  %v2526_v3 = vmax.f32 %v837_v1, 0.0  ;;  %2161 = vmatmul.msk.bf16.gmra.mxu1 %vm607_vm2, %v2212_v60  ;;  %v2214_v59 = vld [vmem:[%s2432_s8 + $0xb8] sm:$0xff]  ;;  %v896_v1 = vpop.f32.mrf.mxu2 }
  0xb0   : > { %v1116_v4 = vpack.c.bf16 %v1018_v2, %v1018_v2  ;;  %v1315_v5 = vsel %vm1311_vm4, %v1018_v2, 0.0  ;;  %v1517_v6 = vmul.f32 %v1018_v2, %v1018_v2  ;;  %v1140_v7 = vpack.c.bf16 %v2526_v3, %v2526_v3 }
  0xb1   : > { %v1316_v8 = vadd.f32 %v1315_v5, %v1314_v56 }
  0xb2   : > { %1215 = vst.msk [vmem:[%s2495_s11 + $0x8] sm:$0xf] %vm1212_vm3, %v1116_v4  ;;  %v1616_v9 = vsel %vm1311_vm4, %v1517_v6, 0.0 }
  0xb3   : > { %v1617_v11 = vadd.f32 %v1616_v9, %v1615_v61  ;;  %v778_v12 = vpop.f32.mrf.mxu0  ;;  %1239 = vst.msk [vmem:[%s2495_s11 + $0x68] sm:$0xf] %vm1212_vm3, %v1140_v7  ;;  %v838_v13 = vpop.f32.mrf.mxu1 }
  0xb4   : > { %v779_v14 = vadd.f32 %v2479_v31, %v778_v12  ;;  %v839_v15 = vadd.f32 %v2479_v31, %v838_v13 }
  0xb6   : > { %v1019_v16 = vmax.f32 %v779_v14, 0.0  ;;  %v2541_v17 = vmax.f32 %v839_v15, 0.0  ;;  %v897_v14 = vadd.f32 %v2479_v31, %v896_v1 }
  0xb8   : > { %v1117_v19 = vpack.c.bf16 %v1019_v16, %v1019_v16  ;;  %v1317_v20 = vsel %vm1311_vm4, %v1019_v16, 0.0  ;;  %v1518_v21 = vmul.f32 %v1019_v16, %v1019_v16  ;;  %v1141_v22 = vpack.c.bf16 %v2541_v17, %v2541_v17 }
  0xb9   : > { %v1318_v23 = vadd.f32 %v1317_v20, %v1316_v8  ;;  %v2606_v20 = vmax.f32 %v897_v14, 0.0 }
  0xba   : > { %1216 = vst.msk [vmem:[%s2495_s11 + $0xc] sm:$0xf] %vm1212_vm3, %v1117_v19  ;;  %v1618_v24 = vsel %vm1311_vm4, %v1518_v21, 0.0  ;;  %v898_v19 = vpop.f32.mrf.mxu2 }
  0xbb   : > { %v1619_v27 = vadd.f32 %v1618_v24, %v1617_v11  ;;  %v781_v28 = vpop.f32.mrf.mxu0  ;;  %1240 = vst.msk [vmem:[%s2495_s11 + $0x6c] sm:$0xf] %vm1212_vm3, %v1141_v22  ;;  %v841_v29 = vpop.f32.mrf.mxu1  ;;  %v2233_v11 = vld [vmem:[%s2432_s8 + $0x150] sm:$0xff]  ;;  %v899_v21 = vadd.f32 %v2479_v31, %v898_v19 }
  0xbc   : > { %v782_v30 = vadd.f32 %v2479_v31, %v781_v28  ;;  %v842_v32 = vadd.f32 %v2479_v31, %v841_v29  ;;  %2182 = vmatmul.msk.bf16.gmra.mxu3 %vm607_vm2, %v2233_v11  ;;  %v2225_v24 = vld [vmem:[%s2432_s8 + $0x110] sm:$0xff] }
  0xbd   : > { %2174 = vmatmul.msk.bf16.gmra.mxu2 %vm607_vm2, %v2225_v24 }
  0xbe   : > { %v1020_v33 = vmax.f32 %v782_v30, 0.0  ;;  %2150 = vmatmul.msk.bf16.gmra.mxu0 %vm607_vm2, %v2201_v25  ;;  %v2558_v34 = vmax.f32 %v842_v32, 0.0  ;;  %2162 = vmatmul.msk.bf16.gmra.mxu1 %vm607_vm2, %v2213_v26  ;;  %v1164_v25 = vpack.c.bf16 %v2606_v20, %v2606_v20  ;;  %v2614_v26 = vmax.f32 %v899_v21, 0.0 }
  0xc0   : > { %v1118_v35 = vpack.c.bf16 %v1020_v33, %v1020_v33  ;;  %v1319_v36 = vsel %vm1311_vm4, %v1020_v33, 0.0  ;;  %v1519_v37 = vmul.f32 %v1020_v33, %v1020_v33  ;;  %v1142_v38 = vpack.c.bf16 %v2558_v34, %v2558_v34  ;;  %1263 = vst.msk [vmem:[%s2495_s11 + $0xc8] sm:$0xf] %vm1212_vm3, %v1164_v25 }
  0xc1   : > { %v1320_v40 = vadd.f32 %v1319_v36, %v1318_v23  ;;  %v2215_v36 = vld [vmem:[%s2432_s8 + $0xc0] sm:$0xff] }
  0xc2   : > { %1217 = vst.msk [vmem:[%s2495_s11 + $0x10] sm:$0xf] %vm1212_vm3, %v1118_v35  ;;  %v1620_v41 = vsel %vm1311_vm4, %v1519_v37, 0.0  ;;  %v1165_v35 = vpack.c.bf16 %v2614_v26, %v2614_v26 }
  0xc3   : > { %v1621_v43 = vadd.f32 %v1620_v41, %v1619_v27  ;;  %v783_v44 = vpop.f32.mrf.mxu0  ;;  %1241 = vst.msk [vmem:[%s2495_s11 + $0x70] sm:$0xf] %vm1212_vm3, %v1142_v38  ;;  %v843_v45 = vpop.f32.mrf.mxu1 }
  0xc4   : > { %v784_v46 = vadd.f32 %v2479_v31, %v783_v44  ;;  %v844_v47 = vadd.f32 %v2479_v31, %v843_v45  ;;  %1264 = vst.msk [vmem:[%s2495_s11 + $0xcc] sm:$0xf] %vm1212_vm3, %v1165_v35 }
  0xc6   : > { %v1021_v48 = vmax.f32 %v784_v46, 0.0  ;;  %v2573_v50 = vmax.f32 %v844_v47, 0.0 }
  0xc8   : > { %v1119_v52 = vpack.c.bf16 %v1021_v48, %v1021_v48  ;;  %v1321_v53 = vsel %vm1311_vm4, %v1021_v48, 0.0  ;;  %v1520_v54 = vmul.f32 %v1021_v48, %v1021_v48  ;;  %v1143_v55 = vpack.c.bf16 %v2573_v50, %v2573_v50 }
  0xc9   : > { %v1322_v56 = vadd.f32 %v1321_v53, %v1320_v40 }
  0xca   : > { %1218 = vst.msk [vmem:[%s2495_s11 + $0x14] sm:$0xf] %vm1212_vm3, %v1119_v52  ;;  %v1622_v57 = vsel %vm1311_vm4, %v1520_v54, 0.0  ;;  %v2234_v54 = vld [vmem:[%s2432_s8 + $0x158] sm:$0xff] }
  0xcb   : > { %v1623_v60 = vadd.f32 %v1622_v57, %v1621_v43  ;;  %v786_v61 = vpop.f32.mrf.mxu0  ;;  %1242 = vst.msk [vmem:[%s2495_s11 + $0x74] sm:$0xf] %vm1212_vm3, %v1143_v55  ;;  %v846_v62 = vpop.f32.mrf.mxu1 }
  0xcc   : > { %v787_v63 = vadd.f32 %v2479_v31, %v786_v61  ;;  %v847_v0 = vadd.f32 %v2479_v31, %v846_v62  ;;  %v901_v43 = vpop.f32.mrf.mxu2  ;;  %2183 = vmatmul.msk.bf16.gmra.mxu3 %vm607_vm2, %v2234_v54 }
  0xcd   : > { %v902_v57 = vadd.f32 %v2479_v31, %v901_v43 }
  0xce   : > { %v1022_v2 = vmax.f32 %v787_v63, 0.0  ;;  %2151 = vmatmul.msk.bf16.gmra.mxu0 %vm607_vm2, %v2202_v58  ;;  %v2590_v4 = vmax.f32 %v847_v0, 0.0  ;;  %2163 = vmatmul.msk.bf16.gmra.mxu1 %vm607_vm2, %v2214_v59 }
  0xcf   : > { %v2650_v62 = vmax.f32 %v902_v57, 0.0 }
  0xd0   : > { %v1120_v5 = vpack.c.bf16 %v1022_v2, %v1022_v2  ;;  %v1323_v6 = vsel %vm1311_vm4, %v1022_v2, 0.0  ;;  %v1521_v7 = vmul.f32 %v1022_v2, %v1022_v2  ;;  %v1144_v8 = vpack.c.bf16 %v2590_v4, %v2590_v4  ;;  %v2226_v2 = vld [vmem:[%s2432_s8 + $0x118] sm:$0xff] }
  0xd1   : > { %v1324_v9 = vadd.f32 %v1323_v6, %v1322_v56  ;;  %2175 = vmatmul.msk.bf16.gmra.mxu2 %vm607_vm2, %v2226_v2 }
  0xd2   : > { %1219 = vst.msk [vmem:[%s2495_s11 + $0x18] sm:$0xf] %vm1212_vm3, %v1120_v5  ;;  %v1624_v10 = vsel %vm1311_vm4, %v1521_v7, 0.0  ;;  %v1166_v5 = vpack.c.bf16 %v2650_v62, %v2650_v62 }
  0xd3   : > { %v1625_v12 = vadd.f32 %v1624_v10, %v1623_v60  ;;  %v788_v13 = vpop.f32.mrf.mxu0  ;;  %1243 = vst.msk [vmem:[%s2495_s11 + $0x78] sm:$0xf] %vm1212_vm3, %v1144_v8  ;;  %v848_v15 = vpop.f32.mrf.mxu1 }
  0xd4   : > { %v789_v16 = vadd.f32 %v2479_v31, %v788_v13  ;;  %v849_v18 = vadd.f32 %v2479_v31, %v848_v15  ;;  %v903_v61 = vpop.f32.mrf.mxu2  ;;  %1265 = vst.msk [vmem:[%s2495_s11 + $0xd0] sm:$0xf] %vm1212_vm3, %v1166_v5 }
  0xd5   : > { %v904_v63 = vadd.f32 %v2479_v31, %v903_v61 }
  0xd6   : > { %v1023_v22 = vmax.f32 %v789_v16, 0.0  ;;  %v2609_v23 = vmax.f32 %v849_v18, 0.0 }
  0xd7   : > { %v2658_v6 = vmax.f32 %v904_v63, 0.0 }
  0xd8   : > { %v1121_v27 = vpack.c.bf16 %v1023_v22, %v1023_v22  ;;  %v1325_v28 = vsel %vm1311_vm4, %v1023_v22, 0.0  ;;  %v1522_v29 = vmul.f32 %v1023_v22, %v1023_v22  ;;  %v1145_v30 = vpack.c.bf16 %v2609_v23, %v2609_v23 }
  0xd9   : > { %v1326_v32 = vadd.f32 %v1325_v28, %v1324_v9  ;;  %v1167_v13 = vpack.c.bf16 %v2658_v6, %v2658_v6 }
  0xda   : > { %1220 = vst.msk [vmem:[%s2495_s11 + $0x1c] sm:$0xf] %vm1212_vm3, %v1121_v27  ;;  %v1626_v33 = vsel %vm1311_vm4, %v1522_v29, 0.0 }
  0xdb   : > { %v1627_v37 = vadd.f32 %v1626_v33, %v1625_v12  ;;  %v791_v38 = vpop.f32.mrf.mxu0  ;;  %1244 = vst.msk [vmem:[%s2495_s11 + $0x7c] sm:$0xf] %vm1212_vm3, %v1145_v30  ;;  %v851_v40 = vpop.f32.mrf.mxu1  ;;  %v2235_v33 = vld [vmem:[%s2432_s8 + $0x160] sm:$0xff] }
  0xdc   : > { %v792_v41 = vadd.f32 %v2479_v31, %v791_v38  ;;  %v852_v42 = vadd.f32 %v2479_v31, %v851_v40  ;;  %1266 = vst.msk [vmem:[%s2495_s11 + $0xd4] sm:$0xf] %vm1212_vm3, %v1167_v13  ;;  %v906_v21 = vpop.f32.mrf.mxu2  ;;  %2184 = vmatmul.msk.bf16.gmra.mxu3 %vm607_vm2, %v2235_v33  ;;  %v2228_v33 = vld [vmem:[%s2432_s8 + $0x128] sm:$0xff] }
  0xde   : > { %v1024_v44 = vmax.f32 %v792_v41, 0.0  ;;  %v2634_v45 = vmax.f32 %v852_v42, 0.0  ;;  %2164 = vmatmul.msk.bf16.gmra.mxu1 %vm607_vm2, %v2215_v36 }
  0xe0   : > { %v1122_v46 = vpack.c.bf16 %v1024_v44, %v1024_v44  ;;  %v1327_v47 = vsel %vm1311_vm4, %v1024_v44, 0.0  ;;  %v1523_v48 = vmul.f32 %v1024_v44, %v1024_v44  ;;  %v1146_v51 = vpack.c.bf16 %v2634_v45, %v2634_v45 }
  0xe1   : > { %v1328_v52 = vadd.f32 %v1327_v47, %v1326_v32 }
  0xe2   : > { %1221 = vst.msk [vmem:[%s2495_s11 + $0x20] sm:$0xf] %vm1212_vm3, %v1122_v46  ;;  %v1628_v53 = vsel %vm1311_vm4, %v1523_v48, 0.0  ;;  %v2227_v48 = vld [vmem:[%s2432_s8 + $0x120] sm:$0xff] }
  0xe3   : > { %v1629_v55 = vadd.f32 %v1628_v53, %v1627_v37  ;;  %v793_v56 = vpop.f32.mrf.mxu0  ;;  %1245 = vst.msk [vmem:[%s2495_s11 + $0x80] sm:$0xf] %vm1212_vm3, %v1146_v51  ;;  %v853_v58 = vpop.f32.mrf.mxu1  ;;  %v907_v37 = vadd.f32 %v2479_v31, %v906_v21  ;;  %2176 = vmatmul.msk.bf16.gmra.mxu2 %vm607_vm2, %v2227_v48 }
  0xe4   : > { %v794_v59 = vadd.f32 %v2479_v31, %v793_v56  ;;  %v854_v60 = vadd.f32 %v2479_v31, %v853_v58  ;;  %v908_v42 = vpop.f32.mrf.mxu2 }
  0xe5   : > { %v2692_v43 = vmax.f32 %v907_v37, 0.0  ;;  %v909_v44 = vadd.f32 %v2479_v31, %v908_v42 }
  0xe6   : > { %v1025_v0 = vmax.f32 %v794_v59, 0.0  ;;  %v2653_v1 = vmax.f32 %v854_v60, 0.0 }
  0xe7   : > { %v1168_v51 = vpack.c.bf16 %v2692_v43, %v2692_v43 }
  0xe8   : > { %v1123_v7 = vpack.c.bf16 %v1025_v0, %v1025_v0  ;;  %v1329_v8 = vsel %vm1311_vm4, %v1025_v0, 0.0  ;;  %v1524_v9 = vmul.f32 %v1025_v0, %v1025_v0  ;;  %v1147_v10 = vpack.c.bf16 %v2653_v1, %v2653_v1 }
  0xe9   : > { %v1330_v11 = vadd.f32 %v1329_v8, %v1328_v52  ;;  %v2700_v52 = vmax.f32 %v909_v44, 0.0  ;;  %1267 = vst.msk [vmem:[%s2495_s11 + $0xd8] sm:$0xf] %vm1212_vm3, %v1168_v51 }
  0xea   : > { %1222 = vst.msk [vmem:[%s2495_s11 + $0x24] sm:$0xf] %vm1212_vm3, %v1123_v7  ;;  %v1630_v12 = vsel %vm1311_vm4, %v1524_v9, 0.0 }
  0xeb   : > { %v1631_v14 = vadd.f32 %v1630_v12, %v1629_v55  ;;  %v796_v15 = vpop.f32.mrf.mxu0  ;;  %1246 = vst.msk [vmem:[%s2495_s11 + $0x84] sm:$0xf] %vm1212_vm3, %v1147_v10  ;;  %v856_v16 = vpop.f32.mrf.mxu1  ;;  %v1169_v59 = vpack.c.bf16 %v2700_v52, %v2700_v52 }
  0xec   : > { %v797_v18 = vadd.f32 %v2479_v31, %v796_v15  ;;  %v857_v19 = vadd.f32 %v2479_v31, %v856_v16  ;;  %v911_v5 = vpop.f32.mrf.mxu2  ;;  %v2236_v15 = vld [vmem:[%s2432_s8 + $0x168] sm:$0xff] }
  0xed   : > { %1268 = vst.msk [vmem:[%s2495_s11 + $0xdc] sm:$0xf] %vm1212_vm3, %v1169_v59  ;;  %2185 = vmatmul.msk.bf16.gmra.mxu3 %vm607_vm2, %v2236_v15 }
  0xee   : > { %v1026_v22 = vmax.f32 %v797_v18, 0.0  ;;  %v2677_v24 = vmax.f32 %v857_v19, 0.0  ;;  %v912_v19 = vadd.f32 %v2479_v31, %v911_v5 }
  0xf0   : > { %v1124_v25 = vpack.c.bf16 %v1026_v22, %v1026_v22  ;;  %v1331_v27 = vsel %vm1311_vm4, %v1026_v22, 0.0  ;;  %v1525_v28 = vmul.f32 %v1026_v22, %v1026_v22  ;;  %v1148_v29 = vpack.c.bf16 %v2677_v24, %v2677_v24 }
  0xf1   : > { %v1332_v30 = vadd.f32 %v1331_v27, %v1330_v11 }
  0xf2   : > { %1223 = vst.msk [vmem:[%s2495_s11 + $0x28] sm:$0xf] %vm1212_vm3, %v1124_v25  ;;  %v1632_v32 = vsel %vm1311_vm4, %v1525_v28, 0.0  ;;  %v2738_v28 = vmax.f32 %v912_v19, 0.0 }
  0xf3   : > { %v1633_v35 = vadd.f32 %v1632_v32, %v1631_v14  ;;  %v798_v36 = vpop.f32.mrf.mxu0  ;;  %1247 = vst.msk [vmem:[%s2495_s11 + $0x88] sm:$0xf] %vm1212_vm3, %v1148_v29  ;;  %v858_v38 = vpop.f32.mrf.mxu1  ;;  %2177 = vmatmul.msk.bf16.gmra.mxu2 %vm607_vm2, %v2228_v33 }
  0xf4   : > { %v799_v40 = vadd.f32 %v2479_v31, %v798_v36  ;;  %v859_v41 = vadd.f32 %v2479_v31, %v858_v38  ;;  %v913_v27 = vpop.f32.mrf.mxu2 }
  0xf5   : > { %v914_v29 = vadd.f32 %v2479_v31, %v913_v27 }
  0xf6   : > { %v1027_v46 = vmax.f32 %v799_v40, 0.0  ;;  %v2695_v47 = vmax.f32 %v859_v41, 0.0 }
  0xf7   : > { %v2748_v36 = vmax.f32 %v914_v29, 0.0 }
  0xf8   : > { %v1125_v53 = vpack.c.bf16 %v1027_v46, %v1027_v46  ;;  %v1333_v54 = vsel %vm1311_vm4, %v1027_v46, 0.0  ;;  %v1526_v55 = vmul.f32 %v1027_v46, %v1027_v46  ;;  %v1149_v56 = vpack.c.bf16 %v2695_v47, %v2695_v47 }
  0xf9   : > { %v1334_v57 = vadd.f32 %v1333_v54, %v1332_v30  ;;  %v1171_v40 = vpack.c.bf16 %v2748_v36, %v2748_v36 }
  0xfa   : > { %1224 = vst.msk [vmem:[%s2495_s11 + $0x2c] sm:$0xf] %vm1212_vm3, %v1125_v53  ;;  %v1634_v58 = vsel %vm1311_vm4, %v1526_v55, 0.0 }
  0xfb   : > { %v1635_v60 = vadd.f32 %v1634_v58, %v1633_v35  ;;  %v801_v61 = vpop.f32.mrf.mxu0  ;;  %1248 = vst.msk [vmem:[%s2495_s11 + $0x8c] sm:$0xf] %vm1212_vm3, %v1149_v56  ;;  %v861_v63 = vpop.f32.mrf.mxu1  ;;  %v1170_v35 = vpack.c.bf16 %v2738_v28, %v2738_v28  ;;  %v2237_v56 = vld [vmem:[%s2432_s8 + $0x170] sm:$0xff] }
  0xfc   : > { %v802_v0 = vadd.f32 %v2479_v31, %v801_v61  ;;  %v862_v2 = vadd.f32 %v2479_v31, %v861_v63  ;;  %1270 = vst.msk [vmem:[%s2495_s11 + $0xe4] sm:$0xf] %vm1212_vm3, %v1171_v40  ;;  %v916_v48 = vpop.f32.mrf.mxu2 }
  0xfd   : > { %1269 = vst.msk [vmem:[%s2495_s11 + $0xe0] sm:$0xf] %vm1212_vm3, %v1170_v35  ;;  %v917_v58 = vadd.f32 %v2479_v31, %v916_v48  ;;  %2186 = vmatmul.msk.bf16.gmra.mxu3 %vm607_vm2, %v2237_v56 }
  0xfe   : > { %v1028_v7 = vmax.f32 %v802_v0, 0.0  ;;  %v2719_v8 = vmax.f32 %v862_v2, 0.0 }
  0xff   : > { %v2784_v0 = vmax.f32 %v917_v58, 0.0 }
 0x100   : > { %v1126_v9 = vpack.c.bf16 %v1028_v7, %v1028_v7  ;;  %v1335_v10 = vsel %vm1311_vm4, %v1028_v7, 0.0  ;;  %v1527_v11 = vmul.f32 %v1028_v7, %v1028_v7  ;;  %v1150_v12 = vpack.c.bf16 %v2719_v8, %v2719_v8 }
 0x101   : > { %v2724_v13 = vadd.f32 %v1335_v10, %v1334_v57 }
 0x102   : > { %1225 = vst.msk [vmem:[%s2495_s11 + $0x30] sm:$0xf] %vm1212_vm3, %v1126_v9  ;;  %v1636_v14 = vsel %vm1311_vm4, %v1527_v11, 0.0  ;;  %v1172_v9 = vpack.c.bf16 %v2784_v0, %v2784_v0  ;;  %v961_v11 = vpop.f32.mrf.mxu3 }
 0x103   : > { %v2730_v16 = vadd.f32 %v1636_v14, %v1635_v60  ;;  %v803_v18 = vpop.f32.mrf.mxu0  ;;  %1249 = vst.msk [vmem:[%s2495_s11 + $0x90] sm:$0xf] %vm1212_vm3, %v1150_v12  ;;  %v863_v21 = vpop.f32.mrf.mxu1 }
 0x104   : > { %v804_v22 = vadd.f32 %v2479_v31, %v803_v18  ;;  %v864_v25 = vadd.f32 %v2479_v31, %v863_v21  ;;  %v918_v63 = vpop.f32.mrf.mxu2  ;;  %1271 = vst.msk [vmem:[%s2495_s11 + $0xe8] sm:$0xf] %vm1212_vm3, %v1172_v9  ;;  %v962_v21 = vadd.f32 %v2479_v31, %v961_v11 }
 0x105   : > { %v919_v2 = vadd.f32 %v2479_v31, %v918_v63 }
 0x106   : > { %v2741_v30 = vmax.f32 %v804_v22, 0.0  ;;  %v2743_v32 = vmax.f32 %v864_v25, 0.0  ;;  %v2812_v29 = vmax.f32 %v962_v21, 0.0 }
 0x107   : > { %v2793_v10 = vmax.f32 %v919_v2, 0.0 }
 0x108   : > { %v1127_v37 = vpack.c.bf16 %v2741_v30, %v2741_v30  ;;  %v1151_v38 = vpack.c.bf16 %v2743_v32, %v2743_v32  ;;  %3643 = vst [vmem:[#allocation8_spill] sm:$0xff] %v2812_v29 }
 0x109   : > { %v1173_v15 = vpack.c.bf16 %v2793_v10, %v2793_v10 }
 0x10a   : > { %1226 = vst.msk [vmem:[%s2495_s11 + $0x34] sm:$0xf] %vm1212_vm3, %v1127_v37  ;;  %v1190_v37 = vpack.c.bf16 %v2812_v29, %v2812_v29 }
 0x10b   : > { %v806_v41 = vpop.f32.mrf.mxu0  ;;  %1250 = vst.msk [vmem:[%s2495_s11 + $0x94] sm:$0xf] %vm1212_vm3, %v1151_v38  ;;  %v866_v42 = vpop.f32.mrf.mxu1 }
 0x10c   : > { %v807_v44 = vadd.f32 %v2479_v31, %v806_v41  ;;  %v867_v46 = vadd.f32 %v2479_v31, %v866_v42  ;;  %1272 = vst.msk [vmem:[%s2495_s11 + $0xec] sm:$0xf] %vm1212_vm3, %v1173_v15  ;;  %v921_v27 = vpop.f32.mrf.mxu2  ;;  %v963_v38 = vpop.f32.mrf.mxu3 }
 0x10d   : > { %1289 = vst.msk [vmem:[%s2495_s11 + $0x130] sm:$0xf] %vm1212_vm3, %v1190_v37  ;;  %v964_v42 = vadd.f32 %v2479_v31, %v963_v38  ;;  %v922_v48 = vadd.f32 %v2479_v31, %v921_v27 }
 0x10e   : > { %v2767_v51 = vmax.f32 %v807_v44, 0.0  ;;  %v2769_v53 = vmax.f32 %v867_v46, 0.0  ;;  %v2238_v44 = vld [vmem:[%s2432_s8 + $0x178] sm:$0xff] }
 0x10f   : > { %2187 = vmatmul.msk.bf16.gmra.mxu3 %vm607_vm2, %v2238_v44 }
 0x110   : > { %v1128_v54 = vpack.c.bf16 %v2767_v51, %v2767_v51  ;;  %v1152_v55 = vpack.c.bf16 %v2769_v53, %v2769_v53 }
 0x112   : > { %1227 = vst.msk [vmem:[%s2495_s11 + $0x38] sm:$0xf] %vm1212_vm3, %v1128_v54 }
 0x113   : > { %v808_v57 = vpop.f32.mrf.mxu0  ;;  %1251 = vst.msk [vmem:[%s2495_s11 + $0x98] sm:$0xf] %vm1212_vm3, %v1152_v55  ;;  %v868_v59 = vpop.f32.mrf.mxu1 }
 0x114   : > { %v809_v60 = vadd.f32 %v2479_v31, %v808_v57  ;;  %v869_v61 = vadd.f32 %v2479_v31, %v868_v59  ;;  %v2835_v57 = vmax.f32 %v964_v42, 0.0  ;;  %v923_v58 = vpop.f32.mrf.mxu2  ;;  %v2838_v59 = vmax.f32 %v922_v48, 0.0  ;;  %v966_v11 = vpop.f32.mrf.mxu3 }
 0x115   : > { %v924_v2 = vadd.f32 %v2479_v31, %v923_v58  ;;  %v967_v21 = vadd.f32 %v2479_v31, %v966_v11 }
 0x116   : > { %v2787_v5 = vmax.f32 %v809_v60, 0.0  ;;  %v2789_v7 = vmax.f32 %v869_v61, 0.0  ;;  %3644 = vst [vmem:[#allocation9_spill] sm:$0xff] %v2835_v57  ;;  %v1191_v63 = vpack.c.bf16 %v2835_v57, %v2835_v57  ;;  %v1174_v9 = vpack.c.bf16 %v2838_v59, %v2838_v59 }
 0x117   : > { %v2859_v15 = vmax.f32 %v924_v2, 0.0  ;;  %v2868_v38 = vmax.f32 %v967_v21, 0.0 }
 0x118   : > { %v1129_v12 = vpack.c.bf16 %v2787_v5, %v2787_v5  ;;  %v1153_v14 = vpack.c.bf16 %v2789_v7, %v2789_v7  ;;  %1290 = vst.msk [vmem:[%s2495_s11 + $0x134] sm:$0xf] %vm1212_vm3, %v1191_v63 }
 0x119   : > { %1273 = vst.msk [vmem:[%s2495_s11 + $0xf0] sm:$0xf] %vm1212_vm3, %v1174_v9  ;;  %v1192_v42 = vpack.c.bf16 %v2868_v38, %v2868_v38 }
 0x11a   : > { %1228 = vst.msk [vmem:[%s2495_s11 + $0x3c] sm:$0xf] %vm1212_vm3, %v1129_v12 }
 0x11b   : > { %v811_v18 = vpop.f32.mrf.mxu0  ;;  %1252 = vst.msk [vmem:[%s2495_s11 + $0x9c] sm:$0xf] %vm1212_vm3, %v1153_v14  ;;  %v871_v19 = vpop.f32.mrf.mxu1 }
 0x11c   : > { %v812_v22 = vadd.f32 %v2479_v31, %v811_v18  ;;  %v872_v25 = vadd.f32 %v2479_v31, %v871_v19  ;;  %v926_v27 = vpop.f32.mrf.mxu2  ;;  %3645 = vst [vmem:[#allocation10_spill] sm:$0xff] %v2868_v38  ;;  %v968_v44 = vpop.f32.mrf.mxu3 }
 0x11d   : > { %v969_v48 = vadd.f32 %v2479_v31, %v968_v44  ;;  %1291 = vst.msk [vmem:[%s2495_s11 + $0x138] sm:$0xf] %vm1212_vm3, %v1192_v42  ;;  %v927_v63 = vadd.f32 %v2479_v31, %v926_v27 }
 0x11e   : > { %v2814_v33 = vmax.f32 %v812_v22, 0.0  ;;  %v2816_v35 = vmax.f32 %v872_v25, 0.0  ;;  %v1175_v25 = vpack.c.bf16 %v2859_v15, %v2859_v15 }
 0x120   : > { %v1130_v40 = vpack.c.bf16 %v2814_v33, %v2814_v33  ;;  %v1154_v41 = vpack.c.bf16 %v2816_v35, %v2816_v35  ;;  %1274 = vst.msk [vmem:[%s2495_s11 + $0xf4] sm:$0xf] %vm1212_vm3, %v1175_v25 }
 0x122   : > { %1229 = vst.msk [vmem:[%s2495_s11 + $0x40] sm:$0xf] %vm1212_vm3, %v1130_v40 }
 0x123   : > { %v813_v46 = vpop.f32.mrf.mxu0  ;;  %1253 = vst.msk [vmem:[%s2495_s11 + $0xa0] sm:$0xf] %vm1212_vm3, %v1154_v41  ;;  %v873_v54 = vpop.f32.mrf.mxu1 }
 0x124   : > { %v814_v55 = vadd.f32 %v2479_v31, %v813_v46  ;;  %v874_v56 = vadd.f32 %v2479_v31, %v873_v54  ;;  %v971_v27 = vpop.f32.mrf.mxu3 }
 0x126   : > { %v2840_v60 = vmax.f32 %v814_v55, 0.0  ;;  %v2842_v61 = vmax.f32 %v874_v56, 0.0  ;;  %v2887_v55 = vmax.f32 %v969_v48, 0.0  ;;  %v2239_v56 = vld [vmem:[%s2432_s8 + $0x180] sm:$0xff] }
 0x127   : > { %2188 = vmatmul.msk.bf16.gmra.mxu3 %vm607_vm2, %v2239_v56 }
 0x128   : > { %v1131_v12 = vpack.c.bf16 %v2840_v60, %v2840_v60  ;;  %v1155_v14 = vpack.c.bf16 %v2842_v61, %v2842_v61  ;;  %3646 = vst [vmem:[#allocation11_spill] sm:$0xff] %v2887_v55 }
 0x12a   : > { %1230 = vst.msk [vmem:[%s2495_s11 + $0x44] sm:$0xf] %vm1212_vm3, %v1131_v12  ;;  %v1193_v12 = vpack.c.bf16 %v2887_v55, %v2887_v55 }
 0x12b   : > { %v816_v18 = vpop.f32.mrf.mxu0  ;;  %1254 = vst.msk [vmem:[%s2495_s11 + $0xa4] sm:$0xf] %vm1212_vm3, %v1155_v14  ;;  %v876_v19 = vpop.f32.mrf.mxu1 }
 0x12c   : > { %v817_v22 = vadd.f32 %v2479_v31, %v816_v18  ;;  %v877_v37 = vadd.f32 %v2479_v31, %v876_v19  ;;  %v928_v14 = vpop.f32.mrf.mxu2  ;;  %v2898_v18 = vmax.f32 %v927_v63, 0.0  ;;  %1292 = vst.msk [vmem:[%s2495_s11 + $0x13c] sm:$0xf] %vm1212_vm3, %v1193_v12 }
 0x12e   : > { %v2870_v40 = vmax.f32 %v817_v22, 0.0  ;;  %v2874_v41 = vmax.f32 %v877_v37, 0.0  ;;  %v929_v22 = vadd.f32 %v2479_v31, %v928_v14  ;;  %v1176_v25 = vpack.c.bf16 %v2898_v18, %v2898_v18 }
 0x130   : > { %v1132_v46 = vpack.c.bf16 %v2870_v40, %v2870_v40  ;;  %v1156_v54 = vpack.c.bf16 %v2874_v41, %v2874_v41  ;;  %1275 = vst.msk [vmem:[%s2495_s11 + $0xf8] sm:$0xf] %vm1212_vm3, %v1176_v25  ;;  %v2917_v44 = vmax.f32 %v929_v22, 0.0  ;;  %v1529_v22 = vmul.f32 %v2767_v51, %v2767_v51 }
 0x131   : > { %v972_v25 = vadd.f32 %v2479_v31, %v971_v27 }
 0x132   : > { %1231 = vst.msk [vmem:[%s2495_s11 + $0x48] sm:$0xf] %vm1212_vm3, %v1132_v46  ;;  %v1177_v56 = vpack.c.bf16 %v2917_v44, %v2917_v44 }
 0x133   : > { %v818_v58 = vpop.f32.mrf.mxu0  ;;  %1255 = vst.msk [vmem:[%s2495_s11 + $0xa8] sm:$0xf] %vm1212_vm3, %v1156_v54  ;;  %v878_v2 = vpop.f32.mrf.mxu1 }
 0x134   : > { %v819_v9 = vadd.f32 %v2479_v31, %v818_v58  ;;  %v879_v11 = vadd.f32 %v2479_v31, %v878_v2  ;;  %v931_v58 = vpop.f32.mrf.mxu2  ;;  %1276 = vst.msk [vmem:[%s2495_s11 + $0xfc] sm:$0xf] %vm1212_vm3, %v1177_v56  ;;  %v973_v2 = vpop.f32.mrf.mxu3  ;;  %v2946_v56 = vmax.f32 %v972_v25, 0.0  ;;  %v1341_v25 = vsel %vm1311_vm4, %v2787_v5, 0.0 }
 0x136   : > { %v2900_v19 = vmax.f32 %v819_v9, 0.0  ;;  %v2902_v21 = vmax.f32 %v879_v11, 0.0  ;;  %v1337_v9 = vsel %vm1311_vm4, %v2741_v30, 0.0  ;;  %v1528_v11 = vmul.f32 %v2741_v30, %v2741_v30  ;;  %3647 = vst [vmem:[#allocation12_spill] sm:$0xff] %v2946_v56 }
 0x137   : > { %v1530_v30 = vmul.f32 %v2787_v5, %v2787_v5 }
 0x138   : > { %v1133_v37 = vpack.c.bf16 %v2900_v19, %v2900_v19  ;;  %v1157_v42 = vpack.c.bf16 %v2902_v21, %v2902_v21  ;;  %v1638_v27 = vsel %vm1311_vm4, %v1528_v11, 0.0  ;;  %v932_v11 = vadd.f32 %v2479_v31, %v931_v58 }
 0x139   : > { %v1639_v57 = vadd.f32 %v1638_v27, %v2730_v16 }
 0x13a   : > { %1232 = vst.msk [vmem:[%s2495_s11 + $0x4c] sm:$0xf] %vm1212_vm3, %v1133_v37  ;;  %v974_v37 = vadd.f32 %v2479_v31, %v973_v2  ;;  %v1339_v2 = vsel %vm1311_vm4, %v2767_v51, 0.0  ;;  %v1531_v51 = vmul.f32 %v2814_v33, %v2814_v33  ;;  %v2973_v58 = vmax.f32 %v932_v11, 0.0 }
 0x13b   : > { %v821_v46 = vpop.f32.mrf.mxu0  ;;  %1256 = vst.msk [vmem:[%s2495_s11 + $0xac] sm:$0xf] %vm1212_vm3, %v1157_v42  ;;  %v881_v48 = vpop.f32.mrf.mxu1 }
 0x13c   : > { %v822_v54 = vadd.f32 %v2479_v31, %v821_v46  ;;  %v882_v14 = vadd.f32 %v2479_v31, %v881_v48  ;;  %v1338_v46 = vadd.f32 %v1337_v9, %v2724_v13  ;;  %v2948_v55 = vmax.f32 %v974_v37, 0.0  ;;  %v933_v9 = vpop.f32.mrf.mxu2  ;;  %3649 = vst [vmem:[#allocation14_spill] sm:$0xff] %v2973_v58  ;;  %v976_v29 = vpop.f32.mrf.mxu3 }
 0x13d   : > { %v1194_v37 = vpack.c.bf16 %v2946_v56, %v2946_v56  ;;  %v1642_v56 = vsel %vm1311_vm4, %v1530_v30, 0.0  ;;  %v1178_v30 = vpack.c.bf16 %v2973_v58, %v2973_v58  ;;  %v1644_v27 = vsel %vm1311_vm4, %v1531_v51, 0.0 }
 0x13e   : > { %v2924_v63 = vmax.f32 %v822_v54, 0.0  ;;  %v2941_v42 = vmax.f32 %v882_v14, 0.0  ;;  %3648 = vst [vmem:[#allocation13_spill] sm:$0xff] %v2948_v55  ;;  %v1640_v14 = vsel %vm1311_vm4, %v1529_v22, 0.0  ;;  %v1195_v22 = vpack.c.bf16 %v2948_v55, %v2948_v55 }
 0x13f   : > { %v1340_v5 = vadd.f32 %v1339_v2, %v1338_v46  ;;  %1293 = vst.msk [vmem:[%s2495_s11 + $0x140] sm:$0xf] %vm1212_vm3, %v1194_v37  ;;  %v1641_v16 = vadd.f32 %v1640_v14, %v1639_v57  ;;  %v1533_v2 = vmul.f32 %v2870_v40, %v2870_v40  ;;  %v1534_v14 = vmul.f32 %v2900_v19, %v2900_v19 }
 0x140   : > { %v1134_v12 = vpack.c.bf16 %v2924_v63, %v2924_v63  ;;  %v1158_v13 = vpack.c.bf16 %v2941_v42, %v2941_v42  ;;  %1294 = vst.msk [vmem:[%s2495_s11 + $0x144] sm:$0xf] %vm1212_vm3, %v1195_v22  ;;  %v934_v51 = vadd.f32 %v2479_v31, %v933_v9  ;;  %v1347_v22 = vsel %vm1311_vm4, %v2870_v40, 0.0 }
 0x141   : > { %v1342_v46 = vadd.f32 %v1341_v25, %v1340_v5  ;;  %v1643_v11 = vadd.f32 %v1642_v56, %v1641_v16  ;;  %1277 = vst.msk [vmem:[%s2495_s11 + $0x100] sm:$0xf] %vm1212_vm3, %v1178_v30  ;;  %v1349_v9 = vsel %vm1311_vm4, %v2900_v19, 0.0 }
 0x142   : > { %1233 = vst.msk [vmem:[%s2495_s11 + $0x50] sm:$0xf] %vm1212_vm3, %v1134_v12  ;;  %v3005_v16 = vmax.f32 %v934_v51, 0.0 }
 0x143   : > { %v823_v54 = vpop.f32.mrf.mxu0  ;;  %v883_v48 = vpop.f32.mrf.mxu1  ;;  %1257 = vst.msk [vmem:[%s2495_s11 + $0xb0] sm:$0xf] %vm1212_vm3, %v1158_v13 }
 0x144   : > { %v824_v12 = vadd.f32 %v2479_v31, %v823_v54  ;;  %v884_v54 = vadd.f32 %v2479_v31, %v883_v48  ;;  %v1532_v48 = vmul.f32 %v2840_v60, %v2840_v60  ;;  %v936_v56 = vpop.f32.mrf.mxu2  ;;  %3650 = vst [vmem:[#allocation15_spill] sm:$0xff] %v3005_v16 }
 0x146   : > { %v1037_v38 = vmax.f32 %v824_v12, 0.0  ;;  %v1343_v12 = vsel %vm1311_vm4, %v2814_v33, 0.0  ;;  %v2979_v55 = vmax.f32 %v884_v54, 0.0  ;;  %v1345_v33 = vsel %vm1311_vm4, %v2840_v60, 0.0 }
 0x147   : > { %v1344_v57 = vadd.f32 %v1343_v12, %v1342_v46  ;;  %v1646_v60 = vsel %vm1311_vm4, %v1532_v48, 0.0  ;;  %v1645_v12 = vadd.f32 %v1644_v27, %v1643_v11  ;;  %v1648_v46 = vsel %vm1311_vm4, %v1533_v2, 0.0 }
 0x148   : > { %v1135_v13 = vpack.c.bf16 %v1037_v38, %v1037_v38  ;;  %v1159_v37 = vpack.c.bf16 %v2979_v55, %v2979_v55  ;;  %v1535_v48 = vmul.f32 %v2924_v63, %v2924_v63  ;;  %v1179_v27 = vpack.c.bf16 %v3005_v16, %v3005_v16 }
 0x149   : > { %v1647_v40 = vadd.f32 %v1646_v60, %v1645_v12  ;;  %v1351_v11 = vsel %vm1311_vm4, %v2924_v63, 0.0  ;;  %v1536_v2 = vmul.f32 %v1037_v38, %v1037_v38  ;;  %v977_v60 = vadd.f32 %v2479_v31, %v976_v29 }
 0x14a   : > { %1234 = vst.msk [vmem:[%s2495_s11 + $0x54] sm:$0xf] %vm1212_vm3, %v1135_v13  ;;  %v1346_v13 = vadd.f32 %v1345_v33, %v1344_v57  ;;  %v978_v33 = vpop.f32.mrf.mxu3 }
 0x14b   : > { %v826_v25 = vpop.f32.mrf.mxu0  ;;  %v886_v54 = vpop.f32.mrf.mxu1  ;;  %1258 = vst.msk [vmem:[%s2495_s11 + $0xb4] sm:$0xf] %vm1212_vm3, %v1159_v37  ;;  %v1650_v37 = vsel %vm1311_vm4, %v1534_v14, 0.0  ;;  %v1649_v51 = vadd.f32 %v1648_v46, %v1647_v40  ;;  %v1652_v14 = vsel %vm1311_vm4, %v1535_v48, 0.0  ;;  %v3028_v46 = vmax.f32 %v977_v60, 0.0 }
 0x14c   : > { %v827_v5 = vadd.f32 %v2479_v31, %v826_v25  ;;  %v1348_v25 = vadd.f32 %v1347_v22, %v1346_v13  ;;  %v887_v19 = vadd.f32 %v2479_v31, %v886_v54  ;;  %1278 = vst.msk [vmem:[%s2495_s11 + $0x104] sm:$0xf] %vm1212_vm3, %v1179_v27  ;;  %v979_v22 = vadd.f32 %v2479_v31, %v978_v33  ;;  %v938_v27 = vpop.f32.mrf.mxu2 }
 0x14d   : > { %v1651_v13 = vadd.f32 %v1650_v37, %v1649_v51  ;;  %v1654_v29 = vsel %vm1311_vm4, %v1536_v2, 0.0  ;;  %v1196_v33 = vpack.c.bf16 %v3028_v46, %v3028_v46 }
 0x14e   : > { %v1038_v30 = vmax.f32 %v827_v5, 0.0  ;;  %v1350_v58 = vadd.f32 %v1349_v9, %v1348_v25  ;;  %v1353_v5 = vsel %vm1311_vm4, %v1037_v38, 0.0  ;;  %v3026_v63 = vmax.f32 %v887_v19, 0.0 }
 0x14f   : > { %v3030_v40 = vmax.f32 %v979_v22, 0.0  ;;  %v1653_v37 = vadd.f32 %v1652_v14, %v1651_v13  ;;  %1295 = vst.msk [vmem:[%s2495_s11 + $0x148] sm:$0xf] %vm1212_vm3, %v1196_v33 }
 0x150   : > { %v1136_v57 = vpack.c.bf16 %v1038_v30, %v1038_v30  ;;  %v1537_v12 = vmul.f32 %v1038_v30, %v1038_v30  ;;  %v1352_v16 = vadd.f32 %v1351_v11, %v1350_v58  ;;  %v1355_v48 = vsel %vm1311_vm4, %v1038_v30, 0.0  ;;  %v3039_v11 = vld [vmem:[#allocation4] ss:$0 sm:$0xff] }
 0x151   : > { %v1160_v25 = vpack.c.bf16 %v3026_v63, %v3026_v63  ;;  %v1197_v19 = vpack.c.bf16 %v3030_v40, %v3030_v40  ;;  %v1655_v51 = vadd.f32 %v1654_v29, %v1653_v37 }
 0x152   : > { %1235 = vst.msk [vmem:[%s2495_s11 + $0x58] sm:$0xf] %vm1212_vm3, %v1136_v57  ;;  %v1354_v58 = vadd.f32 %v1353_v5, %v1352_v16  ;;  %v937_v57 = vadd.f32 %v3039_v11, %v936_v56  ;;  %v1656_v2 = vsel %vm1311_vm4, %v1537_v12, 0.0  ;;  %v1539_v16 = vmul.f32 %v2487_v39, %v2487_v39  ;;  %v981_v22 = vpop.f32.mrf.mxu3 }
 0x153   : > { %v828_v54 = vpop.f32.mrf.mxu0  ;;  %v888_v9 = vpop.f32.mrf.mxu1  ;;  %1259 = vst.msk [vmem:[%s2495_s11 + $0xb8] sm:$0xf] %vm1212_vm3, %v1160_v25 }
 0x154   : > { %v829_v38 = vadd.f32 %v2479_v31, %v828_v54  ;;  %v889_v31 = vadd.f32 %v3039_v11, %v888_v9  ;;  %v1356_v60 = vadd.f32 %v1355_v48, %v1354_v58  ;;  %v3052_v56 = vmax.f32 %v937_v57, 0.0  ;;  %1296 = vst.msk [vmem:[%s2495_s11 + $0x14c] sm:$0xf] %vm1212_vm3, %v1197_v19  ;;  %v941_v19 = vpop.f32.mrf.mxu2 }
 0x155   : > { %v1540_v54 = vmul.f32 %v2507_v49, %v2507_v49  ;;  %v1657_v9 = vadd.f32 %v1656_v2, %v1655_v51  ;;  %v1541_v58 = vmul.f32 %v2526_v3, %v2526_v3 }
 0x156   : > { %v1039_v30 = vmax.f32 %v829_v38, 0.0  ;;  %v3055_v13 = vmax.f32 %v889_v31, 0.0  ;;  %v1180_v48 = vpack.c.bf16 %v3052_v56, %v3052_v56  ;;  %v1359_v38 = vsel %vm1311_vm4, %v2487_v39, 0.0 }
 0x157   : > { %v1361_v39 = vsel %vm1311_vm4, %v2507_v49, 0.0  ;;  %v939_v31 = vadd.f32 %v3039_v11, %v938_v27  ;;  %v1662_v51 = vsel %vm1311_vm4, %v1540_v54, 0.0  ;;  %v1664_v49 = vsel %vm1311_vm4, %v1541_v58, 0.0 }
 0x158   : > { %v1137_v14 = vpack.c.bf16 %v1039_v30, %v1039_v30  ;;  %v1357_v5 = vsel %vm1311_vm4, %v1039_v30, 0.0  ;;  %v1538_v12 = vmul.f32 %v1039_v30, %v1039_v30  ;;  %v1161_v37 = vpack.c.bf16 %v3055_v13, %v3055_v13  ;;  %1279 = vst.msk [vmem:[%s2495_s11 + $0x108] sm:$0xf] %vm1212_vm3, %v1180_v48 }
 0x159   : > { %v1358_v29 = vadd.f32 %v1357_v5, %v1356_v60  ;;  %v1660_v30 = vsel %vm1311_vm4, %v1539_v16, 0.0  ;;  %v1363_v5 = vsel %vm1311_vm4, %v2526_v3, 0.0  ;;  %v1543_v16 = vmul.f32 %v2558_v34, %v2558_v34 }
 0x15a   : > { %1236 = vst.msk [vmem:[%s2495_s11 + $0x5c] sm:$0xf] %vm1212_vm3, %v1137_v14  ;;  %v1658_v25 = vsel %vm1311_vm4, %v1538_v12, 0.0  ;;  %v1542_v12 = vmul.f32 %v2541_v17, %v2541_v17  ;;  %v983_v48 = vpop.f32.mrf.mxu3  ;;  %v1365_v54 = vsel %vm1311_vm4, %v2541_v17, 0.0  ;;  %v1544_v3 = vmul.f32 %v2573_v50, %v2573_v50 }
 0x15b   : > { %v1360_v33 = vadd.f32 %v1359_v38, %v1358_v29  ;;  %v1659_v57 = vadd.f32 %v1658_v25, %v1657_v9  ;;  %v891_v2 = vpop.f32.mrf.mxu1  ;;  %1260 = vst.msk [vmem:[%s2495_s11 + $0xbc] sm:$0xf] %vm1212_vm3, %v1161_v37  ;;  %v3087_v9 = vmax.f32 %v939_v31, 0.0  ;;  %v984_v58 = vadd.f32 %v3039_v11, %v983_v48 }
 0x15c   : > { %v892_v25 = vadd.f32 %v3039_v11, %v891_v2  ;;  %v1668_v17 = vsel %vm1311_vm4, %v1543_v16, 0.0  ;;  %v942_v16 = vadd.f32 %v3039_v11, %v941_v19 }
 0x15d   : > { %v1362_v60 = vadd.f32 %v1361_v39, %v1360_v33  ;;  %v1661_v14 = vadd.f32 %v1660_v30, %v1659_v57  ;;  %v1181_v38 = vpack.c.bf16 %v3087_v9, %v3087_v9  ;;  %v982_v57 = vadd.f32 %v3039_v11, %v981_v22 }
 0x15e   : > { %v1666_v30 = vsel %vm1311_vm4, %v1542_v12, 0.0  ;;  %v1367_v39 = vsel %vm1311_vm4, %v2558_v34, 0.0  ;;  %v3105_v31 = vmax.f32 %v892_v25, 0.0  ;;  %v3109_v22 = vmax.f32 %v984_v58, 0.0 }
 0x15f   : > { %v1364_v27 = vadd.f32 %v1363_v5, %v1362_v60  ;;  %v1663_v29 = vadd.f32 %v1662_v51, %v1661_v14  ;;  %1280 = vst.msk [vmem:[%s2495_s11 + $0x10c] sm:$0xf] %vm1212_vm3, %v1181_v38  ;;  %v3107_v60 = vmax.f32 %v982_v57, 0.0  ;;  %v1369_v5 = vsel %vm1311_vm4, %v2573_v50, 0.0 }
 0x160   : > { %v1545_v34 = vmul.f32 %v2590_v4, %v2590_v4  ;;  %v1162_v12 = vpack.c.bf16 %v3105_v31, %v3105_v31  ;;  %v1371_v50 = vsel %vm1311_vm4, %v2590_v4, 0.0  ;;  %v1546_v38 = vmul.f32 %v2609_v23, %v2609_v23 }
 0x161   : > { %v1366_v37 = vadd.f32 %v1365_v54, %v1364_v27  ;;  %v1665_v33 = vadd.f32 %v1664_v49, %v1663_v29  ;;  %v943_v49 = vpop.f32.mrf.mxu2  ;;  %v1670_v27 = vsel %vm1311_vm4, %v1544_v3, 0.0  ;;  %v1198_v54 = vpack.c.bf16 %v3107_v60, %v3107_v60 }
 0x162   : > { %1261 = vst.msk [vmem:[%s2495_s11 + $0xc0] sm:$0xf] %vm1212_vm3, %v1162_v12  ;;  %v3127_v25 = vmax.f32 %v942_v16, 0.0  ;;  %v986_v57 = vpop.f32.mrf.mxu3  ;;  %v1672_v4 = vsel %vm1311_vm4, %v1545_v34, 0.0  ;;  %v1373_v58 = vsel %vm1311_vm4, %v2609_v23, 0.0  ;;  %v1548_v23 = vmul.f32 %v2653_v1, %v2653_v1 }
 0x163   : > { %v1368_v51 = vadd.f32 %v1367_v39, %v1366_v37  ;;  %v1667_v2 = vadd.f32 %v1666_v30, %v1665_v33  ;;  %v893_v14 = vpop.f32.mrf.mxu1  ;;  %1297 = vst.msk [vmem:[%s2495_s11 + $0x150] sm:$0xf] %vm1212_vm3, %v1198_v54  ;;  %v1199_v33 = vpack.c.bf16 %v3109_v22, %v3109_v22  ;;  %v1547_v30 = vmul.f32 %v2634_v45, %v2634_v45 }
 0x164   : > { %v894_v19 = vadd.f32 %v3039_v11, %v893_v14  ;;  %v1182_v39 = vpack.c.bf16 %v3127_v25, %v3127_v25  ;;  %v1674_v14 = vsel %vm1311_vm4, %v1546_v38, 0.0  ;;  %v944_v34 = vadd.f32 %v3039_v11, %v943_v49 }
 0x165   : > { %v1370_v29 = vadd.f32 %v1369_v5, %v1368_v51  ;;  %v1669_v48 = vadd.f32 %v1668_v17, %v1667_v2  ;;  %1298 = vst.msk [vmem:[%s2495_s11 + $0x154] sm:$0xf] %vm1212_vm3, %v1199_v33  ;;  %v1375_v5 = vsel %vm1311_vm4, %v2634_v45, 0.0  ;;  %v1549_v45 = vmul.f32 %v2677_v24, %v2677_v24 }
 0x166   : > { %v3141_v2 = vmax.f32 %v894_v19, 0.0  ;;  %1281 = vst.msk [vmem:[%s2495_s11 + $0x110] sm:$0xf] %vm1212_vm3, %v1182_v39  ;;  %v3160_v54 = vmax.f32 %v944_v34, 0.0  ;;  %v1678_v49 = vsel %vm1311_vm4, %v1548_v23, 0.0  ;;  %v1551_v33 = vmul.f32 %v2719_v8, %v2719_v8 }
 0x167   : > { %v1372_v37 = vadd.f32 %v1371_v50, %v1370_v29  ;;  %v1671_v3 = vadd.f32 %v1670_v27, %v1669_v48  ;;  %v1676_v29 = vsel %vm1311_vm4, %v1547_v30, 0.0  ;;  %v1377_v48 = vsel %vm1311_vm4, %v2653_v1, 0.0 }
 0x168   : > { %v1163_v27 = vpack.c.bf16 %v3141_v2, %v3141_v2  ;;  %v1183_v1 = vpack.c.bf16 %v3160_v54, %v3160_v54  ;;  %v1680_v39 = vsel %vm1311_vm4, %v1549_v45, 0.0  ;;  %v1553_v45 = vmul.f32 %v2769_v53, %v2769_v53 }
 0x169   : > { %v1374_v17 = vadd.f32 %v1373_v58, %v1372_v37  ;;  %v1673_v51 = vadd.f32 %v1672_v4, %v1671_v3  ;;  %v946_v50 = vpop.f32.mrf.mxu2  ;;  %v1379_v37 = vsel %vm1311_vm4, %v2677_v24, 0.0  ;;  %v1550_v3 = vmul.f32 %v2695_v47, %v2695_v47 }
 0x16a   : > { %1262 = vst.msk [vmem:[%s2495_s11 + $0xc4] sm:$0xf] %vm1212_vm3, %v1163_v27  ;;  %v988_v30 = vpop.f32.mrf.mxu3  ;;  %v987_v24 = vadd.f32 %v3039_v11, %v986_v57  ;;  %v1684_v27 = vsel %vm1311_vm4, %v1551_v33, 0.0  ;;  %v1554_v33 = vmul.f32 %v2789_v7, %v2789_v7 }
 0x16b   : > { %v1376_v12 = vadd.f32 %v1375_v5, %v1374_v17  ;;  %v1675_v16 = vadd.f32 %v1674_v14, %v1673_v51  ;;  %v1381_v17 = vsel %vm1311_vm4, %v2695_v47, 0.0  ;;  %1282 = vst.msk [vmem:[%s2495_s11 + $0x114] sm:$0xf] %vm1212_vm3, %v1183_v1  ;;  %v989_v51 = vadd.f32 %v3039_v11, %v988_v30 }
 0x16c   : > { %v1552_v14 = vmul.f32 %v2743_v32, %v2743_v32  ;;  %v1682_v34 = vsel %vm1311_vm4, %v1550_v3, 0.0 }
 0x16d   : > { %v1378_v38 = vadd.f32 %v1377_v48, %v1376_v12  ;;  %v1677_v19 = vadd.f32 %v1676_v29, %v1675_v16  ;;  %v1383_v12 = vsel %vm1311_vm4, %v2719_v8, 0.0  ;;  %v3185_v16 = vmax.f32 %v987_v24, 0.0 }
 0x16e   : > { %v3187_v47 = vmax.f32 %v989_v51, 0.0  ;;  %v1385_v48 = vsel %vm1311_vm4, %v2743_v32, 0.0  ;;  %v947_v8 = vadd.f32 %v3039_v11, %v946_v50  ;;  %v1387_v32 = vsel %vm1311_vm4, %v2769_v53, 0.0 }
 0x16f   : > { %v1679_v4 = vadd.f32 %v1678_v49, %v1677_v19  ;;  %v1380_v58 = vadd.f32 %v1379_v37, %v1378_v38  ;;  %v1200_v38 = vpack.c.bf16 %v3185_v16, %v3185_v16  ;;  %v1686_v49 = vsel %vm1311_vm4, %v1552_v14, 0.0 }
 0x170   : > { %v1201_v1 = vpack.c.bf16 %v3187_v47, %v3187_v47  ;;  %v1389_v53 = vsel %vm1311_vm4, %v2789_v7, 0.0  ;;  %v1555_v24 = vmul.f32 %v2816_v35, %v2816_v35 }
 0x171   : > { %v1382_v5 = vadd.f32 %v1381_v17, %v1380_v58  ;;  %v1681_v23 = vadd.f32 %v1680_v39, %v1679_v4  ;;  %v948_v19 = vpop.f32.mrf.mxu2  ;;  %1299 = vst.msk [vmem:[%s2495_s11 + $0x158] sm:$0xf] %vm1212_vm3, %v1200_v38  ;;  %v3206_v4 = vmax.f32 %v947_v8, 0.0  ;;  %v1688_v17 = vsel %vm1311_vm4, %v1553_v45, 0.0 }
 0x172   : > { %v949_v50 = vadd.f32 %v3039_v11, %v948_v19  ;;  %1300 = vst.msk [vmem:[%s2495_s11 + $0x15c] sm:$0xf] %vm1212_vm3, %v1201_v1  ;;  %v991_v39 = vpop.f32.mrf.mxu3  ;;  %v1393_v45 = vsel %vm1311_vm4, %v2842_v61, 0.0  ;;  %v1557_v38 = vmul.f32 %v2874_v41, %v2874_v41 }
 0x173   : > { %v1384_v57 = vadd.f32 %v1383_v12, %v1382_v5  ;;  %v1683_v29 = vadd.f32 %v1682_v34, %v1681_v23  ;;  %v1184_v51 = vpack.c.bf16 %v3206_v4, %v3206_v4  ;;  %v1690_v34 = vsel %vm1311_vm4, %v1554_v33, 0.0 }
 0x174   : > { %v3218_v23 = vmax.f32 %v949_v50, 0.0  ;;  %v1391_v12 = vsel %vm1311_vm4, %v2816_v35, 0.0  ;;  %v1696_v50 = vsel %vm1311_vm4, %v1557_v38, 0.0 }
 0x175   : > { %v1386_v37 = vadd.f32 %v1385_v48, %v1384_v57  ;;  %v1685_v3 = vadd.f32 %v1684_v27, %v1683_v29  ;;  %v1556_v27 = vmul.f32 %v2842_v61, %v2842_v61  ;;  %1283 = vst.msk [vmem:[%s2495_s11 + $0x118] sm:$0xf] %vm1212_vm3, %v1184_v51  ;;  %v1692_v48 = vsel %vm1311_vm4, %v1555_v24, 0.0 }
 0x176   : > { %v1185_v29 = vpack.c.bf16 %v3218_v23, %v3218_v23  ;;  %v1559_v61 = vmul.f32 %v2941_v42, %v2941_v42  ;;  %v1560_v24 = vmul.f32 %v2979_v55, %v2979_v55 }
 0x177   : > { %v1388_v58 = vadd.f32 %v1387_v32, %v1386_v37  ;;  %v1687_v30 = vadd.f32 %v1686_v49, %v1685_v3  ;;  %v1694_v49 = vsel %vm1311_vm4, %v1556_v27, 0.0  ;;  %v1395_v37 = vsel %vm1311_vm4, %v2874_v41, 0.0 }
 0x178   : > { %1284 = vst.msk [vmem:[%s2495_s11 + $0x11c] sm:$0xf] %vm1212_vm3, %v1185_v29  ;;  %v1558_v3 = vmul.f32 %v2902_v21, %v2902_v21  ;;  %v1401_v27 = vsel %vm1311_vm4, %v2979_v55, 0.0  ;;  %v1702_v38 = vsel %vm1311_vm4, %v1560_v24, 0.0  ;;  %v1403_v55 = vsel %vm1311_vm4, %v3026_v63, 0.0 }
 0x179   : > { %v1390_v14 = vadd.f32 %v1389_v53, %v1388_v58  ;;  %v1689_v5 = vadd.f32 %v1688_v17, %v1687_v30  ;;  %v951_v8 = vpop.f32.mrf.mxu2  ;;  %v1397_v58 = vsel %vm1311_vm4, %v2902_v21, 0.0  ;;  %v992_v30 = vadd.f32 %v3039_v11, %v991_v39 }
 0x17a   : > { %v993_v33 = vpop.f32.mrf.mxu3  ;;  %v1698_v51 = vsel %vm1311_vm4, %v1558_v3, 0.0  ;;  %v1700_v39 = vsel %vm1311_vm4, %v1559_v61, 0.0 }
 0x17b   : > { %v1392_v7 = vadd.f32 %v1391_v12, %v1390_v14  ;;  %v1691_v57 = vadd.f32 %v1690_v34, %v1689_v5  ;;  %v994_v17 = vadd.f32 %v3039_v11, %v993_v33  ;;  %v1399_v14 = vsel %vm1311_vm4, %v2941_v42, 0.0 }
 0x17c   : > { %v3253_v5 = vmax.f32 %v992_v30, 0.0  ;;  %v952_v42 = vadd.f32 %v3039_v11, %v951_v8 }
 0x17d   : > { %v1394_v35 = vadd.f32 %v1393_v45, %v1392_v7  ;;  %v1693_v19 = vadd.f32 %v1692_v48, %v1691_v57  ;;  %v3255_v34 = vmax.f32 %v994_v17, 0.0  ;;  %v1561_v7 = vmul.f32 %v3026_v63, %v3026_v63 }
 0x17e   : > { %v1202_v57 = vpack.c.bf16 %v3253_v5, %v3253_v5  ;;  %v1405_v63 = vsel %vm1311_vm4, %v3055_v13, 0.0 }
 0x17f   : > { %v1396_v1 = vadd.f32 %v1395_v37, %v1394_v35  ;;  %v1695_v32 = vadd.f32 %v1694_v49, %v1693_v19  ;;  %v1203_v35 = vpack.c.bf16 %v3255_v34, %v3255_v34  ;;  %v1562_v19 = vmul.f32 %v3055_v13, %v3055_v13 }
 0x180   : > { %1301 = vst.msk [vmem:[%s2495_s11 + $0x160] sm:$0xf] %vm1212_vm3, %v1202_v57  ;;  %v3274_v49 = vmax.f32 %v952_v42, 0.0  ;;  %v1704_v61 = vsel %vm1311_vm4, %v1561_v7, 0.0  ;;  %v1411_v7 = vsel %vm1311_vm4, %v2606_v20, 0.0  ;;  %v1566_v57 = vmul.f32 %v2614_v26, %v2614_v26 }
 0x181   : > { %v1398_v53 = vadd.f32 %v1397_v58, %v1396_v1  ;;  %v1697_v41 = vadd.f32 %v1696_v50, %v1695_v32  ;;  %v953_v29 = vpop.f32.mrf.mxu2  ;;  %1302 = vst.msk [vmem:[%s2495_s11 + $0x164] sm:$0xf] %vm1212_vm3, %v1203_v35  ;;  %v1563_v32 = vmul.f32 %v3105_v31, %v3105_v31  ;;  %v1706_v17 = vsel %vm1311_vm4, %v1562_v19, 0.0 }
 0x182   : > { %v954_v8 = vadd.f32 %v3039_v11, %v953_v29  ;;  %v996_v1 = vpop.f32.mrf.mxu3  ;;  %v1186_v33 = vpack.c.bf16 %v3274_v49, %v3274_v49  ;;  %v1567_v29 = vmul.f32 %v2650_v62, %v2650_v62  ;;  %v1413_v35 = vsel %vm1311_vm4, %v2614_v26, 0.0 }
 0x183   : > { %v1400_v21 = vadd.f32 %v1399_v14, %v1398_v53  ;;  %v1699_v12 = vadd.f32 %v1698_v51, %v1697_v41  ;;  %v1407_v53 = vsel %vm1311_vm4, %v3105_v31, 0.0  ;;  %v1564_v41 = vmul.f32 %v3141_v2, %v3141_v2 }
 0x184   : > { %v3286_v30 = vmax.f32 %v954_v8, 0.0  ;;  %1285 = vst.msk [vmem:[%s2495_s11 + $0x120] sm:$0xf] %vm1212_vm3, %v1186_v33  ;;  %v1565_v14 = vmul.f32 %v2606_v20, %v2606_v20  ;;  %v1568_v19 = vmul.f32 %v2658_v6, %v2658_v6  ;;  %v1716_v26 = vsel %vm1311_vm4, %v1567_v29, 0.0 }
 0x185   : > { %v1701_v48 = vadd.f32 %v1700_v39, %v1699_v12  ;;  %v1402_v45 = vadd.f32 %v1401_v27, %v1400_v21  ;;  %v1708_v21 = vsel %vm1311_vm4, %v1563_v32, 0.0  ;;  %v1409_v12 = vsel %vm1311_vm4, %v3141_v2, 0.0 }
 0x186   : > { %v1187_v51 = vpack.c.bf16 %v3286_v30, %v3286_v30  ;;  %v1710_v42 = vsel %vm1311_vm4, %v1564_v41, 0.0  ;;  %v1712_v2 = vsel %vm1311_vm4, %v1565_v14, 0.0  ;;  %v1718_v41 = vsel %vm1311_vm4, %v1568_v19, 0.0 }
 0x187   : > { %v1703_v37 = vadd.f32 %v1702_v38, %v1701_v48  ;;  %v1404_v3 = vadd.f32 %v1403_v55, %v1402_v45  ;;  %v997_v55 = vadd.f32 %v3039_v11, %v996_v1  ;;  %v1570_v14 = vmul.f32 %v2700_v52, %v2700_v52 }
 0x188   : > { %1286 = vst.msk [vmem:[%s2495_s11 + $0x124] sm:$0xf] %vm1212_vm3, %v1187_v51 }
 0x189   : > { %v1705_v50 = vadd.f32 %v1704_v61, %v1703_v37  ;;  %v1406_v58 = vadd.f32 %v1405_v63, %v1404_v3  ;;  %v956_v39 = vpop.f32.mrf.mxu2  ;;  %v1714_v3 = vsel %vm1311_vm4, %v1566_v57, 0.0  ;;  %v1415_v61 = vsel %vm1311_vm4, %v2650_v62, 0.0 }
 0x18a   : > { %v998_v38 = vpop.f32.mrf.mxu3  ;;  %v3321_v63 = vmax.f32 %v997_v55, 0.0  ;;  %v957_v62 = vadd.f32 %v3039_v11, %v956_v39  ;;  %v1571_v57 = vmul.f32 %v2738_v28, %v2738_v28 }
 0x18b   : > { %v1707_v13 = vadd.f32 %v1706_v17, %v1705_v50  ;;  %v1408_v24 = vadd.f32 %v1407_v53, %v1406_v58  ;;  %v999_v20 = vadd.f32 %v3039_v11, %v998_v38  ;;  %v1417_v50 = vsel %vm1311_vm4, %v2658_v6, 0.0 }
 0x18c   : > { %v1569_v58 = vmul.f32 %v2692_v43, %v2692_v43  ;;  %v1204_v17 = vpack.c.bf16 %v3321_v63, %v3321_v63  ;;  %v1419_v6 = vsel %vm1311_vm4, %v2692_v43, 0.0  ;;  %v1421_v43 = vsel %vm1311_vm4, %v2700_v52, 0.0 }
 0x18d   : > { %v1709_v31 = vadd.f32 %v1708_v21, %v1707_v13  ;;  %v1410_v27 = vadd.f32 %v1409_v12, %v1408_v24  ;;  %v3323_v32 = vmax.f32 %v999_v20, 0.0  ;;  %v3342_v21 = vmax.f32 %v957_v62, 0.0 }
 0x18e   : > { %1303 = vst.msk [vmem:[%s2495_s11 + $0x168] sm:$0xf] %vm1212_vm3, %v1204_v17  ;;  %v1722_v38 = vsel %vm1311_vm4, %v1570_v14, 0.0  ;;  %v1724_v19 = vsel %vm1311_vm4, %v1571_v57, 0.0  ;;  %v1429_v62 = vsel %vm1311_vm4, %v2793_v10, 0.0 }
 0x18f   : > { %v1412_v48 = vadd.f32 %v1411_v7, %v1410_v27  ;;  %v1711_v45 = vadd.f32 %v1710_v42, %v1709_v31  ;;  %v1205_v51 = vpack.c.bf16 %v3323_v32, %v3323_v32  ;;  %v1720_v7 = vsel %vm1311_vm4, %v1569_v58, 0.0 }
 0x190   : > { %v1188_v42 = vpack.c.bf16 %v3342_v21, %v3342_v21 }
 0x191   : > { %v1414_v8 = vadd.f32 %v1413_v35, %v1412_v48  ;;  %v1713_v37 = vadd.f32 %v1712_v2, %v1711_v45  ;;  %v958_v53 = vpop.f32.mrf.mxu2  ;;  %1304 = vst.msk [vmem:[%s2495_s11 + $0x16c] sm:$0xf] %vm1212_vm3, %v1205_v51  ;;  %v1423_v2 = vsel %vm1311_vm4, %v2738_v28, 0.0  ;;  %v1572_v35 = vmul.f32 %v2748_v36, %v2748_v36 }
 0x192   : > { %v959_v12 = vadd.f32 %v3039_v11, %v958_v53  ;;  %v1001_v27 = vpop.f32.mrf.mxu3  ;;  %1287 = vst.msk [vmem:[%s2495_s11 + $0x128] sm:$0xf] %vm1212_vm3, %v1188_v42  ;;  %v1574_v28 = vmul.f32 %v2793_v10, %v2793_v10 }
 0x193   : > { %v1416_v1 = vadd.f32 %v1415_v61, %v1414_v8  ;;  %v1715_v33 = vadd.f32 %v1714_v3, %v1713_v37  ;;  %v1425_v8 = vsel %vm1311_vm4, %v2748_v36, 0.0  ;;  %v1573_v37 = vmul.f32 %v2784_v0, %v2784_v0 }
 0x194   : > { %v3354_v45 = vmax.f32 %v959_v12, 0.0  ;;  %v1002_v53 = vadd.f32 %v3039_v11, %v1001_v27  ;;  %v1433_v27 = vsel %vm1311_vm4, %v2859_v15, 0.0 }
 0x195   : > { %v1418_v13 = vadd.f32 %v1417_v50, %v1416_v1  ;;  %v1717_v24 = vadd.f32 %v1716_v26, %v1715_v33  ;;  %v1726_v26 = vsel %vm1311_vm4, %v1572_v35, 0.0  ;;  %v1427_v1 = vsel %vm1311_vm4, %v2784_v0, 0.0 }
 0x196   : > { %v1189_v20 = vpack.c.bf16 %v3354_v45, %v3354_v45  ;;  %v1575_v33 = vmul.f32 %v2838_v59, %v2838_v59  ;;  %v1728_v17 = vsel %vm1311_vm4, %v1573_v37, 0.0  ;;  %v1431_v0 = vsel %vm1311_vm4, %v2838_v59, 0.0 }
 0x197   : > { %v1420_v39 = vadd.f32 %v1419_v6, %v1418_v13  ;;  %v1719_v31 = vadd.f32 %v1718_v41, %v1717_v24  ;;  %v1730_v13 = vsel %vm1311_vm4, %v1574_v28, 0.0  ;;  %v1576_v6 = vmul.f32 %v2859_v15, %v2859_v15 }
 0x198   : > { %1288 = vst.msk [vmem:[%s2495_s11 + $0x12c] sm:$0xf] %vm1212_vm3, %v1189_v20  ;;  %v3389_v14 = vmax.f32 %v1002_v53, 0.0  ;;  %v1732_v10 = vsel %vm1311_vm4, %v1575_v33, 0.0  ;;  %v3651_v20 = vld [vmem:[#allocation14_spill] sm:$0xff]  ;;  %v1443_v53 = vsel %vm1311_vm4, %v3052_v56, 0.0 }
 0x199   : > { %v1422_v29 = vadd.f32 %v1421_v43, %v1420_v39  ;;  %v1721_v48 = vadd.f32 %v1720_v7, %v1719_v31  ;;  %v1577_v7 = vmul.f32 %v2898_v18, %v2898_v18  ;;  %v1439_v28 = vsel %vm1311_vm4, %v3651_v20, 0.0 }
 0x19a   : > { %v1003_v58 = vpop.f32.mrf.mxu3  ;;  %v1206_v59 = vpack.c.bf16 %v3389_v14, %v3389_v14 }
 0x19b   : > { %v1424_v52 = vadd.f32 %v1423_v2, %v1422_v29  ;;  %v1723_v55 = vadd.f32 %v1722_v38, %v1721_v48  ;;  %v1004_v41 = vadd.f32 %v3039_v11, %v1003_v58  ;;  %v1734_v29 = vsel %vm1311_vm4, %v1576_v6, 0.0 }
 0x19c   : > { %v1435_v48 = vsel %vm1311_vm4, %v2898_v18, 0.0  ;;  %v1578_v38 = vmul.f32 %v2917_v44, %v2917_v44  ;;  %1305 = vst.msk [vmem:[%s2495_s11 + $0x170] sm:$0xf] %vm1212_vm3, %v1206_v59  ;;  %v1445_v6 = vsel %vm1311_vm4, %v3087_v9, 0.0  ;;  %v1584_v59 = vmul.f32 %v3160_v54, %v3160_v54 }
 0x19d   : > { %v1426_v3 = vadd.f32 %v1425_v8, %v1424_v52  ;;  %v1725_v61 = vadd.f32 %v1724_v19, %v1723_v55  ;;  %v3391_v12 = vmax.f32 %v1004_v41, 0.0  ;;  %v1736_v52 = vsel %vm1311_vm4, %v1577_v7, 0.0 }
 0x19e   : > { %v1437_v55 = vsel %vm1311_vm4, %v2917_v44, 0.0  ;;  %v1579_v19 = vmul.f32 %v3651_v20, %v3651_v20  ;;  %v1738_v37 = vsel %vm1311_vm4, %v1578_v38, 0.0  ;;  %v1583_v41 = vmul.f32 %v3127_v25, %v3127_v25 }
 0x19f   : > { %v1428_v50 = vadd.f32 %v1427_v1, %v1426_v3  ;;  %v1727_v36 = vadd.f32 %v1726_v26, %v1725_v61  ;;  %v1207_v43 = vpack.c.bf16 %v3391_v12, %v3391_v12  ;;  %v3652_v3 = vld [vmem:[#allocation15_spill] sm:$0xff]  ;;  %v1585_v38 = vmul.f32 %v3206_v4, %v3206_v4 }
 0x1a0   : > { %v1580_v61 = vmul.f32 %v3652_v3, %v3652_v3  ;;  %v1740_v33 = vsel %vm1311_vm4, %v1579_v19, 0.0  ;;  %v1441_v44 = vsel %vm1311_vm4, %v3652_v3, 0.0  ;;  %v1586_v20 = vmul.f32 %v3218_v23, %v3218_v23 }
 0x1a1   : > { %v1729_v24 = vadd.f32 %v1728_v17, %v1727_v36  ;;  %v1430_v51 = vadd.f32 %v1429_v62, %v1428_v50  ;;  %1306 = vst.msk [vmem:[%s2495_s11 + $0x174] sm:$0xf] %vm1212_vm3, %v1207_v43  ;;  %v1581_v50 = vmul.f32 %v3052_v56, %v3052_v56  ;;  %v1582_v36 = vmul.f32 %v3087_v9, %v3087_v9 }
 0x1a2   : > { %v1006_v35 = vpop.f32.mrf.mxu3  ;;  %v1742_v62 = vsel %vm1311_vm4, %v1580_v61, 0.0  ;;  %v1447_v56 = vsel %vm1311_vm4, %v3127_v25, 0.0  ;;  %v1748_v9 = vsel %vm1311_vm4, %v1583_v41, 0.0  ;;  %v1754_v61 = vsel %vm1311_vm4, %v1586_v20, 0.0  ;;  %v3653_v41 = vld [vmem:[#allocation8_spill] sm:$0xff] }
 0x1a3   : > { %v1432_v39 = vadd.f32 %v1431_v0, %v1430_v51  ;;  %v1731_v31 = vadd.f32 %v1730_v13, %v1729_v24  ;;  %v1744_v0 = vsel %vm1311_vm4, %v1581_v50, 0.0 }
 0x1a5   : > { %v1434_v57 = vadd.f32 %v1433_v27, %v1432_v39  ;;  %v1733_v42 = vadd.f32 %v1732_v10, %v1731_v31  ;;  %v1007_v10 = vadd.f32 %v3039_v11, %v1006_v35  ;;  %v1746_v31 = vsel %vm1311_vm4, %v1582_v36, 0.0 }
 0x1a6   : > { %v1589_v36 = vmul.f32 %v3342_v21, %v3342_v21 }
 0x1a7   : > { %v1436_v15 = vadd.f32 %v1435_v48, %v1434_v57  ;;  %v1735_v2 = vadd.f32 %v1734_v29, %v1733_v42  ;;  %v3443_v43 = vmax.f32 %v1007_v10, 0.0  ;;  %v1449_v48 = vsel %vm1311_vm4, %v3160_v54, 0.0 }
 0x1a9   : > { %v1438_v8 = vadd.f32 %v1437_v55, %v1436_v15  ;;  %v1737_v18 = vadd.f32 %v1736_v52, %v1735_v2  ;;  %v1208_v25 = vpack.c.bf16 %v3443_v43, %v3443_v43  ;;  %v1750_v52 = vsel %vm1311_vm4, %v1584_v59, 0.0 }
 0x1aa   : > { %v1008_v51 = vpop.f32.mrf.mxu3  ;;  %v1451_v55 = vsel %vm1311_vm4, %v3206_v4, 0.0 }
 0x1ab   : > { %v1440_v26 = vadd.f32 %v1439_v28, %v1438_v8  ;;  %v1739_v1 = vadd.f32 %v1738_v37, %v1737_v18  ;;  %v1009_v39 = vadd.f32 %v3039_v11, %v1008_v51  ;;  %1307 = vst.msk [vmem:[%s2495_s11 + $0x178] sm:$0xf] %vm1212_vm3, %v1208_v25  ;;  %v1752_v18 = vsel %vm1311_vm4, %v1585_v38, 0.0  ;;  %v3655_v38 = vld [vmem:[#allocation10_spill] sm:$0xff] }
 0x1ac   : > { %v1453_v37 = vsel %vm1311_vm4, %v3218_v23, 0.0  ;;  %v1587_v28 = vmul.f32 %v3274_v49, %v3274_v49  ;;  %v1457_v23 = vsel %vm1311_vm4, %v3286_v30, 0.0  ;;  %v1593_v25 = vmul.f32 %v3655_v38, %v3655_v38 }
 0x1ad   : > { %v1442_v58 = vadd.f32 %v1441_v44, %v1440_v26  ;;  %v1741_v17 = vadd.f32 %v1740_v33, %v1739_v1  ;;  %v3445_v57 = vmax.f32 %v1009_v39, 0.0  ;;  %v1455_v26 = vsel %vm1311_vm4, %v3274_v49, 0.0 }
 0x1ae   : > { %v1588_v1 = vmul.f32 %v3286_v30, %v3286_v30  ;;  %v1756_v50 = vsel %vm1311_vm4, %v1587_v28, 0.0  ;;  %v1459_v49 = vsel %vm1311_vm4, %v3342_v21, 0.0  ;;  %v1760_v30 = vsel %vm1311_vm4, %v1589_v36, 0.0 }
 0x1af   : > { %v1444_v13 = vadd.f32 %v1443_v53, %v1442_v58  ;;  %v1743_v24 = vadd.f32 %v1742_v62, %v1741_v17  ;;  %v1209_v15 = vpack.c.bf16 %v3445_v57, %v3445_v57  ;;  %v1590_v53 = vmul.f32 %v3354_v45, %v3354_v45 }
 0x1b0   : > { %v1758_v62 = vsel %vm1311_vm4, %v1588_v1, 0.0  ;;  %v1463_v21 = vsel %vm1311_vm4, %v3653_v41, 0.0  ;;  %v1467_v20 = vsel %vm1311_vm4, %v3655_v38, 0.0  ;;  %v1602_v38 = vmul.f32 %v3187_v47, %v3187_v47 }
 0x1b1   : > { %v1446_v27 = vadd.f32 %v1445_v6, %v1444_v13  ;;  %v1745_v7 = vadd.f32 %v1744_v0, %v1743_v24  ;;  %1308 = vst.msk [vmem:[%s2495_s11 + $0x17c] sm:$0xf] %vm1212_vm3, %v1209_v15  ;;  %v1591_v13 = vmul.f32 %v3653_v41, %v3653_v41  ;;  %v1461_v6 = vsel %vm1311_vm4, %v3354_v45, 0.0 }
 0x1b2   : > { %v1011_v8 = vpop.f32.mrf.mxu3  ;;  %v1762_v59 = vsel %vm1311_vm4, %v1590_v53, 0.0 }
 0x1b3   : > { %v1448_v42 = vadd.f32 %v1447_v56, %v1446_v27  ;;  %v1747_v29 = vadd.f32 %v1746_v31, %v1745_v7  ;;  %v1012_v10 = vadd.f32 %v3039_v11, %v1011_v8  ;;  %v3654_v7 = vld [vmem:[#allocation9_spill] sm:$0xff]  ;;  %v1764_v45 = vsel %vm1311_vm4, %v1591_v13, 0.0 }
 0x1b4   : > { %v1592_v56 = vmul.f32 %v3654_v7, %v3654_v7  ;;  %v1475_v13 = vsel %vm1311_vm4, %v3028_v46, 0.0 }
 0x1b5   : > { %v1450_v2 = vadd.f32 %v1449_v48, %v1448_v42  ;;  %v1749_v35 = vadd.f32 %v1748_v9, %v1747_v29  ;;  %v3497_v9 = vmax.f32 %v1012_v10, 0.0  ;;  %v1465_v48 = vsel %vm1311_vm4, %v3654_v7, 0.0 }
 0x1b6   : > { %v1599_v10 = vmul.f32 %v3107_v60, %v3107_v60 }
 0x1b7   : > { %v1751_v54 = vadd.f32 %v1750_v52, %v1749_v35  ;;  %v1452_v19 = vadd.f32 %v1451_v55, %v1450_v2  ;;  %v1210_v15 = vpack.c.bf16 %v3497_v9, %v3497_v9  ;;  %v1766_v55 = vsel %vm1311_vm4, %v1592_v56, 0.0 }
 0x1b9   : > { %v1753_v3 = vadd.f32 %v1752_v18, %v1751_v54  ;;  %v1454_v4 = vadd.f32 %v1453_v37, %v1452_v19  ;;  %v3656_v54 = vld [vmem:[#allocation11_spill] sm:$0xff]  ;;  %1309 = vst.msk [vmem:[%s2495_s11 + $0x180] sm:$0xf] %vm1212_vm3, %v1210_v15  ;;  %v1768_v37 = vsel %vm1311_vm4, %v1593_v25, 0.0 }
 0x1ba   : > { %v1013_v0 = vpop.f32.mrf.mxu3  ;;  %v1594_v19 = vmul.f32 %v3656_v54, %v3656_v54  ;;  %v1469_v28 = vsel %vm1311_vm4, %v3656_v54, 0.0  ;;  %v1604_v54 = vmul.f32 %v3255_v34, %v3255_v34 }
 0x1bb   : > { %v1755_v33 = vadd.f32 %v1754_v61, %v1753_v3  ;;  %v1456_v44 = vadd.f32 %v1455_v26, %v1454_v4  ;;  %v1014_v39 = vadd.f32 %v3039_v11, %v1013_v0  ;;  %v3657_v3 = vld [vmem:[#allocation12_spill] sm:$0xff] }
 0x1bc   : > { %v1595_v4 = vmul.f32 %v3657_v3, %v3657_v3  ;;  %v1770_v1 = vsel %vm1311_vm4, %v1594_v19, 0.0 }
 0x1bd   : > { %v1757_v58 = vadd.f32 %v1756_v50, %v1755_v33  ;;  %v1458_v17 = vadd.f32 %v1457_v23, %v1456_v44  ;;  %v3499_v42 = vmax.f32 %v1014_v39, 0.0  ;;  %v1471_v33 = vsel %vm1311_vm4, %v3657_v3, 0.0  ;;  %v3658_v44 = vld [vmem:[#allocation13_spill] sm:$0xff] }
 0x1be   : > { %v1596_v50 = vmul.f32 %v3658_v44, %v3658_v44 }
 0x1bf   : > { %v1759_v24 = vadd.f32 %v1758_v62, %v1757_v58  ;;  %v1460_v51 = vadd.f32 %v1459_v49, %v1458_v17  ;;  %v1211_v2 = vpack.c.bf16 %v3499_v42, %v3499_v42  ;;  %v1772_v58 = vsel %vm1311_vm4, %v1595_v4, 0.0 }
 0x1c0   : > { %v1473_v17 = vsel %vm1311_vm4, %v3658_v44, 0.0  ;;  %v1597_v62 = vmul.f32 %v3028_v46, %v3028_v46  ;;  %v1774_v41 = vsel %vm1311_vm4, %v1596_v50, 0.0  ;;  %v1479_v46 = vsel %vm1311_vm4, %v3107_v60, 0.0 }
 0x1c1   : > { %v1761_v31 = vadd.f32 %v1760_v30, %v1759_v24  ;;  %v1462_v27 = vadd.f32 %v1461_v6, %v1460_v51  ;;  %1310 = vst.msk [vmem:[%s2495_s11 + $0x184] sm:$0xf] %vm1212_vm3, %v1211_v2  ;;  %v1598_v24 = vmul.f32 %v3030_v40, %v3030_v40  ;;  %v1477_v6 = vsel %vm1311_vm4, %v3030_v40, 0.0 }
 0x1c2   : > { %v1776_v30 = vsel %vm1311_vm4, %v1597_v62, 0.0  ;;  %v1481_v40 = vsel %vm1311_vm4, %v3109_v22, 0.0  ;;  %v1483_v60 = vsel %vm1311_vm4, %v3185_v16, 0.0  ;;  %v1790_v4 = vsel %vm1311_vm4, %v1604_v54, 0.0 }
 0x1c3   : > { %v1464_v29 = vadd.f32 %v1463_v21, %v1462_v27  ;;  %v1763_v11 = vadd.f32 %v1762_v59, %v1761_v31  ;;  %v1778_v31 = vsel %vm1311_vm4, %v1598_v24, 0.0  ;;  %v1600_v27 = vmul.f32 %v3109_v22, %v3109_v22 }
 0x1c4   : > { %v1780_v59 = vsel %vm1311_vm4, %v1599_v10, 0.0  ;;  %v1485_v22 = vsel %vm1311_vm4, %v3187_v47, 0.0  ;;  %v1489_v47 = vsel %vm1311_vm4, %v3255_v34, 0.0  ;;  %v1493_v34 = vsel %vm1311_vm4, %v3323_v32, 0.0 }
 0x1c5   : > { %v1466_v35 = vadd.f32 %v1465_v48, %v1464_v29  ;;  %v1765_v52 = vadd.f32 %v1764_v45, %v1763_v11  ;;  %v1601_v45 = vmul.f32 %v3185_v16, %v3185_v16  ;;  %v1782_v48 = vsel %vm1311_vm4, %v1600_v27, 0.0 }
 0x1c6   : > { %v1487_v16 = vsel %vm1311_vm4, %v3253_v5, 0.0  ;;  %v1607_v44 = vmul.f32 %v3389_v14, %v3389_v14  ;;  %v1611_v10 = vmul.f32 %v3497_v9, %v3497_v9 }
 0x1c7   : > { %v1468_v8 = vadd.f32 %v1467_v20, %v1466_v35  ;;  %v1767_v18 = vadd.f32 %v1766_v55, %v1765_v52  ;;  %v1784_v2 = vsel %vm1311_vm4, %v1601_v45, 0.0  ;;  %v1603_v35 = vmul.f32 %v3253_v5, %v3253_v5 }
 0x1c8   : > { %v1786_v20 = vsel %vm1311_vm4, %v1602_v38, 0.0  ;;  %v1491_v5 = vsel %vm1311_vm4, %v3321_v63, 0.0 }
 0x1c9   : > { %v1470_v61 = vadd.f32 %v1469_v28, %v1468_v8  ;;  %v1769_v26 = vadd.f32 %v1768_v37, %v1767_v18  ;;  %v1788_v18 = vsel %vm1311_vm4, %v1603_v35, 0.0  ;;  %v1605_v37 = vmul.f32 %v3321_v63, %v3321_v63 }
 0x1ca   : > { %v1495_v63 = vsel %vm1311_vm4, %v3389_v14, 0.0  ;;  %v1499_v14 = vsel %vm1311_vm4, %v3443_v43, 0.0 }
 0x1cb   : > { %v1472_v23 = vadd.f32 %v1471_v33, %v1470_v61  ;;  %v1771_v36 = vadd.f32 %v1770_v1, %v1769_v26  ;;  %v1606_v61 = vmul.f32 %v3323_v32, %v3323_v32  ;;  %v1792_v33 = vsel %vm1311_vm4, %v1605_v37, 0.0 }
 0x1cc   : > { %v1497_v32 = vsel %vm1311_vm4, %v3391_v12, 0.0 }
 0x1cd   : > { %v1474_v49 = vadd.f32 %v1473_v17, %v1472_v23  ;;  %v1773_v53 = vadd.f32 %v1772_v58, %v1771_v36  ;;  %v1794_v36 = vsel %vm1311_vm4, %v1606_v61, 0.0  ;;  %v1608_v58 = vmul.f32 %v3391_v12, %v3391_v12 }
 0x1ce   : > { %v1501_v12 = vsel %vm1311_vm4, %v3445_v57, 0.0 }
 0x1cf   : > { %v1476_v51 = vadd.f32 %v1475_v13, %v1474_v49  ;;  %v1775_v0 = vadd.f32 %v1774_v41, %v1773_v53  ;;  %v1796_v49 = vsel %vm1311_vm4, %v1607_v44, 0.0  ;;  %v1609_v53 = vmul.f32 %v3443_v43, %v3443_v43 }
 0x1d0   : > { %v1798_v24 = vsel %vm1311_vm4, %v1608_v58, 0.0  ;;  %v1503_v43 = vsel %vm1311_vm4, %v3497_v9, 0.0 }
 0x1d1   : > { %v1478_v39 = vadd.f32 %v1477_v6, %v1476_v51  ;;  %v1777_v21 = vadd.f32 %v1776_v30, %v1775_v0  ;;  %v1610_v51 = vmul.f32 %v3445_v57, %v3445_v57  ;;  %v1800_v6 = vsel %vm1311_vm4, %v1609_v53, 0.0 }
 0x1d2   : > { %v1505_v57 = vsel %vm1311_vm4, %v3499_v42, 0.0 }
 0x1d3   : > { %v1779_v7 = vadd.f32 %v1778_v31, %v1777_v21  ;;  %v1480_v56 = vadd.f32 %v1479_v46, %v1478_v39  ;;  %v1802_v31 = vsel %vm1311_vm4, %v1610_v51, 0.0  ;;  %v1612_v46 = vmul.f32 %v3499_v42, %v3499_v42 }
 0x1d5   : > { %v1482_v29 = vadd.f32 %v1481_v40, %v1480_v56  ;;  %v1781_v11 = vadd.f32 %v1780_v59, %v1779_v7  ;;  %v1804_v56 = vsel %vm1311_vm4, %v1611_v10, 0.0  ;;  %v1806_v45 = vsel %vm1311_vm4, %v1612_v46, 0.0 }
 0x1d7   : > { %v1484_v25 = vadd.f32 %v1483_v60, %v1482_v29  ;;  %v1783_v15 = vadd.f32 %v1782_v48, %v1781_v11 }
 0x1d9   : > { %v1486_v52 = vadd.f32 %v1485_v22, %v1484_v25  ;;  %v1785_v55 = vadd.f32 %v1784_v2, %v1783_v15 }
 0x1db   : > { %v1488_v19 = vadd.f32 %v1487_v16, %v1486_v52  ;;  %v1787_v8 = vadd.f32 %v1786_v20, %v1785_v55 }
 0x1dd   : > { %v1490_v28 = vadd.f32 %v1489_v47, %v1488_v19  ;;  %v1789_v3 = vadd.f32 %v1788_v18, %v1787_v8 }
 0x1df   : > { %v1492_v26 = vadd.f32 %v1491_v5, %v1490_v28  ;;  %v1791_v1 = vadd.f32 %v1790_v4, %v1789_v3 }
 0x1e1   : > { %v1494_v50 = vadd.f32 %v1493_v34, %v1492_v26  ;;  %v1793_v23 = vadd.f32 %v1792_v33, %v1791_v1 }
 0x1e3   : > { %v1496_v17 = vadd.f32 %v1495_v63, %v1494_v50  ;;  %v1795_v62 = vadd.f32 %v1794_v36, %v1793_v23 }
 0x1e5   : > { %v1797_v41 = vadd.f32 %v1796_v49, %v1795_v62  ;;  %v1498_v13 = vadd.f32 %v1497_v32, %v1496_v17 }
 0x1e7   : > { %v1799_v0 = vadd.f32 %v1798_v24, %v1797_v41  ;;  %v1500_v30 = vadd.f32 %v1499_v14, %v1498_v13 }
 0x1e9   : > { %v1801_v39 = vadd.f32 %v1800_v6, %v1799_v0  ;;  %v1502_v21 = vadd.f32 %v1501_v12, %v1500_v30 }
 0x1eb   : > { %v1803_v27 = vadd.f32 %v1802_v31, %v1801_v39  ;;  %v1504_v7 = vadd.f32 %v1503_v43, %v1502_v21 }
 0x1ed   : > { %v1805_v59 = vadd.f32 %v1804_v56, %v1803_v27  ;;  %v1506_v40 = vadd.f32 %v1505_v57, %v1504_v7 }
 0x1ef   : > { %v1507_v29 = vrot.slane %v1506_v40, 4  ;;  %v1807_v11 = vadd.f32 %v1806_v45, %v1805_v59 }
 0x1f1   : > { %v1508_v48 = vadd.f32 %v1507_v29, %v1506_v40  ;;  %v1808_v9 = vrot.slane %v1807_v11, 4 }
 0x1f3   : > { %v1509_v60 = vrot.slane %v1508_v48, 2  ;;  %v1809_v38 = vadd.f32 %v1808_v9, %v1807_v11 }
 0x1f5   : > { %v1510_v25 = vadd.f32 %v1509_v60, %v1508_v48  ;;  %v1810_v15 = vrot.slane %v1809_v38, 2 }
 0x1f7   : > { %v1511_v2 = vrot.slane %v1510_v25, 1  ;;  %v1811_v22 = vadd.f32 %v1810_v15, %v1809_v38 }
 0x1f9   : > { %v1512_v42 = vadd.f32 %v1511_v2, %v1510_v25  ;;  %v1812_v35 = vrot.slane %v1811_v22, 1 }
 0x1fb   : > { %1514 = vst.msk [vmem:[%s243_s16] sm:$0x1] %vm1513_vm5, %v1512_v42  ;;  %v1813_v52 = vadd.f32 %v1812_v35, %v1811_v22 }
 0x1fd   : > { %1814 = vst.msk [vmem:[%s243_s16 + $0x1] sm:$0x1] %vm1513_vm5, %v1813_v52 }
 0x1fe PF: > { %s17_s15 = sadd.s32 1, %s2356_s15  }
 0x1ff   : > { %p14_p8 = scmp.ge.s32.totalorder %s17_s15, 4  }
 0x201   :  { %16 = sbr.rel (!%p14_p8) target bundleno = 2 (0x2), region = 83 }
 0x206   :  { %1851 = vsyncpa [#allocation3], 1 }
 0x207   :  { %1853 = vsyncpa [#allocation3 + $0x1], 1 }
 0x208   :  { %1854 = vsyncpa [#allocation5], 1 }

// kernel: mnist_rotdcf_forward.6
= control target key start
LH: loop header
LB: loop body
LE: loop exit
PB: predicated region body
PF: predicated region fallthrough
CT: control target
= control target key end

     0   :  { %s5485_s15 = smov 0   ;;  %s5487_s16 = smov 0   ;;  %s6846_s0 = inlined_call_operand.vmem [shape: bf16[392,1600], index: 0, kind: input, shape index: {}]   ;;  %s6847_s1 = inlined_call_operand.vmem [shape: bf16[1600,128], index: 1, kind: input, shape index: {}]   ;;  %s6848_s2 = inlined_call_operand.vmem [shape: f32[1,128], index: 2, kind: input, shape index: {}]   ;;  %s6849_s3 = inlined_call_operand.vmem [shape: bf16[392,128], index: 3, kind: output, shape index: {0}]   ;;  %s6850_s4 = inlined_call_operand.vmem [shape: f32[16,128], index: 4, kind: output, shape index: {1}]  }
   0x1   :  { %s5489_s17 = smov 0  }
   0x2 LB: > { %s5498_s18 = sadd.s32 4294967295, %s5426_s17   ;;  %s5500_s19 = sadd.s32 1, %s5426_s17   ;;  %s5426_s17 = sphi %s5489_s17, %s6859_s17   ;;  %s5422_s16 = sphi %s5487_s16, %s6858_s16   ;;  %s5418_s15 = sphi %s5485_s15, %s6857_s15  }
   0x3   : > { %s87_s20 = ssub.s32 %s5426_s17, %s5500_s19  ;;  %s90_s21 = sadd.s32 1, %s5422_s16 }
   0x4   : > { %p88_p0 = scmp.eq.s32.totalorder %s87_s20, 0  ;;  %p100_p1 = scmp.ne.s32.totalorder %s5422_s16, %s5418_s15 }
   0x5   : > { %p101_p2 = scmp.eq.s32.totalorder %s5498_s18, 1  ;;  %p3797_p3 = scmp.ge.s32.totalorder %s5426_s17, 1 }
   0x6   : > { %s5508_s22 = scalar_select %p88_p0, %s5422_s16, %s90_s21  }
   0x7   : > { %p5512_p4 = por %p101_p2, %p100_p1  ;;  %p177_p5 = scmp.lt.s32.totalorder %s5426_s17, 3 }
   0x9   : > { %p178_p6 = pnand %p3797_p3, %p177_p5 }
   0xa   : > { %p234_p7 = scmp.lt.s32.totalorder (!%p178_p6), %s5498_s18, 1  ;;  %s5533_s9 = smul.u32 (!%p178_p6), 26, %s5498_s18 }
   0xb   : > { %181 = sbr.rel (%p178_p6) target bundleno = 1093 (0x445), region = 32  ;;  %s203_s30 = sand.u32 (!%p178_p6), 1, %s5418_s15  }
   0xc   : > { %p218_p8 = scmp.lt.s32.totalorder (!%p178_p6), %s5533_s9, 48  ;;  %s5274_s5 = smul.u32 (!%p178_p6), 104, %s203_s30 }
   0xe   : > { %s6419_s15 = scalar_lea.vmem (!%p178_p6), [#allocation2], %s5274_s5  }
  0x10   : > { %v5079_v0 = vld [vmem:[%s6847_s1 + $0x38] sm:$0xff]  ;;  %s235_s26 = scalar_select %p234_p7, %s5498_s18, 1  ;;  %v5078_v1 = vld [vmem:[%s6847_s1 + $0x30] sm:$0xff]  ;;  %v5077_v2 = vld [vmem:[%s6847_s1 + $0x28] sm:$0xff]  ;;  %vm2070_vm0 = vcmask 523264  }
  0x11   : > { %2110 = vmatpush.bf16.msra.mxu0 %v5079_v0  ;;  %5250 = vmatpush.bf16.msra.mxu1 %v5079_v0  ;;  %v5076_v3 = vld [vmem:[%s6847_s1 + $0x20] sm:$0xff]  ;;  %v5075_v4 = vld [vmem:[%s6847_s1 + $0x18] sm:$0xff]  ;;  %s219_s14 = scalar_select %p218_p8, %s5533_s9, 48  ;;  %v5074_v5 = vld [vmem:[%s6847_s1 + $0x10] sm:$0xff] }
  0x12   : > { %5252 = vmatpush.bf16.msra.mxu3 %v5079_v0  ;;  %5251 = vmatpush.bf16.msra.mxu2 %v5079_v0  ;;  %s3799_s29 = sshll.u32 %s235_s26, 3  ;;  %v5073_v6 = vld [vmem:[%s6847_s1 + $0x8] sm:$0xff]  ;;  %v5072_v7 = vld [vmem:[%s6847_s1] sm:$0xff]  ;;  %v5087_v12 = vld [vmem:[%s6847_s1 + $0x78] sm:$0xff] }
  0x13   : > { %s5527_s6 = scalar_lea.vmem %s6850_s4, %s3799_s29  ;;  %s5275_s21 = smul.u32 52, %s219_s14  ;;  %v5111_v15 = vld [vmem:[%s6847_s1 + $0x138] sm:$0xff]  ;;  %v5086_v22 = vld [vmem:[%s6847_s1 + $0x70] sm:$0xff]  ;;  %v5085_v27 = vld [vmem:[%s6847_s1 + $0x68] sm:$0xff] }
  0x14   : > { %v5103_v16 = vld [vmem:[%s6847_s1 + $0xf8] sm:$0xff]  ;;  %v5110_v24 = vld [vmem:[%s6847_s1 + $0x130] sm:$0xff]  ;;  %v5109_v29 = vld [vmem:[%s6847_s1 + $0x128] sm:$0xff] }
  0x15   : > { %2111 = vmatpush.bf16.msra.mxu0 %v5078_v1  ;;  %5253 = vmatpush.bf16.msra.mxu1 %v5078_v1  ;;  %s5552_s28 = scalar_lea.vmem %s6846_s0, %s5275_s21  ;;  %v5095_v23 = vld [vmem:[%s6847_s1 + $0xb8] sm:$0xff]  ;;  %v5102_v25 = vld [vmem:[%s6847_s1 + $0xf0] sm:$0xff]  ;;  %v5101_v30 = vld [vmem:[%s6847_s1 + $0xe8] sm:$0xff] }
  0x16   : > { %5255 = vmatpush.bf16.msra.mxu3 %v5078_v1  ;;  %5254 = vmatpush.bf16.msra.mxu2 %v5078_v1  ;;  %v3802_v8 = vld [vmem:[%s5552_s28] sm:$0xf]  ;;  %v4909_v9 = vld [vmem:[%s5552_s28 + $0x30] sm:$0xf0]  ;;  %v4322_v13 = vld [vmem:[%s5552_s28 + $0x410] sm:$0xf] }
  0x17   : > { %v4010_v10 = vld [vmem:[%s5552_s28 + $0x1a0] sm:$0xf]  ;;  %v4961_v11 = vld [vmem:[%s5552_s28 + $0x1d0] sm:$0xf0]  ;;  %v5039_v14 = vld [vmem:[%s5552_s28 + $0x440] sm:$0xf0]  ;;  %v3803_v17 = vor.u32 %v4909_v9, %v3802_v8 }
  0x18   : > { %v4011_v18 = vor.u32 %v4961_v11, %v4010_v10  ;;  %v4323_v19 = vor.u32 %v5039_v14, %v4322_v13  ;;  %v4218_v20 = vld [vmem:[%s5552_s28 + $0x340] sm:$0xf]  ;;  %v5013_v21 = vld [vmem:[%s5552_s28 + $0x370] sm:$0xf0]  ;;  %v5093_v32 = vld [vmem:[%s6847_s1 + $0xa8] sm:$0xff] }
  0x19   : > { %2112 = vmatpush.bf16.msra.mxu0 %v5077_v2  ;;  %5256 = vmatpush.bf16.msra.mxu1 %v5077_v2  ;;  %v4219_v26 = vor.u32 %v5013_v21, %v4218_v20  ;;  %v5094_v28 = vld [vmem:[%s6847_s1 + $0xb0] sm:$0xff]  ;;  %v5084_v31 = vld [vmem:[%s6847_s1 + $0x60] sm:$0xff]  ;;  %v3854_v35 = vld [vmem:[%s5552_s28 + $0x68] sm:$0xf] }
  0x1a   : > { %5258 = vmatpush.bf16.msra.mxu3 %v5077_v2  ;;  %5257 = vmatpush.bf16.msra.mxu2 %v5077_v2  ;;  %v5108_v33 = vld [vmem:[%s6847_s1 + $0x120] sm:$0xff]  ;;  %v4922_v36 = vld [vmem:[%s5552_s28 + $0x98] sm:$0xf0]  ;;  %v4062_v37 = vld [vmem:[%s5552_s28 + $0x208] sm:$0xf] }
  0x1b   : > { %v5100_v34 = vld [vmem:[%s6847_s1 + $0xe0] sm:$0xff]  ;;  %v4974_v38 = vld [vmem:[%s5552_s28 + $0x238] sm:$0xf0]  ;;  %v4374_v39 = vld [vmem:[%s5552_s28 + $0x478] sm:$0xf]  ;;  %v3855_v45 = vor.u32 %v4922_v36, %v3854_v35 }
  0x1c   : > { %v5052_v40 = vld [vmem:[%s5552_s28 + $0x4a8] sm:$0xf0]  ;;  %v5083_v41 = vld [vmem:[%s6847_s1 + $0x58] sm:$0xff]  ;;  %v5092_v42 = vld [vmem:[%s6847_s1 + $0xa0] sm:$0xff]  ;;  %v4063_v46 = vor.u32 %v4974_v38, %v4062_v37 }
  0x1d   : > { %2113 = vmatpush.bf16.msra.mxu0 %v5076_v3  ;;  %5259 = vmatpush.bf16.msra.mxu1 %v5076_v3  ;;  %v5099_v43 = vld [vmem:[%s6847_s1 + $0xd8] sm:$0xff]  ;;  %v4375_v47 = vor.u32 %v5052_v40, %v4374_v39  ;;  %v4270_v48 = vld [vmem:[%s5552_s28 + $0x3a8] sm:$0xf]  ;;  %v5082_v51 = vld [vmem:[%s6847_s1 + $0x50] sm:$0xff] }
  0x1e   : > { %5261 = vmatpush.bf16.msra.mxu3 %v5076_v3  ;;  %5260 = vmatpush.bf16.msra.mxu2 %v5076_v3  ;;  %v5107_v44 = vld [vmem:[%s6847_s1 + $0x118] sm:$0xff]  ;;  %v5098_v52 = vld [vmem:[%s6847_s1 + $0xd0] sm:$0xff]  ;;  %v5081_v56 = vld [vmem:[%s6847_s1 + $0x48] sm:$0xff] }
  0x1f   : > { %v5026_v49 = vld [vmem:[%s5552_s28 + $0x3d8] sm:$0xf0]  ;;  %v5106_v53 = vld [vmem:[%s6847_s1 + $0x110] sm:$0xff]  ;;  %v5097_v57 = vld [vmem:[%s6847_s1 + $0xc8] sm:$0xff] }
  0x20   : > { %v5091_v50 = vld [vmem:[%s6847_s1 + $0x98] sm:$0xff]  ;;  %v4271_v54 = vor.u32 %v5026_v49, %v4270_v48  ;;  %v5090_v55 = vld [vmem:[%s6847_s1 + $0x90] sm:$0xff]  ;;  %v5105_v58 = vld [vmem:[%s6847_s1 + $0x108] sm:$0xff] }
  0x21   : > { %2114 = vmatpush.bf16.msra.mxu0 %v5075_v4  ;;  %5262 = vmatpush.bf16.msra.mxu1 %v5075_v4  ;;  %v5089_v59 = vld [vmem:[%s6847_s1 + $0x88] sm:$0xff]  ;;  %v5080_v60 = vld [vmem:[%s6847_s1 + $0x40] sm:$0xff]  ;;  %v3906_v63 = vld [vmem:[%s5552_s28 + $0xd0] sm:$0xf] }
  0x22   : > { %5264 = vmatpush.bf16.msra.mxu3 %v5075_v4  ;;  %5263 = vmatpush.bf16.msra.mxu2 %v5075_v4  ;;  %v5096_v61 = vld [vmem:[%s6847_s1 + $0xc0] sm:$0xff]  ;;  %v5135_v0 = vld [vmem:[%s6847_s1 + $0x1f8] sm:$0xff]  ;;  %v4114_v2 = vld [vmem:[%s5552_s28 + $0x270] sm:$0xf] }
  0x23   : > { %v5104_v62 = vld [vmem:[%s6847_s1 + $0x100] sm:$0xff]  ;;  %v3810_v11 = vld [vmem:[%s5552_s28 + $0x8] sm:$0xf]  ;;  %v5119_v14 = vld [vmem:[%s6847_s1 + $0x178] sm:$0xff] }
  0x24   : > { %v4935_v1 = vld [vmem:[%s5552_s28 + $0x100] sm:$0xf0]  ;;  %v4426_v4 = vld [vmem:[%s5552_s28 + $0x4e0] sm:$0xf]  ;;  %v4904_v20 = vld [vmem:[%s5552_s28 + $0xc] sm:$0xf] }
  0x25   : > { %2115 = vmatpush.bf16.msra.mxu0 %v5074_v5  ;;  %5265 = vmatpush.bf16.msra.mxu1 %v5074_v5  ;;  %v4987_v3 = vld [vmem:[%s5552_s28 + $0x2a0] sm:$0xf0]  ;;  %v3907_v8 = vor.u32 %v4935_v1, %v3906_v63  ;;  %v3812_v21 = vld [vmem:[%s5552_s28 + $0x3c] sm:$0xf0]  ;;  %v4917_v35 = vld [vmem:[%s5552_s28 + $0x74] sm:$0xf] }
  0x26   : > { %5267 = vmatpush.bf16.msra.mxu3 %v5074_v5  ;;  %5266 = vmatpush.bf16.msra.mxu2 %v5074_v5  ;;  %v5065_v5 = vld [vmem:[%s5552_s28 + $0x510] sm:$0xf0]  ;;  %v4115_v9 = vor.u32 %v4987_v3, %v4114_v2  ;;  %v3864_v36 = vld [vmem:[%s5552_s28 + $0xa4] sm:$0xf0]  ;;  %v3914_v40 = vld [vmem:[%s5552_s28 + $0xd8] sm:$0xf] }
  0x27   : > { %v4427_v10 = vor.u32 %v5065_v5, %v4426_v4  ;;  %v3867_v39 = vor.u32 %v4917_v35, %v3864_v36  ;;  %v4930_v48 = vld [vmem:[%s5552_s28 + $0xdc] sm:$0xf]  ;;  %v3916_v49 = vld [vmem:[%s5552_s28 + $0x10c] sm:$0xf0]  ;;  %v4937_v63 = vld [vmem:[%s5552_s28 + $0x110] sm:$0xf0] }
  0x28   : > { %v3968_v1 = vld [vmem:[%s5552_s28 + $0x174] sm:$0xf0]  ;;  %v4018_v5 = vld [vmem:[%s5552_s28 + $0x1a8] sm:$0xf] }
  0x29   : > { %2116 = vmatpush.bf16.msra.mxu0 %v5073_v6  ;;  %5268 = vmatpush.bf16.msra.mxu1 %v5073_v6  ;;  %v4122_v36 = vld [vmem:[%s5552_s28 + $0x278] sm:$0xf] }
  0x2a   : > { %5270 = vmatpush.bf16.msra.mxu3 %v5073_v6  ;;  %5269 = vmatpush.bf16.msra.mxu2 %v5073_v6  ;;  %v5088_v6 = vld [vmem:[%s6847_s1 + $0x80] sm:$0xff] }
  0x2d   : > { %2117 = vmatpush.bf16.msra.mxu0 %v5072_v7  ;;  %5271 = vmatpush.bf16.msra.mxu1 %v5072_v7 }
  0x2e   : > { %5273 = vmatpush.bf16.msra.mxu3 %v5072_v7  ;;  %5272 = vmatpush.bf16.msra.mxu2 %v5072_v7  ;;  %v5127_v7 = vld [vmem:[%s6847_s1 + $0x1b8] sm:$0xff] }
  0x30   : > { %2118 = vmatmul.bf16.vlgmr.msra.gmra.mxu0 %v3803_v17  ;;  %2138 = vmatmul.bf16.vlgmr.msra.gmra.mxu1 %v4011_v18  ;;  %v4948_v17 = vld [vmem:[%s5552_s28 + $0x168] sm:$0xf0]  ;;  %v4166_v18 = vld [vmem:[%s5552_s28 + $0x2d8] sm:$0xf] }
  0x31   : > { %2184 = vmatpush.bf16.msrb.mxu1 %v5087_v12  ;;  %2406 = vmatpush.bf16.msrb.mxu0 %v5111_v15  ;;  %v4910_v12 = vld [vmem:[%s5552_s28 + $0x38] sm:$0xf0] }
  0x32   : > { %2332 = vmatpush.bf16.msrb.mxu3 %v5103_v16  ;;  %2258 = vmatpush.bf16.msrb.mxu2 %v5095_v23  ;;  %v3811_v13 = vor.u32 %v4910_v12, %v3810_v11  ;;  %v5143_v15 = vld [vmem:[%s6847_s1 + $0x238] sm:$0xff]  ;;  %v3960_v11 = vld [vmem:[%s5552_s28 + $0x16c] sm:$0xf0]  ;;  %v3974_v12 = vld [vmem:[%s5552_s28 + $0x148] sm:$0xf] }
  0x33   : > { %2168 = vmatmul.bf16.vlgmr.msra.gmra.mxu3 %v4323_v19  ;;  %2158 = vmatmul.bf16.vlgmr.msra.gmra.mxu2 %v4219_v26  ;;  %v3958_v16 = vld [vmem:[%s5552_s28 + $0x138] sm:$0xf]  ;;  %v5000_v19 = vld [vmem:[%s5552_s28 + $0x308] sm:$0xf0]  ;;  %v4923_v26 = vld [vmem:[%s5552_s28 + $0xa0] sm:$0xf0] }
  0x34   : > { %v4167_v23 = vor.u32 %v5000_v19, %v4166_v18  ;;  %v4070_v19 = vld [vmem:[%s5552_s28 + $0x210] sm:$0xf] }
  0x35   : > { %2185 = vmatpush.bf16.msrb.mxu1 %v5086_v22  ;;  %2407 = vmatpush.bf16.msrb.mxu0 %v5110_v24  ;;  %v3959_v22 = vor.u32 %v4948_v17, %v3958_v16  ;;  %v3815_v24 = vor.u32 %v4904_v20, %v3812_v21  ;;  %v4975_v20 = vld [vmem:[%s5552_s28 + $0x240] sm:$0xf0] }
  0x36   : > { %2333 = vmatpush.bf16.msrb.mxu3 %v5102_v25  ;;  %2259 = vmatpush.bf16.msrb.mxu2 %v5094_v28  ;;  %v3862_v25 = vld [vmem:[%s5552_s28 + $0x70] sm:$0xf]  ;;  %v5116_v21 = vld [vmem:[%s6847_s1 + $0x160] sm:$0xff] }
  0x37   : > { %v5126_v28 = vld [vmem:[%s6847_s1 + $0x1b0] sm:$0xff] }
  0x39   : > { %2186 = vmatpush.bf16.msrb.mxu1 %v5085_v27  ;;  %2408 = vmatpush.bf16.msrb.mxu0 %v5109_v29  ;;  %v3863_v27 = vor.u32 %v4923_v26, %v3862_v25  ;;  %v5134_v29 = vld [vmem:[%s6847_s1 + $0x1f0] sm:$0xff]  ;;  %v4012_v25 = vld [vmem:[%s5552_s28 + $0x1d4] sm:$0xf0] }
  0x3a   : > { %2334 = vmatpush.bf16.msrb.mxu3 %v5101_v30  ;;  %2260 = vmatpush.bf16.msrb.mxu2 %v5093_v32  ;;  %v5118_v30 = vld [vmem:[%s6847_s1 + $0x170] sm:$0xff]  ;;  %v3804_v32 = vld [vmem:[%s5552_s28 + $0x34] sm:$0xf0] }
  0x3b   : > { %v4026_v26 = vld [vmem:[%s5552_s28 + $0x1b0] sm:$0xf] }
  0x3d   : > { %2187 = vmatpush.bf16.msrb.mxu1 %v5084_v31  ;;  %2409 = vmatpush.bf16.msrb.mxu0 %v5108_v33  ;;  %v4903_v31 = vld [vmem:[%s5552_s28 + $0x4] sm:$0xf]  ;;  %v3818_v33 = vld [vmem:[%s5552_s28 + $0x10] sm:$0xf] }
  0x3e   : > { %2335 = vmatpush.bf16.msrb.mxu3 %v5100_v34  ;;  %2261 = vmatpush.bf16.msrb.mxu2 %v5092_v42  ;;  %v4911_v34 = vld [vmem:[%s5552_s28 + $0x40] sm:$0xf0]  ;;  %v3807_v37 = vor.u32 %v4903_v31, %v3804_v32 }
  0x3f   : > { %v3819_v38 = vor.u32 %v4911_v34, %v3818_v33 }
  0x40   : > { %2123 = vmatmul.bf16.gmra.mxu0 %v3855_v45  ;;  %2143 = vmatmul.bf16.gmra.mxu1 %v4063_v46  ;;  %v3856_v45 = vld [vmem:[%s5552_s28 + $0x9c] sm:$0xf0]  ;;  %v3870_v46 = vld [vmem:[%s5552_s28 + $0x78] sm:$0xf] }
  0x41   : > { %2188 = vmatpush.bf16.msrb.mxu1 %v5083_v41  ;;  %2410 = vmatpush.bf16.msrb.mxu0 %v5107_v44  ;;  %v4936_v41 = vld [vmem:[%s5552_s28 + $0x108] sm:$0xf0] }
  0x42   : > { %2336 = vmatpush.bf16.msrb.mxu3 %v5099_v43  ;;  %2262 = vmatpush.bf16.msrb.mxu2 %v5091_v50  ;;  %v3915_v42 = vor.u32 %v4936_v41, %v3914_v40  ;;  %v5142_v43 = vld [vmem:[%s6847_s1 + $0x230] sm:$0xff]  ;;  %v4916_v44 = vld [vmem:[%s5552_s28 + $0x6c] sm:$0xf]  ;;  %v5123_v40 = vld [vmem:[%s6847_s1 + $0x198] sm:$0xff] }
  0x43   : > { %2173 = vmatmul.bf16.gmra.mxu3 %v4375_v47  ;;  %2163 = vmatmul.bf16.gmra.mxu2 %v4271_v54  ;;  %v4924_v47 = vld [vmem:[%s5552_s28 + $0xa8] sm:$0xf0]  ;;  %v3859_v50 = vor.u32 %v4916_v44, %v3856_v45  ;;  %v4949_v54 = vld [vmem:[%s5552_s28 + $0x170] sm:$0xf0] }
  0x45   : > { %2189 = vmatpush.bf16.msrb.mxu1 %v5082_v51  ;;  %2411 = vmatpush.bf16.msrb.mxu0 %v5106_v53  ;;  %v3871_v51 = vor.u32 %v4924_v47, %v3870_v46  ;;  %v3966_v53 = vld [vmem:[%s5552_s28 + $0x140] sm:$0xf]  ;;  %v5131_v46 = vld [vmem:[%s6847_s1 + $0x1d8] sm:$0xff] }
  0x46   : > { %2337 = vmatpush.bf16.msrb.mxu3 %v5098_v52  ;;  %2263 = vmatpush.bf16.msrb.mxu2 %v5090_v55  ;;  %v3919_v52 = vor.u32 %v4930_v48, %v3916_v49  ;;  %v3967_v55 = vor.u32 %v4949_v54, %v3966_v53  ;;  %v5115_v47 = vld [vmem:[%s6847_s1 + $0x158] sm:$0xff]  ;;  %v4968_v49 = vld [vmem:[%s5552_s28 + $0x20c] sm:$0xf] }
  0x47   : > { %v4976_v53 = vld [vmem:[%s5552_s28 + $0x248] sm:$0xf0]  ;;  %v4982_v54 = vld [vmem:[%s5552_s28 + $0x27c] sm:$0xf] }
  0x49   : > { %2190 = vmatpush.bf16.msrb.mxu1 %v5081_v56  ;;  %2412 = vmatpush.bf16.msrb.mxu0 %v5105_v58  ;;  %v5125_v56 = vld [vmem:[%s6847_s1 + $0x1a8] sm:$0xff] }
  0x4a   : > { %2338 = vmatpush.bf16.msrb.mxu3 %v5097_v57  ;;  %2264 = vmatpush.bf16.msrb.mxu2 %v5089_v59  ;;  %v5133_v57 = vld [vmem:[%s6847_s1 + $0x1e8] sm:$0xff] }
  0x4b   : > { %v5117_v58 = vld [vmem:[%s6847_s1 + $0x168] sm:$0xff] }
  0x4c   : > { %v5141_v59 = vld [vmem:[%s6847_s1 + $0x228] sm:$0xff] }
  0x4d   : > { %2191 = vmatpush.bf16.msrb.mxu1 %v5080_v60  ;;  %2413 = vmatpush.bf16.msrb.mxu0 %v5104_v62  ;;  %v4929_v60 = vld [vmem:[%s5552_s28 + $0xd4] sm:$0xf]  ;;  %v3922_v62 = vld [vmem:[%s5552_s28 + $0xe0] sm:$0xf] }
  0x4e   : > { %2339 = vmatpush.bf16.msrb.mxu3 %v5096_v61  ;;  %2265 = vmatpush.bf16.msrb.mxu2 %v5088_v6  ;;  %v3908_v61 = vld [vmem:[%s5552_s28 + $0x104] sm:$0xf0]  ;;  %v3923_v3 = vor.u32 %v4937_v63, %v3922_v62  ;;  %v4962_v6 = vld [vmem:[%s5552_s28 + $0x1d8] sm:$0xf0]  ;;  %v4174_v63 = vld [vmem:[%s5552_s28 + $0x2e0] sm:$0xf] }
  0x4f   : > { %v3911_v2 = vor.u32 %v4929_v60, %v3908_v61 }
  0x50   : > { %2128 = vmatmul.bf16.gmra.mxu0 %v3907_v8  ;;  %2148 = vmatmul.bf16.gmra.mxu1 %v4115_v9  ;;  %v5124_v8 = vld [vmem:[%s6847_s1 + $0x1a0] sm:$0xff] }
  0x51   : > { %2480 = vmatpush.bf16.msra.mxu1 %v5119_v14  ;;  %2702 = vmatpush.bf16.msra.mxu0 %v5143_v15  ;;  %v5132_v9 = vld [vmem:[%s6847_s1 + $0x1e0] sm:$0xff]  ;;  %v4956_v14 = vld [vmem:[%s5552_s28 + $0x1ac] sm:$0xf] }
  0x52   : > { %2628 = vmatpush.bf16.msra.mxu3 %v5135_v0  ;;  %2554 = vmatpush.bf16.msra.mxu2 %v5127_v7  ;;  %v4943_v0 = vld [vmem:[%s5552_s28 + $0x144] sm:$0xf]  ;;  %v4019_v7 = vor.u32 %v4962_v6, %v4018_v5  ;;  %v4020_v15 = vld [vmem:[%s5552_s28 + $0x1dc] sm:$0xf0] }
  0x53   : > { %2178 = vmatmul.bf16.gmra.mxu3 %v4427_v10  ;;  %2266 = vmatmul.bf16.vlgmr.msrb.gmra.mxu2 %v3811_v13  ;;  %v3971_v4 = vor.u32 %v4943_v0, %v3968_v1  ;;  %v4942_v10 = vld [vmem:[%s5552_s28 + $0x13c] sm:$0xf]  ;;  %v4023_v18 = vor.u32 %v4956_v14, %v4020_v15  ;;  %v5001_v0 = vld [vmem:[%s5552_s28 + $0x310] sm:$0xf0]  ;;  %v4116_v14 = vld [vmem:[%s5552_s28 + $0x2a4] sm:$0xf0] }
  0x54   : > { %v4950_v13 = vld [vmem:[%s5552_s28 + $0x178] sm:$0xf0]  ;;  %v3963_v16 = vor.u32 %v4942_v10, %v3960_v11  ;;  %v4175_v5 = vor.u32 %v5001_v0, %v4174_v63  ;;  %v4130_v15 = vld [vmem:[%s5552_s28 + $0x280] sm:$0xf]  ;;  %v4278_v0 = vld [vmem:[%s5552_s28 + $0x3b0] sm:$0xf] }
  0x55   : > { %2481 = vmatpush.bf16.msra.mxu1 %v5118_v30  ;;  %2703 = vmatpush.bf16.msra.mxu0 %v5142_v43  ;;  %v3975_v17 = vor.u32 %v4950_v13, %v3974_v12  ;;  %v4072_v30 = vld [vmem:[%s5552_s28 + $0x244] sm:$0xf0]  ;;  %v4981_v12 = vld [vmem:[%s5552_s28 + $0x274] sm:$0xf] }
  0x56   : > { %2555 = vmatpush.bf16.msra.mxu2 %v5126_v28  ;;  %2629 = vmatpush.bf16.msra.mxu3 %v5134_v29  ;;  %v5772_v28 = vld [vmem:[%s6848_s2] ss:$0 sm:$0xff]  ;;  %v4969_v29 = vld [vmem:[%s5552_s28 + $0x214] sm:$0xf] }
  0x57   : > { %v4075_v35 = vor.u32 %v4969_v29, %v4072_v30 }
  0x59   : > { %2482 = vmatpush.bf16.msra.mxu1 %v5117_v58  ;;  %2704 = vmatpush.bf16.msra.mxu0 %v5141_v59 }
  0x5a   : > { %2556 = vmatpush.bf16.msra.mxu2 %v5125_v56  ;;  %2630 = vmatpush.bf16.msra.mxu3 %v5133_v57 }
  0x5d   : > { %2483 = vmatpush.bf16.msra.mxu1 %v5116_v21 }
  0x5e   : > { %2557 = vmatpush.bf16.msra.mxu2 %v5124_v8  ;;  %2631 = vmatpush.bf16.msra.mxu3 %v5132_v9 }
  0x60   : > { %2133 = vmatmul.bf16.gmra.mxu0 %v3959_v22  ;;  %2153 = vmatmul.bf16.gmra.mxu1 %v4167_v23  ;;  %v4071_v22 = vor.u32 %v4975_v20, %v4070_v19  ;;  %v5140_v23 = vld [vmem:[%s6847_s1 + $0x220] sm:$0xff]  ;;  %v4119_v19 = vor.u32 %v4981_v12, %v4116_v14 }
  0x61   : > { %2705 = vmatpush.bf16.msra.mxu0 %v5140_v23  ;;  %2484 = vmatpush.bf16.msra.mxu1 %v5115_v47  ;;  %v4994_v47 = vld [vmem:[%s5552_s28 + $0x2dc] sm:$0xf] }
  0x62   : > { %2558 = vmatpush.bf16.msra.mxu2 %v5123_v40  ;;  %2632 = vmatpush.bf16.msra.mxu3 %v5131_v46 }
  0x63   : > { %2340 = vmatmul.bf16.vlgmr.msrb.gmra.mxu3 %v3815_v24  ;;  %2271 = vmatmul.bf16.gmra.mxu2 %v3863_v27  ;;  %v4955_v24 = vld [vmem:[%s5552_s28 + $0x1a4] sm:$0xf] }
  0x64   : > { %v4963_v27 = vld [vmem:[%s5552_s28 + $0x1e0] sm:$0xf0]  ;;  %v4015_v31 = vor.u32 %v4955_v24, %v4012_v25 }
  0x65   : > { %v4027_v32 = vor.u32 %v4963_v27, %v4026_v26  ;;  %v4226_v26 = vld [vmem:[%s5552_s28 + $0x348] sm:$0xf]  ;;  %v5014_v27 = vld [vmem:[%s5552_s28 + $0x378] sm:$0xf0] }
  0x70   : > { %2192 = vmatmul.bf16.vlgmr.msrb.gmra.mxu1 %v3807_v37  ;;  %2414 = vmatmul.bf16.vlgmr.msrb.gmra.mxu0 %v3819_v38  ;;  %v4988_v37 = vld [vmem:[%s5552_s28 + $0x2a8] sm:$0xf0] }
  0x73   : > { %2345 = vmatmul.bf16.gmra.mxu3 %v3867_v39  ;;  %2276 = vmatmul.bf16.gmra.mxu2 %v3915_v42  ;;  %v4123_v39 = vor.u32 %v4988_v37, %v4122_v36  ;;  %v5130_v36 = vld [vmem:[%s6847_s1 + $0x1d0] sm:$0xff] }
  0x74   : > { %v5114_v37 = vld [vmem:[%s6847_s1 + $0x150] sm:$0xff]  ;;  %2633 = vmatpush.bf16.msra.mxu3 %v5130_v36 }
  0x75   : > { %2485 = vmatpush.bf16.msra.mxu1 %v5114_v37 }
  0x80   : > { %2197 = vmatmul.bf16.gmra.mxu1 %v3859_v50  ;;  %2419 = vmatmul.bf16.gmra.mxu0 %v3871_v51  ;;  %v4064_v51 = vld [vmem:[%s5552_s28 + $0x23c] sm:$0xf0] }
  0x81   : > { %v4067_v56 = vor.u32 %v4968_v49, %v4064_v51  ;;  %v4182_v49 = vld [vmem:[%s5552_s28 + $0x2e8] sm:$0xf]  ;;  %v5002_v51 = vld [vmem:[%s5552_s28 + $0x318] sm:$0xf0] }
  0x83   : > { %2350 = vmatmul.bf16.gmra.mxu3 %v3919_v52  ;;  %2281 = vmatmul.bf16.gmra.mxu2 %v3967_v55  ;;  %v4078_v52 = vld [vmem:[%s5552_s28 + $0x218] sm:$0xf]  ;;  %v4124_v55 = vld [vmem:[%s5552_s28 + $0x2ac] sm:$0xf0] }
  0x84   : > { %v4079_v57 = vor.u32 %v4976_v53, %v4078_v52  ;;  %v4127_v62 = vor.u32 %v4982_v54, %v4124_v55  ;;  %v5008_v52 = vld [vmem:[%s5552_s28 + $0x34c] sm:$0xf]  ;;  %v4228_v53 = vld [vmem:[%s5552_s28 + $0x37c] sm:$0xf0]  ;;  %v4183_v55 = vor.u32 %v5002_v51, %v4182_v49 }
  0x85   : > { %v4231_v63 = vor.u32 %v5008_v52, %v4228_v53 }
  0x90   : > { %2202 = vmatmul.bf16.gmra.mxu1 %v3911_v2  ;;  %2424 = vmatmul.bf16.gmra.mxu0 %v3923_v3  ;;  %v5139_v2 = vld [vmem:[%s6847_s1 + $0x218] sm:$0xff] }
  0x91   : > { %2706 = vmatpush.bf16.msra.mxu0 %v5139_v2  ;;  %v5027_v2 = vld [vmem:[%s5552_s28 + $0x3e0] sm:$0xf0] }
  0x93   : > { %2355 = vmatmul.bf16.gmra.mxu3 %v3971_v4  ;;  %2286 = vmatmul.bf16.gmra.mxu2 %v4019_v7 }
  0xa0   : > { %2207 = vmatmul.bf16.gmra.mxu1 %v3963_v16  ;;  %2429 = vmatmul.bf16.gmra.mxu0 %v3975_v17  ;;  %v4989_v16 = vld [vmem:[%s5552_s28 + $0x2b0] sm:$0xf0]  ;;  %v4995_v17 = vld [vmem:[%s5552_s28 + $0x2e4] sm:$0xf] }
  0xa1   : > { %v4131_v20 = vor.u32 %v4989_v16, %v4130_v15  ;;  %v5007_v16 = vld [vmem:[%s5552_s28 + $0x344] sm:$0xf] }
  0xa3   : > { %2360 = vmatmul.bf16.gmra.mxu3 %v4023_v18  ;;  %2291 = vmatmul.bf16.gmra.mxu2 %v4071_v22  ;;  %v4176_v18 = vld [vmem:[%s5552_s28 + $0x314] sm:$0xf0] }
  0xa4   : > { %v4179_v25 = vor.u32 %v4995_v17, %v4176_v18  ;;  %v4220_v17 = vld [vmem:[%s5552_s28 + $0x374] sm:$0xf0]  ;;  %v4234_v18 = vld [vmem:[%s5552_s28 + $0x350] sm:$0xf] }
  0xad   : > { %v5776_v33 = vpop.f32.mrf.mxu0  ;;  %v2139_v34 = vpop.f32.mrf.mxu1 }
  0xae   : > { %v5781_v38 = vadd.f32 %v5772_v28, %v2139_v34 }
  0xb0   : > { %2212 = vmatmul.bf16.gmra.mxu1 %v4015_v31  ;;  %2434 = vmatmul.bf16.gmra.mxu0 %v4027_v32  ;;  %v4227_v32 = vor.u32 %v5014_v27, %v4226_v26 }
  0xb3   : > { %2365 = vmatmul.bf16.gmra.mxu3 %v4075_v35  ;;  %2296 = vmatmul.bf16.gmra.mxu2 %v4123_v39  ;;  %v5122_v35 = vld [vmem:[%s6847_s1 + $0x190] sm:$0xff] }
  0xb4   : > { %2559 = vmatpush.bf16.msra.mxu2 %v5122_v35 }
  0xb5   : > { %v5786_v42 = vpop.f32.mrf.mxu0  ;;  %v2141_v43 = vpop.f32.mrf.mxu1 }
  0xb6   : > { %v2169_v41 = vpop.f32.mrf.mxu3  ;;  %v5792_v45 = vadd.f32 %v5772_v28, %v2141_v43  ;;  %v2159_v48 = vpop.f32.mrf.mxu2  ;;  %v2122_v53 = vadd.f32 %v5772_v28, %v5786_v42  ;;  %v4272_v42 = vld [vmem:[%s5552_s28 + $0x3dc] sm:$0xf0] }
  0xb7   : > { %v5789_v44 = vadd.f32 %v5772_v28, %v2169_v41  ;;  %v5802_v50 = vadd.f32 %v5772_v28, %v2159_v48  ;;  %v4168_v48 = vld [vmem:[%s5552_s28 + $0x30c] sm:$0xf0] }
  0xb8   : > { %v4171_v54 = vor.u32 %v4994_v47, %v4168_v48 }
  0xbd   : > { %v5809_v59 = vpop.f32.mrf.mxu0  ;;  %v2144_v60 = vpop.f32.mrf.mxu1 }
  0xbe   : > { %v2171_v58 = vpop.f32.mrf.mxu3  ;;  %v5817_v1 = vadd.f32 %v5772_v28, %v2144_v60  ;;  %v2161_v3 = vpop.f32.mrf.mxu2 }
  0xbf   : > { %v5812_v61 = vadd.f32 %v5772_v28, %v2171_v58  ;;  %v5823_v4 = vadd.f32 %v5772_v28, %v2161_v3 }
  0xc0   : > { %2217 = vmatmul.bf16.gmra.mxu1 %v4067_v56  ;;  %2439 = vmatmul.bf16.gmra.mxu0 %v4079_v57  ;;  %v5138_v57 = vld [vmem:[%s6847_s1 + $0x210] sm:$0xff] }
  0xc1   : > { %2707 = vmatpush.bf16.msra.mxu0 %v5138_v57 }
  0xc3   : > { %2370 = vmatmul.bf16.gmra.mxu3 %v4127_v62  ;;  %2301 = vmatmul.bf16.gmra.mxu2 %v4175_v5 }
  0xc5   : > { %v5825_v7 = vpop.f32.mrf.mxu0  ;;  %v2146_v8 = vpop.f32.mrf.mxu1 }
  0xc6   : > { %v2174_v6 = vpop.f32.mrf.mxu3  ;;  %v5831_v10 = vadd.f32 %v5772_v28, %v2146_v8  ;;  %v2164_v11 = vpop.f32.mrf.mxu2 }
  0xc7   : > { %v5828_v9 = vadd.f32 %v5772_v28, %v2174_v6  ;;  %v5835_v13 = vadd.f32 %v5772_v28, %v2164_v11  ;;  %v4279_v6 = vor.u32 %v5027_v2, %v4278_v0  ;;  %v5020_v2 = vld [vmem:[%s5552_s28 + $0x3ac] sm:$0xf] }
  0xcd   : > { %v5842_v22 = vpop.f32.mrf.mxu0  ;;  %v2149_v23 = vpop.f32.mrf.mxu1 }
  0xce   : > { %v2176_v21 = vpop.f32.mrf.mxu3  ;;  %v5850_v29 = vadd.f32 %v5772_v28, %v2149_v23  ;;  %v2166_v30 = vpop.f32.mrf.mxu2  ;;  %v2120_v23 = vadd.f32 %v5772_v28, %v5776_v33  ;;  %v5040_v33 = vld [vmem:[%s5552_s28 + $0x448] sm:$0xf0] }
  0xcf   : > { %v5845_v24 = vadd.f32 %v5772_v28, %v2176_v21  ;;  %v5853_v31 = vadd.f32 %v5772_v28, %v2166_v30  ;;  %v4280_v21 = vld [vmem:[%s5552_s28 + $0x3e4] sm:$0xf0] }
  0xd0   : > { %2222 = vmatmul.bf16.gmra.mxu1 %v4119_v19  ;;  %2444 = vmatmul.bf16.gmra.mxu0 %v4131_v20  ;;  %v5015_v19 = vld [vmem:[%s5552_s28 + $0x380] sm:$0xf0]  ;;  %v5021_v20 = vld [vmem:[%s5552_s28 + $0x3b4] sm:$0xf]  ;;  %v5121_v30 = vld [vmem:[%s6847_s1 + $0x188] sm:$0xff] }
  0xd1   : > { %v4235_v26 = vor.u32 %v5015_v19, %v4234_v18  ;;  %v4283_v37 = vor.u32 %v5021_v20, %v4280_v21  ;;  %2560 = vmatpush.bf16.msra.mxu2 %v5121_v30  ;;  %v2125_v18 = vadd.f32 %v5772_v28, %v5809_v59  ;;  %v4275_v20 = vor.u32 %v5020_v2, %v4272_v42  ;;  %v4382_v30 = vld [vmem:[%s5552_s28 + $0x480] sm:$0xf]  ;;  %v4384_v2 = vld [vmem:[%s5552_s28 + $0x4b4] sm:$0xf0] }
  0xd2   : > { %v2130_v42 = vadd.f32 %v5772_v28, %v5842_v22 }
  0xd3   : > { %2375 = vmatmul.bf16.gmra.mxu3 %v4179_v25  ;;  %2306 = vmatmul.bf16.gmra.mxu2 %v4227_v32  ;;  %v4223_v25 = vor.u32 %v5007_v16, %v4220_v17  ;;  %v5129_v32 = vld [vmem:[%s6847_s1 + $0x1c8] sm:$0xff]  ;;  %v5034_v16 = vld [vmem:[%s5552_s28 + $0x41c] sm:$0xf]  ;;  %v4332_v17 = vld [vmem:[%s5552_s28 + $0x44c] sm:$0xf0] }
  0xd4   : > { %2634 = vmatpush.bf16.msra.mxu3 %v5129_v32  ;;  %v5053_v32 = vld [vmem:[%s5552_s28 + $0x4b0] sm:$0xf0] }
  0xd5   : > { %v5864_v39 = vpop.f32.mrf.mxu0  ;;  %v2151_v40 = vpop.f32.mrf.mxu1 }
  0xd6   : > { %v2179_v34 = vpop.f32.mrf.mxu3  ;;  %v5870_v43 = vadd.f32 %v5772_v28, %v2151_v40  ;;  %v2267_v46 = vpop.f32.mrf.mxu2  ;;  %v4330_v40 = vld [vmem:[%s5552_s28 + $0x418] sm:$0xf] }
  0xd7   : > { %v5867_v41 = vadd.f32 %v5772_v28, %v2179_v34  ;;  %v5113_v34 = vld [vmem:[%s6847_s1 + $0x148] sm:$0xff]  ;;  %v4331_v51 = vor.u32 %v5040_v33, %v4330_v40 }
  0xd8   : > { %2486 = vmatpush.bf16.msra.mxu1 %v5113_v34 }
  0xdd   : > { %v5881_v58 = vpop.f32.mrf.mxu0  ;;  %v2154_v60 = vpop.f32.mrf.mxu1 }
  0xde   : > { %v2181_v56 = vpop.f32.mrf.mxu3  ;;  %v5889_v3 = vadd.f32 %v5772_v28, %v2154_v60  ;;  %v2269_v5 = vpop.f32.mrf.mxu2 }
  0xdf   : > { %v5884_v62 = vadd.f32 %v5772_v28, %v2181_v56 }
  0xe0   : > { %2227 = vmatmul.bf16.gmra.mxu1 %v4171_v54  ;;  %2449 = vmatmul.bf16.gmra.mxu0 %v4183_v55 }
  0xe3   : > { %2380 = vmatmul.bf16.gmra.mxu3 %v4231_v63  ;;  %2311 = vmatmul.bf16.gmra.mxu2 %v4279_v6  ;;  %v4286_v6 = vld [vmem:[%s5552_s28 + $0x3b8] sm:$0xf] }
  0xe5   : > { %v5891_v11 = vpop.f32.mrf.mxu0  ;;  %v2156_v12 = vpop.f32.mrf.mxu1 }
  0xe6   : > { %v2341_v8 = vpop.f32.mrf.mxu3  ;;  %v5894_v14 = vadd.f32 %v5772_v28, %v2156_v12  ;;  %v2272_v15 = vpop.f32.mrf.mxu2 }
  0xed   : > { %v2193_v35 = vpop.f32.mrf.mxu1  ;;  %v2415_v36 = vpop.f32.mrf.mxu0 }
  0xee   : > { %v2343_v27 = vpop.f32.mrf.mxu3  ;;  %v2194_v47 = vadd.f32 %v2193_v35, %v2120_v23  ;;  %v2274_v48 = vpop.f32.mrf.mxu2 }
  0xf0   : > { %v2268_v49 = vadd.f32 %v2267_v46, %v2194_v47  ;;  %2232 = vmatmul.bf16.gmra.mxu1 %v4223_v25  ;;  %2454 = vmatmul.bf16.gmra.mxu0 %v4235_v26  ;;  %v5137_v46 = vld [vmem:[%s6847_s1 + $0x208] sm:$0xff]  ;;  %v5128_v47 = vld [vmem:[%s6847_s1 + $0x1c0] sm:$0xff] }
  0xf1   : > { %2708 = vmatpush.bf16.msra.mxu0 %v5137_v46  ;;  %2635 = vmatpush.bf16.msra.mxu3 %v5128_v47  ;;  %v4324_v46 = vld [vmem:[%s5552_s28 + $0x444] sm:$0xf0] }
  0xf2   : > { %v2342_v52 = vadd.f32 %v2341_v8, %v2268_v49  ;;  %v5028_v8 = vld [vmem:[%s5552_s28 + $0x3e8] sm:$0xf0] }
  0xf3   : > { %2385 = vmatmul.bf16.gmra.mxu3 %v4283_v37  ;;  %2316 = vmatmul.bf16.gmra.mxu2 %v4331_v51  ;;  %v4287_v21 = vor.u32 %v5028_v8, %v4286_v6  ;;  %v2127_v37 = vadd.f32 %v5772_v28, %v5825_v7 }
  0xf4   : > { %v5917_v54 = vadd.f32 %v2415_v36, %v2342_v52 }
  0xf5   : > { %v2195_v56 = vpop.f32.mrf.mxu1  ;;  %v2417_v57 = vpop.f32.mrf.mxu0 }
  0xf6   : > { %v2346_v55 = vpop.f32.mrf.mxu3  ;;  %v2196_v60 = vadd.f32 %v2195_v56, %v2122_v53  ;;  %v5922_v63 = vpop.f32.mrf.mxu2  ;;  %v4338_v56 = vld [vmem:[%s5552_s28 + $0x420] sm:$0xf] }
  0xf8   : > { %v2270_v0 = vadd.f32 %v2269_v5, %v2196_v60  ;;  %v4335_v5 = vor.u32 %v5034_v16, %v4332_v17  ;;  %v5136_v17 = vld [vmem:[%s6847_s1 + $0x200] sm:$0xff] }
  0xf9   : > { %2709 = vmatpush.bf16.msra.mxu0 %v5136_v17 }
  0xfa   : > { %v2344_v12 = vadd.f32 %v2343_v27, %v2270_v0  ;;  %v4383_v27 = vor.u32 %v5053_v32, %v4382_v30  ;;  %v5047_v0 = vld [vmem:[%s5552_s28 + $0x484] sm:$0xf] }
  0xfc   : > { %v5932_v19 = vadd.f32 %v2417_v57, %v2344_v12  ;;  %v5041_v57 = vld [vmem:[%s5552_s28 + $0x450] sm:$0xf0] }
  0xfd   : > { %v2198_v25 = vpop.f32.mrf.mxu1  ;;  %v2420_v26 = vpop.f32.mrf.mxu0  ;;  %v4339_v12 = vor.u32 %v5041_v57, %v4338_v56 }
  0xfe   : > { %v2348_v23 = vpop.f32.mrf.mxu3  ;;  %v2199_v34 = vadd.f32 %v2198_v25, %v2125_v18  ;;  %v2279_v35 = vpop.f32.mrf.mxu2  ;;  %v5066_v25 = vld [vmem:[%s5552_s28 + $0x518] sm:$0xf0] }
 0x100   : > { %v2273_v36 = vadd.f32 %v2272_v15, %v2199_v34  ;;  %2237 = vmatmul.bf16.gmra.mxu1 %v4275_v20  ;;  %2459 = vmatmul.bf16.gmra.mxu0 %v4287_v21  ;;  %v5120_v15 = vld [vmem:[%s6847_s1 + $0x180] sm:$0xff]  ;;  %v4387_v21 = vor.u32 %v5047_v0, %v4384_v2  ;;  %v2132_v34 = vadd.f32 %v5772_v28, %v5864_v39 }
 0x101   : > { %2561 = vmatpush.bf16.msra.mxu2 %v5120_v15  ;;  %v2135_v39 = vadd.f32 %v5772_v28, %v5881_v58 }
 0x102   : > { %v2347_v59 = vadd.f32 %v2346_v55, %v2273_v36  ;;  %v5033_v55 = vld [vmem:[%s5552_s28 + $0x414] sm:$0xf] }
 0x103   : > { %2390 = vmatmul.bf16.gmra.mxu3 %v4335_v5  ;;  %2321 = vmatmul.bf16.gmra.mxu2 %v4383_v27  ;;  %v4327_v8 = vor.u32 %v5033_v55, %v4324_v46  ;;  %v5060_v55 = vld [vmem:[%s5552_s28 + $0x4ec] sm:$0xf]  ;;  %v4436_v46 = vld [vmem:[%s5552_s28 + $0x51c] sm:$0xf0] }
 0x104   : > { %v5938_v40 = vadd.f32 %v2420_v26, %v2347_v59 }
 0x105   : > { %v2200_v49 = vpop.f32.mrf.mxu1  ;;  %v2422_v51 = vpop.f32.mrf.mxu0 }
 0x106   : > { %v2351_v33 = vpop.f32.mrf.mxu3  ;;  %v2201_v52 = vadd.f32 %v2200_v49, %v2127_v37  ;;  %v2282_v7 = vpop.f32.mrf.mxu2  ;;  %v5046_v49 = vld [vmem:[%s5552_s28 + $0x47c] sm:$0xf] }
 0x108   : > { %v2275_v53 = vadd.f32 %v2274_v48, %v2201_v52  ;;  %v5112_v48 = vld [vmem:[%s6847_s1 + $0x140] sm:$0xff]  ;;  %v4390_v52 = vld [vmem:[%s5552_s28 + $0x488] sm:$0xf] }
 0x109   : > { %2487 = vmatpush.bf16.msra.mxu1 %v5112_v48  ;;  %v4912_v48 = vld [vmem:[%s5552_s28 + $0x48] sm:$0xf0] }
 0x10a   : > { %v2349_v60 = vadd.f32 %v2348_v23, %v2275_v53  ;;  %v4434_v23 = vld [vmem:[%s5552_s28 + $0x4e8] sm:$0xf]  ;;  %v5054_v53 = vld [vmem:[%s5552_s28 + $0x4b8] sm:$0xf0] }
 0x10b   : > { %v4435_v30 = vor.u32 %v5066_v25, %v4434_v23 }
 0x10c   : > { %v5954_v6 = vadd.f32 %v2422_v51, %v2349_v60  ;;  %v4376_v51 = vld [vmem:[%s5552_s28 + $0x4ac] sm:$0xf0]  ;;  %v4391_v60 = vor.u32 %v5054_v53, %v4390_v52 }
 0x10d   : > { %v2203_v18 = vpop.f32.mrf.mxu1  ;;  %v2425_v20 = vpop.f32.mrf.mxu0  ;;  %v4379_v57 = vor.u32 %v5046_v49, %v4376_v51  ;;  %v3828_v49 = vld [vmem:[%s5552_s28 + $0x4c] sm:$0xf0] }
 0x10e   : > { %v2353_v16 = vpop.f32.mrf.mxu3  ;;  %v2204_v26 = vadd.f32 %v2203_v18, %v2130_v42  ;;  %v2284_v22 = vpop.f32.mrf.mxu2 }
 0x110   : > { %v2278_v5 = vadd.f32 %v5922_v63, %v2204_v26  ;;  %2242 = vmatmul.bf16.gmra.mxu1 %v4327_v8  ;;  %2464 = vmatmul.bf16.gmra.mxu0 %v4339_v12  ;;  %v4439_v8 = vor.u32 %v5060_v55, %v4436_v46  ;;  %v3826_v12 = vld [vmem:[%s5552_s28 + $0x18] sm:$0xf] }
 0x111   : > { %v3827_v58 = vor.u32 %v4912_v48, %v3826_v12  ;;  %v5151_v26 = vld [vmem:[%s6847_s1 + $0x278] sm:$0xff] }
 0x112   : > { %v2352_v32 = vadd.f32 %v2351_v33, %v2278_v5  ;;  %2776 = vmatpush.bf16.msrb.mxu1 %v5151_v26  ;;  %v5171_v55 = vld [vmem:[%s6847_s1 + $0x318] sm:$0xff]  ;;  %v4913_v26 = vld [vmem:[%s5552_s28 + $0x50] sm:$0xf0] }
 0x113   : > { %2395 = vmatmul.bf16.gmra.mxu3 %v4387_v21  ;;  %2326 = vmatmul.bf16.gmra.mxu2 %v4435_v30  ;;  %v2137_v21 = vadd.f32 %v5772_v28, %v5891_v11 }
 0x114   : > { %v5967_v36 = vadd.f32 %v2425_v20, %v2352_v32  ;;  %3002 = vmatpush.bf16.msrb.mxu0 %v5171_v55 }
 0x115   : > { %v2205_v59 = vpop.f32.mrf.mxu1  ;;  %v2427_v37 = vpop.f32.mrf.mxu0 }
 0x116   : > { %v2356_v27 = vpop.f32.mrf.mxu3  ;;  %v2206_v63 = vadd.f32 %v2205_v59, %v2132_v34  ;;  %v2287_v15 = vpop.f32.mrf.mxu2  ;;  %v5059_v34 = vld [vmem:[%s5552_s28 + $0x4e4] sm:$0xf]  ;;  %v4442_v59 = vld [vmem:[%s5552_s28 + $0x4f0] sm:$0xf] }
 0x118   : > { %v2280_v47 = vadd.f32 %v2279_v35, %v2206_v63  ;;  %v5159_v35 = vld [vmem:[%s6847_s1 + $0x2b8] sm:$0xff] }
 0x119   : > { %2850 = vmatpush.bf16.msrb.mxu2 %v5159_v35 }
 0x11a   : > { %v2354_v33 = vadd.f32 %v2353_v16, %v2280_v47  ;;  %v4906_v47 = vld [vmem:[%s5552_s28 + $0x1c] sm:$0xf] }
 0x11c   : > { %v5977_v56 = vadd.f32 %v2427_v37, %v2354_v33  ;;  %v5067_v37 = vld [vmem:[%s5552_s28 + $0x520] sm:$0xf0] }
 0x11d   : > { %v2208_v2 = vpop.f32.mrf.mxu1  ;;  %v2430_v42 = vpop.f32.mrf.mxu0  ;;  %v4443_v53 = vor.u32 %v5067_v37, %v4442_v59  ;;  %v5150_v59 = vld [vmem:[%s6847_s1 + $0x270] sm:$0xff] }
 0x11e   : > { %v2358_v0 = vpop.f32.mrf.mxu3  ;;  %v2209_v16 = vadd.f32 %v2208_v2, %v2135_v39  ;;  %v2289_v17 = vpop.f32.mrf.mxu2  ;;  %v3831_v39 = vor.u32 %v4906_v47, %v3828_v49  ;;  %v3930_v49 = vld [vmem:[%s5552_s28 + $0xe8] sm:$0xf]  ;;  %2777 = vmatpush.bf16.msrb.mxu1 %v5150_v59 }
 0x120   : > { %v2283_v18 = vadd.f32 %v2282_v7, %v2209_v16  ;;  %2247 = vmatmul.bf16.gmra.mxu1 %v4379_v57  ;;  %2469 = vmatmul.bf16.gmra.mxu0 %v4391_v60  ;;  %v5167_v7 = vld [vmem:[%s6847_s1 + $0x2f8] sm:$0xff]  ;;  %v3878_v57 = vld [vmem:[%s5552_s28 + $0x80] sm:$0xf]  ;;  %v4925_v60 = vld [vmem:[%s5552_s28 + $0xb0] sm:$0xf0] }
 0x121   : > { %2924 = vmatpush.bf16.msrb.mxu3 %v5167_v7  ;;  %v3834_v7 = vld [vmem:[%s5552_s28 + $0x20] sm:$0xf] }
 0x122   : > { %v2357_v20 = vadd.f32 %v2356_v27, %v2283_v18  ;;  %v4428_v27 = vld [vmem:[%s5552_s28 + $0x514] sm:$0xf0] }
 0x123   : > { %2400 = vmatmul.bf16.gmra.mxu3 %v4439_v8  ;;  %2562 = vmatmul.bf16.vlgmr.msra.gmra.mxu2 %v3827_v58  ;;  %v4431_v52 = vor.u32 %v5059_v34, %v4428_v27  ;;  %v3835_v34 = vor.u32 %v4913_v26, %v3834_v7 }
 0x124   : > { %v5986_v23 = vadd.f32 %v2430_v42, %v2357_v20  ;;  %v3879_v42 = vor.u32 %v4925_v60, %v3878_v57 }
 0x125   : > { %v2210_v5 = vpop.f32.mrf.mxu1  ;;  %v2432_v30 = vpop.f32.mrf.mxu0 }
 0x126   : > { %v2361_v25 = vpop.f32.mrf.mxu3  ;;  %v2211_v32 = vadd.f32 %v2210_v5, %v2137_v21  ;;  %v2292_v28 = vpop.f32.mrf.mxu2  ;;  %v3820_v21 = vld [vmem:[%s5552_s28 + $0x44] sm:$0xf0] }
 0x128   : > { %v2285_v11 = vadd.f32 %v2284_v22, %v2211_v32  ;;  %v3880_v32 = vld [vmem:[%s5552_s28 + $0xb4] sm:$0xf0] }
 0x12a   : > { %v2359_v63 = vadd.f32 %v2358_v0, %v2285_v11 }
 0x12c   : > { %v6000_v51 = vadd.f32 %v2432_v30, %v2359_v63  ;;  %v4919_v30 = vld [vmem:[%s5552_s28 + $0x84] sm:$0xf] }
 0x12d   : > { %v2213_v46 = vpop.f32.mrf.mxu1  ;;  %v2435_v22 = vpop.f32.mrf.mxu0  ;;  %v3883_v47 = vor.u32 %v4919_v30, %v3880_v32 }
 0x12e   : > { %v2363_v33 = vpop.f32.mrf.mxu3  ;;  %v2214_v35 = vadd.f32 %v2213_v46, %v5781_v38  ;;  %v2294_v0 = vpop.f32.mrf.mxu2 }
 0x130   : > { %v2288_v2 = vadd.f32 %v2287_v15, %v2214_v35  ;;  %2252 = vmatmul.bf16.gmra.mxu1 %v4431_v52  ;;  %2474 = vmatmul.bf16.gmra.mxu0 %v4443_v53  ;;  %v4905_v15 = vld [vmem:[%s5552_s28 + $0x14] sm:$0xf]  ;;  %v4938_v52 = vld [vmem:[%s5552_s28 + $0x118] sm:$0xf0] }
 0x131   : > { %v3823_v11 = vor.u32 %v4905_v15, %v3820_v21  ;;  %v3931_v46 = vor.u32 %v4938_v52, %v3930_v49  ;;  %v3932_v15 = vld [vmem:[%s5552_s28 + $0x11c] sm:$0xf0] }
 0x132   : > { %v2362_v8 = vadd.f32 %v2361_v25, %v2288_v2 }
 0x133   : > { %2636 = vmatmul.bf16.vlgmr.msra.gmra.mxu3 %v3831_v39  ;;  %2567 = vmatmul.bf16.gmra.mxu2 %v3879_v42  ;;  %v4918_v42 = vld [vmem:[%s5552_s28 + $0x7c] sm:$0xf] }
 0x134   : > { %v6008_v12 = vadd.f32 %v2435_v22, %v2362_v8  ;;  %v3872_v8 = vld [vmem:[%s5552_s28 + $0xac] sm:$0xf0] }
 0x135   : > { %v2215_v16 = vpop.f32.mrf.mxu1  ;;  %v2437_v38 = vpop.f32.mrf.mxu0  ;;  %v3875_v21 = vor.u32 %v4918_v42, %v3872_v8 }
 0x136   : > { %v2366_v48 = vpop.f32.mrf.mxu3  ;;  %v2216_v18 = vadd.f32 %v2215_v16, %v5792_v45  ;;  %v2297_v58 = vpop.f32.mrf.mxu2  ;;  %v5158_v45 = vld [vmem:[%s6847_s1 + $0x2b0] sm:$0xff]  ;;  %v3886_v16 = vld [vmem:[%s5552_s28 + $0x88] sm:$0xf] }
 0x137   : > { %2851 = vmatpush.bf16.msrb.mxu2 %v5158_v45 }
 0x138   : > { %v2290_v20 = vadd.f32 %v2289_v17, %v2216_v18  ;;  %v5166_v17 = vld [vmem:[%s6847_s1 + $0x2f0] sm:$0xff] }
 0x139   : > { %2925 = vmatpush.bf16.msrb.mxu3 %v5166_v17 }
 0x13a   : > { %v2364_v5 = vadd.f32 %v2363_v33, %v2290_v20  ;;  %v4932_v20 = vld [vmem:[%s5552_s28 + $0xec] sm:$0xf] }
 0x13b   : > { %v3935_v32 = vor.u32 %v4932_v20, %v3932_v15  ;;  %v4034_v15 = vld [vmem:[%s5552_s28 + $0x1b8] sm:$0xf] }
 0x13c   : > { %v6017_v25 = vadd.f32 %v2437_v38, %v2364_v5  ;;  %v4926_v38 = vld [vmem:[%s5552_s28 + $0xb8] sm:$0xf0] }
 0x13d   : > { %v2218_v37 = vpop.f32.mrf.mxu1  ;;  %v2440_v63 = vpop.f32.mrf.mxu0  ;;  %v3887_v7 = vor.u32 %v4926_v38, %v3886_v16 }
 0x13e   : > { %v2368_v27 = vpop.f32.mrf.mxu3  ;;  %v2219_v53 = vadd.f32 %v2218_v37, %v5817_v1  ;;  %v2299_v33 = vpop.f32.mrf.mxu2 }
 0x140   : > { %v2293_v55 = vadd.f32 %v2292_v28, %v2219_v53  ;;  %2488 = vmatmul.bf16.vlgmr.msra.gmra.mxu1 %v3823_v11  ;;  %2710 = vmatmul.bf16.vlgmr.msra.gmra.mxu0 %v3835_v34  ;;  %v4951_v11 = vld [vmem:[%s5552_s28 + $0x180] sm:$0xf0] }
 0x142   : > { %v2367_v22 = vadd.f32 %v2366_v48, %v2293_v55 }
 0x143   : > { %2641 = vmatmul.bf16.gmra.mxu3 %v3883_v47  ;;  %2572 = vmatmul.bf16.gmra.mxu2 %v3931_v46  ;;  %v4931_v46 = vld [vmem:[%s5552_s28 + $0xe4] sm:$0xf] }
 0x144   : > { %v6031_v39 = vadd.f32 %v2440_v63, %v2367_v22  ;;  %v5157_v63 = vld [vmem:[%s6847_s1 + $0x2a8] sm:$0xff]  ;;  %v3924_v22 = vld [vmem:[%s5552_s28 + $0x114] sm:$0xf0] }
 0x145   : > { %v2220_v1 = vpop.f32.mrf.mxu1  ;;  %v2442_v60 = vpop.f32.mrf.mxu0  ;;  %2852 = vmatpush.bf16.msrb.mxu2 %v5157_v63  ;;  %v3927_v8 = vor.u32 %v4931_v46, %v3924_v22  ;;  %v3976_v63 = vld [vmem:[%s5552_s28 + $0x17c] sm:$0xf0] }
 0x146   : > { %v2371_v57 = vpop.f32.mrf.mxu3  ;;  %v2221_v35 = vadd.f32 %v2220_v1, %v5831_v10  ;;  %v2302_v2 = vpop.f32.mrf.mxu2  ;;  %v3982_v10 = vld [vmem:[%s5552_s28 + $0x150] sm:$0xf]  ;;  %v4939_v1 = vld [vmem:[%s5552_s28 + $0x120] sm:$0xf0] }
 0x147   : > { %v3983_v17 = vor.u32 %v4951_v11, %v3982_v10 }
 0x148   : > { %v2295_v28 = vadd.f32 %v2294_v0, %v2221_v35  ;;  %v4945_v35 = vld [vmem:[%s5552_s28 + $0x154] sm:$0xf] }
 0x14a   : > { %v2369_v18 = vadd.f32 %v2368_v27, %v2295_v28  ;;  %v3984_v28 = vld [vmem:[%s5552_s28 + $0x184] sm:$0xf0] }
 0x14b   : > { %v3987_v20 = vor.u32 %v4945_v35, %v3984_v28  ;;  %v4086_v35 = vld [vmem:[%s5552_s28 + $0x220] sm:$0xf]  ;;  %v4977_v28 = vld [vmem:[%s5552_s28 + $0x250] sm:$0xf0] }
 0x14c   : > { %v6040_v48 = vadd.f32 %v2442_v60, %v2369_v18 }
 0x14d   : > { %v2223_v5 = vpop.f32.mrf.mxu1  ;;  %v2445_v30 = vpop.f32.mrf.mxu0 }
 0x14e   : > { %v2373_v26 = vpop.f32.mrf.mxu3  ;;  %v2224_v0 = vadd.f32 %v2223_v5, %v5850_v29  ;;  %v2304_v34 = vpop.f32.mrf.mxu2  ;;  %v5165_v29 = vld [vmem:[%s6847_s1 + $0x2e8] sm:$0xff] }
 0x14f   : > { %2926 = vmatpush.bf16.msrb.mxu3 %v5165_v29  ;;  %v3990_v29 = vld [vmem:[%s5552_s28 + $0x158] sm:$0xf] }
 0x150   : > { %v2298_v45 = vadd.f32 %v2297_v58, %v2224_v0  ;;  %2493 = vmatmul.bf16.gmra.mxu1 %v3875_v21  ;;  %2715 = vmatmul.bf16.gmra.mxu0 %v3887_v7  ;;  %v5149_v58 = vld [vmem:[%s6847_s1 + $0x268] sm:$0xff] }
 0x151   : > { %2778 = vmatpush.bf16.msrb.mxu1 %v5149_v58  ;;  %v4964_v21 = vld [vmem:[%s5552_s28 + $0x1e8] sm:$0xf0] }
 0x152   : > { %v2372_v27 = vadd.f32 %v2371_v57, %v2298_v45  ;;  %v3938_v57 = vld [vmem:[%s5552_s28 + $0xf0] sm:$0xf]  ;;  %v4952_v58 = vld [vmem:[%s5552_s28 + $0x188] sm:$0xf0] }
 0x153   : > { %2646 = vmatmul.bf16.gmra.mxu3 %v3935_v32  ;;  %2577 = vmatmul.bf16.gmra.mxu2 %v3983_v17  ;;  %v3939_v16 = vor.u32 %v4939_v1, %v3938_v57  ;;  %v3991_v46 = vor.u32 %v4952_v58, %v3990_v29 }
 0x154   : > { %v6045_v59 = vadd.f32 %v2445_v30, %v2372_v27  ;;  %v4035_v30 = vor.u32 %v4964_v21, %v4034_v15 }
 0x155   : > { %v2225_v47 = vpop.f32.mrf.mxu1  ;;  %v2447_v49 = vpop.f32.mrf.mxu0 }
 0x156   : > { %v2376_v37 = vpop.f32.mrf.mxu3  ;;  %v2226_v52 = vadd.f32 %v2225_v47, %v5870_v43  ;;  %v2307_v53 = vpop.f32.mrf.mxu2  ;;  %v5170_v43 = vld [vmem:[%s6847_s1 + $0x310] sm:$0xff] }
 0x157   : > { %3003 = vmatpush.bf16.msrb.mxu0 %v5170_v43  ;;  %v4087_v43 = vor.u32 %v4977_v28, %v4086_v35 }
 0x158   : > { %v2300_v55 = vadd.f32 %v2299_v33, %v2226_v52  ;;  %v4036_v52 = vld [vmem:[%s5552_s28 + $0x1ec] sm:$0xf0] }
 0x15a   : > { %v2374_v60 = vadd.f32 %v2373_v26, %v2300_v55 }
 0x15c   : > { %v6063_v42 = vadd.f32 %v2447_v49, %v2374_v60  ;;  %v4958_v49 = vld [vmem:[%s5552_s28 + $0x1bc] sm:$0xf] }
 0x15d   : > { %v2228_v18 = vpop.f32.mrf.mxu1  ;;  %v2450_v33 = vpop.f32.mrf.mxu0  ;;  %v4039_v60 = vor.u32 %v4958_v49, %v4036_v52  ;;  %v4138_v52 = vld [vmem:[%s5552_s28 + $0x288] sm:$0xf] }
 0x15e   : > { %v2378_v38 = vpop.f32.mrf.mxu3  ;;  %v2229_v7 = vadd.f32 %v2228_v18, %v5889_v3  ;;  %v2309_v26 = vpop.f32.mrf.mxu2 }
 0x160   : > { %v2303_v5 = vadd.f32 %v2302_v2, %v2229_v7  ;;  %2498 = vmatmul.bf16.gmra.mxu1 %v3927_v8  ;;  %2720 = vmatmul.bf16.gmra.mxu0 %v3939_v16  ;;  %v4944_v2 = vld [vmem:[%s5552_s28 + $0x14c] sm:$0xf] }
 0x161   : > { %v3979_v55 = vor.u32 %v4944_v2, %v3976_v63 }
 0x162   : > { %v2377_v32 = vadd.f32 %v2376_v37, %v2303_v5 }
 0x163   : > { %2651 = vmatmul.bf16.gmra.mxu3 %v3987_v20  ;;  %2582 = vmatmul.bf16.gmra.mxu2 %v4035_v30  ;;  %v4957_v30 = vld [vmem:[%s5552_s28 + $0x1b4] sm:$0xf] }
 0x164   : > { %v6071_v10 = vadd.f32 %v2450_v33, %v2377_v32  ;;  %v4028_v32 = vld [vmem:[%s5552_s28 + $0x1e4] sm:$0xf0] }
 0x165   : > { %v2230_v0 = vpop.f32.mrf.mxu1  ;;  %v2452_v3 = vpop.f32.mrf.mxu0  ;;  %v4031_v63 = vor.u32 %v4957_v30, %v4028_v32 }
 0x166   : > { %v2381_v11 = vpop.f32.mrf.mxu3  ;;  %v2231_v45 = vadd.f32 %v2230_v0, %v5894_v14  ;;  %v2312_v17 = vpop.f32.mrf.mxu2  ;;  %v5156_v14 = vld [vmem:[%s6847_s1 + $0x2a0] sm:$0xff]  ;;  %v4965_v0 = vld [vmem:[%s5552_s28 + $0x1f0] sm:$0xf0] }
 0x167   : > { %2853 = vmatpush.bf16.msrb.mxu2 %v5156_v14 }
 0x168   : > { %v2305_v27 = vadd.f32 %v2304_v34, %v2231_v45  ;;  %v5164_v34 = vld [vmem:[%s6847_s1 + $0x2e0] sm:$0xff] }
 0x169   : > { %2927 = vmatpush.bf16.msrb.mxu3 %v5164_v34  ;;  %v4971_v45 = vld [vmem:[%s5552_s28 + $0x224] sm:$0xf] }
 0x16a   : > { %v2379_v47 = vadd.f32 %v2378_v38, %v2305_v27  ;;  %v4088_v27 = vld [vmem:[%s5552_s28 + $0x254] sm:$0xf0] }
 0x16c   : > { %v6080_v37 = vadd.f32 %v2452_v3, %v2379_v47 }
 0x16d   : > { %v2233_v57 = vpop.f32.mrf.mxu1  ;;  %v2455_v1 = vpop.f32.mrf.mxu0 }
 0x16e   : > { %v2383_v22 = vpop.f32.mrf.mxu3  ;;  %v2234_v8 = vadd.f32 %v2233_v57, %v5802_v50  ;;  %v2314_v16 = vpop.f32.mrf.mxu2  ;;  %v5148_v50 = vld [vmem:[%s6847_s1 + $0x260] sm:$0xff] }
 0x16f   : > { %2779 = vmatpush.bf16.msrb.mxu1 %v5148_v50 }
 0x170   : > { %v2308_v38 = vadd.f32 %v2307_v53, %v2234_v8  ;;  %2503 = vmatmul.bf16.gmra.mxu1 %v3979_v55  ;;  %2725 = vmatmul.bf16.gmra.mxu0 %v3991_v46  ;;  %v4990_v55 = vld [vmem:[%s5552_s28 + $0x2b8] sm:$0xf0] }
 0x172   : > { %v2382_v18 = vadd.f32 %v2381_v11, %v2308_v38  ;;  %v4042_v11 = vld [vmem:[%s5552_s28 + $0x1c0] sm:$0xf]  ;;  %v4970_v38 = vld [vmem:[%s5552_s28 + $0x21c] sm:$0xf] }
 0x173   : > { %2656 = vmatmul.bf16.gmra.mxu3 %v4039_v60  ;;  %2587 = vmatmul.bf16.gmra.mxu2 %v4087_v43  ;;  %v4043_v29 = vor.u32 %v4965_v0, %v4042_v11  ;;  %v4080_v43 = vld [vmem:[%s5552_s28 + $0x24c] sm:$0xf0] }
 0x174   : > { %v6091_v33 = vadd.f32 %v2455_v1, %v2382_v18  ;;  %v4094_v18 = vld [vmem:[%s5552_s28 + $0x228] sm:$0xf] }
 0x175   : > { %v2235_v53 = vpop.f32.mrf.mxu1  ;;  %v2457_v15 = vpop.f32.mrf.mxu0 }
 0x176   : > { %v2386_v20 = vpop.f32.mrf.mxu3  ;;  %v2236_v21 = vadd.f32 %v2235_v53, %v5823_v4  ;;  %v2317_v7 = vpop.f32.mrf.mxu2  ;;  %v4091_v4 = vor.u32 %v4971_v45, %v4088_v27  ;;  %v4984_v53 = vld [vmem:[%s5552_s28 + $0x28c] sm:$0xf]  ;;  %v4190_v45 = vld [vmem:[%s5552_s28 + $0x2f0] sm:$0xf]  ;;  %v5003_v27 = vld [vmem:[%s5552_s28 + $0x320] sm:$0xf0] }
 0x178   : > { %v2310_v5 = vadd.f32 %v2309_v26, %v2236_v21 }
 0x17a   : > { %v2384_v3 = vadd.f32 %v2383_v22, %v2310_v5  ;;  %v4139_v22 = vor.u32 %v4990_v55, %v4138_v52  ;;  %v4083_v5 = vor.u32 %v4970_v38, %v4080_v43 }
 0x17c   : > { %v6103_v2 = vadd.f32 %v2457_v15, %v2384_v3  ;;  %v4140_v15 = vld [vmem:[%s5552_s28 + $0x2bc] sm:$0xf0] }
 0x17d   : > { %v2238_v47 = vpop.f32.mrf.mxu1  ;;  %v2460_v49 = vpop.f32.mrf.mxu0  ;;  %v4143_v3 = vor.u32 %v4984_v53, %v4140_v15  ;;  %v4242_v15 = vld [vmem:[%s5552_s28 + $0x358] sm:$0xf] }
 0x17e   : > { %v2388_v58 = vpop.f32.mrf.mxu3  ;;  %v2239_v26 = vadd.f32 %v2238_v47, %v5835_v13  ;;  %v2319_v46 = vpop.f32.mrf.mxu2  ;;  %v5155_v13 = vld [vmem:[%s6847_s1 + $0x298] sm:$0xff]  ;;  %v4191_v47 = vor.u32 %v5003_v27, %v4190_v45 }
 0x17f   : > { %2854 = vmatpush.bf16.msrb.mxu2 %v5155_v13  ;;  %v4146_v13 = vld [vmem:[%s5552_s28 + $0x290] sm:$0xf] }
 0x180   : > { %v2313_v14 = vadd.f32 %v2312_v17, %v2239_v26  ;;  %2508 = vmatmul.bf16.gmra.mxu1 %v4031_v63  ;;  %2730 = vmatmul.bf16.gmra.mxu0 %v4043_v29 }
 0x182   : > { %v2387_v34 = vadd.f32 %v2386_v20, %v2313_v14  ;;  %v4978_v20 = vld [vmem:[%s5552_s28 + $0x258] sm:$0xf0] }
 0x183   : > { %2661 = vmatmul.bf16.gmra.mxu3 %v4091_v4  ;;  %2592 = vmatmul.bf16.gmra.mxu2 %v4139_v22  ;;  %v4095_v30 = vor.u32 %v4978_v20, %v4094_v18 }
 0x184   : > { %v6108_v57 = vadd.f32 %v2460_v49, %v2387_v34  ;;  %v4983_v34 = vld [vmem:[%s5552_s28 + $0x284] sm:$0xf] }
 0x185   : > { %v2240_v17 = vpop.f32.mrf.mxu1  ;;  %v2462_v60 = vpop.f32.mrf.mxu0 }
 0x186   : > { %v2391_v1 = vpop.f32.mrf.mxu3  ;;  %v2241_v35 = vadd.f32 %v2240_v17, %v5853_v31  ;;  %v2322_v28 = vpop.f32.mrf.mxu2  ;;  %v5163_v31 = vld [vmem:[%s6847_s1 + $0x2d8] sm:$0xff]  ;;  %v4991_v17 = vld [vmem:[%s5552_s28 + $0x2c0] sm:$0xf0] }
 0x187   : > { %2928 = vmatpush.bf16.msrb.mxu3 %v5163_v31  ;;  %v4147_v18 = vor.u32 %v4991_v17, %v4146_v13 }
 0x188   : > { %v2315_v8 = vadd.f32 %v2314_v16, %v2241_v35  ;;  %v5147_v16 = vld [vmem:[%s6847_s1 + $0x258] sm:$0xff]  ;;  %v4997_v35 = vld [vmem:[%s5552_s28 + $0x2f4] sm:$0xf] }
 0x189   : > { %2780 = vmatpush.bf16.msrb.mxu1 %v5147_v16 }
 0x18a   : > { %v2389_v50 = vadd.f32 %v2388_v58, %v2315_v8  ;;  %v4192_v8 = vld [vmem:[%s5552_s28 + $0x324] sm:$0xf0] }
 0x18c   : > { %v6120_v21 = vadd.f32 %v2462_v60, %v2389_v50 }
 0x18d   : > { %v2243_v11 = vpop.f32.mrf.mxu1  ;;  %v2465_v0 = vpop.f32.mrf.mxu0 }
 0x18e   : > { %v2393_v32 = vpop.f32.mrf.mxu3  ;;  %v2244_v63 = vadd.f32 %v2243_v11, %v5789_v44  ;;  %v2324_v29 = vpop.f32.mrf.mxu2  ;;  %v5169_v44 = vld [vmem:[%s6847_s1 + $0x308] sm:$0xff] }
 0x18f   : > { %3004 = vmatpush.bf16.msrb.mxu0 %v5169_v44  ;;  %v4198_v44 = vld [vmem:[%s5552_s28 + $0x2f8] sm:$0xf] }
 0x190   : > { %v2318_v58 = vadd.f32 %v2317_v7, %v2244_v63  ;;  %2513 = vmatmul.bf16.gmra.mxu1 %v4083_v5  ;;  %2735 = vmatmul.bf16.gmra.mxu0 %v4095_v30  ;;  %v5016_v5 = vld [vmem:[%s5552_s28 + $0x388] sm:$0xf0] }
 0x191   : > { %v4243_v16 = vor.u32 %v5016_v5, %v4242_v15 }
 0x192   : > { %v2392_v49 = vadd.f32 %v2391_v1, %v2318_v58  ;;  %v4132_v1 = vld [vmem:[%s5552_s28 + $0x2b4] sm:$0xf0] }
 0x193   : > { %2666 = vmatmul.bf16.gmra.mxu3 %v4143_v3  ;;  %2597 = vmatmul.bf16.gmra.mxu2 %v4191_v47  ;;  %v4135_v43 = vor.u32 %v4983_v34, %v4132_v1  ;;  %v5154_v3 = vld [vmem:[%s6847_s1 + $0x290] sm:$0xff] }
 0x194   : > { %v6131_v4 = vadd.f32 %v2465_v0, %v2392_v49  ;;  %2855 = vmatpush.bf16.msrb.mxu2 %v5154_v3  ;;  %v4996_v49 = vld [vmem:[%s5552_s28 + $0x2ec] sm:$0xf]  ;;  %v4250_v3 = vld [vmem:[%s5552_s28 + $0x360] sm:$0xf] }
 0x195   : > { %v2245_v7 = vpop.f32.mrf.mxu1  ;;  %v2467_v55 = vpop.f32.mrf.mxu0 }
 0x196   : > { %v2396_v52 = vpop.f32.mrf.mxu3  ;;  %v2246_v26 = vadd.f32 %v2245_v7, %v5812_v61  ;;  %v2327_v14 = vpop.f32.mrf.mxu2  ;;  %v4195_v61 = vor.u32 %v4997_v35, %v4192_v8  ;;  %v5004_v7 = vld [vmem:[%s5552_s28 + $0x328] sm:$0xf0]  ;;  %v4294_v8 = vld [vmem:[%s5552_s28 + $0x3c0] sm:$0xf] }
 0x197   : > { %v4199_v13 = vor.u32 %v5004_v7, %v4198_v44 }
 0x198   : > { %v2320_v22 = vadd.f32 %v2319_v46, %v2246_v26  ;;  %v5010_v26 = vld [vmem:[%s5552_s28 + $0x35c] sm:$0xf] }
 0x19a   : > { %v2394_v60 = vadd.f32 %v2393_v32, %v2320_v22  ;;  %v4244_v22 = vld [vmem:[%s5552_s28 + $0x38c] sm:$0xf0] }
 0x19b   : > { %v4247_v35 = vor.u32 %v5010_v26, %v4244_v22  ;;  %v4346_v26 = vld [vmem:[%s5552_s28 + $0x428] sm:$0xf]  ;;  %v5042_v22 = vld [vmem:[%s5552_s28 + $0x458] sm:$0xf0] }
 0x19c   : > { %v6143_v38 = vadd.f32 %v2467_v55, %v2394_v60 }
 0x19d   : > { %v2248_v50 = vpop.f32.mrf.mxu1  ;;  %v2470_v53 = vpop.f32.mrf.mxu0 }
 0x19e   : > { %v2398_v20 = vpop.f32.mrf.mxu3  ;;  %v2249_v46 = vadd.f32 %v2248_v50, %v5828_v9  ;;  %v2329_v30 = vpop.f32.mrf.mxu2  ;;  %v5162_v9 = vld [vmem:[%s6847_s1 + $0x2d0] sm:$0xff] }
 0x19f   : > { %2929 = vmatpush.bf16.msrb.mxu3 %v5162_v9  ;;  %v5017_v9 = vld [vmem:[%s5552_s28 + $0x390] sm:$0xf0] }
 0x1a0   : > { %v2323_v31 = vadd.f32 %v2322_v28, %v2249_v46  ;;  %2518 = vmatmul.bf16.gmra.mxu1 %v4135_v43  ;;  %2740 = vmatmul.bf16.gmra.mxu0 %v4147_v18  ;;  %v5146_v28 = vld [vmem:[%s6847_s1 + $0x250] sm:$0xff] }
 0x1a1   : > { %2781 = vmatpush.bf16.msrb.mxu1 %v5146_v28  ;;  %v5029_v43 = vld [vmem:[%s5552_s28 + $0x3f0] sm:$0xf0] }
 0x1a2   : > { %v2397_v32 = vadd.f32 %v2396_v52, %v2323_v31  ;;  %v4184_v52 = vld [vmem:[%s5552_s28 + $0x31c] sm:$0xf0] }
 0x1a3   : > { %2671 = vmatmul.bf16.gmra.mxu3 %v4195_v61  ;;  %2602 = vmatmul.bf16.gmra.mxu2 %v4243_v16  ;;  %v4187_v1 = vor.u32 %v4996_v49, %v4184_v52  ;;  %v5145_v52 = vld [vmem:[%s6847_s1 + $0x248] sm:$0xff] }
 0x1a4   : > { %v6148_v11 = vadd.f32 %v2470_v53, %v2397_v32  ;;  %v4236_v32 = vld [vmem:[%s5552_s28 + $0x384] sm:$0xf0] }
 0x1a5   : > { %v2250_v45 = vpop.f32.mrf.mxu1  ;;  %v2472_v27 = vpop.f32.mrf.mxu0  ;;  %2782 = vmatpush.bf16.msrb.mxu1 %v5145_v52 }
 0x1a6   : > { %v2401_v0 = vpop.f32.mrf.mxu3  ;;  %v2251_v63 = vadd.f32 %v2250_v45, %v5845_v24  ;;  %v2563_v58 = vpop.f32.mrf.mxu2  ;;  %v5023_v45 = vld [vmem:[%s5552_s28 + $0x3c4] sm:$0xf] }
 0x1a8   : > { %v2325_v47 = vadd.f32 %v2324_v29, %v2251_v63 }
 0x1aa   : > { %v2399_v55 = vadd.f32 %v2398_v20, %v2325_v47  ;;  %v4295_v20 = vor.u32 %v5029_v43, %v4294_v8  ;;  %v4251_v47 = vor.u32 %v5017_v9, %v4250_v3 }
 0x1ac   : > { %v6166_v34 = vadd.f32 %v2472_v27, %v2399_v55  ;;  %v4296_v27 = vld [vmem:[%s5552_s28 + $0x3f4] sm:$0xf0] }
 0x1ad   : > { %v2253_v24 = vpop.f32.mrf.mxu1  ;;  %v2475_v60 = vpop.f32.mrf.mxu0  ;;  %v4299_v55 = vor.u32 %v5023_v45, %v4296_v27 }
 0x1ae   : > { %v2403_v17 = vpop.f32.mrf.mxu3  ;;  %v2254_v29 = vadd.f32 %v2253_v24, %v5867_v41  ;;  %v2565_v18 = vpop.f32.mrf.mxu2  ;;  %v4347_v24 = vor.u32 %v5042_v22, %v4346_v26 }
 0x1b0   : > { %v2328_v50 = vadd.f32 %v2327_v14, %v2254_v29  ;;  %2523 = vmatmul.bf16.gmra.mxu1 %v4187_v1  ;;  %2745 = vmatmul.bf16.gmra.mxu0 %v4199_v13  ;;  %v5009_v14 = vld [vmem:[%s5552_s28 + $0x354] sm:$0xf] }
 0x1b1   : > { %v4239_v63 = vor.u32 %v5009_v14, %v4236_v32  ;;  %v4348_v14 = vld [vmem:[%s5552_s28 + $0x45c] sm:$0xf0] }
 0x1b2   : > { %v2402_v53 = vadd.f32 %v2401_v0, %v2328_v50 }
 0x1b3   : > { %2676 = vmatmul.bf16.gmra.mxu3 %v4247_v35  ;;  %2607 = vmatmul.bf16.gmra.mxu2 %v4295_v20 }
 0x1b4   : > { %v6171_v61 = vadd.f32 %v2475_v60, %v2402_v53  ;;  %v5022_v53 = vld [vmem:[%s5552_s28 + $0x3bc] sm:$0xf] }
 0x1b5   : > { %v2255_v5 = vpop.f32.mrf.mxu1  ;;  %v2477_v46 = vpop.f32.mrf.mxu0 }
 0x1b6   : > { %v2637_v15 = vpop.f32.mrf.mxu3  ;;  %v2256_v41 = vadd.f32 %v2255_v5, %v5884_v62  ;;  %v2568_v31 = vpop.f32.mrf.mxu2  ;;  %v5153_v62 = vld [vmem:[%s6847_s1 + $0x288] sm:$0xff] }
 0x1b7   : > { %2856 = vmatpush.bf16.msrb.mxu2 %v5153_v62  ;;  %v4302_v5 = vld [vmem:[%s5552_s28 + $0x3c8] sm:$0xf] }
 0x1b8   : > { %v2330_v16 = vadd.f32 %v2329_v30, %v2256_v41  ;;  %v5161_v30 = vld [vmem:[%s6847_s1 + $0x2c8] sm:$0xff] }
 0x1b9   : > { %2930 = vmatpush.bf16.msrb.mxu3 %v5161_v30 }
 0x1ba   : > { %v2404_v28 = vadd.f32 %v2403_v17, %v2330_v16  ;;  %v5036_v16 = vld [vmem:[%s5552_s28 + $0x42c] sm:$0xf] }
 0x1bc   : > { %v6180_v0 = vadd.f32 %v2477_v46, %v2404_v28  ;;  %v5030_v46 = vld [vmem:[%s5552_s28 + $0x3f8] sm:$0xf0] }
 0x1bd   : > { %v2489_v44 = vpop.f32.mrf.mxu1  ;;  %v2711_v7 = vpop.f32.mrf.mxu0  ;;  %v4303_v9 = vor.u32 %v5030_v46, %v4302_v5 }
 0x1be   : > { %v2639_v49 = vpop.f32.mrf.mxu3  ;;  %v2490_v1 = vadd.f32 %v2489_v44, %v5917_v54  ;;  %v2570_v13 = vpop.f32.mrf.mxu2  ;;  %v5168_v54 = vld [vmem:[%s6847_s1 + $0x300] sm:$0xff] }
 0x1bf   : > { %3005 = vmatpush.bf16.msrb.mxu0 %v5168_v54  ;;  %v5043_v54 = vld [vmem:[%s5552_s28 + $0x460] sm:$0xf0] }
 0x1c0   : > { %v2564_v17 = vadd.f32 %v2563_v58, %v2490_v1  ;;  %2528 = vmatmul.bf16.gmra.mxu1 %v4239_v63  ;;  %2750 = vmatmul.bf16.gmra.mxu0 %v4251_v47  ;;  %v4398_v63 = vld [vmem:[%s5552_s28 + $0x490] sm:$0xf]  ;;  %v5055_v47 = vld [vmem:[%s5552_s28 + $0x4c0] sm:$0xf0] }
 0x1c2   : > { %v2638_v60 = vadd.f32 %v2637_v15, %v2564_v17  ;;  %v4288_v15 = vld [vmem:[%s5552_s28 + $0x3ec] sm:$0xf0] }
 0x1c3   : > { %2681 = vmatmul.bf16.gmra.mxu3 %v4299_v55  ;;  %2612 = vmatmul.bf16.gmra.mxu2 %v4347_v24  ;;  %v4291_v3 = vor.u32 %v5022_v53, %v4288_v15  ;;  %v5035_v24 = vld [vmem:[%s5552_s28 + $0x424] sm:$0xf] }
 0x1c4   : > { %v6194_v35 = vadd.f32 %v2711_v7, %v2638_v60  ;;  %v4340_v60 = vld [vmem:[%s5552_s28 + $0x454] sm:$0xf0] }
 0x1c5   : > { %v2491_v58 = vpop.f32.mrf.mxu1  ;;  %v2713_v43 = vpop.f32.mrf.mxu0  ;;  %v4343_v53 = vor.u32 %v5035_v24, %v4340_v60 }
 0x1c6   : > { %v2642_v8 = vpop.f32.mrf.mxu3  ;;  %v2492_v29 = vadd.f32 %v2491_v58, %v5932_v19  ;;  %v2573_v50 = vpop.f32.mrf.mxu2  ;;  %v4351_v19 = vor.u32 %v5036_v16, %v4348_v14  ;;  %v4450_v16 = vld [vmem:[%s5552_s28 + $0x4f8] sm:$0xf]  ;;  %v5068_v14 = vld [vmem:[%s5552_s28 + $0x528] sm:$0xf0] }
 0x1c8   : > { %v2566_v20 = vadd.f32 %v2565_v18, %v2492_v29  ;;  %v4400_v29 = vld [vmem:[%s5552_s28 + $0x4c4] sm:$0xf0] }
 0x1ca   : > { %v2640_v41 = vadd.f32 %v2639_v49, %v2566_v20  ;;  %v4399_v49 = vor.u32 %v5055_v47, %v4398_v63 }
 0x1cc   : > { %v6206_v32 = vadd.f32 %v2713_v43, %v2640_v41  ;;  %v5049_v43 = vld [vmem:[%s5552_s28 + $0x494] sm:$0xf] }
 0x1cd   : > { %v2494_v45 = vpop.f32.mrf.mxu1  ;;  %v2716_v27 = vpop.f32.mrf.mxu0  ;;  %v4403_v41 = vor.u32 %v5049_v43, %v4400_v29  ;;  %v4914_v43 = vld [vmem:[%s5552_s28 + $0x58] sm:$0xf0] }
 0x1ce   : > { %v2644_v28 = vpop.f32.mrf.mxu3  ;;  %v2495_v18 = vadd.f32 %v2494_v45, %v5938_v40  ;;  %v2575_v62 = vpop.f32.mrf.mxu2  ;;  %v5152_v40 = vld [vmem:[%s6847_s1 + $0x280] sm:$0xff]  ;;  %v4451_v45 = vor.u32 %v5068_v14, %v4450_v16  ;;  %v5061_v14 = vld [vmem:[%s5552_s28 + $0x4f4] sm:$0xf] }
 0x1cf   : > { %2857 = vmatpush.bf16.msrb.mxu2 %v5152_v40  ;;  %v4406_v40 = vld [vmem:[%s5552_s28 + $0x498] sm:$0xf] }
 0x1d0   : > { %v2569_v30 = vadd.f32 %v2568_v31, %v2495_v18  ;;  %2533 = vmatmul.bf16.gmra.mxu1 %v4291_v3  ;;  %2755 = vmatmul.bf16.gmra.mxu0 %v4303_v9  ;;  %v5160_v31 = vld [vmem:[%s6847_s1 + $0x2c0] sm:$0xff] }
 0x1d1   : > { %2931 = vmatpush.bf16.msrb.mxu3 %v5160_v31  ;;  %v5056_v31 = vld [vmem:[%s5552_s28 + $0x4c8] sm:$0xf0] }
 0x1d2   : > { %v2643_v52 = vadd.f32 %v2642_v8, %v2569_v30  ;;  %v4354_v8 = vld [vmem:[%s5552_s28 + $0x430] sm:$0xf]  ;;  %v4407_v24 = vor.u32 %v5056_v31, %v4406_v40 }
 0x1d3   : > { %2686 = vmatmul.bf16.gmra.mxu3 %v4351_v19  ;;  %2617 = vmatmul.bf16.gmra.mxu2 %v4399_v49  ;;  %v4355_v15 = vor.u32 %v5043_v54, %v4354_v8  ;;  %v5048_v49 = vld [vmem:[%s5552_s28 + $0x48c] sm:$0xf] }
 0x1d4   : > { %v6211_v44 = vadd.f32 %v2716_v27, %v2643_v52  ;;  %v4392_v52 = vld [vmem:[%s5552_s28 + $0x4bc] sm:$0xf0] }
 0x1d5   : > { %v2496_v55 = vpop.f32.mrf.mxu1  ;;  %v2718_v26 = vpop.f32.mrf.mxu0 }
 0x1d6   : > { %v2647_v7 = vpop.f32.mrf.mxu3  ;;  %v2497_v22 = vadd.f32 %v2496_v55, %v5954_v6  ;;  %v2578_v1 = vpop.f32.mrf.mxu2  ;;  %v5144_v6 = vld [vmem:[%s6847_s1 + $0x240] sm:$0xff] }
 0x1d7   : > { %2783 = vmatpush.bf16.msrb.mxu1 %v5144_v6 }
 0x1d8   : > { %v2571_v17 = vadd.f32 %v2570_v13, %v2497_v22  ;;  %v4452_v22 = vld [vmem:[%s5552_s28 + $0x52c] sm:$0xf0] }
 0x1da   : > { %v2645_v58 = vadd.f32 %v2644_v28, %v2571_v17  ;;  %v4395_v17 = vor.u32 %v5048_v49, %v4392_v52 }
 0x1dc   : > { %v6226_v20 = vadd.f32 %v2718_v26, %v2645_v58  ;;  %v5062_v26 = vld [vmem:[%s5552_s28 + $0x4fc] sm:$0xf] }
 0x1dd   : > { %v2499_v46 = vpop.f32.mrf.mxu1  ;;  %v2721_v13 = vpop.f32.mrf.mxu0  ;;  %v4455_v58 = vor.u32 %v5062_v26, %v4452_v22 }
 0x1de   : > { %v2649_v5 = vpop.f32.mrf.mxu3  ;;  %v2500_v3 = vadd.f32 %v2499_v46, %v5967_v36  ;;  %v2580_v9 = vpop.f32.mrf.mxu2 }
 0x1e0   : > { %v2574_v28 = vadd.f32 %v2573_v50, %v2500_v3  ;;  %2538 = vmatmul.bf16.gmra.mxu1 %v4343_v53  ;;  %2760 = vmatmul.bf16.gmra.mxu0 %v4355_v15  ;;  %v4444_v3 = vld [vmem:[%s5552_s28 + $0x524] sm:$0xf0] }
 0x1e2   : > { %v2648_v27 = vadd.f32 %v2647_v7, %v2574_v28  ;;  %v4458_v28 = vld [vmem:[%s5552_s28 + $0x500] sm:$0xf] }
 0x1e3   : > { %2691 = vmatmul.bf16.gmra.mxu3 %v4403_v41  ;;  %2622 = vmatmul.bf16.gmra.mxu2 %v4451_v45  ;;  %v5069_v45 = vld [vmem:[%s5552_s28 + $0x530] sm:$0xf0] }
 0x1e4   : > { %v6234_v19 = vadd.f32 %v2721_v13, %v2648_v27 }
 0x1e5   : > { %v2501_v47 = vpop.f32.mrf.mxu1  ;;  %v2723_v36 = vpop.f32.mrf.mxu0 }
 0x1e6   : > { %v2652_v63 = vpop.f32.mrf.mxu3  ;;  %v2502_v18 = vadd.f32 %v2501_v47, %v5977_v56  ;;  %v2583_v30 = vpop.f32.mrf.mxu2  ;;  %v3842_v56 = vld [vmem:[%s5552_s28 + $0x28] sm:$0xf]  ;;  %v4908_v47 = vld [vmem:[%s5552_s28 + $0x2c] sm:$0xf] }
 0x1e7   : > { %v3843_v15 = vor.u32 %v4914_v43, %v3842_v56 }
 0x1e8   : > { %v2576_v50 = vadd.f32 %v2575_v62, %v2502_v18  ;;  %v4447_v18 = vor.u32 %v5061_v14, %v4444_v3 }
 0x1ea   : > { %v2650_v55 = vadd.f32 %v2649_v5, %v2576_v50  ;;  %v4459_v50 = vor.u32 %v5069_v45, %v4458_v28  ;;  %v3946_v45 = vld [vmem:[%s5552_s28 + $0xf8] sm:$0xf] }
 0x1ec   : > { %v6243_v7 = vadd.f32 %v2723_v36, %v2650_v55  ;;  %v3844_v36 = vld [vmem:[%s5552_s28 + $0x5c] sm:$0xf0]  ;;  %v4927_v55 = vld [vmem:[%s5552_s28 + $0xc0] sm:$0xf0] }
 0x1ed   : > { %v2504_v8 = vpop.f32.mrf.mxu1  ;;  %v2726_v54 = vpop.f32.mrf.mxu0  ;;  %v3847_v31 = vor.u32 %v4908_v47, %v3844_v36 }
 0x1ee   : > { %v2654_v60 = vpop.f32.mrf.mxu3  ;;  %v2505_v62 = vadd.f32 %v2504_v8, %v5986_v23  ;;  %v2585_v29 = vpop.f32.mrf.mxu2 }
 0x1f0   : > { %v2579_v53 = vadd.f32 %v2578_v1, %v2505_v62  ;;  %2543 = vmatmul.bf16.gmra.mxu1 %v4395_v17  ;;  %2765 = vmatmul.bf16.gmra.mxu0 %v4407_v24  ;;  %v3836_v62 = vld [vmem:[%s5552_s28 + $0x54] sm:$0xf0] }
 0x1f2   : > { %v2653_v5 = vadd.f32 %v2652_v63, %v2579_v53  ;;  %v3850_v53 = vld [vmem:[%s5552_s28 + $0x30] sm:$0xf] }
 0x1f3   : > { %2696 = vmatmul.bf16.gmra.mxu3 %v4455_v58  ;;  %2858 = vmatmul.bf16.vlgmr.msrb.gmra.mxu2 %v3843_v15  ;;  %v4915_v15 = vld [vmem:[%s5552_s28 + $0x60] sm:$0xf0] }
 0x1f4   : > { %v6248_v6 = vadd.f32 %v2726_v54, %v2653_v5 }
 0x1f5   : > { %v2506_v13 = vpop.f32.mrf.mxu1  ;;  %v2728_v41 = vpop.f32.mrf.mxu0 }
 0x1f6   : > { %v2657_v46 = vpop.f32.mrf.mxu3  ;;  %v2507_v23 = vadd.f32 %v2506_v13, %v6000_v51  ;;  %v2588_v16 = vpop.f32.mrf.mxu2  ;;  %v3894_v51 = vld [vmem:[%s5552_s28 + $0x90] sm:$0xf]  ;;  %v4921_v13 = vld [vmem:[%s5552_s28 + $0x94] sm:$0xf] }
 0x1f7   : > { %v3895_v17 = vor.u32 %v4927_v55, %v3894_v51  ;;  %v4920_v55 = vld [vmem:[%s5552_s28 + $0x8c] sm:$0xf] }
 0x1f8   : > { %v2581_v1 = vadd.f32 %v2580_v9, %v2507_v23 }
 0x1fa   : > { %v2655_v27 = vadd.f32 %v2654_v60, %v2581_v1  ;;  %v3851_v1 = vor.u32 %v4915_v15, %v3850_v53 }
 0x1fc   : > { %v6257_v63 = vadd.f32 %v2728_v41, %v2655_v27  ;;  %v3896_v41 = vld [vmem:[%s5552_s28 + $0xc4] sm:$0xf0] }
 0x1fd   : > { %v2509_v52 = vpop.f32.mrf.mxu1  ;;  %v2731_v40 = vpop.f32.mrf.mxu0 }
 0x1fe   : > { %v2659_v49 = vpop.f32.mrf.mxu3  ;;  %v2510_v9 = vadd.f32 %v2509_v52, %v6008_v12  ;;  %v2590_v26 = vpop.f32.mrf.mxu2 }
 0x200   : > { %v2584_v22 = vadd.f32 %v2583_v30, %v2510_v9  ;;  %2548 = vmatmul.bf16.gmra.mxu1 %v4447_v18  ;;  %2770 = vmatmul.bf16.gmra.mxu0 %v4459_v50  ;;  %v4907_v30 = vld [vmem:[%s5552_s28 + $0x24] sm:$0xf]  ;;  %v3888_v9 = vld [vmem:[%s5552_s28 + $0xbc] sm:$0xf0] }
 0x201   : > { %v3839_v23 = vor.u32 %v4907_v30, %v3836_v62 }
 0x202   : > { %v2658_v24 = vadd.f32 %v2657_v46, %v2584_v22  ;;  %v3902_v22 = vld [vmem:[%s5552_s28 + $0x98] sm:$0xf] }
 0x203   : > { %2932 = vmatmul.bf16.vlgmr.msrb.gmra.mxu3 %v3847_v31  ;;  %2863 = vmatmul.bf16.gmra.mxu2 %v3895_v17  ;;  %v4928_v17 = vld [vmem:[%s5552_s28 + $0xc8] sm:$0xf0] }
 0x204   : > { %v6262_v60 = vadd.f32 %v2731_v40, %v2658_v24 }
 0x205   : > { %v2511_v54 = vpop.f32.mrf.mxu1  ;;  %v2733_v58 = vpop.f32.mrf.mxu0 }
 0x206   : > { %v2662_v8 = vpop.f32.mrf.mxu3  ;;  %v2512_v12 = vadd.f32 %v2511_v54, %v6017_v25  ;;  %v2593_v56 = vpop.f32.mrf.mxu2  ;;  %v3899_v25 = vor.u32 %v4921_v13, %v3896_v41  ;;  %v4934_v54 = vld [vmem:[%s5552_s28 + $0xfc] sm:$0xf] }
 0x208   : > { %v2586_v43 = vadd.f32 %v2585_v29, %v2512_v12  ;;  %v4940_v29 = vld [vmem:[%s5552_s28 + $0x128] sm:$0xf0]  ;;  %v3891_v12 = vor.u32 %v4920_v55, %v3888_v9 }
 0x209   : > { %v3947_v18 = vor.u32 %v4940_v29, %v3946_v45  ;;  %v4933_v29 = vld [vmem:[%s5552_s28 + $0xf4] sm:$0xf] }
 0x20a   : > { %v2660_v5 = vadd.f32 %v2659_v49, %v2586_v43  ;;  %v3903_v43 = vor.u32 %v4928_v17, %v3902_v22 }
 0x20c   : > { %v6271_v46 = vadd.f32 %v2733_v58, %v2660_v5  ;;  %v3948_v58 = vld [vmem:[%s5552_s28 + $0x12c] sm:$0xf0]  ;;  %v4953_v5 = vld [vmem:[%s5552_s28 + $0x190] sm:$0xf0] }
 0x20d   : > { %v2514_v3 = vpop.f32.mrf.mxu1  ;;  %v2736_v28 = vpop.f32.mrf.mxu0  ;;  %v3951_v15 = vor.u32 %v4934_v54, %v3948_v58 }
 0x20e   : > { %v2664_v14 = vpop.f32.mrf.mxu3  ;;  %v2515_v27 = vadd.f32 %v2514_v3, %v6031_v39  ;;  %v2595_v47 = vpop.f32.mrf.mxu2 }
 0x210   : > { %v2589_v36 = vadd.f32 %v2588_v16, %v2515_v27  ;;  %2784 = vmatmul.bf16.vlgmr.msrb.gmra.mxu1 %v3839_v23  ;;  %4876 = vmatmul.msk.bf16.vlgmr.msrb.gmra.mxu0 %vm2070_vm0, %v3851_v1  ;;  %v3940_v27 = vld [vmem:[%s5552_s28 + $0x124] sm:$0xf0] }
 0x212   : > { %v2663_v50 = vadd.f32 %v2662_v8, %v2589_v36  ;;  %v3954_v36 = vld [vmem:[%s5552_s28 + $0x100] sm:$0xf] }
 0x213   : > { %2937 = vmatmul.bf16.gmra.mxu3 %v3899_v25  ;;  %2868 = vmatmul.bf16.gmra.mxu2 %v3947_v18  ;;  %v4941_v18 = vld [vmem:[%s5552_s28 + $0x130] sm:$0xf0] }
 0x214   : > { %v6277_v49 = vadd.f32 %v2736_v28, %v2663_v50 }
 0x215   : > { %v2516_v40 = vpop.f32.mrf.mxu1  ;;  %v2738_v39 = vpop.f32.mrf.mxu0 }
 0x216   : > { %v2667_v52 = vpop.f32.mrf.mxu3  ;;  %v2517_v31 = vadd.f32 %v2516_v40, %v6040_v48  ;;  %v2598_v51 = vpop.f32.mrf.mxu2  ;;  %v3998_v48 = vld [vmem:[%s5552_s28 + $0x160] sm:$0xf]  ;;  %v4947_v40 = vld [vmem:[%s5552_s28 + $0x164] sm:$0xf] }
 0x217   : > { %v3999_v23 = vor.u32 %v4953_v5, %v3998_v48  ;;  %v4946_v5 = vld [vmem:[%s5552_s28 + $0x15c] sm:$0xf] }
 0x218   : > { %v2591_v16 = vadd.f32 %v2590_v26, %v2517_v31  ;;  %v3943_v31 = vor.u32 %v4933_v29, %v3940_v27 }
 0x21a   : > { %v2665_v24 = vadd.f32 %v2664_v14, %v2591_v16  ;;  %v3955_v16 = vor.u32 %v4941_v18, %v3954_v36 }
 0x21c   : > { %v6286_v8 = vadd.f32 %v2738_v39, %v2665_v24  ;;  %v4000_v39 = vld [vmem:[%s5552_s28 + $0x194] sm:$0xf0]  ;;  %v4966_v24 = vld [vmem:[%s5552_s28 + $0x1f8] sm:$0xf0] }
 0x21d   : > { %v2519_v62 = vpop.f32.mrf.mxu1  ;;  %v2741_v53 = vpop.f32.mrf.mxu0  ;;  %v4003_v17 = vor.u32 %v4947_v40, %v4000_v39 }
 0x21e   : > { %v2669_v30 = vpop.f32.mrf.mxu3  ;;  %v2520_v26 = vadd.f32 %v2519_v62, %v6045_v59  ;;  %v2600_v13 = vpop.f32.mrf.mxu2 }
 0x220   : > { %v2594_v41 = vadd.f32 %v2593_v56, %v2520_v26  ;;  %2789 = vmatmul.bf16.gmra.mxu1 %v3891_v12  ;;  %4877 = vmatmul.msk.bf16.gmra.mxu0 %vm2070_vm0, %v3903_v43  ;;  %v3992_v26 = vld [vmem:[%s5552_s28 + $0x18c] sm:$0xf0] }
 0x222   : > { %v2668_v1 = vadd.f32 %v2667_v52, %v2594_v41  ;;  %v4006_v41 = vld [vmem:[%s5552_s28 + $0x168] sm:$0xf] }
 0x223   : > { %2942 = vmatmul.bf16.gmra.mxu3 %v3951_v15  ;;  %2873 = vmatmul.bf16.gmra.mxu2 %v3999_v23  ;;  %v4954_v23 = vld [vmem:[%s5552_s28 + $0x198] sm:$0xf0] }
 0x224   : > { %v6292_v14 = vadd.f32 %v2741_v53, %v2668_v1 }
 0x225   : > { %v2521_v28 = vpop.f32.mrf.mxu1  ;;  %v2743_v59 = vpop.f32.mrf.mxu0 }
 0x226   : > { %v2672_v3 = vpop.f32.mrf.mxu3  ;;  %v2522_v25 = vadd.f32 %v2521_v28, %v6063_v42  ;;  %v2603_v45 = vpop.f32.mrf.mxu2  ;;  %v4050_v42 = vld [vmem:[%s5552_s28 + $0x1c8] sm:$0xf]  ;;  %v4960_v28 = vld [vmem:[%s5552_s28 + $0x1cc] sm:$0xf] }
 0x227   : > { %v4051_v12 = vor.u32 %v4966_v24, %v4050_v42  ;;  %v4959_v24 = vld [vmem:[%s5552_s28 + $0x1c4] sm:$0xf] }
 0x228   : > { %v2596_v56 = vadd.f32 %v2595_v47, %v2522_v25  ;;  %v3995_v25 = vor.u32 %v4946_v5, %v3992_v26 }
 0x22a   : > { %v2670_v50 = vadd.f32 %v2669_v30, %v2596_v56  ;;  %v4007_v56 = vor.u32 %v4954_v23, %v4006_v41 }
 0x22c   : > { %v6301_v52 = vadd.f32 %v2743_v59, %v2670_v50  ;;  %v4052_v59 = vld [vmem:[%s5552_s28 + $0x1fc] sm:$0xf0]  ;;  %v4979_v50 = vld [vmem:[%s5552_s28 + $0x260] sm:$0xf0] }
 0x22d   : > { %v2524_v9 = vpop.f32.mrf.mxu1  ;;  %v2746_v22 = vpop.f32.mrf.mxu0  ;;  %v4055_v18 = vor.u32 %v4960_v28, %v4052_v59 }
 0x22e   : > { %v2674_v55 = vpop.f32.mrf.mxu3  ;;  %v2525_v47 = vadd.f32 %v2524_v9, %v6071_v10  ;;  %v2605_v54 = vpop.f32.mrf.mxu2 }
 0x230   : > { %v2599_v58 = vadd.f32 %v2598_v51, %v2525_v47  ;;  %2794 = vmatmul.bf16.gmra.mxu1 %v3943_v31  ;;  %4878 = vmatmul.msk.bf16.gmra.mxu0 %vm2070_vm0, %v3955_v16  ;;  %v4044_v47 = vld [vmem:[%s5552_s28 + $0x1f4] sm:$0xf0] }
 0x232   : > { %v2673_v43 = vadd.f32 %v2672_v3, %v2599_v58  ;;  %v4058_v58 = vld [vmem:[%s5552_s28 + $0x1d0] sm:$0xf] }
 0x233   : > { %2947 = vmatmul.bf16.gmra.mxu3 %v4003_v17  ;;  %2878 = vmatmul.bf16.gmra.mxu2 %v4051_v12  ;;  %v4967_v12 = vld [vmem:[%s5552_s28 + $0x200] sm:$0xf0] }
 0x234   : > { %v6307_v30 = vadd.f32 %v2746_v22, %v2673_v43 }
 0x235   : > { %v2526_v53 = vpop.f32.mrf.mxu1  ;;  %v2748_v10 = vpop.f32.mrf.mxu0 }
 0x236   : > { %v2677_v62 = vpop.f32.mrf.mxu3  ;;  %v2527_v15 = vadd.f32 %v2526_v53, %v6080_v37  ;;  %v2608_v48 = vpop.f32.mrf.mxu2  ;;  %v4102_v37 = vld [vmem:[%s5552_s28 + $0x230] sm:$0xf]  ;;  %v4973_v53 = vld [vmem:[%s5552_s28 + $0x234] sm:$0xf] }
 0x237   : > { %v4103_v31 = vor.u32 %v4979_v50, %v4102_v37  ;;  %v4972_v50 = vld [vmem:[%s5552_s28 + $0x22c] sm:$0xf] }
 0x238   : > { %v2601_v51 = vadd.f32 %v2600_v13, %v2527_v15  ;;  %v4047_v15 = vor.u32 %v4959_v24, %v4044_v47 }
 0x23a   : > { %v2675_v1 = vadd.f32 %v2674_v55, %v2601_v51  ;;  %v4059_v51 = vor.u32 %v4967_v12, %v4058_v58 }
 0x23c   : > { %v6316_v3 = vadd.f32 %v2748_v10, %v2675_v1  ;;  %v4104_v10 = vld [vmem:[%s5552_s28 + $0x264] sm:$0xf0]  ;;  %v4992_v1 = vld [vmem:[%s5552_s28 + $0x2c8] sm:$0xf0] }
 0x23d   : > { %v2529_v27 = vpop.f32.mrf.mxu1  ;;  %v2751_v36 = vpop.f32.mrf.mxu0  ;;  %v4107_v23 = vor.u32 %v4973_v53, %v4104_v10 }
 0x23e   : > { %v2679_v29 = vpop.f32.mrf.mxu3  ;;  %v2530_v13 = vadd.f32 %v2529_v27, %v6091_v33  ;;  %v2610_v40 = vpop.f32.mrf.mxu2 }
 0x240   : > { %v2604_v39 = vadd.f32 %v2603_v45, %v2530_v13  ;;  %2799 = vmatmul.bf16.gmra.mxu1 %v3995_v25  ;;  %4879 = vmatmul.msk.bf16.gmra.mxu0 %vm2070_vm0, %v4007_v56  ;;  %v4096_v13 = vld [vmem:[%s5552_s28 + $0x25c] sm:$0xf0] }
 0x242   : > { %v2678_v16 = vadd.f32 %v2677_v62, %v2604_v39  ;;  %v4110_v39 = vld [vmem:[%s5552_s28 + $0x238] sm:$0xf] }
 0x243   : > { %2952 = vmatmul.bf16.gmra.mxu3 %v4055_v18  ;;  %2883 = vmatmul.bf16.gmra.mxu2 %v4103_v31  ;;  %v4980_v31 = vld [vmem:[%s5552_s28 + $0x268] sm:$0xf0] }
 0x244   : > { %v6322_v55 = vadd.f32 %v2751_v36, %v2678_v16 }
 0x245   : > { %v2531_v22 = vpop.f32.mrf.mxu1  ;;  %v2753_v33 = vpop.f32.mrf.mxu0 }
 0x246   : > { %v2682_v9 = vpop.f32.mrf.mxu3  ;;  %v2532_v17 = vadd.f32 %v2531_v22, %v6103_v2  ;;  %v2613_v42 = vpop.f32.mrf.mxu2  ;;  %v4154_v2 = vld [vmem:[%s5552_s28 + $0x298] sm:$0xf]  ;;  %v4986_v22 = vld [vmem:[%s5552_s28 + $0x29c] sm:$0xf] }
 0x247   : > { %v4155_v25 = vor.u32 %v4992_v1, %v4154_v2  ;;  %v4985_v1 = vld [vmem:[%s5552_s28 + $0x294] sm:$0xf] }
 0x248   : > { %v2606_v45 = vadd.f32 %v2605_v54, %v2532_v17  ;;  %v4099_v17 = vor.u32 %v4972_v50, %v4096_v13 }
 0x24a   : > { %v2680_v43 = vadd.f32 %v2679_v29, %v2606_v45  ;;  %v4111_v45 = vor.u32 %v4980_v31, %v4110_v39 }
 0x24c   : > { %v6331_v62 = vadd.f32 %v2753_v33, %v2680_v43  ;;  %v4156_v33 = vld [vmem:[%s5552_s28 + $0x2cc] sm:$0xf0]  ;;  %v5005_v43 = vld [vmem:[%s5552_s28 + $0x330] sm:$0xf0] }
 0x24d   : > { %v2534_v26 = vpop.f32.mrf.mxu1  ;;  %v2756_v41 = vpop.f32.mrf.mxu0  ;;  %v4159_v12 = vor.u32 %v4986_v22, %v4156_v33 }
 0x24e   : > { %v2684_v5 = vpop.f32.mrf.mxu3  ;;  %v2535_v54 = vadd.f32 %v2534_v26, %v6108_v57  ;;  %v2615_v28 = vpop.f32.mrf.mxu2 }
 0x250   : > { %v2609_v59 = vadd.f32 %v2608_v48, %v2535_v54  ;;  %2804 = vmatmul.bf16.gmra.mxu1 %v4047_v15  ;;  %4880 = vmatmul.msk.bf16.gmra.mxu0 %vm2070_vm0, %v4059_v51  ;;  %v4148_v54 = vld [vmem:[%s5552_s28 + $0x2c4] sm:$0xf0] }
 0x252   : > { %v2683_v56 = vadd.f32 %v2682_v9, %v2609_v59  ;;  %v4162_v59 = vld [vmem:[%s5552_s28 + $0x2a0] sm:$0xf] }
 0x253   : > { %2957 = vmatmul.bf16.gmra.mxu3 %v4107_v23  ;;  %2888 = vmatmul.bf16.gmra.mxu2 %v4155_v25  ;;  %v4993_v25 = vld [vmem:[%s5552_s28 + $0x2d0] sm:$0xf0] }
 0x254   : > { %v6337_v29 = vadd.f32 %v2756_v41, %v2683_v56 }
 0x255   : > { %v2536_v36 = vpop.f32.mrf.mxu1  ;;  %v2758_v57 = vpop.f32.mrf.mxu0 }
 0x256   : > { %v2687_v27 = vpop.f32.mrf.mxu3  ;;  %v2537_v18 = vadd.f32 %v2536_v36, %v6120_v21  ;;  %v2618_v37 = vpop.f32.mrf.mxu2  ;;  %v4206_v21 = vld [vmem:[%s5552_s28 + $0x300] sm:$0xf]  ;;  %v4999_v36 = vld [vmem:[%s5552_s28 + $0x304] sm:$0xf] }
 0x257   : > { %v4207_v15 = vor.u32 %v5005_v43, %v4206_v21  ;;  %v4998_v43 = vld [vmem:[%s5552_s28 + $0x2fc] sm:$0xf] }
 0x258   : > { %v2611_v48 = vadd.f32 %v2610_v40, %v2537_v18  ;;  %v4151_v18 = vor.u32 %v4985_v1, %v4148_v54 }
 0x25a   : > { %v2685_v16 = vadd.f32 %v2684_v5, %v2611_v48  ;;  %v4163_v48 = vor.u32 %v4993_v25, %v4162_v59 }
 0x25c   : > { %v6346_v9 = vadd.f32 %v2758_v57, %v2685_v16  ;;  %v4208_v57 = vld [vmem:[%s5552_s28 + $0x334] sm:$0xf0]  ;;  %v5018_v16 = vld [vmem:[%s5552_s28 + $0x398] sm:$0xf0] }
 0x25d   : > { %v2539_v47 = vpop.f32.mrf.mxu1  ;;  %v2761_v58 = vpop.f32.mrf.mxu0  ;;  %v4211_v31 = vor.u32 %v4999_v36, %v4208_v57 }
 0x25e   : > { %v2689_v24 = vpop.f32.mrf.mxu3  ;;  %v2540_v40 = vadd.f32 %v2539_v47, %v6131_v4  ;;  %v2620_v53 = vpop.f32.mrf.mxu2 }
 0x260   : > { %v2614_v10 = vadd.f32 %v2613_v42, %v2540_v40  ;;  %2809 = vmatmul.bf16.gmra.mxu1 %v4099_v17  ;;  %4881 = vmatmul.msk.bf16.gmra.mxu0 %vm2070_vm0, %v4111_v45  ;;  %v4200_v40 = vld [vmem:[%s5552_s28 + $0x32c] sm:$0xf0] }
 0x262   : > { %v2688_v51 = vadd.f32 %v2687_v27, %v2614_v10  ;;  %v4214_v10 = vld [vmem:[%s5552_s28 + $0x308] sm:$0xf] }
 0x263   : > { %2962 = vmatmul.bf16.gmra.mxu3 %v4159_v12  ;;  %2893 = vmatmul.bf16.gmra.mxu2 %v4207_v15  ;;  %v5006_v15 = vld [vmem:[%s5552_s28 + $0x338] sm:$0xf0] }
 0x264   : > { %v6352_v5 = vadd.f32 %v2761_v58, %v2688_v51 }
 0x265   : > { %v2541_v41 = vpop.f32.mrf.mxu1  ;;  %v2763_v4 = vpop.f32.mrf.mxu0 }
 0x266   : > { %v2692_v26 = vpop.f32.mrf.mxu3  ;;  %v2542_v23 = vadd.f32 %v2541_v41, %v6143_v38  ;;  %v2623_v2 = vpop.f32.mrf.mxu2  ;;  %v4258_v38 = vld [vmem:[%s5552_s28 + $0x368] sm:$0xf]  ;;  %v5012_v41 = vld [vmem:[%s5552_s28 + $0x36c] sm:$0xf] }
 0x267   : > { %v4259_v17 = vor.u32 %v5018_v16, %v4258_v38  ;;  %v5011_v16 = vld [vmem:[%s5552_s28 + $0x364] sm:$0xf] }
 0x268   : > { %v2616_v42 = vadd.f32 %v2615_v28, %v2542_v23  ;;  %v4203_v23 = vor.u32 %v4998_v43, %v4200_v40 }
 0x26a   : > { %v2690_v56 = vadd.f32 %v2689_v24, %v2616_v42  ;;  %v4215_v42 = vor.u32 %v5006_v15, %v4214_v10  ;;  %v4362_v15 = vld [vmem:[%s5552_s28 + $0x438] sm:$0xf] }
 0x26c   : > { %v6361_v27 = vadd.f32 %v2763_v4, %v2690_v56  ;;  %v4260_v4 = vld [vmem:[%s5552_s28 + $0x39c] sm:$0xf0]  ;;  %v5031_v56 = vld [vmem:[%s5552_s28 + $0x400] sm:$0xf0] }
 0x26d   : > { %v2544_v13 = vpop.f32.mrf.mxu1  ;;  %v2766_v39 = vpop.f32.mrf.mxu0  ;;  %v4263_v25 = vor.u32 %v5012_v41, %v4260_v4 }
 0x26e   : > { %v2694_v50 = vpop.f32.mrf.mxu3  ;;  %v2545_v28 = vadd.f32 %v2544_v13, %v6148_v11  ;;  %v2625_v22 = vpop.f32.mrf.mxu2 }
 0x270   : > { %v2619_v33 = vadd.f32 %v2618_v37, %v2545_v28  ;;  %2814 = vmatmul.bf16.gmra.mxu1 %v4151_v18  ;;  %4882 = vmatmul.msk.bf16.gmra.mxu0 %vm2070_vm0, %v4163_v48  ;;  %v4252_v28 = vld [vmem:[%s5552_s28 + $0x394] sm:$0xf0] }
 0x272   : > { %v2693_v45 = vadd.f32 %v2692_v26, %v2619_v33  ;;  %v4266_v33 = vld [vmem:[%s5552_s28 + $0x370] sm:$0xf] }
 0x273   : > { %2967 = vmatmul.bf16.gmra.mxu3 %v4211_v31  ;;  %2898 = vmatmul.bf16.gmra.mxu2 %v4259_v17  ;;  %v5019_v17 = vld [vmem:[%s5552_s28 + $0x3a0] sm:$0xf0] }
 0x274   : > { %v6367_v24 = vadd.f32 %v2766_v39, %v2693_v45 }
 0x275   : > { %v2546_v58 = vpop.f32.mrf.mxu1  ;;  %v2768_v11 = vpop.f32.mrf.mxu0 }
 0x276   : > { %v2697_v47 = vpop.f32.mrf.mxu3  ;;  %v2547_v12 = vadd.f32 %v2546_v58, %v6166_v34  ;;  %v2859_v21 = vpop.f32.mrf.mxu2  ;;  %v4310_v34 = vld [vmem:[%s5552_s28 + $0x3d0] sm:$0xf]  ;;  %v5025_v58 = vld [vmem:[%s5552_s28 + $0x3d4] sm:$0xf] }
 0x277   : > { %v4311_v18 = vor.u32 %v5031_v56, %v4310_v34  ;;  %v5024_v56 = vld [vmem:[%s5552_s28 + $0x3cc] sm:$0xf] }
 0x278   : > { %v2621_v37 = vadd.f32 %v2620_v53, %v2547_v12  ;;  %v4255_v12 = vor.u32 %v5011_v16, %v4252_v28 }
 0x27a   : > { %v2695_v51 = vadd.f32 %v2694_v50, %v2621_v37  ;;  %v4267_v37 = vor.u32 %v5019_v17, %v4266_v33  ;;  %v5057_v17 = vld [vmem:[%s5552_s28 + $0x4d0] sm:$0xf0] }
 0x27c   : > { %v6376_v26 = vadd.f32 %v2768_v11, %v2695_v51  ;;  %v5044_v51 = vld [vmem:[%s5552_s28 + $0x468] sm:$0xf0] }
 0x27d   : > { %v2549_v54 = vpop.f32.mrf.mxu1  ;;  %v2771_v59 = vpop.f32.mrf.mxu0  ;;  %v4363_v4 = vor.u32 %v5044_v51, %v4362_v15 }
 0x27e   : > { %v2699_v1 = vpop.f32.mrf.mxu3  ;;  %v2550_v53 = vadd.f32 %v2549_v54, %v6171_v61  ;;  %v2861_v36 = vpop.f32.mrf.mxu2 }
 0x280   : > { %v2624_v57 = vadd.f32 %v2623_v2, %v2550_v53  ;;  %2819 = vmatmul.bf16.gmra.mxu1 %v4203_v23  ;;  %4883 = vmatmul.msk.bf16.gmra.mxu0 %vm2070_vm0, %v4215_v42  ;;  %v4304_v53 = vld [vmem:[%s5552_s28 + $0x3fc] sm:$0xf0] }
 0x282   : > { %v2698_v48 = vadd.f32 %v2697_v47, %v2624_v57  ;;  %v4312_v47 = vld [vmem:[%s5552_s28 + $0x404] sm:$0xf0]  ;;  %v4318_v57 = vld [vmem:[%s5552_s28 + $0x3d8] sm:$0xf] }
 0x283   : > { %2972 = vmatmul.bf16.gmra.mxu3 %v4263_v25  ;;  %2903 = vmatmul.bf16.gmra.mxu2 %v4311_v18  ;;  %v5032_v18 = vld [vmem:[%s5552_s28 + $0x408] sm:$0xf0] }
 0x284   : > { %v6382_v50 = vadd.f32 %v2771_v59, %v2698_v48 }
 0x285   : > { %v2551_v39 = vpop.f32.mrf.mxu1  ;;  %v2773_v61 = vpop.f32.mrf.mxu0 }
 0x286   : > { %v2933_v13 = vpop.f32.mrf.mxu3  ;;  %v2552_v31 = vadd.f32 %v2551_v39, %v6180_v0  ;;  %v6385_v38 = vpop.f32.mrf.mxu2  ;;  %v4315_v0 = vor.u32 %v5025_v58, %v4312_v47  ;;  %v5038_v39 = vld [vmem:[%s5552_s28 + $0x43c] sm:$0xf] }
 0x288   : > { %v2626_v2 = vadd.f32 %v2625_v22, %v2552_v31 }
 0x28a   : > { %v2700_v45 = vadd.f32 %v2699_v1, %v2626_v2  ;;  %v4307_v2 = vor.u32 %v5024_v56, %v4304_v53  ;;  %v5051_v56 = vld [vmem:[%s5552_s28 + $0x4a4] sm:$0xf] }
 0x28c   : > { %v6393_v11 = vadd.f32 %v2773_v61, %v2700_v45  ;;  %v4364_v61 = vld [vmem:[%s5552_s28 + $0x46c] sm:$0xf0] }
 0x28d   : > { %v2785_v40 = vpop.f32.mrf.mxu1  ;;  %v3007_v10 = vpop.f32.mrf.mxu0  ;;  %v4367_v33 = vor.u32 %v5038_v39, %v4364_v61  ;;  %v4466_v39 = vld [vmem:[%s5552_s28 + $0x508] sm:$0xf] }
 0x28e   : > { %v2935_v43 = vpop.f32.mrf.mxu3  ;;  %v2786_v22 = vadd.f32 %v2785_v40, %v6194_v35  ;;  %v2866_v41 = vpop.f32.mrf.mxu2 }
 0x290   : > { %2824 = vmatmul.bf16.gmra.mxu1 %v4255_v12  ;;  %4884 = vmatmul.msk.bf16.gmra.mxu0 %vm2070_vm0, %v4267_v37  ;;  %v2860_v23 = vadd.f32 %v2859_v21, %v2786_v22 }
 0x292   : > { %v2934_v59 = vadd.f32 %v2933_v13, %v2860_v23  ;;  %v4319_v13 = vor.u32 %v5032_v18, %v4318_v57  ;;  %v5037_v23 = vld [vmem:[%s5552_s28 + $0x434] sm:$0xf] }
 0x293   : > { %2977 = vmatmul.bf16.gmra.mxu3 %v4315_v0  ;;  %2908 = vmatmul.bf16.gmra.mxu2 %v4363_v4 }
 0x294   : > { %v3008_v21 = vadd.f32 %v3007_v10, %v2934_v59  ;;  %v5045_v59 = vld [vmem:[%s5552_s28 + $0x470] sm:$0xf0] }
 0x295   : > { %v2787_v1 = vpop.f32.mrf.mxu1  ;;  %v3009_v54 = vpop.f32.mrf.mxu0 }
 0x296   : > { %v2938_v42 = vpop.f32.mrf.mxu3  ;;  %v2788_v35 = vadd.f32 %v2787_v1, %v6206_v32  ;;  %v6400_v25 = vpop.f32.mrf.mxu2  ;;  %v6411_v45 = vmax.f32 %v3008_v21, 0.0  ;;  %v4356_v1 = vld [vmem:[%s5552_s28 + $0x464] sm:$0xf0] }
 0x297   : > { %v4359_v57 = vor.u32 %v5037_v23, %v4356_v1  ;;  %v5064_v23 = vld [vmem:[%s5552_s28 + $0x50c] sm:$0xf]  ;;  %v4468_v1 = vld [vmem:[%s5552_s28 + $0x53c] sm:$0xf0] }
 0x298   : > { %v2862_v34 = vadd.f32 %v2861_v36, %v2788_v35  ;;  %v4414_v36 = vld [vmem:[%s5552_s28 + $0x4a0] sm:$0xf] }
 0x29a   : > { %v2936_v48 = vadd.f32 %v2935_v43, %v2862_v34  ;;  %v4415_v43 = vor.u32 %v5057_v17, %v4414_v36 }
 0x29c   : > { %v3010_v31 = vadd.f32 %v3009_v54, %v2936_v48  ;;  %v4370_v54 = vld [vmem:[%s5552_s28 + $0x440] sm:$0xf] }
 0x29d   : > { %v2790_v32 = vpop.f32.mrf.mxu1  ;;  %v3012_v28 = vpop.f32.mrf.mxu0  ;;  %v4371_v18 = vor.u32 %v5045_v59, %v4370_v54 }
 0x29e   : > { %v2940_v16 = vpop.f32.mrf.mxu3  ;;  %v6413_v58 = vmax.f32 %v3010_v31, 0.0  ;;  %v2791_v47 = vadd.f32 %v2790_v32, %v6211_v44  ;;  %v2871_v12 = vpop.f32.mrf.mxu2 }
 0x2a0   : > { %v5176_v37 = vpack.c.bf16 %v6413_v58, %v6411_v45  ;;  %2829 = vmatmul.bf16.gmra.mxu1 %v4307_v2  ;;  %4885 = vmatmul.msk.bf16.gmra.mxu0 %vm2070_vm0, %v4319_v13  ;;  %v2865_v44 = vadd.f32 %v6385_v38, %v2791_v47  ;;  %v4416_v38 = vld [vmem:[%s5552_s28 + $0x4d4] sm:$0xf0] }
 0x2a2   : > { %5177 = vst [vmem:[%s6419_s15] sm:$0xff] %v5176_v37   ;;  %v2939_v15 = vadd.f32 %v2938_v42, %v2865_v44  ;;  %v5050_v44 = vld [vmem:[%s5552_s28 + $0x49c] sm:$0xf] }
 0x2a3   : > { %2982 = vmatmul.bf16.gmra.mxu3 %v4367_v33  ;;  %2913 = vmatmul.bf16.gmra.mxu2 %v4415_v43 }
 0x2a4   : > { %v3013_v35 = vadd.f32 %v3012_v28, %v2939_v15  ;;  %v5058_v15 = vld [vmem:[%s5552_s28 + $0x4d8] sm:$0xf0] }
 0x2a5   : > { %v2792_v10 = vpop.f32.mrf.mxu1  ;;  %v3014_v0 = vpop.f32.mrf.mxu0 }
 0x2a6   : > { %v2943_v40 = vpop.f32.mrf.mxu3  ;;  %v2793_v51 = vadd.f32 %v2792_v10, %v6226_v20  ;;  %v2874_v22 = vpop.f32.mrf.mxu2  ;;  %v4419_v20 = vor.u32 %v5051_v56, %v4416_v38  ;;  %v6432_v61 = vmax.f32 %v3013_v35, 0.0  ;;  %v4408_v10 = vld [vmem:[%s5552_s28 + $0x4cc] sm:$0xf0] }
 0x2a7   : > { %v4411_v54 = vor.u32 %v5050_v44, %v4408_v10 }
 0x2a8   : > { %v2867_v4 = vadd.f32 %v2866_v41, %v2793_v51  ;;  %v5070_v41 = vld [vmem:[%s5552_s28 + $0x538] sm:$0xf0] }
 0x2a9   : > { %v4467_v32 = vor.u32 %v5070_v41, %v4466_v39 }
 0x2aa   : > { %v2941_v34 = vadd.f32 %v2940_v16, %v2867_v4 }
 0x2ac   : > { %v3015_v53 = vadd.f32 %v3014_v0, %v2941_v34  ;;  %v4422_v0 = vld [vmem:[%s5552_s28 + $0x4a8] sm:$0xf] }
 0x2ad   : > { %v2795_v42 = vpop.f32.mrf.mxu1  ;;  %v3017_v48 = vpop.f32.mrf.mxu0  ;;  %v4423_v59 = vor.u32 %v5058_v15, %v4422_v0 }
 0x2ae   : > { %v2945_v21 = vpop.f32.mrf.mxu3  ;;  %v6434_v31 = vmax.f32 %v3015_v53, 0.0  ;;  %v2796_v2 = vadd.f32 %v2795_v42, %v6234_v19  ;;  %v2876_v13 = vpop.f32.mrf.mxu2 }
 0x2b0   : > { %v5181_v16 = vpack.c.bf16 %v6434_v31, %v6432_v61  ;;  %2834 = vmatmul.bf16.gmra.mxu1 %v4359_v57  ;;  %4886 = vmatmul.msk.bf16.gmra.mxu0 %vm2070_vm0, %v4371_v18  ;;  %v2870_v28 = vadd.f32 %v6400_v25, %v2796_v2  ;;  %v5063_v2 = vld [vmem:[%s5552_s28 + $0x504] sm:$0xf] }
 0x2b2   : > { %5238 = vst [vmem:[%s6419_s15 + $0x8] sm:$0xff] %v5181_v16   ;;  %v2944_v17 = vadd.f32 %v2943_v40, %v2870_v28  ;;  %v4471_v40 = vor.u32 %v5064_v23, %v4468_v1  ;;  %v4460_v16 = vld [vmem:[%s5552_s28 + $0x534] sm:$0xf0]  ;;  %v5071_v28 = vld [vmem:[%s5552_s28 + $0x540] sm:$0xf0] }
 0x2b3   : > { %2987 = vmatmul.bf16.gmra.mxu3 %v4419_v20  ;;  %2918 = vmatmul.bf16.gmra.mxu2 %v4467_v32  ;;  %v4474_v32 = vld [vmem:[%s5552_s28 + $0x510] sm:$0xf] }
 0x2b4   : > { %v3018_v51 = vadd.f32 %v3017_v48, %v2944_v17 }
 0x2b5   : > { %v2797_v19 = vpop.f32.mrf.mxu1  ;;  %v3019_v36 = vpop.f32.mrf.mxu0 }
 0x2b6   : > { %v2948_v33 = vpop.f32.mrf.mxu3  ;;  %v2798_v47 = vadd.f32 %v2797_v19, %v6243_v7  ;;  %v2879_v37 = vpop.f32.mrf.mxu2  ;;  %v6449_v38 = vmax.f32 %v3018_v51, 0.0 }
 0x2b8   : > { %v2872_v43 = vadd.f32 %v2871_v12, %v2798_v47  ;;  %v4463_v47 = vor.u32 %v5063_v2, %v4460_v16 }
 0x2ba   : > { %v2946_v4 = vadd.f32 %v2945_v21, %v2872_v43  ;;  %v4475_v43 = vor.u32 %v5071_v28, %v4474_v32 }
 0x2bc   : > { %v3020_v25 = vadd.f32 %v3019_v36, %v2946_v4 }
 0x2bd   : > { %v2800_v34 = vpop.f32.mrf.mxu1  ;;  %v3022_v56 = vpop.f32.mrf.mxu0 }
 0x2be   : > { %v2950_v35 = vpop.f32.mrf.mxu3  ;;  %v6451_v7 = vmax.f32 %v3020_v25, 0.0  ;;  %v2801_v12 = vadd.f32 %v2800_v34, %v6248_v6  ;;  %v2881_v53 = vpop.f32.mrf.mxu2 }
 0x2c0   : > { %v5186_v57 = vpack.c.bf16 %v6451_v7, %v6449_v38  ;;  %2839 = vmatmul.bf16.gmra.mxu1 %v4411_v54  ;;  %4887 = vmatmul.msk.bf16.gmra.mxu0 %vm2070_vm0, %v4423_v59  ;;  %v2875_v18 = vadd.f32 %v2874_v22, %v2801_v12 }
 0x2c2   : > { %5239 = vst [vmem:[%s6419_s15 + $0x10] sm:$0xff] %v5186_v57   ;;  %v2949_v20 = vadd.f32 %v2948_v33, %v2875_v18 }
 0x2c3   : > { %2992 = vmatmul.bf16.gmra.mxu3 %v4471_v40 }
 0x2c4   : > { %v3023_v19 = vadd.f32 %v3022_v56, %v2949_v20 }
 0x2c5   : > { %v2802_v42 = vpop.f32.mrf.mxu1  ;;  %v3024_v48 = vpop.f32.mrf.mxu0 }
 0x2c6   : > { %v2953_v21 = vpop.f32.mrf.mxu3  ;;  %v2803_v39 = vadd.f32 %v2802_v42, %v6257_v63  ;;  %v2884_v6 = vpop.f32.mrf.mxu2  ;;  %v6463_v0 = vmax.f32 %v3023_v19, 0.0 }
 0x2c8   : > { %v2877_v41 = vadd.f32 %v2876_v13, %v2803_v39 }
 0x2ca   : > { %v2951_v36 = vadd.f32 %v2950_v35, %v2877_v41 }
 0x2cc   : > { %v3025_v17 = vadd.f32 %v3024_v48, %v2951_v36 }
 0x2cd   : > { %v2805_v22 = vpop.f32.mrf.mxu1  ;;  %v3027_v10 = vpop.f32.mrf.mxu0 }
 0x2ce   : > { %v2955_v44 = vpop.f32.mrf.mxu3  ;;  %v6465_v33 = vmax.f32 %v3025_v17, 0.0  ;;  %v2806_v63 = vadd.f32 %v2805_v22, %v6262_v60  ;;  %v2886_v13 = vpop.f32.mrf.mxu2 }
 0x2d0   : > { %v5191_v15 = vpack.c.bf16 %v6465_v33, %v6463_v0  ;;  %2844 = vmatmul.bf16.gmra.mxu1 %v4463_v47  ;;  %4888 = vmatmul.msk.bf16.gmra.mxu0 %vm2070_vm0, %v4475_v43  ;;  %v2880_v51 = vadd.f32 %v2879_v37, %v2806_v63 }
 0x2d2   : > { %5240 = vst [vmem:[%s6419_s15 + $0x18] sm:$0xff] %v5191_v15   ;;  %v2954_v25 = vadd.f32 %v2953_v21, %v2880_v51 }
 0x2d4   : > { %v3028_v34 = vadd.f32 %v3027_v10, %v2954_v25 }
 0x2d5   : > { %v2807_v23 = vpop.f32.mrf.mxu1  ;;  %v3029_v1 = vpop.f32.mrf.mxu0 }
 0x2d6   : > { %v2958_v4 = vpop.f32.mrf.mxu3  ;;  %v2808_v54 = vadd.f32 %v2807_v23, %v6271_v46  ;;  %v2889_v59 = vpop.f32.mrf.mxu2  ;;  %v6473_v18 = vmax.f32 %v3028_v34, 0.0 }
 0x2d8   : > { %v2882_v35 = vadd.f32 %v2881_v53, %v2808_v54 }
 0x2da   : > { %v2956_v60 = vadd.f32 %v2955_v44, %v2882_v35 }
 0x2dc   : > { %v3030_v56 = vadd.f32 %v3029_v1, %v2956_v60 }
 0x2dd   : > { %v2810_v12 = vpop.f32.mrf.mxu1  ;;  %v3032_v57 = vpop.f32.mrf.mxu0 }
 0x2de   : > { %v2960_v40 = vpop.f32.mrf.mxu3  ;;  %v6475_v42 = vmax.f32 %v3030_v56, 0.0  ;;  %v2811_v37 = vadd.f32 %v2810_v12, %v6277_v49  ;;  %v2891_v48 = vpop.f32.mrf.mxu2 }
 0x2e0   : > { %v5196_v21 = vpack.c.bf16 %v6475_v42, %v6473_v18  ;;  %v2885_v46 = vadd.f32 %v2884_v6, %v2811_v37 }
 0x2e2   : > { %5241 = vst [vmem:[%s6419_s15 + $0x20] sm:$0xff] %v5196_v21   ;;  %v2959_v41 = vadd.f32 %v2958_v4, %v2885_v46 }
 0x2e4   : > { %v3033_v28 = vadd.f32 %v3032_v57, %v2959_v41 }
 0x2e5   : > { %v2812_v53 = vpop.f32.mrf.mxu1  ;;  %v3034_v39 = vpop.f32.mrf.mxu0 }
 0x2e6   : > { %v2963_v20 = vpop.f32.mrf.mxu3  ;;  %v2813_v2 = vadd.f32 %v2812_v53, %v6286_v8  ;;  %v2894_v32 = vpop.f32.mrf.mxu2  ;;  %v6482_v43 = vmax.f32 %v3033_v28, 0.0 }
 0x2e8   : > { %v2887_v16 = vadd.f32 %v2886_v13, %v2813_v2 }
 0x2ea   : > { %v2961_v19 = vadd.f32 %v2960_v40, %v2887_v16 }
 0x2ec   : > { %v3035_v36 = vadd.f32 %v3034_v39, %v2961_v19 }
 0x2ed   : > { %v2815_v49 = vpop.f32.mrf.mxu1  ;;  %v3037_v47 = vpop.f32.mrf.mxu0 }
 0x2ee   : > { %v2965_v17 = vpop.f32.mrf.mxu3  ;;  %v6484_v44 = vmax.f32 %v3035_v36, 0.0  ;;  %v2816_v6 = vadd.f32 %v2815_v49, %v6292_v14  ;;  %v2896_v8 = vpop.f32.mrf.mxu2 }
 0x2f0   : > { %v5201_v22 = vpack.c.bf16 %v6484_v44, %v6482_v43  ;;  %v2890_v10 = vadd.f32 %v2889_v59, %v2816_v6 }
 0x2f2   : > { %5242 = vst [vmem:[%s6419_s15 + $0x28] sm:$0xff] %v5201_v22   ;;  %v2964_v51 = vadd.f32 %v2963_v20, %v2890_v10 }
 0x2f4   : > { %v3038_v1 = vadd.f32 %v3037_v47, %v2964_v51 }
 0x2f5   : > { %v2817_v13 = vpop.f32.mrf.mxu1  ;;  %v3039_v15 = vpop.f32.mrf.mxu0 }
 0x2f6   : > { %v2968_v63 = vpop.f32.mrf.mxu3  ;;  %v2818_v4 = vadd.f32 %v2817_v13, %v6301_v52  ;;  %v2899_v34 = vpop.f32.mrf.mxu2  ;;  %v6491_v56 = vmax.f32 %v3038_v1, 0.0 }
 0x2f8   : > { %v2892_v23 = vadd.f32 %v2891_v48, %v2818_v4 }
 0x2fa   : > { %v2966_v25 = vadd.f32 %v2965_v17, %v2892_v23 }
 0x2fc   : > { %v3040_v54 = vadd.f32 %v3039_v15, %v2966_v25 }
 0x2fd   : > { %v2820_v14 = vpop.f32.mrf.mxu1  ;;  %v3042_v60 = vpop.f32.mrf.mxu0 }
 0x2fe   : > { %v2970_v35 = vpop.f32.mrf.mxu3  ;;  %v6493_v40 = vmax.f32 %v3040_v54, 0.0  ;;  %v2821_v59 = vadd.f32 %v2820_v14, %v6307_v30  ;;  %v2901_v20 = vpop.f32.mrf.mxu2 }
 0x300   : > { %v5206_v12 = vpack.c.bf16 %v6493_v40, %v6491_v56  ;;  %v2895_v57 = vadd.f32 %v2894_v32, %v2821_v59 }
 0x302   : > { %5243 = vst [vmem:[%s6419_s15 + $0x30] sm:$0xff] %v5206_v12   ;;  %v2969_v21 = vadd.f32 %v2968_v63, %v2895_v57 }
 0x304   : > { %v3043_v39 = vadd.f32 %v3042_v60, %v2969_v21 }
 0x305   : > { %v2822_v37 = vpop.f32.mrf.mxu1  ;;  %v3044_v48 = vpop.f32.mrf.mxu0 }
 0x306   : > { %v2973_v52 = vpop.f32.mrf.mxu3  ;;  %v2823_v46 = vadd.f32 %v2822_v37, %v6316_v3  ;;  %v6500_v19 = vmax.f32 %v3043_v39, 0.0  ;;  %v2904_v49 = vpop.f32.mrf.mxu2 }
 0x308   : > { %v2897_v53 = vadd.f32 %v2896_v8, %v2823_v46 }
 0x30a   : > { %v2971_v41 = vadd.f32 %v2970_v35, %v2897_v53 }
 0x30c   : > { %v3045_v2 = vadd.f32 %v3044_v48, %v2971_v41 }
 0x30d   : > { %v2825_v28 = vpop.f32.mrf.mxu1  ;;  %v3047_v30 = vpop.f32.mrf.mxu0 }
 0x30e   : > { %v2975_v16 = vpop.f32.mrf.mxu3  ;;  %v6502_v36 = vmax.f32 %v3045_v2, 0.0  ;;  %v2826_v32 = vadd.f32 %v2825_v28, %v6322_v55  ;;  %v2906_v51 = vpop.f32.mrf.mxu2 }
 0x310   : > { %v5211_v17 = vpack.c.bf16 %v6502_v36, %v6500_v19  ;;  %v2900_v3 = vadd.f32 %v2899_v34, %v2826_v32 }
 0x312   : > { %5244 = vst [vmem:[%s6419_s15 + $0x38] sm:$0xff] %v5211_v17   ;;  %v2974_v10 = vadd.f32 %v2973_v52, %v2900_v3 }
 0x314   : > { %v3048_v13 = vadd.f32 %v3047_v30, %v2974_v10 }
 0x315   : > { %v2827_v6 = vpop.f32.mrf.mxu1  ;;  %v3049_v22 = vpop.f32.mrf.mxu0 }
 0x316   : > { %v2978_v47 = vpop.f32.mrf.mxu3  ;;  %v2828_v8 = vadd.f32 %v2827_v6, %v6331_v62  ;;  %v6509_v25 = vmax.f32 %v3048_v13, 0.0  ;;  %v2909_v62 = vpop.f32.mrf.mxu2 }
 0x318   : > { %v2902_v63 = vadd.f32 %v2901_v20, %v2828_v8 }
 0x31a   : > { %v2976_v15 = vadd.f32 %v2975_v16, %v2902_v63 }
 0x31c   : > { %v3050_v4 = vadd.f32 %v3049_v22, %v2976_v15 }
 0x31d   : > { %v2830_v55 = vpop.f32.mrf.mxu1  ;;  %v3052_v1 = vpop.f32.mrf.mxu0 }
 0x31e   : > { %v2980_v23 = vpop.f32.mrf.mxu3  ;;  %v6511_v54 = vmax.f32 %v3050_v4, 0.0  ;;  %v2831_v35 = vadd.f32 %v2830_v55, %v6337_v29  ;;  %v2911_v2 = vpop.f32.mrf.mxu2 }
 0x320   : > { %v5216_v34 = vpack.c.bf16 %v6511_v54, %v6509_v25  ;;  %v2905_v14 = vadd.f32 %v2904_v49, %v2831_v35 }
 0x322   : > { %5245 = vst [vmem:[%s6419_s15 + $0x40] sm:$0xff] %v5216_v34   ;;  %v2979_v12 = vadd.f32 %v2978_v47, %v2905_v14 }
 0x324   : > { %v3053_v48 = vadd.f32 %v3052_v1, %v2979_v12 }
 0x325   : > { %v2832_v60 = vpop.f32.mrf.mxu1  ;;  %v3054_v59 = vpop.f32.mrf.mxu0 }
 0x326   : > { %v2833_v57 = vadd.f32 %v2832_v60, %v6346_v9  ;;  %v2983_v52 = vpop.f32.mrf.mxu3  ;;  %v6518_v29 = vmax.f32 %v3053_v48, 0.0  ;;  %v2914_v47 = vpop.f32.mrf.mxu2 }
 0x328   : > { %v2907_v37 = vadd.f32 %v2906_v51, %v2833_v57 }
 0x32a   : > { %v2981_v21 = vadd.f32 %v2980_v23, %v2907_v37 }
 0x32c   : > { %v3055_v46 = vadd.f32 %v3054_v59, %v2981_v21 }
 0x32d   : > { %v2835_v20 = vpop.f32.mrf.mxu1  ;;  %v3057_v53 = vpop.f32.mrf.mxu0 }
 0x32e   : > { %v6520_v39 = vmax.f32 %v3055_v46, 0.0  ;;  %v2836_v41 = vadd.f32 %v2835_v20, %v6352_v5  ;;  %v2985_v28 = vpop.f32.mrf.mxu3 }
 0x330   : > { %v5221_v16 = vpack.c.bf16 %v6520_v39, %v6518_v29  ;;  %v2910_v9 = vadd.f32 %v2909_v62, %v2836_v41 }
 0x332   : > { %5246 = vst [vmem:[%s6419_s15 + $0x48] sm:$0xff] %v5221_v16   ;;  %v2984_v17 = vadd.f32 %v2983_v52, %v2910_v9 }
 0x334   : > { %v3058_v6 = vadd.f32 %v3057_v53, %v2984_v17 }
 0x335   : > { %v2837_v30 = vpop.f32.mrf.mxu1  ;;  %v3059_v32 = vpop.f32.mrf.mxu0 }
 0x336   : > { %v2838_v49 = vadd.f32 %v2837_v30, %v6361_v27  ;;  %v2988_v10 = vpop.f32.mrf.mxu3  ;;  %v6527_v13 = vmax.f32 %v3058_v6, 0.0  ;;  %v2916_v27 = vpop.f32.mrf.mxu2 }
 0x338   : > { %v2912_v3 = vadd.f32 %v2911_v2, %v2838_v49 }
 0x33a   : > { %v2986_v22 = vadd.f32 %v2985_v28, %v2912_v3 }
 0x33c   : > { %v3060_v8 = vadd.f32 %v3059_v32, %v2986_v22 }
 0x33d   : > { %v2840_v5 = vpop.f32.mrf.mxu1  ;;  %v3062_v63 = vpop.f32.mrf.mxu0 }
 0x33e   : > { %v6529_v15 = vmax.f32 %v3060_v8, 0.0  ;;  %v2841_v51 = vadd.f32 %v2840_v5, %v6367_v24  ;;  %v2990_v55 = vpop.f32.mrf.mxu3  ;;  %v2919_v57 = vpop.f32.mrf.mxu2 }
 0x340   : > { %v5226_v4 = vpack.c.bf16 %v6529_v15, %v6527_v13  ;;  %v2915_v23 = vadd.f32 %v2914_v47, %v2841_v51 }
 0x342   : > { %5247 = vst [vmem:[%s6419_s15 + $0x50] sm:$0xff] %v5226_v4   ;;  %v2989_v35 = vadd.f32 %v2988_v10, %v2915_v23 }
 0x344   : > { %v3063_v60 = vadd.f32 %v3062_v63, %v2989_v35 }
 0x345   : > { %v2842_v1 = vpop.f32.mrf.mxu1  ;;  %v3064_v14 = vpop.f32.mrf.mxu0 }
 0x346   : > { %v2843_v34 = vadd.f32 %v2842_v1, %v6376_v26  ;;  %v6536_v24 = vmax.f32 %v3063_v60, 0.0  ;;  %v2993_v21 = vpop.f32.mrf.mxu3  ;;  %v2921_v16 = vpop.f32.mrf.mxu2 }
 0x348   : > { %v2917_v62 = vadd.f32 %v2916_v27, %v2843_v34 }
 0x34a   : > { %v2991_v59 = vadd.f32 %v2990_v55, %v2917_v62 }
 0x34c   : > { %v3065_v12 = vadd.f32 %v3064_v14, %v2991_v59 }
 0x34d   : > { %v2845_v52 = vpop.f32.mrf.mxu1  ;;  %v3067_v20 = vpop.f32.mrf.mxu0 }
 0x34e   : > { %v6538_v37 = vmax.f32 %v3065_v12, 0.0  ;;  %v2846_v48 = vadd.f32 %v2845_v52, %v6382_v50  ;;  %v2995_v9 = vpop.f32.mrf.mxu3 }
 0x350   : > { %v5231_v46 = vpack.c.bf16 %v6538_v37, %v6536_v24  ;;  %v2920_v26 = vadd.f32 %v2919_v57, %v2846_v48 }
 0x352   : > { %5248 = vst [vmem:[%s6419_s15 + $0x58] sm:$0xff] %v5231_v46   ;;  %v2994_v41 = vadd.f32 %v2993_v21, %v2920_v26 }
 0x354   : > { %v3068_v30 = vadd.f32 %v3067_v20, %v2994_v41 }
 0x355   : > { %v2847_v53 = vpop.f32.mrf.mxu1  ;;  %v3069_v17 = vpop.f32.mrf.mxu0 }
 0x356   : > { %v2848_v2 = vadd.f32 %v2847_v53, %v6393_v11  ;;  %v6545_v50 = vmax.f32 %v3068_v30, 0.0 }
 0x358   : > { %v2922_v28 = vadd.f32 %v2921_v16, %v2848_v2 }
 0x35a   : > { %v2996_v32 = vadd.f32 %v2995_v9, %v2922_v28 }
 0x35c   : > { %v3070_v49 = vadd.f32 %v3069_v17, %v2996_v32 }
 0x35e   : > { %v6547_v3 = vmax.f32 %v3070_v49, 0.0  ;;  %3153 = sbr.rel (%p101_p2) target bundleno = 932 (0x3a4), region = 36 }
 0x360   : > { %v5236_v47 = vpack.c.bf16 %v6547_v3, %v6545_v50 }
 0x362   : > { %5249 = vst [vmem:[%s6419_s15 + $0x60] sm:$0xff] %v5236_v47  }
 0x363   : > { %v3154_v11 = vadd.f32 %v6413_v58, %v6411_v45  ;;  %v3186_v6 = vmul.f32 %v6411_v45, %v6411_v45  ;;  %v3187_v22 = vmul.f32 %v6413_v58, %v6413_v58  ;;  %v3188_v8 = vmul.f32 %v6432_v61, %v6432_v61 }
 0x364   : > { %v3189_v63 = vmul.f32 %v6434_v31, %v6434_v31  ;;  %v3190_v23 = vmul.f32 %v6449_v38, %v6449_v38  ;;  %v3191_v1 = vmul.f32 %v6451_v7, %v6451_v7  ;;  %v3192_v14 = vmul.f32 %v6463_v0, %v6463_v0 }
 0x365   : > { %v3155_v10 = vadd.f32 %v3154_v11, %v6432_v61  ;;  %v3212_v51 = vadd.f32 %v3187_v22, %v3186_v6  ;;  %v3193_v59 = vmul.f32 %v6465_v33, %v6465_v33  ;;  %v3194_v52 = vmul.f32 %v6473_v18, %v6473_v18 }
 0x366   : > { %v3195_v46 = vmul.f32 %v6475_v42, %v6475_v42  ;;  %v3196_v53 = vmul.f32 %v6482_v43, %v6482_v43  ;;  %v3197_v16 = vmul.f32 %v6484_v44, %v6484_v44  ;;  %v3198_v30 = vmul.f32 %v6491_v56, %v6491_v56 }
 0x367   : > { %v3156_v5 = vadd.f32 %v3155_v10, %v6434_v31  ;;  %v3213_v27 = vadd.f32 %v3212_v51, %v3188_v8  ;;  %v3199_v49 = vmul.f32 %v6493_v40, %v6493_v40  ;;  %v3200_v6 = vmul.f32 %v6500_v19, %v6500_v19 }
 0x368   : > { %v3201_v8 = vmul.f32 %v6502_v36, %v6502_v36  ;;  %v3202_v51 = vmul.f32 %v6509_v25, %v6509_v25 }
 0x369   : > { %v3157_v4 = vadd.f32 %v3156_v5, %v6449_v38  ;;  %v3214_v35 = vadd.f32 %v3213_v27, %v3189_v63  ;;  %v3203_v27 = vmul.f32 %v6511_v54, %v6511_v54 }
 0x36b   : > { %v3158_v55 = vadd.f32 %v3157_v4, %v6451_v7  ;;  %v3215_v62 = vadd.f32 %v3214_v35, %v3190_v23  ;;  %v3204_v35 = vmul.f32 %v6518_v29, %v6518_v29 }
 0x36d   : > { %v3159_v34 = vadd.f32 %v3158_v55, %v6463_v0  ;;  %v3216_v12 = vadd.f32 %v3215_v62, %v3191_v1  ;;  %v3205_v62 = vmul.f32 %v6520_v39, %v6520_v39 }
 0x36f   : > { %v3160_v60 = vadd.f32 %v3159_v34, %v6465_v33  ;;  %v3217_v48 = vadd.f32 %v3216_v12, %v3192_v14  ;;  %v3206_v12 = vmul.f32 %v6527_v13, %v6527_v13 }
 0x371   : > { %v3161_v57 = vadd.f32 %v3160_v60, %v6473_v18  ;;  %v3218_v20 = vadd.f32 %v3217_v48, %v3193_v59  ;;  %v3207_v48 = vmul.f32 %v6529_v15, %v6529_v15 }
 0x373   : > { %v3162_v21 = vadd.f32 %v3161_v57, %v6475_v42  ;;  %v3219_v41 = vadd.f32 %v3218_v20, %v3194_v52  ;;  %v3208_v20 = vmul.f32 %v6536_v24, %v6536_v24 }
 0x375   : > { %v3163_v26 = vadd.f32 %v3162_v21, %v6482_v43  ;;  %v3220_v28 = vadd.f32 %v3219_v41, %v3195_v46  ;;  %v3209_v41 = vmul.f32 %v6538_v37, %v6538_v37 }
 0x377   : > { %v3164_v2 = vadd.f32 %v3163_v26, %v6484_v44  ;;  %v3221_v32 = vadd.f32 %v3220_v28, %v3196_v53  ;;  %v3210_v28 = vmul.f32 %v6545_v50, %v6545_v50 }
 0x379   : > { %v3165_v9 = vadd.f32 %v3164_v2, %v6491_v56  ;;  %v3222_v47 = vadd.f32 %v3221_v32, %v3197_v16  ;;  %v3211_v32 = vmul.f32 %v6547_v3, %v6547_v3 }
 0x37b   : > { %v3166_v17 = vadd.f32 %v3165_v9, %v6493_v40  ;;  %v3223_v22 = vadd.f32 %v3222_v47, %v3198_v30 }
 0x37d   : > { %v3167_v11 = vadd.f32 %v3166_v17, %v6500_v19  ;;  %v3224_v5 = vadd.f32 %v3223_v22, %v3199_v49 }
 0x37f   : > { %v3168_v10 = vadd.f32 %v3167_v11, %v6502_v36  ;;  %v3225_v4 = vadd.f32 %v3224_v5, %v3200_v6 }
 0x381   : > { %v3169_v63 = vadd.f32 %v3168_v10, %v6509_v25  ;;  %v3226_v55 = vadd.f32 %v3225_v4, %v3201_v8 }
 0x383   : > { %v3170_v23 = vadd.f32 %v3169_v63, %v6511_v54  ;;  %v3227_v34 = vadd.f32 %v3226_v55, %v3202_v51 }
 0x385   : > { %v3171_v1 = vadd.f32 %v3170_v23, %v6518_v29  ;;  %v3228_v60 = vadd.f32 %v3227_v34, %v3203_v27 }
 0x387   : > { %v3172_v14 = vadd.f32 %v3171_v1, %v6520_v39  ;;  %v3229_v57 = vadd.f32 %v3228_v60, %v3204_v35 }
 0x389   : > { %v3173_v59 = vadd.f32 %v3172_v14, %v6527_v13  ;;  %v3230_v21 = vadd.f32 %v3229_v57, %v3205_v62 }
 0x38b   : > { %v3174_v52 = vadd.f32 %v3173_v59, %v6529_v15  ;;  %v3231_v26 = vadd.f32 %v3230_v21, %v3206_v12 }
 0x38d   : > { %v3175_v46 = vadd.f32 %v3174_v52, %v6536_v24  ;;  %v3232_v2 = vadd.f32 %v3231_v26, %v3207_v48 }
 0x38f   : > { %v3176_v53 = vadd.f32 %v3175_v46, %v6538_v37  ;;  %v3233_v9 = vadd.f32 %v3232_v2, %v3208_v20 }
 0x391   : > { %v3177_v16 = vadd.f32 %v3176_v53, %v6545_v50  ;;  %v3234_v17 = vadd.f32 %v3233_v9, %v3209_v41 }
 0x393   : > { %v3178_v30 = vadd.f32 %v3177_v16, %v6547_v3  ;;  %v3235_v47 = vadd.f32 %v3234_v17, %v3210_v28 }
 0x395   : > { %v3179_v49 = vrot.slane %v3178_v30, 4  ;;  %v3236_v6 = vadd.f32 %v3235_v47, %v3211_v32 }
 0x397   : > { %v3180_v11 = vadd.f32 %v3179_v49, %v3178_v30  ;;  %v3237_v10 = vrot.slane %v3236_v6, 4 }
 0x399   : > { %v3181_v22 = vrot.slane %v3180_v11, 2  ;;  %v3238_v5 = vadd.f32 %v3237_v10, %v3236_v6 }
 0x39b   : > { %v3182_v8 = vadd.f32 %v3181_v22, %v3180_v11  ;;  %v3239_v51 = vrot.slane %v3238_v5, 2 }
 0x39d   : > { %v3183_v63 = vrot.slane %v3182_v8, 1  ;;  %v3240_v23 = vadd.f32 %v3239_v51, %v3238_v5 }
 0x39f   : > { %v3184_v4 = vadd.f32 %v3183_v63, %v3182_v8  ;;  %v3241_v27 = vrot.slane %v3240_v23, 1 }
 0x3a1   : > { %3185 = vst [vmem:[%s5527_s6] sm:$0x1] %v3184_v4  ;;  %v3242_v55 = vadd.f32 %v3241_v27, %v3240_v23 }
 0x3a3   : > { %3243 = vst [vmem:[%s5527_s6 + $0x1] sm:$0x1] %v3242_v55 }
 0x3a4 PF: > { %p4890_p9 = scmp.ne.s32.totalorder %s5498_s18, 1 }
 0x3a5   : > { %s3248_s28 = smul.u32 (!%p4890_p9), 208, %s5498_s18 }
 0x3a6   : > { %3247 = sbr.rel (%p4890_p9) target bundleno = 1015 (0x3f7), region = 40 }
 0x3ab   : > { %v3249_v1 = vlaneseq  ;;  %v6639_v14 = vstv %s3248_s28 }
 0x3ad   : > { %v6635_v35 = vshrl.u32 %v3249_v1, 7 }
 0x3af   : > { %v3251_v34 = vadd.s32 8, %v6635_v35  ;;  %v3252_v62 = vadd.s32 16, %v6635_v35  ;;  %v3253_v60 = vadd.s32 24, %v6635_v35  ;;  %v3277_v59 = vadd.s32 %v6639_v14, %v6635_v35 }
 0x3b0   : > { %v3254_v57 = vadd.s32 32, %v6635_v35  ;;  %v3255_v48 = vadd.s32 40, %v6635_v35  ;;  %v3256_v46 = vadd.s32 48, %v6635_v35  ;;  %v3257_v41 = vadd.s32 56, %v6635_v35 }
 0x3b1   : > { %v3278_v12 = vadd.s32 %v6639_v14, %v3251_v34  ;;  %v3279_v52 = vadd.s32 %v6639_v14, %v3252_v62  ;;  %v3280_v21 = vadd.s32 %v6639_v14, %v3253_v60  ;;  %vm3303_vm1 = vcmp.lt.s32.totalorder %v3277_v59, 392 }
 0x3b2   : > { %v3281_v20 = vadd.s32 %v6639_v14, %v3254_v57  ;;  %v3329_v26 = vsel %vm3303_vm1, %v6411_v45, 0.0  ;;  %v3282_v2 = vadd.s32 %v6639_v14, %v3255_v48  ;;  %v3258_v28 = vadd.s32 64, %v6635_v35 }
 0x3b3   : > { %vm3304_vm2 = vcmp.lt.s32.totalorder %v3278_v12, 392  ;;  %vm3305_vm3 = vcmp.lt.s32.totalorder %v3279_v52, 392  ;;  %vm3306_vm4 = vcmp.lt.s32.totalorder %v3280_v21, 392  ;;  %v3283_v9 = vadd.s32 %v6639_v14, %v3256_v46 }
 0x3b4   : > { %v3330_v53 = vsel %vm3304_vm2, %v6413_v58, 0.0  ;;  %v3331_v30 = vsel %vm3305_vm3, %v6432_v61, 0.0  ;;  %vm3307_vm5 = vcmp.lt.s32.totalorder %v3281_v20, 392  ;;  %v3387_v17 = vmul.f32 %v3329_v26, %v3329_v26 }
 0x3b5   : > { %v3355_v16 = vadd.f32 %v3330_v53, %v3329_v26  ;;  %v3388_v49 = vmul.f32 %v3330_v53, %v3330_v53  ;;  %v3259_v45 = vadd.s32 72, %v6635_v35  ;;  %v3332_v58 = vsel %vm3306_vm4, %v6434_v31, 0.0 }
 0x3b6   : > { %v3284_v47 = vadd.s32 %v6639_v14, %v3257_v41  ;;  %vm3308_vm6 = vcmp.lt.s32.totalorder %v3282_v2, 392  ;;  %v3389_v6 = vmul.f32 %v3331_v30, %v3331_v30  ;;  %v3260_v22 = vadd.s32 80, %v6635_v35 }
 0x3b7   : > { %v3356_v32 = vadd.f32 %v3355_v16, %v3331_v30  ;;  %v3285_v10 = vadd.s32 %v6639_v14, %v3258_v28  ;;  %v3333_v8 = vsel %vm3307_vm5, %v6449_v38, 0.0  ;;  %vm3309_vm7 = vcmp.lt.s32.totalorder %v3283_v9, 392 }
 0x3b8   : > { %v3390_v5 = vmul.f32 %v3332_v58, %v3332_v58  ;;  %v3413_v63 = vadd.f32 %v3388_v49, %v3387_v17  ;;  %v3261_v51 = vadd.s32 88, %v6635_v35  ;;  %v3286_v4 = vadd.s32 %v6639_v14, %v3259_v45 }
 0x3b9   : > { %v3357_v11 = vadd.f32 %v3356_v32, %v3332_v58  ;;  %v3334_v31 = vsel %vm3308_vm6, %v6451_v7, 0.0  ;;  %vm3310_vm8 = vcmp.lt.s32.totalorder %v3284_v47, 392  ;;  %v3391_v27 = vmul.f32 %v3333_v8, %v3333_v8 }
 0x3ba   : > { %v3414_v55 = vadd.f32 %v3413_v63, %v3389_v6  ;;  %v3262_v1 = vadd.s32 96, %v6635_v35  ;;  %v3287_v34 = vadd.s32 %v6639_v14, %v3260_v22  ;;  %v3335_v38 = vsel %vm3309_vm7, %v6463_v0, 0.0 }
 0x3bb   : > { %v3358_v61 = vadd.f32 %v3357_v11, %v3333_v8  ;;  %vm3311_vm9 = vcmp.lt.s32.totalorder %v3285_v10, 392  ;;  %v3392_v60 = vmul.f32 %v3334_v31, %v3334_v31  ;;  %v3263_v12 = vadd.s32 104, %v6635_v35 }
 0x3bc   : > { %v3415_v59 = vadd.f32 %v3414_v55, %v3390_v5  ;;  %v3288_v57 = vadd.s32 %v6639_v14, %v3261_v51  ;;  %v3336_v7 = vsel %vm3310_vm8, %v6465_v33, 0.0  ;;  %vm3312_vm10 = vcmp.lt.s32.totalorder %v3286_v4, 392 }
 0x3bd   : > { %v3359_v23 = vadd.f32 %v3358_v61, %v3334_v31  ;;  %v3393_v48 = vmul.f32 %v3335_v38, %v3335_v38  ;;  %v3264_v46 = vadd.s32 112, %v6635_v35  ;;  %v3289_v20 = vadd.s32 %v6639_v14, %v3262_v1 }
 0x3be   : > { %v3416_v21 = vadd.f32 %v3415_v59, %v3391_v27  ;;  %v3337_v0 = vsel %vm3311_vm9, %v6473_v18, 0.0  ;;  %vm3313_vm11 = vcmp.lt.s32.totalorder %v3287_v34, 392  ;;  %v3394_v53 = vmul.f32 %v3336_v7, %v3336_v7 }
 0x3bf   : > { %v3360_v62 = vadd.f32 %v3359_v23, %v3335_v38  ;;  %v3265_v2 = vadd.s32 120, %v6635_v35  ;;  %v3290_v16 = vadd.s32 %v6639_v14, %v3263_v12  ;;  %v3338_v33 = vsel %vm3312_vm10, %v6475_v42, 0.0 }
 0x3c0   : > { %v3417_v41 = vadd.f32 %v3416_v21, %v3392_v60  ;;  %vm3314_vm12 = vcmp.lt.s32.totalorder %v3288_v57, 392  ;;  %v3395_v9 = vmul.f32 %v3337_v0, %v3337_v0  ;;  %v3266_v32 = vadd.s32 128, %v6635_v35 }
 0x3c1   : > { %v3361_v52 = vadd.f32 %v3360_v62, %v3336_v7  ;;  %v3291_v17 = vadd.s32 %v6639_v14, %v3264_v46  ;;  %v3339_v18 = vsel %vm3313_vm11, %v6482_v43, 0.0  ;;  %vm3315_vm13 = vcmp.lt.s32.totalorder %v3289_v20, 392 }
 0x3c2   : > { %v3418_v30 = vadd.f32 %v3417_v41, %v3393_v48  ;;  %v3396_v45 = vmul.f32 %v3338_v33, %v3338_v33  ;;  %v3267_v47 = vadd.s32 136, %v6635_v35  ;;  %v3292_v11 = vadd.s32 %v6639_v14, %v3265_v2 }
 0x3c3   : > { %v3362_v26 = vadd.f32 %v3361_v52, %v3337_v0  ;;  %v3340_v42 = vsel %vm3314_vm12, %v6484_v44, 0.0  ;;  %vm3316_vm14 = vcmp.lt.s32.totalorder %v3290_v16, 392  ;;  %v3397_v22 = vmul.f32 %v3339_v18, %v3339_v18 }
 0x3c4   : > { %v3419_v58 = vadd.f32 %v3418_v30, %v3394_v53  ;;  %v3268_v8 = vadd.s32 144, %v6635_v35  ;;  %v3293_v61 = vadd.s32 %v6639_v14, %v3266_v32  ;;  %v3341_v43 = vsel %vm3315_vm13, %v6491_v56, 0.0 }
 0x3c5   : > { %v3363_v28 = vadd.f32 %v3362_v26, %v3338_v33  ;;  %vm3317_vm15 = vcmp.lt.s32.totalorder %v3291_v17, 392  ;;  %v3398_v63 = vmul.f32 %v3340_v42, %v3340_v42  ;;  %v3269_v4 = vadd.s32 152, %v6635_v35 }
 0x3c6   : > { %v3420_v10 = vadd.f32 %v3419_v58, %v3395_v9  ;;  %v3294_v31 = vadd.s32 %v6639_v14, %v3267_v47  ;;  %v3342_v44 = vsel %vm3316_vm14, %v6493_v40, 0.0  ;;  %vm3318_vm0 = vcmp.lt.s32.totalorder %v3292_v11, 392 }
 0x3c7   : > { %v3364_v49 = vadd.f32 %v3363_v28, %v3339_v18  ;;  %v3399_v27 = vmul.f32 %v3341_v43, %v3341_v43  ;;  %v3270_v1 = vadd.s32 160, %v6635_v35  ;;  %v3295_v34 = vadd.s32 %v6639_v14, %v3268_v8 }
 0x3c8   : > { %v3421_v51 = vadd.f32 %v3420_v10, %v3396_v45  ;;  %v3343_v56 = vsel %vm3317_vm15, %v6500_v19, 0.0  ;;  %vm3319_vm1 = vcmp.lt.s32.totalorder %v3293_v61, 392  ;;  %v3400_v62 = vmul.f32 %v3342_v44, %v3342_v44 }
 0x3c9   : > { %v3365_v6 = vadd.f32 %v3364_v49, %v3340_v42  ;;  %v3271_v59 = vadd.s32 168, %v6635_v35  ;;  %v3296_v12 = vadd.s32 %v6639_v14, %v3269_v4  ;;  %v3344_v40 = vsel %vm3318_vm0, %v6502_v36, 0.0 }
 0x3ca   : > { %v3422_v55 = vadd.f32 %v3421_v51, %v3397_v22  ;;  %vm3320_vm2 = vcmp.lt.s32.totalorder %v3294_v31, 392  ;;  %v3401_v7 = vmul.f32 %v3343_v56, %v3343_v56  ;;  %v3272_v48 = vadd.s32 176, %v6635_v35 }
 0x3cb   : > { %v3366_v5 = vadd.f32 %v3365_v6, %v3341_v43  ;;  %v3297_v21 = vadd.s32 %v6639_v14, %v3270_v1  ;;  %v3345_v19 = vsel %vm3319_vm1, %v6509_v25, 0.0  ;;  %vm3321_vm3 = vcmp.lt.s32.totalorder %v3295_v34, 392 }
 0x3cc   : > { %v3423_v60 = vadd.f32 %v3422_v55, %v3398_v63  ;;  %v3402_v20 = vmul.f32 %v3344_v40, %v3344_v40  ;;  %v3273_v26 = vadd.s32 184, %v6635_v35  ;;  %v3298_v53 = vadd.s32 %v6639_v14, %v3271_v59 }
 0x3cd   : > { %v3367_v23 = vadd.f32 %v3366_v5, %v3342_v44  ;;  %v3346_v36 = vsel %vm3320_vm2, %v6511_v54, 0.0  ;;  %vm3322_vm4 = vcmp.lt.s32.totalorder %v3296_v12, 392  ;;  %v3403_v2 = vmul.f32 %v3345_v19, %v3345_v19 }
 0x3ce   : > { %v3424_v52 = vadd.f32 %v3423_v60, %v3399_v27  ;;  %v3274_v33 = vadd.s32 192, %v6635_v35  ;;  %v3299_v28 = vadd.s32 %v6639_v14, %v3272_v48  ;;  %v3347_v25 = vsel %vm3321_vm3, %v6518_v29, 0.0 }
 0x3cf   : > { %v3368_v38 = vadd.f32 %v3367_v23, %v3343_v56  ;;  %vm3323_vm5 = vcmp.lt.s32.totalorder %v3297_v21, 392  ;;  %v3404_v30 = vmul.f32 %v3346_v36, %v3346_v36  ;;  %v3275_v17 = vadd.s32 200, %v6635_v35 }
 0x3d0   : > { %v3425_v0 = vadd.f32 %v3424_v52, %v3400_v62  ;;  %v3300_v18 = vadd.s32 %v6639_v14, %v3273_v26  ;;  %v3348_v54 = vsel %vm3322_vm4, %v6520_v39, 0.0  ;;  %vm3324_vm6 = vcmp.lt.s32.totalorder %v3298_v53, 392 }
 0x3d1   : > { %v3369_v57 = vadd.f32 %v3368_v38, %v3344_v40  ;;  %v3405_v45 = vmul.f32 %v3347_v25, %v3347_v25  ;;  %v3301_v47 = vadd.s32 %v6639_v14, %v3274_v33  ;;  %v3349_v11 = vsel %vm3323_vm5, %v6527_v13, 0.0 }
 0x3d2   : > { %v3426_v16 = vadd.f32 %v3425_v0, %v3401_v7  ;;  %vm3325_vm7 = vcmp.lt.s32.totalorder %v3299_v28, 392  ;;  %v3406_v42 = vmul.f32 %v3348_v54, %v3348_v54  ;;  %v3302_v22 = vadd.s32 %v6639_v14, %v3275_v17 }
 0x3d3   : > { %v3370_v46 = vadd.f32 %v3369_v57, %v3345_v19  ;;  %v3350_v35 = vsel %vm3324_vm6, %v6529_v15, 0.0  ;;  %vm3326_vm8 = vcmp.lt.s32.totalorder %v3300_v18, 392  ;;  %v3407_v8 = vmul.f32 %v3349_v11, %v3349_v11 }
 0x3d4   : > { %v3427_v32 = vadd.f32 %v3426_v16, %v3402_v20  ;;  %v3351_v61 = vsel %vm3325_vm7, %v6536_v24, 0.0  ;;  %vm3327_vm9 = vcmp.lt.s32.totalorder %v3301_v47, 392  ;;  %v3408_v5 = vmul.f32 %v3350_v35, %v3350_v35 }
 0x3d5   : > { %v3371_v41 = vadd.f32 %v3370_v46, %v3346_v36  ;;  %v3352_v13 = vsel %vm3326_vm8, %v6538_v37, 0.0  ;;  %vm3328_vm10 = vcmp.lt.s32.totalorder %v3302_v22, 392  ;;  %v3409_v4 = vmul.f32 %v3351_v61, %v3351_v61 }
 0x3d6   : > { %v3428_v58 = vadd.f32 %v3427_v32, %v3403_v2  ;;  %v3353_v14 = vsel %vm3327_vm9, %v6545_v50, 0.0  ;;  %v3410_v15 = vmul.f32 %v3352_v13, %v3352_v13  ;;  %v3354_v27 = vsel %vm3328_vm10, %v6547_v3, 0.0 }
 0x3d7   : > { %v3372_v9 = vadd.f32 %v3371_v41, %v3347_v25  ;;  %v3411_v24 = vmul.f32 %v3353_v14, %v3353_v14  ;;  %v3412_v56 = vmul.f32 %v3354_v27, %v3354_v27 }
 0x3d8   : > { %v3429_v6 = vadd.f32 %v3428_v58, %v3404_v30 }
 0x3d9   : > { %v3373_v49 = vadd.f32 %v3372_v9, %v3348_v54 }
 0x3da   : > { %v3430_v39 = vadd.f32 %v3429_v6, %v3405_v45 }
 0x3db   : > { %v3374_v29 = vadd.f32 %v3373_v49, %v3349_v11 }
 0x3dc   : > { %v3431_v63 = vadd.f32 %v3430_v39, %v3406_v42 }
 0x3dd   : > { %v3375_v10 = vadd.f32 %v3374_v29, %v3350_v35 }
 0x3de   : > { %v3432_v31 = vadd.f32 %v3431_v63, %v3407_v8 }
 0x3df   : > { %v3376_v43 = vadd.f32 %v3375_v10, %v3351_v61 }
 0x3e0   : > { %v3433_v23 = vadd.f32 %v3432_v31, %v3408_v5 }
 0x3e1   : > { %v3377_v51 = vadd.f32 %v3376_v43, %v3352_v13 }
 0x3e2   : > { %v3434_v1 = vadd.f32 %v3433_v23, %v3409_v4 }
 0x3e3   : > { %v3378_v44 = vadd.f32 %v3377_v51, %v3353_v14 }
 0x3e4   : > { %v3435_v38 = vadd.f32 %v3434_v1, %v3410_v15 }
 0x3e5   : > { %v3379_v55 = vadd.f32 %v3378_v44, %v3354_v27 }
 0x3e6   : > { %v3436_v62 = vadd.f32 %v3435_v38, %v3411_v24 }
 0x3e7   : > { %v3380_v34 = vrot.slane %v3379_v55, 4 }
 0x3e8   : > { %v3437_v59 = vadd.f32 %v3436_v62, %v3412_v56 }
 0x3e9   : > { %v3381_v37 = vadd.f32 %v3380_v34, %v3379_v55 }
 0x3ea   : > { %v3438_v40 = vrot.slane %v3437_v59, 4 }
 0x3eb   : > { %v3382_v60 = vrot.slane %v3381_v37, 2 }
 0x3ec   : > { %v3439_v57 = vadd.f32 %v3438_v40, %v3437_v59 }
 0x3ed   : > { %v3383_v12 = vadd.f32 %v3382_v60, %v3381_v37 }
 0x3ee   : > { %v3440_v52 = vrot.slane %v3439_v57, 2 }
 0x3ef   : > { %v3384_v50 = vrot.slane %v3383_v12, 1 }
 0x3f0   : > { %v3441_v3 = vadd.f32 %v3440_v52, %v3439_v57 }
 0x3f1   : > { %v3385_v7 = vadd.f32 %v3384_v50, %v3383_v12 }
 0x3f2   : > { %v3442_v48 = vrot.slane %v3441_v3, 1 }
 0x3f3   : > { %3386 = vst [vmem:[%s5527_s6] sm:$0x1] %v3385_v7 }
 0x3f4   : > { %v3443_v21 = vadd.f32 %v3442_v48, %v3441_v3 }
 0x3f6   : > { %3444 = vst [vmem:[%s5527_s6 + $0x1] sm:$0x1] %v3443_v21 }
 0x3f7 PF: > { %3455 = sbr.rel (!%p5512_p4) target bundleno = 1093 (0x445), region = 44  ;;  %s3457_s7 = ssub.s32 (%p5512_p4), 49, %s5533_s9 }
 0x3f8   : > { %s5172_s8 = smul.u32 (%p5512_p4), 104, %s5498_s18  ;;  %p3458_p10 = scmp.lt.s32.totalorder (%p5512_p4), %s3457_s7, 26 }
 0x3fa   : > { %s6727_s12 = scalar_lea.vmem (%p5512_p4), %s6849_s3, %s5172_s8  }
 0x3fc   : > { %s6861_s7 = smov (!%p3458_p10, %s3457_s7), 26 }
 0x3fd   : > { %s4891_s13 = sshll.u32 %s6861_s7, 2 }
 0x3fe   : > { %p4894_p11 = scmp.eq.s32.totalorder %s4891_s13, 0 }
 0x3ff   : > { %5366 = sdivrem.u32 (!%p4894_p11), %s6861_s7, 26 }
 0x400   : > { %3466 = sbr.rel (%p4894_p11) target bundleno = 1093 (0x445), region = 48 }
 0x408   : > { %s6733_s23 = spop.drf %5366 }
 0x409   : > { %s5368_s6 = spop.drf %5366  ;;  %p4895_p12 = scmp.le.s32.totalorder %s6733_s23, 0 }
 0x40a   : > { %s6852_s18 = smov (!%p4895_p12), %s6727_s12  ;;  %s6853_s9 = smov (!%p4895_p12), %s6419_s15 }
 0x40b   : > { %3741 = sbr.rel (%p4895_p12) target bundleno = 1067 (0x42b), region = 132  ;;  %s6742_s14 = smov (!%p4895_p12), 0  }
 0x40c   : > { %s6744_s17 = smov (!%p4895_p12), 0  }
 0x410 LB: >> { %v3484_v19 = vld [vmem:[%s5434_s9] sm:$0xf]  ;;  %v3486_v46 = vld [vmem:[%s5434_s9 + $0x4] sm:$0xf]  ;;  %v3488_v20 = vld [vmem:[%s5434_s9 + $0x8] sm:$0xf]  ;;  %s5442_s17 = sphi %s6744_s17, %s3478_s17   ;;  %s5438_s14 = sphi %s6742_s14, %s6856_s14   ;;  %s5434_s9 = sphi %s6853_s9, %s6855_s9   ;;  %s5430_s18 = sphi %s6852_s18, %s6854_s18  }
 0x411   : >> { %3485 = vst [vmem:[%s5430_s18] sm:$0xf] %v3484_v19  ;;  %v3490_v0 = vld [vmem:[%s5434_s9 + $0xc] sm:$0xf]  ;;  %v3492_v26 = vld [vmem:[%s5434_s9 + $0x10] sm:$0xf]  ;;  %s3536_s20 = sadd.s32 1, %s5438_s14 }
 0x412   : >> { %3487 = vst [vmem:[%s5430_s18 + $0x4] sm:$0xf] %v3486_v46  ;;  %v3494_v53 = vld [vmem:[%s5434_s9 + $0x14] sm:$0xf]  ;;  %v3496_v36 = vld [vmem:[%s5434_s9 + $0x18] sm:$0xf]  ;;  %p3537_p13 = scmp.ge.s32.totalorder %s3536_s20, %s6733_s23 }
 0x413   : >> { %3489 = vst [vmem:[%s5430_s18 + $0x8] sm:$0xf] %v3488_v20  ;;  %v3498_v41 = vld [vmem:[%s5434_s9 + $0x1c] sm:$0xf]  ;;  %v3500_v2 = vld [vmem:[%s5434_s9 + $0x20] sm:$0xf] }
 0x414   : >> { %3491 = vst [vmem:[%s5430_s18 + $0xc] sm:$0xf] %v3490_v0  ;;  %v3502_v16 = vld [vmem:[%s5434_s9 + $0x24] sm:$0xf]  ;;  %v3504_v33 = vld [vmem:[%s5434_s9 + $0x28] sm:$0xf] }
 0x415   : >> { %3493 = vst [vmem:[%s5430_s18 + $0x10] sm:$0xf] %v3492_v26  ;;  %v3506_v28 = vld [vmem:[%s5434_s9 + $0x2c] sm:$0xf]  ;;  %v3508_v25 = vld [vmem:[%s5434_s9 + $0x30] sm:$0xf] }
 0x416   : >> { %3495 = vst [vmem:[%s5430_s18 + $0x14] sm:$0xf] %v3494_v53  ;;  %v3510_v9 = vld [vmem:[%s5434_s9 + $0x34] sm:$0xf]  ;;  %v3512_v30 = vld [vmem:[%s5434_s9 + $0x38] sm:$0xf] }
 0x417   : >> { %3497 = vst [vmem:[%s5430_s18 + $0x18] sm:$0xf] %v3496_v36  ;;  %s6863_s20 = smov (%p3537_p13, %s3536_s20), 0  ;;  %v3514_v32 = vld [vmem:[%s5434_s9 + $0x3c] sm:$0xf]  ;;  %s3478_s17 = sadd.s32 1, %s5442_s17  }
 0x418   : >> { %3499 = vst [vmem:[%s5430_s18 + $0x1c] sm:$0xf] %v3498_v41  ;;  %v3516_v17 = vld [vmem:[%s5434_s9 + $0x40] sm:$0xf]  ;;  %s3539_s21 = smul.u32 104, %s6863_s20  ;;  %p3477_p0 = scmp.ge.s32.totalorder %s3478_s17, %s6733_s23 }
 0x419   : >> { %3501 = vst [vmem:[%s5430_s18 + $0x20] sm:$0xf] %v3500_v2  ;;  %v3518_v18 = vld [vmem:[%s5434_s9 + $0x44] sm:$0xf]  ;;  %v3520_v54 = vld [vmem:[%s5434_s9 + $0x48] sm:$0xf]  ;;  %s6856_s14 = smov %s6863_s20 }
 0x41a   : >> { %3503 = vst [vmem:[%s5430_s18 + $0x24] sm:$0xf] %v3502_v16  ;;  %s3541_s24 = scalar_lea.vmem %s6419_s15, %s3539_s21 [#allocation2]   ;;  %s3542_s25 = scalar_lea.vmem %s6727_s12, %s3539_s21   ;;  %v3522_v49 = vld [vmem:[%s5434_s9 + $0x4c] sm:$0xf]  ;;  %v3524_v45 = vld [vmem:[%s5434_s9 + $0x50] sm:$0xf] }
 0x41b   : >> { %3505 = vst [vmem:[%s5430_s18 + $0x28] sm:$0xf] %v3504_v33  ;;  %v3526_v58 = vld [vmem:[%s5434_s9 + $0x54] sm:$0xf]  ;;  %v3528_v47 = vld [vmem:[%s5434_s9 + $0x58] sm:$0xf] }
 0x41c   : >> { %3507 = vst [vmem:[%s5430_s18 + $0x2c] sm:$0xf] %v3506_v28  ;;  %v3530_v11 = vld [vmem:[%s5434_s9 + $0x5c] sm:$0xf]  ;;  %v3532_v29 = vld [vmem:[%s5434_s9 + $0x60] sm:$0xf] }
 0x41d   : >> { %3509 = vst [vmem:[%s5430_s18 + $0x30] sm:$0xf] %v3508_v25  ;;  %v3534_v42 = vld [vmem:[%s5434_s9 + $0x64] sm:$0xf]  ;;  %s6855_s9 = smov %s3541_s24 }
 0x41e   : >> { %3511 = vst [vmem:[%s5430_s18 + $0x34] sm:$0xf] %v3510_v9 }
 0x41f   : >> { %3513 = vst [vmem:[%s5430_s18 + $0x38] sm:$0xf] %v3512_v30 }
 0x420   : >> { %3515 = vst [vmem:[%s5430_s18 + $0x3c] sm:$0xf] %v3514_v32 }
 0x421   : >> { %3517 = vst [vmem:[%s5430_s18 + $0x40] sm:$0xf] %v3516_v17 }
 0x422   : >> { %3519 = vst [vmem:[%s5430_s18 + $0x44] sm:$0xf] %v3518_v18 }
 0x423   : >> { %3521 = vst [vmem:[%s5430_s18 + $0x48] sm:$0xf] %v3520_v54 }
 0x424   : >> { %3523 = vst [vmem:[%s5430_s18 + $0x4c] sm:$0xf] %v3522_v49 }
 0x425   : >> { %3525 = vst [vmem:[%s5430_s18 + $0x50] sm:$0xf] %v3524_v45 }
 0x426   : >> { %3527 = vst [vmem:[%s5430_s18 + $0x54] sm:$0xf] %v3526_v58  ;;  %3480 = sbr.rel (!%p3477_p0) target bundleno = 1040 (0x410), region = 138 }
 0x427   : >> { %3529 = vst [vmem:[%s5430_s18 + $0x58] sm:$0xf] %v3528_v47 }
 0x428   : >> { %3531 = vst [vmem:[%s5430_s18 + $0x5c] sm:$0xf] %v3530_v11 }
 0x429   : >> { %3533 = vst [vmem:[%s5430_s18 + $0x60] sm:$0xf] %v3532_v29 }
 0x42a   : >> { %3535 = vst [vmem:[%s5430_s18 + $0x64] sm:$0xf] %v3534_v42  ;;  %s6854_s18 = smov %s3542_s25 }
 0x42b PF: > { %5369 = sdivrem.u32 %s6861_s7, 26 }
 0x42c   : > { %s4896_s26 = smul.u32 104, %s6733_s23 }
 0x42e   : > { %s6831_s27 = scalar_lea.vmem %s6419_s15, %s4896_s26 [#allocation2]   ;;  %s3549_s29 = scalar_lea.vmem %s6727_s12, %s4896_s26  }
 0x434   : > { %s5370_s30 = spop.drf %5369 }
 0x435   : > { %s5371_s5 = spop.drf %5369 }
 0x436   : > { %p4898_p1 = scmp.le.s32.totalorder %s5371_s5, 0 }
 0x437   : > { %s5444_s28 = smov (!%p4898_p1), %s3549_s29   ;;  %s5448_s8 = smov (!%p4898_p1), %s6831_s27  }
 0x438   : > { %3755 = sbr.rel (%p4898_p1) target bundleno = 1093 (0x445), region = 143  ;;  %s5452_s10 = smov (!%p4898_p1), 0  }
 0x439   : > { %s5456_s11 = smov (!%p4898_p1), 0  }
 0x43d LB: >> { %v3559_v6 = vld [vmem:[%s5450_s8] sm:$0xf]  ;;  %s3561_s15 = sadd.s32 1, %s5454_s10  ;;  %s3553_s11 = sadd.s32 1, %s5458_s11   ;;  %s5458_s11 = sphi %s5456_s11, %s3553_s11   ;;  %s5454_s10 = sphi %s5452_s10, %s5453_s10   ;;  %s5450_s8 = sphi %s5448_s8, %s3566_s8   ;;  %s5446_s28 = sphi %s5444_s28, %s3567_s28  }
 0x43e   : >> { %3560 = vst [vmem:[%s5446_s28] sm:$0xf] %v3559_v6  ;;  %p3562_p2 = scmp.ge.s32.totalorder %s3561_s15, %s5371_s5  ;;  %p3552_p3 = scmp.ge.s32.totalorder %s3553_s11, %s5371_s5 }
 0x440   : >> { %s6865_s15 = smov (%p3562_p2, %s3561_s15), 0  ;;  %3555 = sbr.rel (!%p3552_p3) target bundleno = 1085 (0x43d), region = 149 }
 0x441   : >> { %s4899_s7 = sshll.u32 %s6865_s15, 2  ;;  %s5453_s10 = smov %s6865_s15  }
 0x442   : >> { %s3566_s8 = scalar_lea.vmem %s6831_s27, %s4899_s7 [#allocation2]   ;;  %s3567_s28 = scalar_lea.vmem %s3549_s29, %s4899_s7  }
 0x445 PF: > { %p12_p4 = scmp.ge.s32.totalorder %s5500_s19, 4   ;;  %s6857_s15 = smov %s5422_s16 }
 0x446   : > { %s6858_s16 = smov %s5508_s22  ;;  %s6859_s17 = smov %s5500_s19 }
 0x447   :  { %14 = sbr.rel (!%p12_p4) target bundleno = 2 (0x2), region = 160 }

// kernel: mnist_rotdcf_forward.7
= control target key start
LH: loop header
LB: loop body
LE: loop exit
PB: predicated region body
PF: predicated region fallthrough
CT: control target
= control target key end

     0   :  { %s8001_s15 = smov 0   ;;  %s8003_s16 = smov 0   ;;  %s11618_s0 = inlined_call_operand.vmem [shape: bf16[98,3200], index: 0, kind: input, shape index: {}]   ;;  %s11619_s1 = inlined_call_operand.vmem [shape: bf16[3200,256], index: 1, kind: input, shape index: {}]   ;;  %s11620_s2 = inlined_call_operand.vmem [shape: f32[1,256], index: 2, kind: input, shape index: {}]   ;;  %s11621_s3 = inlined_call_operand.vmem [shape: bf16[98,256], index: 3, kind: output, shape index: {0}]   ;;  %s11622_s4 = inlined_call_operand.vmem [shape: f32[16,256], index: 4, kind: output, shape index: {1}]  }
   0x1   :  { %s8005_s17 = smov 0  }
   0x2 LB: > { %s8014_s18 = sadd.s32 4294967295, %s7942_s17   ;;  %s8016_s19 = sadd.s32 1, %s7942_s17   ;;  %s7942_s17 = sphi %s8005_s17, %s11822_s17   ;;  %s7938_s16 = sphi %s8003_s16, %s11821_s16   ;;  %s7934_s15 = sphi %s8001_s15, %s11820_s15  }
   0x3   : > { %s87_s20 = ssub.s32 %s7942_s17, %s8016_s19  ;;  %s90_s21 = sadd.s32 1, %s7938_s16 }
   0x4   : > { %p88_p0 = scmp.eq.s32.totalorder %s87_s20, 0  ;;  %p100_p1 = scmp.ne.s32.totalorder %s7938_s16, %s7934_s15 }
   0x5   : > { %p101_p2 = scmp.eq.s32.totalorder %s8014_s18, 1  ;;  %p5246_p3 = scmp.ge.s32.totalorder %s7942_s17, 1 }
   0x6   : > { %s8024_s22 = scalar_select %p88_p0, %s7938_s16, %s90_s21  }
   0x7   : > { %p8028_p4 = por %p101_p2, %p100_p1  ;;  %p177_p5 = scmp.lt.s32.totalorder %s7942_s17, 3 }
   0x9   : > { %p178_p6 = pnand %p5246_p3, %p177_p5 }
   0xb   : > { %181 = sbr.rel (%p178_p6) target bundleno = 1121 (0x461), region = 32 }
  0x10   : > { %v5710_v0 = vld [vmem:[%s11619_s1 + $0x70] sm:$0xf]  ;;  %v7392_v1 = vld [vmem:[%s11619_s1 + $0x74] sm:$0xf0]  ;;  %p236_p7 = scmp.lt.s32.totalorder %s8014_s18, 1  ;;  %s8082_s11 = sshll.u32 %s8014_s18, 3 }
  0x11   : > { %v5774_v2 = vld [vmem:[%s11619_s1 + $0xf0] sm:$0xf]  ;;  %v5711_v3 = vor.u32 %v7392_v1, %v5710_v0  ;;  %v7408_v4 = vld [vmem:[%s11619_s1 + $0xf4] sm:$0xf0]  ;;  %v5702_v5 = vld [vmem:[%s11619_s1 + $0x60] sm:$0xf] }
  0x12   : > { %v5775_v6 = vor.u32 %v7408_v4, %v5774_v2  ;;  %v7390_v7 = vld [vmem:[%s11619_s1 + $0x64] sm:$0xf0]  ;;  %v5766_v8 = vld [vmem:[%s11619_s1 + $0xe0] sm:$0xf]  ;;  %s237_s14 = scalar_select %p236_p7, %s8014_s18, 1 }
  0x13   : > { %v7406_v9 = vld [vmem:[%s11619_s1 + $0xe4] sm:$0xf0]  ;;  %7782 = vmatpush.bf16.msra.mxu2 %v5711_v3  ;;  %3255 = vmatpush.bf16.msra.mxu0 %v5711_v3  ;;  %v5703_v10 = vor.u32 %v7390_v7, %v5702_v5  ;;  %v5694_v12 = vld [vmem:[%s11619_s1 + $0x50] sm:$0xf]  ;;  %v7388_v13 = vld [vmem:[%s11619_s1 + $0x54] sm:$0xf0] }
  0x14   : > { %7790 = vmatpush.bf16.msra.mxu3 %v5775_v6  ;;  %3284 = vmatpush.bf16.msra.mxu1 %v5775_v6  ;;  %v5767_v11 = vor.u32 %v7406_v9, %v5766_v8  ;;  %s7276_s25 = sshll.u32 %s237_s14, 4  ;;  %v5758_v14 = vld [vmem:[%s11619_s1 + $0xd0] sm:$0xf]  ;;  %v7404_v15 = vld [vmem:[%s11619_s1 + $0xd4] sm:$0xf0]  ;;  %v5695_v16 = vor.u32 %v7388_v13, %v5694_v12  ;;  %p219_p8 = scmp.lt.s32.totalorder %s8082_s11, 12 }
  0x15   : > { %s8073_s6 = scalar_lea.vmem %s11622_s4, %s7276_s25  ;;  %v5759_v17 = vor.u32 %v7404_v15, %v5758_v14  ;;  %v5686_v18 = vld [vmem:[%s11619_s1 + $0x40] sm:$0xf]  ;;  %v7386_v19 = vld [vmem:[%s11619_s1 + $0x44] sm:$0xf0]  ;;  %v5678_v24 = vld [vmem:[%s11619_s1 + $0x30] sm:$0xf] }
  0x16   : > { %v5750_v20 = vld [vmem:[%s11619_s1 + $0xc0] sm:$0xf]  ;;  %v7402_v21 = vld [vmem:[%s11619_s1 + $0xc4] sm:$0xf0]  ;;  %v5687_v22 = vor.u32 %v7386_v19, %v5686_v18  ;;  %v7384_v25 = vld [vmem:[%s11619_s1 + $0x34] sm:$0xf0] }
  0x17   : > { %7783 = vmatpush.bf16.msra.mxu2 %v5703_v10  ;;  %3256 = vmatpush.bf16.msra.mxu0 %v5703_v10  ;;  %v5751_v23 = vor.u32 %v7402_v21, %v5750_v20  ;;  %v5742_v26 = vld [vmem:[%s11619_s1 + $0xb0] sm:$0xf]  ;;  %v7400_v27 = vld [vmem:[%s11619_s1 + $0xb4] sm:$0xf0]  ;;  %v5679_v28 = vor.u32 %v7384_v25, %v5678_v24  ;;  %s220_s30 = scalar_select %p219_p8, %s8082_s11, 12 }
  0x18   : > { %7791 = vmatpush.bf16.msra.mxu3 %v5767_v11  ;;  %3285 = vmatpush.bf16.msra.mxu1 %v5767_v11  ;;  %v5743_v29 = vor.u32 %v7400_v27, %v5742_v26  ;;  %v5670_v30 = vld [vmem:[%s11619_s1 + $0x20] sm:$0xf]  ;;  %v7382_v31 = vld [vmem:[%s11619_s1 + $0x24] sm:$0xf0]  ;;  %v5662_v36 = vld [vmem:[%s11619_s1 + $0x10] sm:$0xf] }
  0x19   : > { %v5734_v32 = vld [vmem:[%s11619_s1 + $0xa0] sm:$0xf]  ;;  %v7398_v33 = vld [vmem:[%s11619_s1 + $0xa4] sm:$0xf0]  ;;  %v5671_v34 = vor.u32 %v7382_v31, %v5670_v30  ;;  %s7798_s17 = smul.u32 100, %s220_s30  ;;  %s203_s7 = sand.u32 1, %s7934_s15  }
  0x1a   : > { %v5735_v35 = vor.u32 %v7398_v33, %v5734_v32  ;;  %v7380_v37 = vld [vmem:[%s11619_s1 + $0x14] sm:$0xf0]  ;;  %v5726_v38 = vld [vmem:[%s11619_s1 + $0x90] sm:$0xf]  ;;  %v5654_v41 = vld [vmem:[%s11619_s1] sm:$0xf] }
  0x1b   : > { %7784 = vmatpush.bf16.msra.mxu2 %v5695_v16  ;;  %3257 = vmatpush.bf16.msra.mxu0 %v5695_v16  ;;  %v7396_v39 = vld [vmem:[%s11619_s1 + $0x94] sm:$0xf0]  ;;  %v5663_v40 = vor.u32 %v7380_v37, %v5662_v36  ;;  %v7378_v42 = vld [vmem:[%s11619_s1 + $0x4] sm:$0xf0]  ;;  %s8137_s12 = scalar_lea.vmem %s11618_s0, %s7798_s17  ;;  %v5718_v44 = vld [vmem:[%s11619_s1 + $0x80] sm:$0xf] }
  0x1c   : > { %7792 = vmatpush.bf16.msra.mxu3 %v5759_v17  ;;  %3286 = vmatpush.bf16.msra.mxu1 %v5759_v17  ;;  %v5727_v43 = vor.u32 %v7396_v39, %v5726_v38  ;;  %v7394_v45 = vld [vmem:[%s11619_s1 + $0x84] sm:$0xf0]  ;;  %v5838_v46 = vld [vmem:[%s11619_s1 + $0x170] sm:$0xf]  ;;  %v7424_v47 = vld [vmem:[%s11619_s1 + $0x174] sm:$0xf0]  ;;  %v5655_v53 = vor.u32 %v7378_v42, %v5654_v41 }
  0x1d   : > { %v5902_v48 = vld [vmem:[%s11619_s1 + $0x1f0] sm:$0xf]  ;;  %v7440_v49 = vld [vmem:[%s11619_s1 + $0x1f4] sm:$0xf0]  ;;  %v7339_v54 = vld [vmem:[%s8137_s12 + $0x1f0] sm:$0xf0]  ;;  %v5719_v58 = vor.u32 %v7394_v45, %v5718_v44  ;;  %v5839_v61 = vor.u32 %v7424_v47, %v5838_v46 }
  0x1e   : > { %v5454_v50 = vld [vmem:[%s8137_s12 + $0x190] sm:$0xf]  ;;  %v7456_v52 = vld [vmem:[%s11619_s1 + $0x274] sm:$0xf0]  ;;  %v5254_v55 = vld [vmem:[%s8137_s12] sm:$0xf]  ;;  %v5903_v63 = vor.u32 %v7440_v49, %v5902_v48 }
  0x1f   : > { %7785 = vmatpush.bf16.msra.mxu2 %v5687_v22  ;;  %3258 = vmatpush.bf16.msra.mxu0 %v5687_v22  ;;  %v5966_v51 = vld [vmem:[%s11619_s1 + $0x270] sm:$0xf]  ;;  %v7289_v56 = vld [vmem:[%s8137_s12 + $0x60] sm:$0xf0]  ;;  %v5830_v57 = vld [vmem:[%s11619_s1 + $0x160] sm:$0xf]  ;;  %v8180_v3 = vor.u32 %v7339_v54, %v5454_v50 }
  0x20   : > { %7793 = vmatpush.bf16.msra.mxu3 %v5751_v23  ;;  %3287 = vmatpush.bf16.msra.mxu1 %v5751_v23  ;;  %v7327_v59 = vld [vmem:[%s8137_s12 + $0x194] sm:$0xf]  ;;  %v5456_v60 = vld [vmem:[%s8137_s12 + $0x1f4] sm:$0xf0]  ;;  %v7422_v62 = vld [vmem:[%s11619_s1 + $0x164] sm:$0xf0]  ;;  %v8182_v4 = vor.u32 %v7289_v56, %v5254_v55  ;;  %v5967_v9 = vor.u32 %v7456_v52, %v5966_v51 }
  0x21   : > { %v7277_v0 = vld [vmem:[%s8137_s12 + $0x4] sm:$0xf]  ;;  %v5256_v1 = vld [vmem:[%s8137_s12 + $0x64] sm:$0xf0]  ;;  %v5894_v2 = vld [vmem:[%s11619_s1 + $0x1e0] sm:$0xf]  ;;  %v8193_v8 = vor.u32 %v7327_v59, %v5456_v60  ;;  %v5831_v11 = vor.u32 %v7422_v62, %v5830_v57 }
  0x22   : > { %v7438_v5 = vld [vmem:[%s11619_s1 + $0x1e4] sm:$0xf0]  ;;  %v6030_v6 = vld [vmem:[%s11619_s1 + $0x2f0] sm:$0xf]  ;;  %v7472_v7 = vld [vmem:[%s11619_s1 + $0x2f4] sm:$0xf0]  ;;  %v8195_v10 = vor.u32 %v7277_v0, %v5256_v1 }
  0x23   : > { %7786 = vmatpush.bf16.msra.mxu2 %v5679_v28  ;;  %3259 = vmatpush.bf16.msra.mxu0 %v5679_v28  ;;  %v5958_v12 = vld [vmem:[%s11619_s1 + $0x260] sm:$0xf]  ;;  %v7454_v13 = vld [vmem:[%s11619_s1 + $0x264] sm:$0xf0]  ;;  %v5895_v14 = vor.u32 %v7438_v5, %v5894_v2  ;;  %v6031_v15 = vor.u32 %v7472_v7, %v6030_v6  ;;  %v5822_v16 = vld [vmem:[%s11619_s1 + $0x150] sm:$0xf] }
  0x24   : > { %7794 = vmatpush.bf16.msra.mxu3 %v5743_v29  ;;  %3288 = vmatpush.bf16.msra.mxu1 %v5743_v29  ;;  %v7420_v17 = vld [vmem:[%s11619_s1 + $0x154] sm:$0xf0]  ;;  %v5886_v18 = vld [vmem:[%s11619_s1 + $0x1d0] sm:$0xf]  ;;  %v6022_v20 = vld [vmem:[%s11619_s1 + $0x2e0] sm:$0xf]  ;;  %v5959_v22 = vor.u32 %v7454_v13, %v5958_v12 }
  0x25   : > { %v7436_v19 = vld [vmem:[%s11619_s1 + $0x1d4] sm:$0xf0]  ;;  %v7470_v21 = vld [vmem:[%s11619_s1 + $0x2e4] sm:$0xf0]  ;;  %v5823_v23 = vor.u32 %v7420_v17, %v5822_v16  ;;  %v5950_v24 = vld [vmem:[%s11619_s1 + $0x250] sm:$0xf] }
  0x26   : > { %v7452_v25 = vld [vmem:[%s11619_s1 + $0x254] sm:$0xf0]  ;;  %v5887_v26 = vor.u32 %v7436_v19, %v5886_v18  ;;  %v6023_v27 = vor.u32 %v7470_v21, %v6022_v20  ;;  %v5814_v28 = vld [vmem:[%s11619_s1 + $0x140] sm:$0xf]  ;;  %v7418_v29 = vld [vmem:[%s11619_s1 + $0x144] sm:$0xf0] }
  0x27   : > { %7787 = vmatpush.bf16.msra.mxu2 %v5671_v34  ;;  %3260 = vmatpush.bf16.msra.mxu0 %v5671_v34  ;;  %v5878_v30 = vld [vmem:[%s11619_s1 + $0x1c0] sm:$0xf]  ;;  %v7434_v31 = vld [vmem:[%s11619_s1 + $0x1c4] sm:$0xf0]  ;;  %v6014_v32 = vld [vmem:[%s11619_s1 + $0x2d0] sm:$0xf]  ;;  %v5951_v34 = vor.u32 %v7452_v25, %v5950_v24 }
  0x28   : > { %7795 = vmatpush.bf16.msra.mxu3 %v5735_v35  ;;  %3289 = vmatpush.bf16.msra.mxu1 %v5735_v35  ;;  %v7468_v33 = vld [vmem:[%s11619_s1 + $0x2d4] sm:$0xf0]  ;;  %v5815_v35 = vor.u32 %v7418_v29, %v5814_v28  ;;  %v5942_v36 = vld [vmem:[%s11619_s1 + $0x240] sm:$0xf]  ;;  %v7450_v37 = vld [vmem:[%s11619_s1 + $0x244] sm:$0xf0]  ;;  %v5879_v38 = vor.u32 %v7434_v31, %v5878_v30 }
  0x29   : > { %v6015_v39 = vor.u32 %v7468_v33, %v6014_v32  ;;  %v7364_v41 = vld [vmem:[%s8137_s12 + $0x2b8] sm:$0xf0]  ;;  %v5806_v42 = vld [vmem:[%s11619_s1 + $0x130] sm:$0xf]  ;;  %v5556_v46 = vld [vmem:[%s8137_s12 + $0x2bc] sm:$0xf0]  ;;  %v5943_v50 = vor.u32 %v7450_v37, %v5942_v36 }
  0x2a   : > { %v5870_v44 = vld [vmem:[%s11619_s1 + $0x1b0] sm:$0xf]  ;;  %v7352_v45 = vld [vmem:[%s8137_s12 + $0x25c] sm:$0xf]  ;;  %v7432_v47 = vld [vmem:[%s11619_s1 + $0x1b4] sm:$0xf0] }
  0x2b   : > { %7788 = vmatpush.bf16.msra.mxu2 %v5663_v40  ;;  %3261 = vmatpush.bf16.msra.mxu0 %v5663_v40  ;;  %v5554_v40 = vld [vmem:[%s8137_s12 + $0x258] sm:$0xf]  ;;  %v6006_v48 = vld [vmem:[%s11619_s1 + $0x2c0] sm:$0xf]  ;;  %v7466_v49 = vld [vmem:[%s11619_s1 + $0x2c4] sm:$0xf0]  ;;  %v8309_v6 = vor.u32 %v7352_v45, %v5556_v46 }
  0x2c   : > { %7796 = vmatpush.bf16.msra.mxu3 %v5727_v43  ;;  %3290 = vmatpush.bf16.msra.mxu1 %v5727_v43  ;;  %v7416_v43 = vld [vmem:[%s11619_s1 + $0x134] sm:$0xf0]  ;;  %v5354_v51 = vld [vmem:[%s8137_s12 + $0xc8] sm:$0xf]  ;;  %v7314_v52 = vld [vmem:[%s8137_s12 + $0x128] sm:$0xf0]  ;;  %v6007_v59 = vor.u32 %v7466_v49, %v6006_v48 }
  0x2d   : > { %v5807_v54 = vor.u32 %v7416_v43, %v5806_v42  ;;  %v7448_v55 = vld [vmem:[%s11619_s1 + $0x234] sm:$0xf0]  ;;  %v7302_v56 = vld [vmem:[%s8137_s12 + $0xcc] sm:$0xf]  ;;  %v5356_v57 = vld [vmem:[%s8137_s12 + $0x12c] sm:$0xf0]  ;;  %v8298_v0 = vor.u32 %v7314_v52, %v5354_v51 }
  0x2e   : > { %v5798_v60 = vld [vmem:[%s11619_s1 + $0x120] sm:$0xf]  ;;  %v7430_v1 = vld [vmem:[%s11619_s1 + $0x1a4] sm:$0xf0]  ;;  %v5998_v2 = vld [vmem:[%s11619_s1 + $0x2b0] sm:$0xf] }
  0x2f   : > { %7789 = vmatpush.bf16.msra.mxu2 %v5655_v53  ;;  %3262 = vmatpush.bf16.msra.mxu0 %v5655_v53  ;;  %v5934_v53 = vld [vmem:[%s11619_s1 + $0x230] sm:$0xf]  ;;  %v5862_v62 = vld [vmem:[%s11619_s1 + $0x1a0] sm:$0xf]  ;;  %v7464_v5 = vld [vmem:[%s11619_s1 + $0x2b4] sm:$0xf0] }
  0x30   : > { %7797 = vmatpush.bf16.msra.mxu3 %v5719_v58  ;;  %3291 = vmatpush.bf16.msra.mxu1 %v5719_v58  ;;  %v5871_v58 = vor.u32 %v7432_v47, %v5870_v44  ;;  %v5935_v7 = vor.u32 %v7448_v55, %v5934_v53  ;;  %v5926_v12 = vld [vmem:[%s11619_s1 + $0x220] sm:$0xf]  ;;  %v7446_v13 = vld [vmem:[%s11619_s1 + $0x224] sm:$0xf0]  ;;  %v5790_v16 = vld [vmem:[%s11619_s1 + $0x110] sm:$0xf] }
  0x31   : > { %v7412_v17 = vld [vmem:[%s11619_s1 + $0x114] sm:$0xf0]  ;;  %v5854_v18 = vld [vmem:[%s11619_s1 + $0x190] sm:$0xf]  ;;  %v5990_v20 = vld [vmem:[%s11619_s1 + $0x2a0] sm:$0xf] }
  0x32   : > { %3273 = vmatmul.bf16.vlgmr.msra.gmra.mxu2 %v8180_v3  ;;  %3263 = vmatmul.bf16.vlgmr.msra.gmra.mxu0 %v8182_v4  ;;  %v7428_v19 = vld [vmem:[%s11619_s1 + $0x194] sm:$0xf0]  ;;  %v7462_v21 = vld [vmem:[%s11619_s1 + $0x2a4] sm:$0xf0]  ;;  %v5918_v24 = vld [vmem:[%s11619_s1 + $0x210] sm:$0xf] }
  0x33   : > { %3313 = vmatpush.bf16.msrb.mxu2 %v5839_v61  ;;  %3302 = vmatmul.bf16.vlgmr.msra.gmra.mxu3 %v8193_v8  ;;  %v7414_v61 = vld [vmem:[%s11619_s1 + $0x124] sm:$0xf0]  ;;  %v7444_v25 = vld [vmem:[%s11619_s1 + $0x214] sm:$0xf0]  ;;  %v5991_v28 = vor.u32 %v7462_v21, %v5990_v20  ;;  %v5846_v30 = vld [vmem:[%s11619_s1 + $0x180] sm:$0xf] }
  0x34   : > { %3342 = vmatpush.bf16.msrb.mxu3 %v5903_v63  ;;  %3371 = vmatpush.bf16.msrb.mxu0 %v5967_v9  ;;  %v8296_v63 = vor.u32 %v7364_v41, %v5554_v40  ;;  %v8311_v9 = vor.u32 %v7302_v56, %v5356_v57  ;;  %v7410_v29 = vld [vmem:[%s11619_s1 + $0x104] sm:$0xf0]  ;;  %v5982_v32 = vld [vmem:[%s11619_s1 + $0x290] sm:$0xf]  ;;  %v7460_v33 = vld [vmem:[%s11619_s1 + $0x294] sm:$0xf0] }
  0x35   : > { %3292 = vmatmul.bf16.vlgmr.msra.gmra.mxu1 %v8195_v10  ;;  %v7426_v31 = vld [vmem:[%s11619_s1 + $0x184] sm:$0xf0]  ;;  %v7488_v36 = vld [vmem:[%s11619_s1 + $0x374] sm:$0xf0]  ;;  %v6158_v37 = vld [vmem:[%s11619_s1 + $0x3f0] sm:$0xf]  ;;  %v5983_v43 = vor.u32 %v7460_v33, %v5982_v32 }
  0x36   : > { %3400 = vmatpush.bf16.msrb.mxu1 %v6031_v15  ;;  %v5999_v15 = vor.u32 %v7464_v5, %v5998_v2  ;;  %v5910_v40 = vld [vmem:[%s11619_s1 + $0x200] sm:$0xf]  ;;  %v7442_v41 = vld [vmem:[%s11619_s1 + $0x204] sm:$0xf0]  ;;  %v5847_v42 = vor.u32 %v7426_v31, %v5846_v30  ;;  %v7290_v45 = vld [vmem:[%s8137_s12 + $0x68] sm:$0xf0] }
  0x37   : > { %3314 = vmatpush.bf16.msrb.mxu2 %v5831_v11  ;;  %v5799_v11 = vor.u32 %v7414_v61, %v5798_v60  ;;  %v5262_v44 = vld [vmem:[%s8137_s12 + $0x8] sm:$0xf]  ;;  %v6222_v46 = vld [vmem:[%s11619_s1 + $0x470] sm:$0xf]  ;;  %v7520_v47 = vld [vmem:[%s11619_s1 + $0x474] sm:$0xf0] }
  0x38   : > { %3343 = vmatpush.bf16.msrb.mxu3 %v5895_v14  ;;  %3372 = vmatpush.bf16.msrb.mxu0 %v5959_v22  ;;  %v5863_v14 = vor.u32 %v7430_v1, %v5862_v62  ;;  %v5927_v22 = vor.u32 %v7446_v13, %v5926_v12  ;;  %v7278_v48 = vld [vmem:[%s8137_s12 + $0xc] sm:$0xf]  ;;  %v5264_v49 = vld [vmem:[%s8137_s12 + $0x6c] sm:$0xf0]  ;;  %v5974_v51 = vld [vmem:[%s11619_s1 + $0x280] sm:$0xf]  ;;  %v6223_v61 = vor.u32 %v7520_v47, %v6222_v46 }
  0x39   : > { %v7458_v52 = vld [vmem:[%s11619_s1 + $0x284] sm:$0xf0]  ;;  %v5270_v55 = vld [vmem:[%s8137_s12 + $0x10] sm:$0xf]  ;;  %v7291_v56 = vld [vmem:[%s8137_s12 + $0x70] sm:$0xf0] }
  0x3a   : > { %3401 = vmatpush.bf16.msrb.mxu1 %v6023_v27  ;;  %v5855_v27 = vor.u32 %v7428_v19, %v5854_v18  ;;  %v7279_v57 = vld [vmem:[%s8137_s12 + $0x14] sm:$0xf]  ;;  %v7486_v60 = vld [vmem:[%s11619_s1 + $0x364] sm:$0xf0]  ;;  %v5975_v62 = vor.u32 %v7458_v52, %v5974_v51  ;;  %v6150_v1 = vld [vmem:[%s11619_s1 + $0x3e0] sm:$0xf] }
  0x3b   : > { %3315 = vmatpush.bf16.msrb.mxu2 %v5823_v23  ;;  %v5791_v23 = vor.u32 %v7412_v17, %v5790_v16  ;;  %v7502_v2 = vld [vmem:[%s11619_s1 + $0x3e4] sm:$0xf0]  ;;  %v6286_v5 = vld [vmem:[%s11619_s1 + $0x4f0] sm:$0xf]  ;;  %v7536_v12 = vld [vmem:[%s11619_s1 + $0x4f4] sm:$0xf0] }
  0x3c   : > { %3344 = vmatpush.bf16.msrb.mxu3 %v5887_v26  ;;  %3373 = vmatpush.bf16.msrb.mxu0 %v5951_v34  ;;  %v5782_v26 = vld [vmem:[%s11619_s1 + $0x100] sm:$0xf]  ;;  %v6094_v34 = vld [vmem:[%s11619_s1 + $0x370] sm:$0xf]  ;;  %v6151_v18 = vor.u32 %v7502_v2, %v6150_v1  ;;  %v7484_v20 = vld [vmem:[%s11619_s1 + $0x354] sm:$0xf0]  ;;  %v6287_v21 = vor.u32 %v7536_v12, %v6286_v5 }
  0x3d   : > { %v6214_v13 = vld [vmem:[%s11619_s1 + $0x460] sm:$0xf]  ;;  %v6078_v19 = vld [vmem:[%s11619_s1 + $0x350] sm:$0xf]  ;;  %v7482_v32 = vld [vmem:[%s11619_s1 + $0x344] sm:$0xf0] }
  0x3e   : > { %3402 = vmatpush.bf16.msrb.mxu1 %v6015_v39  ;;  %v5783_v39 = vor.u32 %v7410_v29, %v5782_v26  ;;  %v7534_v26 = vld [vmem:[%s11619_s1 + $0x4e4] sm:$0xf0]  ;;  %v6079_v29 = vor.u32 %v7484_v20, %v6078_v19  ;;  %v6070_v31 = vld [vmem:[%s11619_s1 + $0x340] sm:$0xf]  ;;  %v7315_v46 = vld [vmem:[%s8137_s12 + $0x130] sm:$0xf0] }
  0x3f   : > { %3316 = vmatpush.bf16.msrb.mxu2 %v5815_v35  ;;  %v5919_v35 = vor.u32 %v7444_v25, %v5918_v24  ;;  %v6278_v25 = vld [vmem:[%s11619_s1 + $0x4e0] sm:$0xf]  ;;  %v7303_v52 = vld [vmem:[%s8137_s12 + $0xd4] sm:$0xf]  ;;  %v7478_v1 = vld [vmem:[%s11619_s1 + $0x324] sm:$0xf0] }
  0x40   : > { %3345 = vmatpush.bf16.msrb.mxu3 %v5879_v38  ;;  %3374 = vmatpush.bf16.msrb.mxu0 %v5943_v50  ;;  %v7504_v38 = vld [vmem:[%s11619_s1 + $0x3f4] sm:$0xf0]  ;;  %v6095_v50 = vor.u32 %v7488_v36, %v6094_v34  ;;  %v6279_v33 = vor.u32 %v7534_v26, %v6278_v25  ;;  %v6134_v34 = vld [vmem:[%s11619_s1 + $0x3c0] sm:$0xf]  ;;  %v6254_v19 = vld [vmem:[%s11619_s1 + $0x4b0] sm:$0xf] }
  0x41   : > { %v6159_v53 = vor.u32 %v7504_v38, %v6158_v37  ;;  %v6270_v37 = vld [vmem:[%s11619_s1 + $0x4d0] sm:$0xf]  ;;  %v7532_v38 = vld [vmem:[%s11619_s1 + $0x4d4] sm:$0xf0]  ;;  %v6262_v51 = vld [vmem:[%s11619_s1 + $0x4c0] sm:$0xf] }
  0x42   : > { %3403 = vmatpush.bf16.msrb.mxu1 %v6007_v59  ;;  %3278 = vmatmul.bf16.gmra.mxu2 %v8296_v63  ;;  %v6086_v59 = vld [vmem:[%s11619_s1 + $0x360] sm:$0xf]  ;;  %v6271_v47 = vor.u32 %v7532_v38, %v6270_v37  ;;  %v7528_v20 = vld [vmem:[%s11619_s1 + $0x4b4] sm:$0xf0]  ;;  %v6046_v26 = vld [vmem:[%s11619_s1 + $0x310] sm:$0xf] }
  0x43   : > { %3317 = vmatpush.bf16.msrb.mxu2 %v5807_v54  ;;  %3268 = vmatmul.bf16.gmra.mxu0 %v8298_v0  ;;  %v5911_v54 = vor.u32 %v7442_v41, %v5910_v40  ;;  %v6087_v16 = vor.u32 %v7486_v60, %v6086_v59  ;;  %v7514_v40 = vld [vmem:[%s11619_s1 + $0x444] sm:$0xf0]  ;;  %v6071_v41 = vor.u32 %v7482_v32, %v6070_v31  ;;  %v7304_v60 = vld [vmem:[%s8137_s12 + $0xdc] sm:$0xf]  ;;  %v5372_v2 = vld [vmem:[%s8137_s12 + $0x13c] sm:$0xf0] }
  0x44   : > { %3346 = vmatpush.bf16.msrb.mxu3 %v5871_v58  ;;  %3375 = vmatpush.bf16.msrb.mxu0 %v5935_v7  ;;  %v5272_v58 = vld [vmem:[%s8137_s12 + $0x74] sm:$0xf0]  ;;  %v8418_v7 = vor.u32 %v7290_v45, %v5262_v44  ;;  %v5362_v45 = vld [vmem:[%s8137_s12 + $0xd0] sm:$0xf]  ;;  %v6118_v12 = vld [vmem:[%s11619_s1 + $0x3a0] sm:$0xf]  ;;  %v6255_v25 = vor.u32 %v7528_v20, %v6254_v19 }
  0x45   : > { %3307 = vmatmul.bf16.gmra.mxu3 %v8309_v6  ;;  %3297 = vmatmul.bf16.gmra.mxu1 %v8311_v9  ;;  %v8433_v17 = vor.u32 %v7279_v57, %v5272_v58  ;;  %v7480_v44 = vld [vmem:[%s11619_s1 + $0x334] sm:$0xf0]  ;;  %v7316_v58 = vld [vmem:[%s8137_s12 + $0x138] sm:$0xf0]  ;;  %v6182_v31 = vld [vmem:[%s11619_s1 + $0x420] sm:$0xf] }
  0x46   : > { %3404 = vmatpush.bf16.msrb.mxu1 %v5999_v15  ;;  %v8431_v15 = vor.u32 %v7278_v48, %v5264_v49  ;;  %v6126_v48 = vld [vmem:[%s11619_s1 + $0x3b0] sm:$0xf]  ;;  %v7496_v49 = vld [vmem:[%s11619_s1 + $0x3b4] sm:$0xf0]  ;;  %v7510_v32 = vld [vmem:[%s11619_s1 + $0x424] sm:$0xf0] }
  0x47   : > { %3318 = vmatpush.bf16.msrb.mxu2 %v5799_v11  ;;  %v8420_v11 = vor.u32 %v7291_v56, %v5270_v55  ;;  %v7512_v55 = vld [vmem:[%s11619_s1 + $0x434] sm:$0xf0]  ;;  %v6038_v37 = vld [vmem:[%s11619_s1 + $0x300] sm:$0xf]  ;;  %v7474_v38 = vld [vmem:[%s11619_s1 + $0x304] sm:$0xf0] }
  0x48   : > { %3347 = vmatpush.bf16.msrb.mxu3 %v5863_v14  ;;  %3376 = vmatpush.bf16.msrb.mxu0 %v5927_v22  ;;  %v7518_v14 = vld [vmem:[%s11619_s1 + $0x464] sm:$0xf0]  ;;  %v6142_v22 = vld [vmem:[%s11619_s1 + $0x3d0] sm:$0xf]  ;;  %v5364_v56 = vld [vmem:[%s8137_s12 + $0x134] sm:$0xf0] }
  0x49   : > { %v6215_v24 = vor.u32 %v7518_v14, %v6214_v13  ;;  %v5370_v57 = vld [vmem:[%s8137_s12 + $0xd8] sm:$0xf]  ;;  %v7494_v13 = vld [vmem:[%s11619_s1 + $0x3a4] sm:$0xf0]  ;;  %v6414_v20 = vld [vmem:[%s11619_s1 + $0x5f0] sm:$0xf] }
  0x4a   : > { %3405 = vmatpush.bf16.msrb.mxu1 %v5991_v28  ;;  %v7516_v28 = vld [vmem:[%s11619_s1 + $0x454] sm:$0xf0]  ;;  %s5247_s8 = sshll.u32 %s203_s7, 6 }
  0x4b   : > { %3319 = vmatpush.bf16.msrb.mxu2 %v5791_v23  ;;  %v7500_v23 = vld [vmem:[%s11619_s1 + $0x3d4] sm:$0xf0]  ;;  %s11393_s15 = scalar_lea.vmem [#allocation2], %s5247_s8  }
  0x4c   : > { %3348 = vmatpush.bf16.msrb.mxu3 %v5855_v27  ;;  %3377 = vmatpush.bf16.msrb.mxu0 %v5919_v35  ;;  %v6206_v27 = vld [vmem:[%s11619_s1 + $0x450] sm:$0xf]  ;;  %v6143_v30 = vor.u32 %v7500_v23, %v6142_v22  ;;  %v7498_v35 = vld [vmem:[%s11619_s1 + $0x3c4] sm:$0xf0]  ;;  %v8543_v23 = vor.u32 %v7304_v60, %v5372_v2  ;;  %v7552_v19 = vld [vmem:[%s11619_s1 + $0x574] sm:$0xf0] }
  0x4d   : > { %v6207_v36 = vor.u32 %v7516_v28, %v6206_v27  ;;  %v7476_v27 = vld [vmem:[%s11619_s1 + $0x314] sm:$0xf0]  ;;  %v6110_v28 = vld [vmem:[%s11619_s1 + $0x390] sm:$0xf]  ;;  %v5472_v60 = vld [vmem:[%s8137_s12 + $0x204] sm:$0xf0] }
  0x4e   : > { %3406 = vmatpush.bf16.msrb.mxu1 %v5983_v43  ;;  %v6062_v43 = vld [vmem:[%s11619_s1 + $0x330] sm:$0xf] }
  0x4f   : > { %3320 = vmatpush.bf16.msrb.mxu2 %v5783_v39  ;;  %v6198_v39 = vld [vmem:[%s11619_s1 + $0x440] sm:$0xf]  ;;  %v6063_v59 = vor.u32 %v7480_v44, %v6062_v43  ;;  %v6174_v43 = vld [vmem:[%s11619_s1 + $0x410] sm:$0xf] }
  0x50   : > { %3349 = vmatpush.bf16.msrb.mxu3 %v5847_v42  ;;  %3378 = vmatpush.bf16.msrb.mxu0 %v5911_v54  ;;  %v6135_v42 = vor.u32 %v7498_v35, %v6134_v34  ;;  %v6190_v54 = vld [vmem:[%s11619_s1 + $0x430] sm:$0xf]  ;;  %v6183_v34 = vor.u32 %v7510_v32, %v6182_v31  ;;  %v6246_v35 = vld [vmem:[%s11619_s1 + $0x4a0] sm:$0xf]  ;;  %v7584_v32 = vld [vmem:[%s11619_s1 + $0x674] sm:$0xf0] }
  0x51   : > { %v6191_v14 = vor.u32 %v7512_v55, %v6190_v54  ;;  %v5470_v54 = vld [vmem:[%s8137_s12 + $0x1a0] sm:$0xf]  ;;  %v7341_v55 = vld [vmem:[%s8137_s12 + $0x200] sm:$0xf0]  ;;  %v6478_v31 = vld [vmem:[%s11619_s1 + $0x670] sm:$0xf] }
  0x52   : > { %3407 = vmatpush.bf16.msrb.mxu1 %v5975_v62  ;;  %3321 = vmatmul.bf16.vlgmr.msrb.gmra.mxu2 %v8418_v7  ;;  %v6054_v62 = vld [vmem:[%s11619_s1 + $0x320] sm:$0xf] }
  0x53   : > { %3429 = vmatpush.bf16.msra.mxu2 %v6095_v50  ;;  %3379 = vmatmul.bf16.vlgmr.msrb.gmra.mxu0 %v8420_v11  ;;  %v6199_v50 = vor.u32 %v7514_v40, %v6198_v39  ;;  %v6055_v22 = vor.u32 %v7478_v1, %v6054_v62  ;;  %v6039_v40 = vor.u32 %v7474_v38, %v6038_v37  ;;  %v5562_v38 = vld [vmem:[%s8137_s12 + $0x260] sm:$0xf] }
  0x54   : > { %3458 = vmatpush.bf16.msra.mxu3 %v6159_v53  ;;  %3487 = vmatpush.bf16.msra.mxu0 %v6223_v61  ;;  %v7530_v53 = vld [vmem:[%s11619_s1 + $0x4c4] sm:$0xf0]  ;;  %v6127_v61 = vor.u32 %v7496_v49, %v6126_v48  ;;  %v8613_v62 = vor.u32 %v7341_v55, %v5470_v54  ;;  %v7564_v54 = vld [vmem:[%s11619_s1 + $0x5d4] sm:$0xf0]  ;;  %v6470_v55 = vld [vmem:[%s11619_s1 + $0x660] sm:$0xf] }
  0x55   : > { %3350 = vmatmul.bf16.vlgmr.msrb.gmra.mxu3 %v8431_v15  ;;  %3408 = vmatmul.bf16.vlgmr.msrb.gmra.mxu1 %v8433_v17  ;;  %v6263_v5 = vor.u32 %v7530_v53, %v6262_v51  ;;  %v7506_v51 = vld [vmem:[%s11619_s1 + $0x404] sm:$0xf0]  ;;  %v7340_v53 = vld [vmem:[%s8137_s12 + $0x1f8] sm:$0xf0] }
  0x56   : > { %3516 = vmatpush.bf16.msra.mxu1 %v6287_v21  ;;  %v8541_v21 = vor.u32 %v7303_v52, %v5364_v56  ;;  %v5462_v52 = vld [vmem:[%s8137_s12 + $0x198] sm:$0xf] }
  0x57   : > { %3430 = vmatpush.bf16.msra.mxu2 %v6087_v16  ;;  %v8531_v16 = vor.u32 %v7315_v46, %v5362_v45  ;;  %v7508_v45 = vld [vmem:[%s11619_s1 + $0x414] sm:$0xf0]  ;;  %v6238_v46 = vld [vmem:[%s11619_s1 + $0x490] sm:$0xf] }
  0x58   : > { %3459 = vmatpush.bf16.msra.mxu3 %v6151_v18  ;;  %3488 = vmatpush.bf16.msra.mxu0 %v6215_v24  ;;  %v8533_v18 = vor.u32 %v7316_v58, %v5370_v57  ;;  %v6119_v24 = vor.u32 %v7494_v13, %v6118_v12  ;;  %v6175_v48 = vor.u32 %v7508_v45, %v6174_v43  ;;  %v7328_v57 = vld [vmem:[%s8137_s12 + $0x19c] sm:$0xf]  ;;  %v5464_v58 = vld [vmem:[%s8137_s12 + $0x1fc] sm:$0xf0]  ;;  %v7522_v12 = vld [vmem:[%s11619_s1 + $0x484] sm:$0xf0] }
  0x59   : > { %v8615_v1 = vor.u32 %v7328_v57, %v5464_v58  ;;  %v5564_v43 = vld [vmem:[%s8137_s12 + $0x2c4] sm:$0xf0]  ;;  %v5572_v45 = vld [vmem:[%s8137_s12 + $0x2cc] sm:$0xf0] }
  0x5a   : > { %3517 = vmatpush.bf16.msra.mxu1 %v6279_v33 }
  0x5b   : > { %3431 = vmatpush.bf16.msra.mxu2 %v6079_v29  ;;  %v6047_v29 = vor.u32 %v7476_v27, %v6046_v26  ;;  %v6342_v26 = vld [vmem:[%s11619_s1 + $0x560] sm:$0xf]  ;;  %v7550_v27 = vld [vmem:[%s11619_s1 + $0x564] sm:$0xf0] }
  0x5c   : > { %3460 = vmatpush.bf16.msra.mxu3 %v6143_v30  ;;  %3489 = vmatpush.bf16.msra.mxu0 %v6207_v36  ;;  %v7492_v30 = vld [vmem:[%s11619_s1 + $0x394] sm:$0xf0]  ;;  %v7526_v36 = vld [vmem:[%s11619_s1 + $0x4a4] sm:$0xf0] }
  0x5d   : > { %v6111_v33 = vor.u32 %v7492_v30, %v6110_v28  ;;  %v6247_v39 = vor.u32 %v7526_v36, %v6246_v35  ;;  %v6406_v28 = vld [vmem:[%s11619_s1 + $0x5e0] sm:$0xf]  ;;  %v7566_v30 = vld [vmem:[%s11619_s1 + $0x5e4] sm:$0xf0]  ;;  %v6542_v35 = vld [vmem:[%s11619_s1 + $0x6f0] sm:$0xf] }
  0x5e   : > { %3518 = vmatpush.bf16.msra.mxu1 %v6271_v47  ;;  %v7524_v47 = vld [vmem:[%s11619_s1 + $0x494] sm:$0xf0] }
  0x5f   : > { %3432 = vmatpush.bf16.msra.mxu2 %v6071_v41  ;;  %v6102_v41 = vld [vmem:[%s11619_s1 + $0x380] sm:$0xf]  ;;  %v6239_v49 = vor.u32 %v7524_v47, %v6238_v46  ;;  %v7600_v36 = vld [vmem:[%s11619_s1 + $0x6f4] sm:$0xf0] }
  0x60   : > { %3461 = vmatpush.bf16.msra.mxu3 %v6135_v42  ;;  %3490 = vmatpush.bf16.msra.mxu0 %v6199_v50  ;;  %v7490_v42 = vld [vmem:[%s11619_s1 + $0x384] sm:$0xf0]  ;;  %v6166_v50 = vld [vmem:[%s11619_s1 + $0x400] sm:$0xf]  ;;  %v6543_v37 = vor.u32 %v7600_v36, %v6542_v35  ;;  %v7281_v36 = vld [vmem:[%s8137_s12 + $0x24] sm:$0xf] }
  0x61   : > { %v6103_v44 = vor.u32 %v7490_v42, %v6102_v41  ;;  %v6167_v56 = vor.u32 %v7506_v51, %v6166_v50  ;;  %v7366_v41 = vld [vmem:[%s8137_s12 + $0x2c8] sm:$0xf0]  ;;  %v7353_v42 = vld [vmem:[%s8137_s12 + $0x264] sm:$0xf]  ;;  %v6334_v50 = vld [vmem:[%s11619_s1 + $0x550] sm:$0xf] }
  0x62   : > { %3519 = vmatpush.bf16.msra.mxu1 %v6263_v5  ;;  %3326 = vmatmul.bf16.gmra.mxu2 %v8531_v16  ;;  %v6230_v5 = vld [vmem:[%s11619_s1 + $0x480] sm:$0xf]  ;;  %v7548_v51 = vld [vmem:[%s11619_s1 + $0x554] sm:$0xf0] }
  0x63   : > { %3433 = vmatpush.bf16.msra.mxu2 %v6063_v59  ;;  %3384 = vmatmul.bf16.gmra.mxu0 %v8533_v18  ;;  %v7329_v59 = vld [vmem:[%s8137_s12 + $0x1a4] sm:$0xf]  ;;  %v6231_v13 = vor.u32 %v7522_v12, %v6230_v5  ;;  %v6326_v5 = vld [vmem:[%s11619_s1 + $0x540] sm:$0xf]  ;;  %v7546_v12 = vld [vmem:[%s11619_s1 + $0x544] sm:$0xf0] }
  0x64   : > { %3462 = vmatpush.bf16.msra.mxu3 %v6127_v61  ;;  %3491 = vmatpush.bf16.msra.mxu0 %v6191_v14  ;;  %v8611_v61 = vor.u32 %v7340_v53, %v5462_v52  ;;  %v8617_v2 = vor.u32 %v7329_v59, %v5472_v60  ;;  %v6350_v14 = vld [vmem:[%s11619_s1 + $0x570] sm:$0xf]  ;;  %v6335_v53 = vor.u32 %v7548_v51, %v6334_v50  ;;  %v6534_v59 = vld [vmem:[%s11619_s1 + $0x6e0] sm:$0xf]  ;;  %v7598_v60 = vld [vmem:[%s11619_s1 + $0x6e4] sm:$0xf0] }
  0x65   : > { %3355 = vmatmul.bf16.gmra.mxu3 %v8541_v21  ;;  %3413 = vmatmul.bf16.gmra.mxu1 %v8543_v23  ;;  %v6398_v52 = vld [vmem:[%s11619_s1 + $0x5d0] sm:$0xf]  ;;  %v5280_v35 = vld [vmem:[%s8137_s12 + $0x7c] sm:$0xf0]  ;;  %v7560_v50 = vld [vmem:[%s11619_s1 + $0x5b4] sm:$0xf0] }
  0x66   : > { %3520 = vmatpush.bf16.msra.mxu1 %v6255_v25  ;;  %v6399_v57 = vor.u32 %v7564_v54, %v6398_v52  ;;  %v6454_v51 = vld [vmem:[%s11619_s1 + $0x640] sm:$0xf]  ;;  %v7578_v52 = vld [vmem:[%s11619_s1 + $0x644] sm:$0xf0] }
  0x67   : > { %3434 = vmatpush.bf16.msra.mxu2 %v6055_v22  ;;  %v6351_v22 = vor.u32 %v7552_v19, %v6350_v14  ;;  %v6327_v14 = vor.u32 %v7546_v12, %v6326_v5  ;;  %v6390_v19 = vld [vmem:[%s11619_s1 + $0x5c0] sm:$0xf]  ;;  %v6455_v54 = vor.u32 %v7578_v52, %v6454_v51  ;;  %v7542_v5 = vld [vmem:[%s11619_s1 + $0x524] sm:$0xf0] }
  0x68   : > { %3463 = vmatpush.bf16.msra.mxu3 %v6119_v24  ;;  %3492 = vmatpush.bf16.msra.mxu0 %v6183_v34  ;;  %v7568_v24 = vld [vmem:[%s11619_s1 + $0x5f4] sm:$0xf0]  ;;  %v6479_v34 = vor.u32 %v7584_v32, %v6478_v31  ;;  %v7292_v31 = vld [vmem:[%s8137_s12 + $0x78] sm:$0xf0]  ;;  %v5286_v32 = vld [vmem:[%s8137_s12 + $0x20] sm:$0xf] }
  0x69   : > { %v6415_v25 = vor.u32 %v7568_v24, %v6414_v20  ;;  %v7562_v20 = vld [vmem:[%s11619_s1 + $0x5c4] sm:$0xf0]  ;;  %v6438_v51 = vld [vmem:[%s11619_s1 + $0x620] sm:$0xf] }
  0x6a   : > { %3521 = vmatpush.bf16.msra.mxu1 %v6247_v39  ;;  %v7365_v39 = vld [vmem:[%s8137_s12 + $0x2c0] sm:$0xf0]  ;;  %v6391_v24 = vor.u32 %v7562_v20, %v6390_v19  ;;  %v6446_v19 = vld [vmem:[%s11619_s1 + $0x630] sm:$0xf]  ;;  %v5386_v20 = vld [vmem:[%s8137_s12 + $0xe8] sm:$0xf] }
  0x6b   : > { %3435 = vmatpush.bf16.msra.mxu2 %v6047_v29  ;;  %v6343_v29 = vor.u32 %v7550_v27, %v6342_v26  ;;  %v8673_v46 = vor.u32 %v7365_v39, %v5562_v38  ;;  %v6526_v26 = vld [vmem:[%s11619_s1 + $0x6d0] sm:$0xf]  ;;  %v7596_v27 = vld [vmem:[%s11619_s1 + $0x6d4] sm:$0xf0]  ;;  %v7574_v52 = vld [vmem:[%s11619_s1 + $0x624] sm:$0xf0] }
  0x6c   : > { %3464 = vmatpush.bf16.msra.mxu3 %v6111_v33  ;;  %3493 = vmatpush.bf16.msra.mxu0 %v6175_v48  ;;  %v6407_v33 = vor.u32 %v7566_v30, %v6406_v28  ;;  %v8677_v48 = vor.u32 %v7353_v42, %v5564_v43  ;;  %v5278_v30 = vld [vmem:[%s8137_s12 + $0x18] sm:$0xf]  ;;  %v6318_v42 = vld [vmem:[%s11619_s1 + $0x530] sm:$0xf] }
  0x6d   : > { %v8741_v38 = vor.u32 %v7292_v31, %v5278_v30  ;;  %v7544_v43 = vld [vmem:[%s11619_s1 + $0x534] sm:$0xf0]  ;;  %v5388_v30 = vld [vmem:[%s8137_s12 + $0x14c] sm:$0xf0] }
  0x6e   : > { %3522 = vmatpush.bf16.msra.mxu1 %v6239_v49 }
  0x6f   : > { %3436 = vmatpush.bf16.msra.mxu2 %v6039_v40  ;;  %v5570_v40 = vld [vmem:[%s8137_s12 + $0x268] sm:$0xf] }
  0x70   : > { %3465 = vmatpush.bf16.msra.mxu3 %v6103_v44  ;;  %3494 = vmatpush.bf16.msra.mxu0 %v6167_v56  ;;  %v7354_v44 = vld [vmem:[%s8137_s12 + $0x26c] sm:$0xf]  ;;  %v8675_v47 = vor.u32 %v7366_v41, %v5570_v40  ;;  %v7582_v56 = vld [vmem:[%s11619_s1 + $0x664] sm:$0xf0] }
  0x71   : > { %v8679_v49 = vor.u32 %v7354_v44, %v5572_v45  ;;  %v6471_v58 = vor.u32 %v7582_v56, %v6470_v55  ;;  %v6382_v44 = vld [vmem:[%s11619_s1 + $0x5b0] sm:$0xf]  ;;  %v6319_v45 = vor.u32 %v7544_v43, %v6318_v42  ;;  %v6518_v55 = vld [vmem:[%s11619_s1 + $0x6c0] sm:$0xf]  ;;  %v7594_v56 = vld [vmem:[%s11619_s1 + $0x6c4] sm:$0xf0] }
  0x72   : > { %3331 = vmatmul.bf16.gmra.mxu2 %v8611_v61  ;;  %3523 = vmatpush.bf16.msra.mxu1 %v6231_v13  ;;  %v6535_v13 = vor.u32 %v7598_v60, %v6534_v59  ;;  %v7317_v59 = vld [vmem:[%s8137_s12 + $0x140] sm:$0xf0]  ;;  %v6519_v60 = vor.u32 %v7594_v56, %v6518_v55  ;;  %v6302_v42 = vld [vmem:[%s11619_s1 + $0x510] sm:$0xf]  ;;  %v7540_v43 = vld [vmem:[%s11619_s1 + $0x514] sm:$0xf0] }
  0x73   : > { %3389 = vmatmul.bf16.gmra.mxu0 %v8613_v62  ;;  %3545 = vmatpush.bf16.msrb.mxu2 %v6351_v22  ;;  %11688 = vst [vmem:[#allocation3_spill] sm:$0xff] %v8679_v49  ;;  %v6462_v22 = vld [vmem:[%s11619_s1 + $0x650] sm:$0xf]  ;;  %v6502_v55 = vld [vmem:[%s11619_s1 + $0x6a0] sm:$0xf] }
  0x74   : > { %3574 = vmatpush.bf16.msrb.mxu3 %v6415_v25  ;;  %3603 = vmatpush.bf16.msrb.mxu0 %v6479_v34  ;;  %v7580_v25 = vld [vmem:[%s11619_s1 + $0x654] sm:$0xf0]  ;;  %v7280_v34 = vld [vmem:[%s8137_s12 + $0x1c] sm:$0xf]  ;;  %v7590_v56 = vld [vmem:[%s11619_s1 + $0x6a4] sm:$0xf0] }
  0x75   : > { %3360 = vmatmul.bf16.gmra.mxu3 %v8615_v1  ;;  %3418 = vmatmul.bf16.gmra.mxu1 %v8617_v2  ;;  %v6463_v28 = vor.u32 %v7580_v25, %v6462_v22  ;;  %v8745_v40 = vor.u32 %v7280_v34, %v5280_v35  ;;  %v7318_v22 = vld [vmem:[%s8137_s12 + $0x148] sm:$0xf0]  ;;  %v7576_v25 = vld [vmem:[%s11619_s1 + $0x634] sm:$0xf0]  ;;  %v6510_v35 = vld [vmem:[%s11619_s1 + $0x6b0] sm:$0xf] }
  0x76   : > { %3632 = vmatpush.bf16.msrb.mxu1 %v6543_v37  ;;  %v5288_v37 = vld [vmem:[%s8137_s12 + $0x84] sm:$0xf0] }
  0x77   : > { %3546 = vmatpush.bf16.msrb.mxu2 %v6343_v29  ;;  %v6527_v29 = vor.u32 %v7596_v27, %v6526_v26  ;;  %v8747_v41 = vor.u32 %v7281_v36, %v5288_v37  ;;  %v7305_v26 = vld [vmem:[%s8137_s12 + $0xe4] sm:$0xf]  ;;  %v5380_v27 = vld [vmem:[%s8137_s12 + $0x144] sm:$0xf0]  ;;  %v7592_v36 = vld [vmem:[%s11619_s1 + $0x6b4] sm:$0xf0] }
  0x78   : > { %3575 = vmatpush.bf16.msrb.mxu3 %v6407_v33  ;;  %3604 = vmatpush.bf16.msrb.mxu0 %v6471_v58  ;;  %v7293_v33 = vld [vmem:[%s8137_s12 + $0x80] sm:$0xf0]  ;;  %v5378_v58 = vld [vmem:[%s8137_s12 + $0xe0] sm:$0xf]  ;;  %v6511_v37 = vor.u32 %v7592_v36, %v6510_v35  ;;  %v5488_v35 = vld [vmem:[%s8137_s12 + $0x214] sm:$0xf0] }
  0x79   : > { %v8743_v39 = vor.u32 %v7293_v33, %v5286_v32  ;;  %11689 = vst [vmem:[#allocation4_spill] sm:$0xff] %v8747_v41  ;;  %v8803_v31 = vor.u32 %v7317_v59, %v5378_v58  ;;  %v8805_v32 = vor.u32 %v7318_v22, %v5386_v20  ;;  %v8807_v33 = vor.u32 %v7305_v26, %v5380_v27  ;;  %v745_v58 = vld [vmem:[%s11620_s2] sm:$0x3]  ;;  %v5478_v59 = vld [vmem:[%s8137_s12 + $0x1a8] sm:$0xf] }
  0x7a   : > { %3633 = vmatpush.bf16.msrb.mxu1 %v6535_v13  ;;  %v6374_v13 = vld [vmem:[%s11619_s1 + $0x5a0] sm:$0xf]  ;;  %v6430_v20 = vld [vmem:[%s11619_s1 + $0x610] sm:$0xf]  ;;  %v7572_v26 = vld [vmem:[%s11619_s1 + $0x614] sm:$0xf0] }
  0x7b   : > { %3547 = vmatpush.bf16.msrb.mxu2 %v6335_v53  ;;  %v6383_v53 = vor.u32 %v7560_v50, %v6382_v44  ;;  %v6366_v44 = vld [vmem:[%s11619_s1 + $0x590] sm:$0xf]  ;;  %v7556_v50 = vld [vmem:[%s11619_s1 + $0x594] sm:$0xf0]  ;;  %v7330_v27 = vld [vmem:[%s8137_s12 + $0x1ac] sm:$0xf] }
  0x7c   : > { %3576 = vmatpush.bf16.msrb.mxu3 %v6399_v57  ;;  %3605 = vmatpush.bf16.msrb.mxu0 %v6463_v28  ;;  %v6310_v57 = vld [vmem:[%s11619_s1 + $0x520] sm:$0xf]  ;;  %v6447_v28 = vor.u32 %v7576_v25, %v6446_v19  ;;  %v7554_v19 = vld [vmem:[%s11619_s1 + $0x584] sm:$0xf0]  ;;  %v5486_v22 = vld [vmem:[%s8137_s12 + $0x1b0] sm:$0xf] }
  0x7d   : > { %v6311_v12 = vor.u32 %v7542_v5, %v6310_v57  ;;  %v6294_v57 = vld [vmem:[%s11619_s1 + $0x500] sm:$0xf]  ;;  %v6503_v5 = vor.u32 %v7590_v56, %v6502_v55  ;;  %v6494_v36 = vld [vmem:[%s11619_s1 + $0x690] sm:$0xf] }
  0x7e   : > { %3634 = vmatpush.bf16.msrb.mxu1 %v6527_v29  ;;  %v7306_v29 = vld [vmem:[%s8137_s12 + $0xec] sm:$0xf] }
  0x7f   : > { %3548 = vmatpush.bf16.msrb.mxu2 %v6327_v14  ;;  %v7558_v14 = vld [vmem:[%s11619_s1 + $0x5a4] sm:$0xf0]  ;;  %v8809_v34 = vor.u32 %v7306_v29, %v5388_v30  ;;  %v7331_v29 = vld [vmem:[%s8137_s12 + $0x1b4] sm:$0xf]  ;;  %v6431_v30 = vor.u32 %v7572_v26, %v6430_v20  ;;  %v7632_v20 = vld [vmem:[%s11619_s1 + $0x7f4] sm:$0xf0] }
  0x80   : > { %3577 = vmatpush.bf16.msrb.mxu3 %v6391_v24  ;;  %3606 = vmatpush.bf16.msrb.mxu0 %v6455_v54  ;;  %v6375_v24 = vor.u32 %v7558_v14, %v6374_v13  ;;  %v6439_v54 = vor.u32 %v7574_v52, %v6438_v51  ;;  %v6358_v14 = vld [vmem:[%s11619_s1 + $0x580] sm:$0xf]  ;;  %v8895_v55 = vor.u32 %v7331_v29, %v5488_v35  ;;  %v5578_v35 = vld [vmem:[%s8137_s12 + $0x270] sm:$0xf] }
  0x81   : > { %11690 = vst [vmem:[#allocation5_spill] sm:$0xff] %v8809_v34  ;;  %v6359_v25 = vor.u32 %v7554_v19, %v6358_v14  ;;  %v6422_v52 = vld [vmem:[%s11619_s1 + $0x600] sm:$0xf]  ;;  %v6670_v14 = vld [vmem:[%s11619_s1 + $0x7f0] sm:$0xf] }
  0x82   : > { %3336 = vmatmul.bf16.gmra.mxu2 %v8673_v46  ;;  %3635 = vmatpush.bf16.msrb.mxu1 %v6519_v60  ;;  %v7342_v60 = vld [vmem:[%s8137_s12 + $0x208] sm:$0xf0]  ;;  %11694 = vst [vmem:[#allocation9_spill] sm:$0xff] %v8895_v55 }
  0x83   : > { %3394 = vmatmul.bf16.gmra.mxu0 %v8675_v47  ;;  %3549 = vmatpush.bf16.msrb.mxu2 %v6319_v45  ;;  %v6303_v45 = vor.u32 %v7540_v43, %v6302_v42  ;;  %v8880_v42 = vperm.slane %v745_v58, 0  ;;  %v8882_v43 = vor.u32 %v7342_v60, %v5478_v59  ;;  %v6486_v58 = vld [vmem:[%s11619_s1 + $0x680] sm:$0xf]  ;;  %v7586_v59 = vld [vmem:[%s11619_s1 + $0x684] sm:$0xf0] }
  0x84   : > { %3578 = vmatpush.bf16.msrb.mxu3 %v6383_v53  ;;  %3607 = vmatpush.bf16.msrb.mxu0 %v6447_v28  ;;  %v6367_v53 = vor.u32 %v7556_v50, %v6366_v44  ;;  %v5480_v28 = vld [vmem:[%s8137_s12 + $0x20c] sm:$0xf0] }
  0x85   : > { %3365 = vmatmul.bf16.gmra.mxu3 %v8677_v48  ;;  %3423 = vmatmul.bf16.gmra.mxu1 %v8679_v49  ;;  %11691 = vst [vmem:[#allocation6_spill] sm:$0xff] %v8882_v43  ;;  %v8886_v51 = vor.u32 %v7330_v27, %v5480_v28 }
  0x86   : > { %3636 = vmatpush.bf16.msrb.mxu1 %v6511_v37  ;;  %v7588_v37 = vld [vmem:[%s11619_s1 + $0x694] sm:$0xf0] }
  0x87   : > { %3550 = vmatpush.bf16.msrb.mxu2 %v6311_v12  ;;  %v7538_v12 = vld [vmem:[%s11619_s1 + $0x504] sm:$0xf0]  ;;  %11693 = vst [vmem:[#allocation8_spill] sm:$0xff] %v8886_v51 }
  0x88   : > { %3579 = vmatpush.bf16.msrb.mxu3 %v6375_v24  ;;  %3608 = vmatpush.bf16.msrb.mxu0 %v6439_v54  ;;  %v6295_v13 = vor.u32 %v7538_v12, %v6294_v57  ;;  %v7343_v24 = vld [vmem:[%s8137_s12 + $0x210] sm:$0xf0]  ;;  %v6606_v12 = vld [vmem:[%s11619_s1 + $0x770] sm:$0xf] }
  0x89   : > { %v8884_v44 = vor.u32 %v7343_v24, %v5486_v22  ;;  %v6671_v24 = vor.u32 %v7632_v20, %v6670_v14  ;;  %v7356_v20 = vld [vmem:[%s8137_s12 + $0x27c] sm:$0xf] }
  0x8a   : > { %3637 = vmatpush.bf16.msrb.mxu1 %v6503_v5  ;;  %v6487_v5 = vor.u32 %v7586_v59, %v6486_v58  ;;  %v6734_v58 = vld [vmem:[%s11619_s1 + $0x870] sm:$0xf]  ;;  %v7648_v59 = vld [vmem:[%s11619_s1 + $0x874] sm:$0xf0] }
  0x8b   : > { %3551 = vmatpush.bf16.msrb.mxu2 %v6303_v45  ;;  %11692 = vst [vmem:[#allocation7_spill] sm:$0xff] %v8884_v44  ;;  %v6495_v45 = vor.u32 %v7588_v37, %v6494_v36  ;;  %v7367_v36 = vld [vmem:[%s8137_s12 + $0x2d0] sm:$0xf0]  ;;  %v5586_v37 = vld [vmem:[%s8137_s12 + $0x278] sm:$0xf]  ;;  %v6735_v14 = vor.u32 %v7648_v59, %v6734_v58 }
  0x8c   : > { %3580 = vmatpush.bf16.msrb.mxu3 %v6367_v53  ;;  %3609 = vmatpush.bf16.msrb.mxu0 %v6431_v30  ;;  %v7570_v53 = vld [vmem:[%s11619_s1 + $0x604] sm:$0xf0]  ;;  %v7612_v58 = vld [vmem:[%s11619_s1 + $0x754] sm:$0xf0] }
  0x8d   : > { %v6423_v56 = vor.u32 %v7570_v53, %v6422_v52  ;;  %v6598_v52 = vld [vmem:[%s11619_s1 + $0x760] sm:$0xf]  ;;  %v7614_v53 = vld [vmem:[%s11619_s1 + $0x764] sm:$0xf0] }
  0x8e   : > { %3638 = vmatpush.bf16.msrb.mxu1 %v6495_v45  ;;  %v7368_v45 = vld [vmem:[%s8137_s12 + $0x2d8] sm:$0xf0] }
  0x8f   : > { %3552 = vmatpush.bf16.msrb.mxu2 %v6295_v13  ;;  %v7616_v13 = vld [vmem:[%s11619_s1 + $0x774] sm:$0xf0] }
  0x90   : > { %3581 = vmatpush.bf16.msrb.mxu3 %v6359_v25  ;;  %3610 = vmatpush.bf16.msrb.mxu0 %v6423_v56  ;;  %v6607_v19 = vor.u32 %v7616_v13, %v6606_v12  ;;  %v6599_v56 = vor.u32 %v7614_v53, %v6598_v52  ;;  %v5580_v12 = vld [vmem:[%s8137_s12 + $0x2d4] sm:$0xf0] }
  0x92   : > { %3437 = vmatmul.bf16.vlgmr.msra.gmra.mxu2 %v8741_v38  ;;  %3639 = vmatpush.bf16.msrb.mxu1 %v6487_v5  ;;  %v7355_v5 = vld [vmem:[%s8137_s12 + $0x274] sm:$0xf] }
  0x93   : > { %3495 = vmatmul.bf16.vlgmr.msra.gmra.mxu0 %v8743_v39  ;;  %3661 = vmatpush.bf16.msra.mxu2 %v6607_v19 }
  0x94   : > { %3719 = vmatpush.bf16.msra.mxu0 %v6735_v14 }
  0x95   : > { %3466 = vmatmul.bf16.vlgmr.msra.gmra.mxu3 %v8745_v40  ;;  %3524 = vmatmul.bf16.vlgmr.msra.gmra.mxu1 %v8747_v41 }
  0x96   : > { %3690 = vmatpush.bf16.msra.mxu3 %v6671_v24 }
  0x97   : > { %3662 = vmatpush.bf16.msra.mxu2 %v6599_v56 }
  0xa2   : > { %3442 = vmatmul.bf16.gmra.mxu2 %v8803_v31 }
  0xa3   : > { %3500 = vmatmul.bf16.gmra.mxu0 %v8805_v32 }
  0xa5   : > { %3471 = vmatmul.bf16.gmra.mxu3 %v8807_v33  ;;  %3529 = vmatmul.bf16.gmra.mxu1 %v8809_v34 }
  0xaf   : > { %v3264_v50 = vpop.f32.mrf.mxu0 }
  0xb0   : > { %v3265_v54 = vadd.f32 %v3264_v50, %v8880_v42 }
  0xb2   : > { %v3293_v57 = vpop.f32.mrf.mxu1  ;;  %3447 = vmatmul.bf16.gmra.mxu2 %v8882_v43 }
  0xb3   : > { %v8904_v60 = vadd.f32 %v3293_v57, %v3265_v54  ;;  %3505 = vmatmul.bf16.gmra.mxu0 %v8884_v44  ;;  %v6662_v54 = vld [vmem:[%s11619_s1 + $0x7e0] sm:$0xf]  ;;  %v7630_v57 = vld [vmem:[%s11619_s1 + $0x7e4] sm:$0xf0] }
  0xb4   : > { %v6663_v13 = vor.u32 %v7630_v57, %v6662_v54 }
  0xb5   : > { %3476 = vmatmul.bf16.gmra.mxu3 %v8886_v51  ;;  %3534 = vmatmul.bf16.gmra.mxu1 %v8895_v55  ;;  %v3274_v22 = vpop.f32.mrf.mxu2  ;;  %v5304_v55 = vld [vmem:[%s8137_s12 + $0x94] sm:$0xf0] }
  0xb6   : > { %v3275_v25 = vadd.f32 %v3274_v22, %v8880_v42  ;;  %v3303_v26 = vpop.f32.mrf.mxu3  ;;  %v5588_v22 = vld [vmem:[%s8137_s12 + $0x2dc] sm:$0xf0]  ;;  %3691 = vmatpush.bf16.msra.mxu3 %v6663_v13 }
  0xb7   : > { %v3266_v27 = vpop.f32.mrf.mxu0  ;;  %v8963_v54 = vor.u32 %v7356_v20, %v5588_v22  ;;  %v6726_v13 = vld [vmem:[%s11619_s1 + $0x860] sm:$0xf]  ;;  %v7646_v20 = vld [vmem:[%s11619_s1 + $0x864] sm:$0xf0] }
  0xb8   : > { %v8922_v28 = vadd.f32 %v3303_v26, %v3275_v25  ;;  %v3267_v29 = vadd.f32 %v3266_v27, %v8880_v42  ;;  %v8954_v26 = vor.u32 %v7367_v36, %v5578_v35  ;;  %v8956_v27 = vor.u32 %v7368_v45, %v5586_v37  ;;  %v6798_v35 = vld [vmem:[%s11619_s1 + $0x8f0] sm:$0xf]  ;;  %v7664_v36 = vld [vmem:[%s11619_s1 + $0x8f4] sm:$0xf0] }
  0xb9   : > { %11698 = vst [vmem:[#allocation13_spill] sm:$0xff] %v8963_v54  ;;  %v6799_v37 = vor.u32 %v7664_v36, %v6798_v35  ;;  %v6590_v45 = vld [vmem:[%s11619_s1 + $0x750] sm:$0xf]  ;;  %v5294_v36 = vld [vmem:[%s8137_s12 + $0x28] sm:$0xf] }
  0xba   : > { %v3295_v30 = vpop.f32.mrf.mxu1  ;;  %11695 = vst [vmem:[#allocation10_spill] sm:$0xff] %v8954_v26  ;;  %v6591_v59 = vor.u32 %v7612_v58, %v6590_v45  ;;  %v5302_v45 = vld [vmem:[%s8137_s12 + $0x30] sm:$0xf]  ;;  %v7295_v58 = vld [vmem:[%s8137_s12 + $0x90] sm:$0xf0] }
  0xbb   : > { %v8929_v50 = vadd.f32 %v3295_v30, %v3267_v29  ;;  %11696 = vst [vmem:[#allocation11_spill] sm:$0xff] %v8956_v27  ;;  %v8958_v30 = vor.u32 %v7355_v5, %v5580_v12  ;;  %v6654_v5 = vld [vmem:[%s11619_s1 + $0x7d0] sm:$0xf]  ;;  %v7628_v12 = vld [vmem:[%s11619_s1 + $0x7d4] sm:$0xf0]  ;;  %3748 = vmatpush.bf16.msra.mxu1 %v6799_v37 }
  0xbc   : > { %3663 = vmatpush.bf16.msra.mxu2 %v6591_v59  ;;  %v7294_v37 = vld [vmem:[%s8137_s12 + $0x88] sm:$0xf0]  ;;  %v6790_v59 = vld [vmem:[%s11619_s1 + $0x8e0] sm:$0xf] }
  0xbd   : > { %v3276_v19 = vpop.f32.mrf.mxu2  ;;  %11697 = vst [vmem:[#allocation12_spill] sm:$0xff] %v8958_v30 }
  0xbe   : > { %v3277_v24 = vadd.f32 %v3276_v19, %v8880_v42  ;;  %v3305_v25 = vpop.f32.mrf.mxu3  ;;  %v6655_v19 = vor.u32 %v7628_v12, %v6654_v5  ;;  %v7282_v12 = vld [vmem:[%s8137_s12 + $0x2c] sm:$0xf] }
  0xc0   : > { %v3269_v29 = vpop.f32.mrf.mxu0  ;;  %v8960_v52 = vadd.f32 %v3305_v25, %v3277_v24  ;;  %v6727_v25 = vor.u32 %v7646_v20, %v6726_v13  ;;  %3692 = vmatpush.bf16.msra.mxu3 %v6655_v19  ;;  %v7662_v13 = vld [vmem:[%s11619_s1 + $0x8e4] sm:$0xf0] }
  0xc1   : > { %v3270_v53 = vadd.f32 %v3269_v29, %v8880_v42  ;;  %v6791_v19 = vor.u32 %v7662_v13, %v6790_v59  ;;  %v7610_v20 = vld [vmem:[%s11619_s1 + $0x744] sm:$0xf0]  ;;  %v7644_v59 = vld [vmem:[%s11619_s1 + $0x854] sm:$0xf0] }
  0xc2   : > { %v3298_v57 = vpop.f32.mrf.mxu1  ;;  %3452 = vmatmul.bf16.gmra.mxu2 %v8954_v26  ;;  %3720 = vmatpush.bf16.msra.mxu0 %v6727_v25  ;;  %v5296_v25 = vld [vmem:[%s8137_s12 + $0x8c] sm:$0xf0]  ;;  %v9034_v26 = vor.u32 %v7294_v37, %v5294_v36  ;;  %v7660_v36 = vld [vmem:[%s11619_s1 + $0x8d4] sm:$0xf0] }
  0xc3   : > { %v8966_v56 = vadd.f32 %v3298_v57, %v3270_v53  ;;  %3510 = vmatmul.bf16.gmra.mxu0 %v8956_v27  ;;  %3749 = vmatpush.bf16.msra.mxu1 %v6791_v19  ;;  %v7624_v37 = vld [vmem:[%s11619_s1 + $0x7b4] sm:$0xf0]  ;;  %v7642_v19 = vld [vmem:[%s11619_s1 + $0x844] sm:$0xf0] }
  0xc4   : > { %11699 = vst [vmem:[#allocation14_spill] sm:$0xff] %v9034_v26 }
  0xc5   : > { %3481 = vmatmul.bf16.gmra.mxu3 %v8958_v30  ;;  %3539 = vmatmul.bf16.gmra.mxu1 %v8963_v54  ;;  %v3279_v14 = vpop.f32.mrf.mxu2  ;;  %v7283_v54 = vld [vmem:[%s8137_s12 + $0x34] sm:$0xf] }
  0xc6   : > { %v3280_v22 = vadd.f32 %v3279_v14, %v8880_v42  ;;  %v6582_v14 = vld [vmem:[%s11619_s1 + $0x740] sm:$0xf]  ;;  %v9042_v30 = vor.u32 %v7283_v54, %v5304_v55  ;;  %v7608_v55 = vld [vmem:[%s11619_s1 + $0x734] sm:$0xf0]  ;;  %v6638_v54 = vld [vmem:[%s11619_s1 + $0x7b0] sm:$0xf] }
  0xc8   : > { %v3308_v24 = vpop.f32.mrf.mxu3  ;;  %v3271_v29 = vpop.f32.mrf.mxu0  ;;  %11702 = vst [vmem:[#allocation17_spill] sm:$0xff] %v9042_v30 }
  0xc9   : > { %v8996_v53 = vadd.f32 %v3308_v24, %v3280_v22  ;;  %v3272_v57 = vadd.f32 %v3271_v29, %v8880_v42  ;;  %v6646_v22 = vld [vmem:[%s11619_s1 + $0x7c0] sm:$0xf]  ;;  %v7626_v24 = vld [vmem:[%s11619_s1 + $0x7c4] sm:$0xf0]  ;;  %v6583_v29 = vor.u32 %v7610_v20, %v6582_v14  ;;  %v9036_v14 = vor.u32 %v7295_v58, %v5302_v45 }
  0xca   : > { %v3300_v35 = vpop.f32.mrf.mxu1  ;;  %v6710_v45 = vld [vmem:[%s11619_s1 + $0x840] sm:$0xf] }
  0xcb   : > { %v9003_v5 = vadd.f32 %v3300_v35, %v3272_v57  ;;  %v6647_v57 = vor.u32 %v7626_v24, %v6646_v22  ;;  %v6718_v35 = vld [vmem:[%s11619_s1 + $0x850] sm:$0xf]  ;;  %11700 = vst [vmem:[#allocation15_spill] sm:$0xff] %v9036_v14  ;;  %3664 = vmatpush.bf16.msra.mxu2 %v6583_v29  ;;  %v9038_v22 = vor.u32 %v7282_v12, %v5296_v25 }
  0xcc   : > { %v6719_v34 = vor.u32 %v7644_v59, %v6718_v35  ;;  %v6639_v12 = vor.u32 %v7624_v37, %v6638_v54  ;;  %v7307_v54 = vld [vmem:[%s8137_s12 + $0xf4] sm:$0xf]  ;;  %v6566_v37 = vld [vmem:[%s11619_s1 + $0x720] sm:$0xf] }
  0xcd   : > { %v3281_v13 = vpop.f32.mrf.mxu2  ;;  %3693 = vmatpush.bf16.msra.mxu3 %v6647_v57  ;;  %11701 = vst [vmem:[#allocation16_spill] sm:$0xff] %v9038_v22  ;;  %v6711_v57 = vor.u32 %v7642_v19, %v6710_v45  ;;  %v5396_v19 = vld [vmem:[%s8137_s12 + $0x154] sm:$0xf0] }
  0xce   : > { %v3282_v41 = vadd.f32 %v3281_v13, %v8880_v42  ;;  %3721 = vmatpush.bf16.msra.mxu0 %v6719_v34  ;;  %v6782_v42 = vld [vmem:[%s11619_s1 + $0x8d0] sm:$0xf] }
  0xcf   : > { %v6783_v34 = vor.u32 %v7660_v36, %v6782_v42  ;;  %v5394_v42 = vld [vmem:[%s8137_s12 + $0xf0] sm:$0xf]  ;;  %v7319_v36 = vld [vmem:[%s8137_s12 + $0x150] sm:$0xf0] }
  0xd0   : > { %v3310_v27 = vpop.f32.mrf.mxu3  ;;  %v3380_v20 = vpop.f32.mrf.mxu0 }
  0xd1   : > { %v9040_v24 = vadd.f32 %v3310_v27, %v3282_v41  ;;  %v6574_v41 = vld [vmem:[%s11619_s1 + $0x730] sm:$0xf]  ;;  %3750 = vmatpush.bf16.msra.mxu1 %v6783_v34  ;;  %3694 = vmatpush.bf16.msra.mxu3 %v6639_v12  ;;  %v5402_v34 = vld [vmem:[%s8137_s12 + $0xf8] sm:$0xf]  ;;  %v7622_v12 = vld [vmem:[%s11619_s1 + $0x7a4] sm:$0xf0] }
  0xd2   : > { %v3409_v49 = vpop.f32.mrf.mxu1  ;;  %3553 = vmatmul.bf16.vlgmr.msrb.gmra.mxu2 %v9034_v26  ;;  %v6575_v27 = vor.u32 %v7608_v55, %v6574_v41  ;;  %3722 = vmatpush.bf16.msra.mxu0 %v6711_v57  ;;  %v7320_v41 = vld [vmem:[%s8137_s12 + $0x158] sm:$0xf0]  ;;  %v6702_v57 = vld [vmem:[%s11619_s1 + $0x830] sm:$0xf] }
  0xd3   : > { %3611 = vmatmul.bf16.vlgmr.msrb.gmra.mxu0 %v9036_v14  ;;  %v5404_v14 = vld [vmem:[%s8137_s12 + $0x15c] sm:$0xf0] }
  0xd4   : > { %3665 = vmatpush.bf16.msra.mxu2 %v6575_v27  ;;  %v7658_v27 = vld [vmem:[%s11619_s1 + $0x8c4] sm:$0xf0] }
  0xd5   : > { %3582 = vmatmul.bf16.vlgmr.msrb.gmra.mxu3 %v9038_v22  ;;  %3640 = vmatmul.bf16.vlgmr.msrb.gmra.mxu1 %v9042_v30  ;;  %v3322_v58 = vpop.f32.mrf.mxu2  ;;  %v7308_v30 = vld [vmem:[%s8137_s12 + $0xfc] sm:$0xf] }
  0xd6   : > { %v3323_v25 = vadd.f32 %v3322_v58, %v8904_v60  ;;  %v6774_v60 = vld [vmem:[%s11619_s1 + $0x8c0] sm:$0xf] }
  0xd7   : > { %v6775_v45 = vor.u32 %v7658_v27, %v6774_v60  ;;  %v6630_v58 = vld [vmem:[%s11619_s1 + $0x7a0] sm:$0xf] }
  0xd8   : > { %v3351_v29 = vpop.f32.mrf.mxu3  ;;  %v3382_v35 = vpop.f32.mrf.mxu0 }
  0xd9   : > { %v3352_v59 = vadd.f32 %v3351_v29, %v3323_v25  ;;  %v6631_v29 = vor.u32 %v7622_v12, %v6630_v58  ;;  %3751 = vmatpush.bf16.msra.mxu1 %v6775_v45  ;;  %v9112_v12 = vor.u32 %v7307_v54, %v5396_v19  ;;  %v7638_v45 = vld [vmem:[%s11619_s1 + $0x824] sm:$0xf0] }
  0xda   : > { %v3411_v13 = vpop.f32.mrf.mxu1 }
  0xdb   : > { %v3381_v55 = vadd.f32 %v3380_v20, %v3352_v59  ;;  %v7606_v20 = vld [vmem:[%s11619_s1 + $0x724] sm:$0xf0]  ;;  %v7640_v59 = vld [vmem:[%s11619_s1 + $0x834] sm:$0xf0]  ;;  %3695 = vmatpush.bf16.msra.mxu3 %v6631_v29  ;;  %11705 = vst [vmem:[#allocation20_spill] sm:$0xff] %v9112_v12 }
  0xdc   : > { %v6567_v25 = vor.u32 %v7606_v20, %v6566_v37  ;;  %v6703_v26 = vor.u32 %v7640_v59, %v6702_v57  ;;  %v9108_v37 = vor.u32 %v7319_v36, %v5394_v42  ;;  %v9110_v20 = vor.u32 %v7320_v41, %v5402_v34  ;;  %v7656_v42 = vld [vmem:[%s11619_s1 + $0x8b4] sm:$0xf0]  ;;  %v6694_v36 = vld [vmem:[%s11619_s1 + $0x820] sm:$0xf] }
  0xdd   : > { %v9103_v60 = vadd.f32 %v3409_v49, %v3381_v55  ;;  %v3324_v27 = vpop.f32.mrf.mxu2  ;;  %v9114_v55 = vor.u32 %v7308_v30, %v5404_v14  ;;  %v7604_v30 = vld [vmem:[%s11619_s1 + $0x714] sm:$0xf0]  ;;  %v6695_v29 = vor.u32 %v7638_v45, %v6694_v36  ;;  %v7618_v36 = vld [vmem:[%s11619_s1 + $0x784] sm:$0xf0]  ;;  %v5496_v45 = vld [vmem:[%s8137_s12 + $0x21c] sm:$0xf0] }
  0xde   : > { %v3325_v22 = vadd.f32 %v3324_v27, %v8929_v50  ;;  %11703 = vst [vmem:[#allocation18_spill] sm:$0xff] %v9108_v37  ;;  %3666 = vmatpush.bf16.msra.mxu2 %v6567_v25  ;;  %3723 = vmatpush.bf16.msra.mxu0 %v6703_v26  ;;  %v6766_v50 = vld [vmem:[%s11619_s1 + $0x8b0] sm:$0xf]  ;;  %v5494_v27 = vld [vmem:[%s8137_s12 + $0x1b8] sm:$0xf] }
  0xdf   : > { %11704 = vst [vmem:[#allocation19_spill] sm:$0xff] %v9110_v20  ;;  %v6767_v26 = vor.u32 %v7656_v42, %v6766_v50  ;;  %v7345_v50 = vld [vmem:[%s8137_s12 + $0x220] sm:$0xf0]  ;;  %v6758_v42 = vld [vmem:[%s11619_s1 + $0x8a0] sm:$0xf] }
  0xe0   : > { %v3353_v44 = vpop.f32.mrf.mxu3  ;;  %v3385_v58 = vpop.f32.mrf.mxu0  ;;  %11706 = vst [vmem:[#allocation21_spill] sm:$0xff] %v9114_v55 }
  0xe1   : > { %v3354_v49 = vadd.f32 %v3353_v44, %v3325_v22  ;;  %v6558_v44 = vld [vmem:[%s11619_s1 + $0x710] sm:$0xf]  ;;  %3752 = vmatpush.bf16.msra.mxu1 %v6767_v26 }
  0xe2   : > { %v3414_v43 = vpop.f32.mrf.mxu1  ;;  %3558 = vmatmul.bf16.gmra.mxu2 %v9108_v37  ;;  %v6559_v14 = vor.u32 %v7604_v30, %v6558_v44  ;;  %v6622_v22 = vld [vmem:[%s11619_s1 + $0x790] sm:$0xf]  ;;  %3724 = vmatpush.bf16.msra.mxu0 %v6695_v29  ;;  %v6550_v30 = vld [vmem:[%s11619_s1 + $0x700] sm:$0xf] }
  0xe3   : > { %v3383_v51 = vadd.f32 %v3382_v35, %v3354_v49  ;;  %3616 = vmatmul.bf16.gmra.mxu0 %v9110_v20  ;;  %v7620_v35 = vld [vmem:[%s11619_s1 + $0x794] sm:$0xf0]  ;;  %v5502_v49 = vld [vmem:[%s8137_s12 + $0x1c0] sm:$0xf] }
  0xe4   : > { %v6623_v54 = vor.u32 %v7620_v35, %v6622_v22  ;;  %3667 = vmatpush.bf16.msra.mxu2 %v6559_v14  ;;  %v7602_v14 = vld [vmem:[%s11619_s1 + $0x704] sm:$0xf0]  ;;  %v6614_v22 = vld [vmem:[%s11619_s1 + $0x780] sm:$0xf] }
  0xe5   : > { %3587 = vmatmul.bf16.gmra.mxu3 %v9112_v12  ;;  %3645 = vmatmul.bf16.gmra.mxu1 %v9114_v55  ;;  %v9141_v34 = vadd.f32 %v3411_v13, %v3383_v51  ;;  %v3327_v41 = vpop.f32.mrf.mxu2  ;;  %v7344_v51 = vld [vmem:[%s8137_s12 + $0x218] sm:$0xf0]  ;;  %v6551_v35 = vor.u32 %v7602_v14, %v6550_v30  ;;  %v5504_v30 = vld [vmem:[%s8137_s12 + $0x224] sm:$0xf0]  ;;  %v6750_v14 = vld [vmem:[%s11619_s1 + $0x890] sm:$0xf] }
  0xe6   : > { %v3328_v19 = vadd.f32 %v3327_v41, %v8966_v56  ;;  %3696 = vmatpush.bf16.msra.mxu3 %v6623_v54  ;;  %v7654_v56 = vld [vmem:[%s11619_s1 + $0x8a4] sm:$0xf0]  ;;  %v7636_v41 = vld [vmem:[%s11619_s1 + $0x814] sm:$0xf0]  ;;  %v7332_v54 = vld [vmem:[%s8137_s12 + $0x1bc] sm:$0xf] }
  0xe7   : > { %v6759_v44 = vor.u32 %v7654_v56, %v6758_v42  ;;  %v9180_v56 = vor.u32 %v7344_v51, %v5494_v27  ;;  %v7652_v55 = vld [vmem:[%s11619_s1 + $0x894] sm:$0xf0]  ;;  %v9192_v51 = vor.u32 %v7332_v54, %v5496_v45 }
  0xe8   : > { %v3356_v25 = vpop.f32.mrf.mxu3  ;;  %v3387_v57 = vpop.f32.mrf.mxu0  ;;  %3668 = vmatpush.bf16.msra.mxu2 %v6551_v35  ;;  %v7634_v35 = vld [vmem:[%s11619_s1 + $0x804] sm:$0xf0]  ;;  %v7680_v45 = vld [vmem:[%s11619_s1 + $0x974] sm:$0xf0] }
  0xe9   : > { %v3357_v59 = vadd.f32 %v3356_v25, %v3328_v19  ;;  %v7333_v19 = vld [vmem:[%s8137_s12 + $0x1c4] sm:$0xf]  ;;  %3753 = vmatpush.bf16.msra.mxu1 %v6759_v44  ;;  %v6615_v25 = vor.u32 %v7618_v36, %v6614_v22  ;;  %11707 = vst [vmem:[#allocation22_spill] sm:$0xff] %v9180_v56  ;;  %v9190_v22 = vor.u32 %v7345_v50, %v5502_v49  ;;  %v7650_v50 = vld [vmem:[%s11619_s1 + $0x884] sm:$0xf0] }
  0xea   : > { %v3416_v13 = vpop.f32.mrf.mxu1  ;;  %11709 = vst [vmem:[#allocation24_spill] sm:$0xff] %v9192_v51 }
  0xeb   : > { %v3386_v26 = vadd.f32 %v3385_v58, %v3357_v59  ;;  %v6686_v58 = vld [vmem:[%s11619_s1 + $0x810] sm:$0xf]  ;;  %11708 = vst [vmem:[#allocation23_spill] sm:$0xff] %v9190_v22  ;;  %3697 = vmatpush.bf16.msra.mxu3 %v6615_v25  ;;  %v7696_v25 = vld [vmem:[%s11619_s1 + $0x9f4] sm:$0xf0] }
  0xec   : > { %v6687_v29 = vor.u32 %v7636_v41, %v6686_v58  ;;  %v9200_v58 = vor.u32 %v7333_v19, %v5504_v30 }
  0xed   : > { %v9178_v59 = vadd.f32 %v3414_v43, %v3386_v26  ;;  %v3329_v42 = vpop.f32.mrf.mxu2  ;;  %v6751_v43 = vor.u32 %v7652_v55, %v6750_v14  ;;  %v6678_v26 = vld [vmem:[%s11619_s1 + $0x800] sm:$0xf] }
  0xee   : > { %v3330_v20 = vadd.f32 %v3329_v42, %v9003_v5  ;;  %3725 = vmatpush.bf16.msra.mxu0 %v6687_v29  ;;  %11710 = vst [vmem:[#allocation25_spill] sm:$0xff] %v9200_v58  ;;  %v6679_v5 = vor.u32 %v7634_v35, %v6678_v26  ;;  %v6742_v55 = vld [vmem:[%s11619_s1 + $0x880] sm:$0xf] }
  0xef   : > { %3754 = vmatpush.bf16.msra.mxu1 %v6751_v43  ;;  %v6743_v54 = vor.u32 %v7650_v50, %v6742_v55  ;;  %v5602_v55 = vld [vmem:[%s8137_s12 + $0x288] sm:$0xf]  ;;  %v7370_v50 = vld [vmem:[%s8137_s12 + $0x2e8] sm:$0xf0] }
  0xf0   : > { %v3358_v44 = vpop.f32.mrf.mxu3  ;;  %v3390_v27 = vpop.f32.mrf.mxu0 }
  0xf1   : > { %v3359_v36 = vadd.f32 %v3358_v44, %v3330_v20  ;;  %v6862_v20 = vld [vmem:[%s11619_s1 + $0x970] sm:$0xf] }
  0xf2   : > { %v3419_v49 = vpop.f32.mrf.mxu1  ;;  %3563 = vmatmul.bf16.gmra.mxu2 %v9180_v56  ;;  %3726 = vmatpush.bf16.msra.mxu0 %v6679_v5  ;;  %v6863_v19 = vor.u32 %v7680_v45, %v6862_v20  ;;  %v7369_v5 = vld [vmem:[%s8137_s12 + $0x2e0] sm:$0xf0]  ;;  %v7694_v45 = vld [vmem:[%s11619_s1 + $0x9e4] sm:$0xf0]  ;;  %v9258_v56 = vor.u32 %v7370_v50, %v5602_v55  ;;  %v6910_v50 = vld [vmem:[%s11619_s1 + $0x9d0] sm:$0xf] }
  0xf3   : > { %v3388_v41 = vadd.f32 %v3387_v57, %v3359_v36  ;;  %3621 = vmatmul.bf16.gmra.mxu0 %v9190_v22  ;;  %v6926_v57 = vld [vmem:[%s11619_s1 + $0x9f0] sm:$0xf]  ;;  %3755 = vmatpush.bf16.msra.mxu1 %v6743_v54  ;;  %v5594_v36 = vld [vmem:[%s8137_s12 + $0x280] sm:$0xf] }
  0xf4   : > { %v6927_v30 = vor.u32 %v7696_v25, %v6926_v57  ;;  %3777 = vmatpush.bf16.msrb.mxu2 %v6863_v19  ;;  %v6918_v54 = vld [vmem:[%s11619_s1 + $0x9e0] sm:$0xf]  ;;  %v7712_v57 = vld [vmem:[%s11619_s1 + $0xa74] sm:$0xf0]  ;;  %v7357_v19 = vld [vmem:[%s8137_s12 + $0x284] sm:$0xf]  ;;  %v9256_v22 = vor.u32 %v7369_v5, %v5594_v36 }
  0xf5   : > { %3592 = vmatmul.bf16.gmra.mxu3 %v9192_v51  ;;  %3650 = vmatmul.bf16.gmra.mxu1 %v9200_v58  ;;  %v9224_v29 = vadd.f32 %v3416_v13, %v3388_v41  ;;  %v3332_v42 = vpop.f32.mrf.mxu2  ;;  %v6854_v41 = vld [vmem:[%s11619_s1 + $0x960] sm:$0xf]  ;;  %v5596_v25 = vld [vmem:[%s8137_s12 + $0x2e4] sm:$0xf0]  ;;  %11712 = vst [vmem:[#allocation27_spill] sm:$0xff] %v9258_v56 }
  0xf6   : > { %v3333_v14 = vadd.f32 %v3332_v42, %v8922_v28  ;;  %3806 = vmatpush.bf16.msrb.mxu3 %v6927_v30  ;;  %v7678_v28 = vld [vmem:[%s11619_s1 + $0x964] sm:$0xf0]  ;;  %v6919_v42 = vor.u32 %v7694_v45, %v6918_v54  ;;  %11711 = vst [vmem:[#allocation26_spill] sm:$0xff] %v9256_v22  ;;  %v9260_v37 = vor.u32 %v7357_v19, %v5596_v25  ;;  %v7728_v36 = vld [vmem:[%s11619_s1 + $0xaf4] sm:$0xf0] }
  0xf7   : > { %v6855_v20 = vor.u32 %v7678_v28, %v6854_v41  ;;  %v5604_v41 = vld [vmem:[%s8137_s12 + $0x2ec] sm:$0xf0] }
  0xf8   : > { %v3361_v44 = vpop.f32.mrf.mxu3  ;;  %v3392_v43 = vpop.f32.mrf.mxu0  ;;  %11713 = vst [vmem:[#allocation28_spill] sm:$0xff] %v9260_v37 }
  0xf9   : > { %v3362_v26 = vadd.f32 %v3361_v44, %v3333_v14  ;;  %3778 = vmatpush.bf16.msrb.mxu2 %v6855_v20  ;;  %v7692_v20 = vld [vmem:[%s11619_s1 + $0x9d4] sm:$0xf0] }
  0xfa   : > { %v3421_v35 = vpop.f32.mrf.mxu1  ;;  %3807 = vmatpush.bf16.msrb.mxu3 %v6919_v42  ;;  %v6911_v25 = vor.u32 %v7692_v20, %v6910_v50  ;;  %v7710_v42 = vld [vmem:[%s11619_s1 + $0xa64] sm:$0xf0]  ;;  %v6902_v20 = vld [vmem:[%s11619_s1 + $0x9c0] sm:$0xf] }
  0xfb   : > { %v3391_v13 = vadd.f32 %v3390_v27, %v3362_v26  ;;  %v6990_v27 = vld [vmem:[%s11619_s1 + $0xa70] sm:$0xf]  ;;  %v7358_v26 = vld [vmem:[%s8137_s12 + $0x28c] sm:$0xf] }
  0xfc   : > { %v6991_v30 = vor.u32 %v7712_v57, %v6990_v27  ;;  %v9262_v45 = vor.u32 %v7358_v26, %v5604_v41  ;;  %v6982_v27 = vld [vmem:[%s11619_s1 + $0xa60] sm:$0xf] }
  0xfd   : > { %v9251_v14 = vadd.f32 %v3419_v49, %v3391_v13  ;;  %v3334_v44 = vpop.f32.mrf.mxu2  ;;  %v6983_v26 = vor.u32 %v7710_v42, %v6982_v27  ;;  %v7690_v27 = vld [vmem:[%s11619_s1 + $0x9c4] sm:$0xf0] }
  0xfe   : > { %v3335_v28 = vadd.f32 %v3334_v44, %v8960_v52  ;;  %3835 = vmatpush.bf16.msrb.mxu0 %v6991_v30  ;;  %11714 = vst [vmem:[#allocation29_spill] sm:$0xff] %v9262_v45  ;;  %v7054_v52 = vld [vmem:[%s11619_s1 + $0xaf0] sm:$0xf]  ;;  %3808 = vmatpush.bf16.msrb.mxu3 %v6911_v25  ;;  %v6903_v42 = vor.u32 %v7690_v27, %v6902_v20 }
  0xff   : > { %v7055_v5 = vor.u32 %v7728_v36, %v7054_v52  ;;  %v5318_v52 = vld [vmem:[%s8137_s12 + $0x40] sm:$0xf]  ;;  %v7297_v36 = vld [vmem:[%s8137_s12 + $0xa0] sm:$0xf0] }
 0x100   : > { %v3363_v58 = vpop.f32.mrf.mxu3  ;;  %v3395_v51 = vpop.f32.mrf.mxu0 }
 0x101   : > { %v3364_v54 = vadd.f32 %v3363_v58, %v3335_v28  ;;  %v6846_v58 = vld [vmem:[%s11619_s1 + $0x950] sm:$0xf]  ;;  %3864 = vmatpush.bf16.msrb.mxu1 %v7055_v5 }
 0x102   : > { %v3424_v49 = vpop.f32.mrf.mxu1  ;;  %3568 = vmatmul.bf16.gmra.mxu2 %v9256_v22  ;;  %3836 = vmatpush.bf16.msrb.mxu0 %v6983_v26 }
 0x103   : > { %v3393_v13 = vadd.f32 %v3392_v43, %v3364_v54  ;;  %3626 = vmatmul.bf16.gmra.mxu0 %v9258_v56  ;;  %v7676_v43 = vld [vmem:[%s11619_s1 + $0x954] sm:$0xf0]  ;;  %3809 = vmatpush.bf16.msrb.mxu3 %v6903_v42 }
 0x104   : > { %v6847_v55 = vor.u32 %v7676_v43, %v6846_v58  ;;  %v5310_v54 = vld [vmem:[%s8137_s12 + $0x38] sm:$0xf]  ;;  %v7284_v58 = vld [vmem:[%s8137_s12 + $0x3c] sm:$0xf]  ;;  %v7726_v43 = vld [vmem:[%s11619_s1 + $0xae4] sm:$0xf0] }
 0x105   : > { %3597 = vmatmul.bf16.gmra.mxu3 %v9260_v37  ;;  %3655 = vmatmul.bf16.gmra.mxu1 %v9262_v45  ;;  %v9289_v57 = vadd.f32 %v3421_v35, %v3393_v13  ;;  %v3337_v19 = vpop.f32.mrf.mxu2  ;;  %v7296_v13 = vld [vmem:[%s8137_s12 + $0x98] sm:$0xf0] }
 0x106   : > { %v3338_v30 = vadd.f32 %v3337_v19, %v8996_v53  ;;  %3779 = vmatpush.bf16.msrb.mxu2 %v6847_v55  ;;  %v7046_v53 = vld [vmem:[%s11619_s1 + $0xae0] sm:$0xf] }
 0x107   : > { %v6838_v55 = vld [vmem:[%s11619_s1 + $0x940] sm:$0xf]  ;;  %v7047_v50 = vor.u32 %v7726_v43, %v7046_v53  ;;  %v7285_v53 = vld [vmem:[%s8137_s12 + $0x44] sm:$0xf]  ;;  %v5320_v43 = vld [vmem:[%s8137_s12 + $0xa4] sm:$0xf0] }
 0x108   : > { %v3366_v44 = vpop.f32.mrf.mxu3  ;;  %v3397_v41 = vpop.f32.mrf.mxu0  ;;  %v5312_v19 = vld [vmem:[%s8137_s12 + $0x9c] sm:$0xf0] }
 0x109   : > { %v3367_v28 = vadd.f32 %v3366_v44, %v3338_v30  ;;  %v6974_v30 = vld [vmem:[%s11619_s1 + $0xa50] sm:$0xf]  ;;  %v7708_v44 = vld [vmem:[%s11619_s1 + $0xa54] sm:$0xf0]  ;;  %3865 = vmatpush.bf16.msrb.mxu1 %v7047_v50  ;;  %v9334_v27 = vor.u32 %v7284_v58, %v5312_v19 }
 0x10a   : > { %v3426_v35 = vpop.f32.mrf.mxu1  ;;  %v6975_v45 = vor.u32 %v7708_v44, %v6974_v30 }
 0x10b   : > { %v3396_v5 = vadd.f32 %v3395_v51, %v3367_v28  ;;  %v7674_v51 = vld [vmem:[%s11619_s1 + $0x944] sm:$0xf0]  ;;  %11717 = vst [vmem:[#allocation32_spill] sm:$0xff] %v9334_v27 }
 0x10c   : > { %v6839_v25 = vor.u32 %v7674_v51, %v6838_v55  ;;  %v9330_v55 = vor.u32 %v7296_v13, %v5310_v54  ;;  %v9332_v51 = vor.u32 %v7297_v36, %v5318_v52  ;;  %3837 = vmatpush.bf16.msrb.mxu0 %v6975_v45  ;;  %v7724_v54 = vld [vmem:[%s11619_s1 + $0xad4] sm:$0xf0]  ;;  %v6894_v13 = vld [vmem:[%s11619_s1 + $0x9b0] sm:$0xf]  ;;  %v6966_v36 = vld [vmem:[%s11619_s1 + $0xa40] sm:$0xf] }
 0x10d   : > { %v9325_v26 = vadd.f32 %v3424_v49, %v3396_v5  ;;  %v3339_v28 = vpop.f32.mrf.mxu2  ;;  %v9336_v5 = vor.u32 %v7285_v53, %v5320_v43  ;;  %v7688_v52 = vld [vmem:[%s11619_s1 + $0x9b4] sm:$0xf0]  ;;  %v7321_v43 = vld [vmem:[%s8137_s12 + $0x160] sm:$0xf0] }
 0x10e   : > { %v3340_v56 = vadd.f32 %v3339_v28, %v9040_v24  ;;  %11715 = vst [vmem:[#allocation30_spill] sm:$0xff] %v9330_v55  ;;  %3780 = vmatpush.bf16.msrb.mxu2 %v6839_v25  ;;  %v7038_v24 = vld [vmem:[%s11619_s1 + $0xad0] sm:$0xf]  ;;  %v6895_v19 = vor.u32 %v7688_v52, %v6894_v13  ;;  %v7706_v25 = vld [vmem:[%s11619_s1 + $0xa44] sm:$0xf0] }
 0x10f   : > { %11716 = vst [vmem:[#allocation31_spill] sm:$0xff] %v9332_v51  ;;  %v7039_v45 = vor.u32 %v7724_v54, %v7038_v24  ;;  %v6967_v44 = vor.u32 %v7706_v25, %v6966_v36  ;;  %v7322_v24 = vld [vmem:[%s8137_s12 + $0x168] sm:$0xf0]  ;;  %v6886_v13 = vld [vmem:[%s11619_s1 + $0x9a0] sm:$0xf] }
 0x110   : > { %v3368_v22 = vpop.f32.mrf.mxu3  ;;  %v3496_v20 = vpop.f32.mrf.mxu0  ;;  %11718 = vst [vmem:[#allocation33_spill] sm:$0xff] %v9336_v5  ;;  %3810 = vmatpush.bf16.msrb.mxu3 %v6895_v19  ;;  %v7686_v52 = vld [vmem:[%s11619_s1 + $0x9a4] sm:$0xf0]  ;;  %v6958_v25 = vld [vmem:[%s11619_s1 + $0xa30] sm:$0xf] }
 0x111   : > { %v3369_v49 = vadd.f32 %v3368_v22, %v3340_v56  ;;  %v6830_v56 = vld [vmem:[%s11619_s1 + $0x930] sm:$0xf]  ;;  %v7672_v22 = vld [vmem:[%s11619_s1 + $0x934] sm:$0xf0]  ;;  %3866 = vmatpush.bf16.msrb.mxu1 %v7039_v45  ;;  %3838 = vmatpush.bf16.msrb.mxu0 %v6967_v44  ;;  %v7309_v45 = vld [vmem:[%s8137_s12 + $0x104] sm:$0xf]  ;;  %v6887_v19 = vor.u32 %v7686_v52, %v6886_v13 }
 0x112   : > { %v3525_v37 = vpop.f32.mrf.mxu1  ;;  %3669 = vmatmul.bf16.vlgmr.msra.gmra.mxu2 %v9330_v55  ;;  %v5412_v36 = vld [vmem:[%s8137_s12 + $0x164] sm:$0xf0] }
 0x113   : > { %v3398_v12 = vadd.f32 %v3397_v41, %v3369_v49  ;;  %3727 = vmatmul.bf16.vlgmr.msra.gmra.mxu0 %v9332_v51  ;;  %v6831_v41 = vor.u32 %v7672_v22, %v6830_v56  ;;  %v5418_v49 = vld [vmem:[%s8137_s12 + $0x108] sm:$0xf]  ;;  %v6822_v22 = vld [vmem:[%s11619_s1 + $0x920] sm:$0xf]  ;;  %v9408_v52 = vor.u32 %v7309_v45, %v5412_v36 }
 0x114   : > { %v7722_v56 = vld [vmem:[%s11619_s1 + $0xac4] sm:$0xf0]  ;;  %3811 = vmatpush.bf16.msrb.mxu3 %v6887_v19  ;;  %v6950_v45 = vld [vmem:[%s11619_s1 + $0xa20] sm:$0xf] }
 0x115   : > { %3698 = vmatmul.bf16.vlgmr.msra.gmra.mxu3 %v9334_v27  ;;  %3756 = vmatmul.bf16.vlgmr.msra.gmra.mxu1 %v9336_v5  ;;  %v9363_v58 = vadd.f32 %v3426_v35, %v3398_v12  ;;  %v3438_v50 = vpop.f32.mrf.mxu2  ;;  %v5410_v35 = vld [vmem:[%s8137_s12 + $0x100] sm:$0xf]  ;;  %11721 = vst [vmem:[#allocation36_spill] sm:$0xff] %v9408_v52  ;;  %v7702_v19 = vld [vmem:[%s11619_s1 + $0xa24] sm:$0xf0] }
 0x116   : > { %v3439_v42 = vadd.f32 %v3438_v50, %v9103_v60  ;;  %3781 = vmatpush.bf16.msrb.mxu2 %v6831_v41  ;;  %v7030_v60 = vld [vmem:[%s11619_s1 + $0xac0] sm:$0xf] }
 0x117   : > { %v7031_v41 = vor.u32 %v7722_v56, %v7030_v60  ;;  %v5420_v60 = vld [vmem:[%s8137_s12 + $0x16c] sm:$0xf0] }
 0x118   : > { %v3467_v30 = vpop.f32.mrf.mxu3  ;;  %v3498_v28 = vpop.f32.mrf.mxu0 }
 0x119   : > { %v3468_v53 = vadd.f32 %v3467_v30, %v3439_v42  ;;  %v7704_v42 = vld [vmem:[%s11619_s1 + $0xa34] sm:$0xf0]  ;;  %3867 = vmatpush.bf16.msrb.mxu1 %v7031_v41 }
 0x11a   : > { %v3527_v12 = vpop.f32.mrf.mxu1  ;;  %v6959_v56 = vor.u32 %v7704_v42, %v6958_v25 }
 0x11b   : > { %v3497_v54 = vadd.f32 %v3496_v20, %v3468_v53  ;;  %v7670_v20 = vld [vmem:[%s11619_s1 + $0x924] sm:$0xf0]  ;;  %v7310_v53 = vld [vmem:[%s8137_s12 + $0x10c] sm:$0xf] }
 0x11c   : > { %v6823_v50 = vor.u32 %v7670_v20, %v6822_v22  ;;  %v9404_v22 = vor.u32 %v7321_v43, %v5410_v35  ;;  %v9406_v20 = vor.u32 %v7322_v24, %v5418_v49  ;;  %3839 = vmatpush.bf16.msrb.mxu0 %v6959_v56  ;;  %v7720_v35 = vld [vmem:[%s11619_s1 + $0xab4] sm:$0xf0]  ;;  %v6878_v49 = vld [vmem:[%s11619_s1 + $0x990] sm:$0xf]  ;;  %v5510_v56 = vld [vmem:[%s8137_s12 + $0x1c8] sm:$0xf] }
 0x11d   : > { %v9399_v30 = vadd.f32 %v3525_v37, %v3497_v54  ;;  %v3440_v44 = vpop.f32.mrf.mxu2  ;;  %v9410_v54 = vor.u32 %v7310_v53, %v5420_v60  ;;  %v7684_v24 = vld [vmem:[%s11619_s1 + $0x994] sm:$0xf0] }
 0x11e   : > { %v3441_v5 = vadd.f32 %v3440_v44, %v9141_v34  ;;  %11719 = vst [vmem:[#allocation34_spill] sm:$0xff] %v9404_v22  ;;  %3782 = vmatpush.bf16.msrb.mxu2 %v6823_v50  ;;  %v7022_v34 = vld [vmem:[%s11619_s1 + $0xab0] sm:$0xf]  ;;  %v6879_v50 = vor.u32 %v7684_v24, %v6878_v49  ;;  %v6951_v44 = vor.u32 %v7702_v19, %v6950_v45  ;;  %v6870_v49 = vld [vmem:[%s11619_s1 + $0x980] sm:$0xf] }
 0x11f   : > { %11720 = vst [vmem:[#allocation35_spill] sm:$0xff] %v9406_v20  ;;  %v7023_v43 = vor.u32 %v7720_v35, %v7022_v34  ;;  %v7347_v34 = vld [vmem:[%s8137_s12 + $0x230] sm:$0xf0]  ;;  %v7014_v35 = vld [vmem:[%s11619_s1 + $0xaa0] sm:$0xf] }
 0x120   : > { %v3469_v51 = vpop.f32.mrf.mxu3  ;;  %v3501_v13 = vpop.f32.mrf.mxu0  ;;  %11722 = vst [vmem:[#allocation37_spill] sm:$0xff] %v9410_v54  ;;  %3812 = vmatpush.bf16.msrb.mxu3 %v6879_v50  ;;  %3840 = vmatpush.bf16.msrb.mxu0 %v6951_v44  ;;  %v7682_v45 = vld [vmem:[%s11619_s1 + $0x984] sm:$0xf0]  ;;  %v7334_v50 = vld [vmem:[%s8137_s12 + $0x1cc] sm:$0xf] }
 0x121   : > { %v3470_v37 = vadd.f32 %v3469_v51, %v3441_v5  ;;  %v6814_v51 = vld [vmem:[%s11619_s1 + $0x910] sm:$0xf]  ;;  %v7668_v5 = vld [vmem:[%s11619_s1 + $0x914] sm:$0xf0]  ;;  %3868 = vmatpush.bf16.msrb.mxu1 %v7023_v43 }
 0x122   : > { %v3530_v55 = vpop.f32.mrf.mxu1  ;;  %3674 = vmatmul.bf16.gmra.mxu2 %v9404_v22  ;;  %v5512_v19 = vld [vmem:[%s8137_s12 + $0x22c] sm:$0xf0] }
 0x123   : > { %v3499_v27 = vadd.f32 %v3498_v28, %v3470_v37  ;;  %3732 = vmatmul.bf16.gmra.mxu0 %v9406_v20  ;;  %v6815_v28 = vor.u32 %v7668_v5, %v6814_v51  ;;  %v5518_v37 = vld [vmem:[%s8137_s12 + $0x1d0] sm:$0xf]  ;;  %v6806_v5 = vld [vmem:[%s11619_s1 + $0x900] sm:$0xf] }
 0x125   : > { %3703 = vmatmul.bf16.gmra.mxu3 %v9408_v52  ;;  %3761 = vmatmul.bf16.gmra.mxu1 %v9410_v54  ;;  %v9437_v41 = vadd.f32 %v3527_v12, %v3499_v27  ;;  %v3443_v36 = vpop.f32.mrf.mxu2  ;;  %v7346_v27 = vld [vmem:[%s8137_s12 + $0x228] sm:$0xf0]  ;;  %v7716_v54 = vld [vmem:[%s11619_s1 + $0xa94] sm:$0xf0] }
 0x126   : > { %v3444_v25 = vadd.f32 %v3443_v36, %v9178_v59  ;;  %3783 = vmatpush.bf16.msrb.mxu2 %v6815_v28  ;;  %v7718_v59 = vld [vmem:[%s11619_s1 + $0xaa4] sm:$0xf0]  ;;  %v7700_v36 = vld [vmem:[%s11619_s1 + $0xa14] sm:$0xf0] }
 0x127   : > { %v7015_v51 = vor.u32 %v7718_v59, %v7014_v35  ;;  %v7666_v28 = vld [vmem:[%s11619_s1 + $0x904] sm:$0xf0]  ;;  %v9476_v59 = vor.u32 %v7346_v27, %v5510_v56  ;;  %v9488_v27 = vor.u32 %v7334_v50, %v5512_v19  ;;  %v7744_v19 = vld [vmem:[%s11619_s1 + $0xb74] sm:$0xf0] }
 0x128   : > { %v3472_v42 = vpop.f32.mrf.mxu3  ;;  %v3503_v53 = vpop.f32.mrf.mxu0  ;;  %v6807_v24 = vor.u32 %v7666_v28, %v6806_v5  ;;  %v5520_v5 = vld [vmem:[%s8137_s12 + $0x234] sm:$0xf0]  ;;  %v7006_v28 = vld [vmem:[%s11619_s1 + $0xa90] sm:$0xf] }
 0x129   : > { %v3473_v60 = vadd.f32 %v3472_v42, %v3444_v25  ;;  %v7335_v25 = vld [vmem:[%s8137_s12 + $0x1d4] sm:$0xf]  ;;  %3869 = vmatpush.bf16.msrb.mxu1 %v7015_v51  ;;  %v6871_v42 = vor.u32 %v7682_v45, %v6870_v49  ;;  %11723 = vst [vmem:[#allocation38_spill] sm:$0xff] %v9476_v59  ;;  %v9486_v49 = vor.u32 %v7347_v34, %v5518_v37  ;;  %v7714_v34 = vld [vmem:[%s11619_s1 + $0xa84] sm:$0xf0] }
 0x12a   : > { %v3532_v12 = vpop.f32.mrf.mxu1  ;;  %3784 = vmatpush.bf16.msrb.mxu2 %v6807_v24  ;;  %11725 = vst [vmem:[#allocation40_spill] sm:$0xff] %v9488_v27  ;;  %v7698_v24 = vld [vmem:[%s11619_s1 + $0xa04] sm:$0xf0] }
 0x12b   : > { %v3502_v43 = vadd.f32 %v3501_v13, %v3473_v60  ;;  %v6942_v13 = vld [vmem:[%s11619_s1 + $0xa10] sm:$0xf]  ;;  %11724 = vst [vmem:[#allocation39_spill] sm:$0xff] %v9486_v49  ;;  %3813 = vmatpush.bf16.msrb.mxu3 %v6871_v42  ;;  %v7760_v42 = vld [vmem:[%s11619_s1 + $0xbf4] sm:$0xf0] }
 0x12c   : > { %v6943_v44 = vor.u32 %v7700_v36, %v6942_v13  ;;  %v9496_v13 = vor.u32 %v7335_v25, %v5520_v5 }
 0x12d   : > { %v9474_v60 = vadd.f32 %v3530_v55, %v3502_v43  ;;  %v3445_v35 = vpop.f32.mrf.mxu2  ;;  %v7007_v55 = vor.u32 %v7716_v54, %v7006_v28  ;;  %v6934_v43 = vld [vmem:[%s11619_s1 + $0xa00] sm:$0xf] }
 0x12e   : > { %v3446_v20 = vadd.f32 %v3445_v35, %v9224_v29  ;;  %3841 = vmatpush.bf16.msrb.mxu0 %v6943_v44  ;;  %11726 = vst [vmem:[#allocation41_spill] sm:$0xff] %v9496_v13  ;;  %v6935_v29 = vor.u32 %v7698_v24, %v6934_v43  ;;  %v6998_v54 = vld [vmem:[%s11619_s1 + $0xa80] sm:$0xf] }
 0x12f   : > { %3870 = vmatpush.bf16.msrb.mxu1 %v7007_v55  ;;  %v6999_v50 = vor.u32 %v7714_v34, %v6998_v54  ;;  %v5618_v54 = vld [vmem:[%s8137_s12 + $0x298] sm:$0xf]  ;;  %v7372_v34 = vld [vmem:[%s8137_s12 + $0x2f8] sm:$0xf0] }
 0x130   : > { %v3474_v51 = vpop.f32.mrf.mxu3  ;;  %v3506_v56 = vpop.f32.mrf.mxu0 }
 0x131   : > { %v3475_v45 = vadd.f32 %v3474_v51, %v3446_v20  ;;  %v7118_v20 = vld [vmem:[%s11619_s1 + $0xb70] sm:$0xf] }
 0x132   : > { %v3535_v37 = vpop.f32.mrf.mxu1  ;;  %3679 = vmatmul.bf16.gmra.mxu2 %v9476_v59  ;;  %3842 = vmatpush.bf16.msrb.mxu0 %v6935_v29  ;;  %v7119_v25 = vor.u32 %v7744_v19, %v7118_v20  ;;  %v7371_v29 = vld [vmem:[%s8137_s12 + $0x2f0] sm:$0xf0]  ;;  %v7758_v19 = vld [vmem:[%s11619_s1 + $0xbe4] sm:$0xf0]  ;;  %v9554_v59 = vor.u32 %v7372_v34, %v5618_v54  ;;  %v7166_v34 = vld [vmem:[%s11619_s1 + $0xbd0] sm:$0xf] }
 0x133   : > { %v3504_v36 = vadd.f32 %v3503_v53, %v3475_v45  ;;  %3737 = vmatmul.bf16.gmra.mxu0 %v9486_v49  ;;  %v7182_v53 = vld [vmem:[%s11619_s1 + $0xbf0] sm:$0xf]  ;;  %3871 = vmatpush.bf16.msrb.mxu1 %v6999_v50  ;;  %v7174_v50 = vld [vmem:[%s11619_s1 + $0xbe0] sm:$0xf] }
 0x134   : > { %v7183_v5 = vor.u32 %v7760_v42, %v7182_v53  ;;  %3893 = vmatpush.bf16.msra.mxu2 %v7119_v25  ;;  %v5610_v45 = vld [vmem:[%s8137_s12 + $0x290] sm:$0xf]  ;;  %v7776_v53 = vld [vmem:[%s11619_s1 + $0xc74] sm:$0xf0]  ;;  %v7359_v25 = vld [vmem:[%s8137_s12 + $0x294] sm:$0xf] }
 0x135   : > { %3708 = vmatmul.bf16.gmra.mxu3 %v9488_v27  ;;  %3766 = vmatmul.bf16.gmra.mxu1 %v9496_v13  ;;  %v9520_v44 = vadd.f32 %v3532_v12, %v3504_v36  ;;  %v3448_v35 = vpop.f32.mrf.mxu2  ;;  %v7110_v36 = vld [vmem:[%s11619_s1 + $0xb60] sm:$0xf]  ;;  %v5612_v42 = vld [vmem:[%s8137_s12 + $0x2f4] sm:$0xf0]  ;;  %v9552_v49 = vor.u32 %v7371_v29, %v5610_v45  ;;  %11728 = vst [vmem:[#allocation43_spill] sm:$0xff] %v9554_v59 }
 0x136   : > { %v3449_v28 = vadd.f32 %v3448_v35, %v9251_v14  ;;  %3922 = vmatpush.bf16.msra.mxu3 %v7183_v5  ;;  %v7742_v14 = vld [vmem:[%s11619_s1 + $0xb64] sm:$0xf0]  ;;  %v7175_v35 = vor.u32 %v7758_v19, %v7174_v50  ;;  %v9556_v22 = vor.u32 %v7359_v25, %v5612_v42  ;;  %v5712_v45 = vld [vmem:[%s11619_s1 + $0x78] sm:$0xf0] }
 0x137   : > { %v7111_v20 = vor.u32 %v7742_v14, %v7110_v36  ;;  %v5620_v36 = vld [vmem:[%s8137_s12 + $0x2fc] sm:$0xf0]  ;;  %11727 = vst [vmem:[#allocation42_spill] sm:$0xff] %v9552_v49 }
 0x138   : > { %v3477_v51 = vpop.f32.mrf.mxu3  ;;  %v3508_v55 = vpop.f32.mrf.mxu0  ;;  %11729 = vst [vmem:[#allocation44_spill] sm:$0xff] %v9556_v22 }
 0x139   : > { %v3478_v43 = vadd.f32 %v3477_v51, %v3449_v28  ;;  %3894 = vmatpush.bf16.msra.mxu2 %v7111_v20  ;;  %v7756_v20 = vld [vmem:[%s11619_s1 + $0xbd4] sm:$0xf0] }
 0x13a   : > { %v3537_v24 = vpop.f32.mrf.mxu1  ;;  %3923 = vmatpush.bf16.msra.mxu3 %v7175_v35  ;;  %v7167_v42 = vor.u32 %v7756_v20, %v7166_v34  ;;  %v7774_v35 = vld [vmem:[%s11619_s1 + $0xc64] sm:$0xf0]  ;;  %v7158_v20 = vld [vmem:[%s11619_s1 + $0xbc0] sm:$0xf] }
 0x13b   : > { %v3507_v12 = vadd.f32 %v3506_v56, %v3478_v43  ;;  %v7246_v56 = vld [vmem:[%s11619_s1 + $0xc70] sm:$0xf]  ;;  %v7360_v43 = vld [vmem:[%s8137_s12 + $0x29c] sm:$0xf] }
 0x13c   : > { %v7247_v5 = vor.u32 %v7776_v53, %v7246_v56  ;;  %v9558_v19 = vor.u32 %v7360_v43, %v5620_v36  ;;  %v7238_v56 = vld [vmem:[%s11619_s1 + $0xc60] sm:$0xf] }
 0x13d   : > { %v9547_v28 = vadd.f32 %v3535_v37, %v3507_v12  ;;  %v3450_v51 = vpop.f32.mrf.mxu2  ;;  %v7239_v43 = vor.u32 %v7774_v35, %v7238_v56  ;;  %v7754_v56 = vld [vmem:[%s11619_s1 + $0xbc4] sm:$0xf0] }
 0x13e   : > { %v3451_v14 = vadd.f32 %v3450_v51, %v9289_v57  ;;  %3951 = vmatpush.bf16.msra.mxu0 %v7247_v5  ;;  %11730 = vst [vmem:[#allocation45_spill] sm:$0xff] %v9558_v19  ;;  %v7391_v57 = vld [vmem:[%s11619_s1 + $0x74] sm:$0xf]  ;;  %3924 = vmatpush.bf16.msra.mxu3 %v7167_v42  ;;  %v7159_v35 = vor.u32 %v7754_v56, %v7158_v20 }
 0x13f   : > { %v5715_v29 = vor.u32 %v7391_v57, %v5712_v45  ;;  %v5334_v57 = vld [vmem:[%s8137_s12 + $0x50] sm:$0xf]  ;;  %v7299_v45 = vld [vmem:[%s8137_s12 + $0xb0] sm:$0xf0] }
 0x140   : > { %v3479_v13 = vpop.f32.mrf.mxu3  ;;  %v3511_v27 = vpop.f32.mrf.mxu0 }
 0x141   : > { %v3480_v50 = vadd.f32 %v3479_v13, %v3451_v14  ;;  %v7102_v13 = vld [vmem:[%s11619_s1 + $0xb50] sm:$0xf]  ;;  %3980 = vmatpush.bf16.msra.mxu1 %v5715_v29 }
 0x142   : > { %v3540_v37 = vpop.f32.mrf.mxu1  ;;  %3684 = vmatmul.bf16.gmra.mxu2 %v9552_v49  ;;  %3952 = vmatpush.bf16.msra.mxu0 %v7239_v43 }
 0x143   : > { %v3509_v12 = vadd.f32 %v3508_v55, %v3480_v50  ;;  %3742 = vmatmul.bf16.gmra.mxu0 %v9554_v59  ;;  %v7740_v55 = vld [vmem:[%s11619_s1 + $0xb54] sm:$0xf0]  ;;  %v5326_v50 = vld [vmem:[%s8137_s12 + $0x48] sm:$0xf]  ;;  %3925 = vmatpush.bf16.msra.mxu3 %v7159_v35 }
 0x144   : > { %v7103_v54 = vor.u32 %v7740_v55, %v7102_v13  ;;  %v7286_v13 = vld [vmem:[%s8137_s12 + $0x4c] sm:$0xf] }
 0x145   : > { %3713 = vmatmul.bf16.gmra.mxu3 %v9556_v22  ;;  %3771 = vmatmul.bf16.gmra.mxu1 %v9558_v19  ;;  %v9585_v53 = vadd.f32 %v3537_v24, %v3509_v12  ;;  %v3453_v25 = vpop.f32.mrf.mxu2  ;;  %v7298_v12 = vld [vmem:[%s8137_s12 + $0xa8] sm:$0xf0] }
 0x146   : > { %v3454_v5 = vadd.f32 %v3453_v25, %v9325_v26  ;;  %3895 = vmatpush.bf16.msra.mxu2 %v7103_v54  ;;  %v7389_v26 = vld [vmem:[%s11619_s1 + $0x64] sm:$0xf]  ;;  %v5704_v55 = vld [vmem:[%s11619_s1 + $0x68] sm:$0xf0]  ;;  %v7094_v54 = vld [vmem:[%s11619_s1 + $0xb40] sm:$0xf] }
 0x147   : > { %v5707_v34 = vor.u32 %v7389_v26, %v5704_v55  ;;  %v5328_v25 = vld [vmem:[%s8137_s12 + $0xac] sm:$0xf0]  ;;  %v7287_v26 = vld [vmem:[%s8137_s12 + $0x54] sm:$0xf]  ;;  %v5336_v55 = vld [vmem:[%s8137_s12 + $0xb4] sm:$0xf0] }
 0x148   : > { %v3482_v51 = vpop.f32.mrf.mxu3  ;;  %v3513_v36 = vpop.f32.mrf.mxu0  ;;  %v9630_v56 = vor.u32 %v7286_v13, %v5328_v25 }
 0x149   : > { %v3483_v14 = vadd.f32 %v3482_v51, %v3454_v5  ;;  %v7230_v5 = vld [vmem:[%s11619_s1 + $0xc50] sm:$0xf]  ;;  %v7772_v51 = vld [vmem:[%s11619_s1 + $0xc54] sm:$0xf0]  ;;  %3981 = vmatpush.bf16.msra.mxu1 %v5707_v34 }
 0x14a   : > { %v3542_v24 = vpop.f32.mrf.mxu1  ;;  %v7231_v19 = vor.u32 %v7772_v51, %v7230_v5  ;;  %11733 = vst [vmem:[#allocation48_spill] sm:$0xff] %v9630_v56 }
 0x14b   : > { %v3512_v29 = vadd.f32 %v3511_v27, %v3483_v14  ;;  %v7738_v27 = vld [vmem:[%s11619_s1 + $0xb44] sm:$0xf0] }
 0x14c   : > { %v7095_v42 = vor.u32 %v7738_v27, %v7094_v54  ;;  %v9626_v54 = vor.u32 %v7298_v12, %v5326_v50  ;;  %v9628_v27 = vor.u32 %v7299_v45, %v5334_v57  ;;  %3953 = vmatpush.bf16.msra.mxu0 %v7231_v19  ;;  %v5696_v50 = vld [vmem:[%s11619_s1 + $0x58] sm:$0xf0]  ;;  %v7150_v12 = vld [vmem:[%s11619_s1 + $0xbb0] sm:$0xf]  ;;  %v7752_v57 = vld [vmem:[%s11619_s1 + $0xbb4] sm:$0xf0] }
 0x14d   : > { %v9621_v43 = vadd.f32 %v3540_v37, %v3512_v29  ;;  %v3455_v14 = vpop.f32.mrf.mxu2  ;;  %v9632_v29 = vor.u32 %v7287_v26, %v5336_v55  ;;  %v7222_v45 = vld [vmem:[%s11619_s1 + $0xc40] sm:$0xf]  ;;  %v7151_v25 = vor.u32 %v7752_v57, %v7150_v12  ;;  %v7323_v55 = vld [vmem:[%s8137_s12 + $0x170] sm:$0xf0]  ;;  %v7750_v57 = vld [vmem:[%s11619_s1 + $0xba4] sm:$0xf0] }
 0x14e   : > { %v3456_v59 = vadd.f32 %v3455_v14, %v9363_v58  ;;  %11731 = vst [vmem:[#allocation46_spill] sm:$0xff] %v9626_v54  ;;  %3896 = vmatpush.bf16.msra.mxu2 %v7095_v42  ;;  %v7387_v58 = vld [vmem:[%s11619_s1 + $0x54] sm:$0xf]  ;;  %v7770_v42 = vld [vmem:[%s11619_s1 + $0xc44] sm:$0xf0] }
 0x14f   : > { %11732 = vst [vmem:[#allocation47_spill] sm:$0xff] %v9628_v27  ;;  %v5699_v19 = vor.u32 %v7387_v58, %v5696_v50  ;;  %v7223_v51 = vor.u32 %v7770_v42, %v7222_v45  ;;  %3926 = vmatpush.bf16.msra.mxu3 %v7151_v25  ;;  %v7324_v58 = vld [vmem:[%s8137_s12 + $0x178] sm:$0xf0]  ;;  %v7142_v12 = vld [vmem:[%s11619_s1 + $0xba0] sm:$0xf] }
 0x150   : > { %v3484_v49 = vpop.f32.mrf.mxu3  ;;  %v3612_v20 = vpop.f32.mrf.mxu0  ;;  %11734 = vst [vmem:[#allocation49_spill] sm:$0xff] %v9632_v29  ;;  %v5428_v45 = vld [vmem:[%s8137_s12 + $0x174] sm:$0xf0]  ;;  %v7143_v25 = vor.u32 %v7750_v57, %v7142_v12  ;;  %v7214_v42 = vld [vmem:[%s11619_s1 + $0xc30] sm:$0xf] }
 0x151   : > { %v3485_v37 = vadd.f32 %v3484_v49, %v3456_v59  ;;  %v7086_v59 = vld [vmem:[%s11619_s1 + $0xb30] sm:$0xf]  ;;  %v7736_v49 = vld [vmem:[%s11619_s1 + $0xb34] sm:$0xf0]  ;;  %3982 = vmatpush.bf16.msra.mxu1 %v5699_v19  ;;  %3954 = vmatpush.bf16.msra.mxu0 %v7223_v51  ;;  %v7311_v19 = vld [vmem:[%s8137_s12 + $0x114] sm:$0xf] }
 0x152   : > { %v3641_v22 = vpop.f32.mrf.mxu1  ;;  %3785 = vmatmul.bf16.vlgmr.msrb.gmra.mxu2 %v9626_v54  ;;  %v9704_v57 = vor.u32 %v7311_v19, %v5428_v45  ;;  %v7206_v19 = vld [vmem:[%s11619_s1 + $0xc20] sm:$0xf] }
 0x153   : > { %v3514_v52 = vadd.f32 %v3513_v36, %v3485_v37  ;;  %3843 = vmatmul.bf16.vlgmr.msrb.gmra.mxu0 %v9628_v27  ;;  %v7087_v36 = vor.u32 %v7736_v49, %v7086_v59  ;;  %v5434_v37 = vld [vmem:[%s8137_s12 + $0x118] sm:$0xf]  ;;  %v5688_v59 = vld [vmem:[%s11619_s1 + $0x48] sm:$0xf0]  ;;  %v7078_v49 = vld [vmem:[%s11619_s1 + $0xb20] sm:$0xf]  ;;  %3927 = vmatpush.bf16.msra.mxu3 %v7143_v25 }
 0x154   : > { %v7766_v25 = vld [vmem:[%s11619_s1 + $0xc24] sm:$0xf0] }
 0x155   : > { %3814 = vmatmul.bf16.vlgmr.msrb.gmra.mxu3 %v9630_v56  ;;  %3872 = vmatmul.bf16.vlgmr.msrb.gmra.mxu1 %v9632_v29  ;;  %v9659_v13 = vadd.f32 %v3542_v24, %v3514_v52  ;;  %v3554_v34 = vpop.f32.mrf.mxu2  ;;  %v5426_v24 = vld [vmem:[%s8137_s12 + $0x110] sm:$0xf] }
 0x156   : > { %v3555_v35 = vadd.f32 %v3554_v34, %v9399_v30  ;;  %3897 = vmatpush.bf16.msra.mxu2 %v7087_v36  ;;  %v7385_v30 = vld [vmem:[%s11619_s1 + $0x44] sm:$0xf] }
 0x157   : > { %v5691_v36 = vor.u32 %v7385_v30, %v5688_v59  ;;  %v5436_v30 = vld [vmem:[%s8137_s12 + $0x17c] sm:$0xf0] }
 0x158   : > { %v3583_v5 = vpop.f32.mrf.mxu3  ;;  %v3614_v14 = vpop.f32.mrf.mxu0 }
 0x159   : > { %v3584_v26 = vadd.f32 %v3583_v5, %v3555_v35  ;;  %v7768_v35 = vld [vmem:[%s11619_s1 + $0xc34] sm:$0xf0]  ;;  %3983 = vmatpush.bf16.msra.mxu1 %v5691_v36 }
 0x15a   : > { %v3643_v52 = vpop.f32.mrf.mxu1  ;;  %v7215_v59 = vor.u32 %v7768_v35, %v7214_v42 }
 0x15b   : > { %v3613_v50 = vadd.f32 %v3612_v20, %v3584_v26  ;;  %v7734_v20 = vld [vmem:[%s11619_s1 + $0xb24] sm:$0xf0]  ;;  %v7312_v26 = vld [vmem:[%s8137_s12 + $0x11c] sm:$0xf] }
 0x15c   : > { %v7079_v34 = vor.u32 %v7734_v20, %v7078_v49  ;;  %v9700_v49 = vor.u32 %v7323_v55, %v5426_v24  ;;  %v9702_v20 = vor.u32 %v7324_v58, %v5434_v37  ;;  %3955 = vmatpush.bf16.msra.mxu0 %v7215_v59  ;;  %v5680_v24 = vld [vmem:[%s11619_s1 + $0x38] sm:$0xf0]  ;;  %v7134_v37 = vld [vmem:[%s11619_s1 + $0xb90] sm:$0xf]  ;;  %v7748_v58 = vld [vmem:[%s11619_s1 + $0xb94] sm:$0xf0] }
 0x15d   : > { %v9695_v5 = vadd.f32 %v3641_v22, %v3613_v50  ;;  %v3556_v51 = vpop.f32.mrf.mxu2  ;;  %v9706_v50 = vor.u32 %v7312_v26, %v5436_v30  ;;  %v5526_v59 = vld [vmem:[%s8137_s12 + $0x1d8] sm:$0xf] }
 0x15e   : > { %v3557_v29 = vadd.f32 %v3556_v51, %v9437_v41  ;;  %11735 = vst [vmem:[#allocation50_spill] sm:$0xff] %v9700_v49  ;;  %3898 = vmatpush.bf16.msra.mxu2 %v7079_v34  ;;  %v7383_v41 = vld [vmem:[%s11619_s1 + $0x34] sm:$0xf]  ;;  %v7135_v34 = vor.u32 %v7748_v58, %v7134_v37  ;;  %v7207_v51 = vor.u32 %v7766_v25, %v7206_v19  ;;  %v7126_v37 = vld [vmem:[%s11619_s1 + $0xb80] sm:$0xf] }
 0x15f   : > { %11736 = vst [vmem:[#allocation51_spill] sm:$0xff] %v9702_v20  ;;  %v5683_v55 = vor.u32 %v7383_v41, %v5680_v24  ;;  %v7349_v41 = vld [vmem:[%s8137_s12 + $0x240] sm:$0xf0]  ;;  %v7746_v19 = vld [vmem:[%s11619_s1 + $0xb84] sm:$0xf0] }
 0x160   : > { %v3585_v27 = vpop.f32.mrf.mxu3  ;;  %v3617_v12 = vpop.f32.mrf.mxu0  ;;  %11737 = vst [vmem:[#allocation52_spill] sm:$0xff] %v9706_v50  ;;  %3928 = vmatpush.bf16.msra.mxu3 %v7135_v34  ;;  %3956 = vmatpush.bf16.msra.mxu0 %v7207_v51  ;;  %v7381_v24 = vld [vmem:[%s11619_s1 + $0x24] sm:$0xf]  ;;  %v7336_v34 = vld [vmem:[%s8137_s12 + $0x1dc] sm:$0xf] }
 0x161   : > { %v3586_v22 = vadd.f32 %v3585_v27, %v3557_v29  ;;  %v7070_v27 = vld [vmem:[%s11619_s1 + $0xb10] sm:$0xf]  ;;  %v7732_v29 = vld [vmem:[%s11619_s1 + $0xb14] sm:$0xf0]  ;;  %3984 = vmatpush.bf16.msra.mxu1 %v5683_v55  ;;  %v5528_v25 = vld [vmem:[%s8137_s12 + $0x23c] sm:$0xf0] }
 0x162   : > { %v3646_v54 = vpop.f32.mrf.mxu1  ;;  %3790 = vmatmul.bf16.gmra.mxu2 %v9700_v49 }
 0x163   : > { %v3615_v56 = vadd.f32 %v3614_v14, %v3586_v22  ;;  %3848 = vmatmul.bf16.gmra.mxu0 %v9702_v20  ;;  %v7071_v14 = vor.u32 %v7732_v29, %v7070_v27  ;;  %v5534_v22 = vld [vmem:[%s8137_s12 + $0x1e0] sm:$0xf] }
 0x164   : > { %v7062_v29 = vld [vmem:[%s11619_s1 + $0xb00] sm:$0xf] }
 0x165   : > { %3819 = vmatmul.bf16.gmra.mxu3 %v9704_v57  ;;  %3877 = vmatmul.bf16.gmra.mxu1 %v9706_v50  ;;  %v9733_v36 = vadd.f32 %v3643_v52, %v3615_v56  ;;  %v3559_v45 = vpop.f32.mrf.mxu2  ;;  %v7348_v56 = vld [vmem:[%s8137_s12 + $0x238] sm:$0xf0] }
 0x166   : > { %v3560_v42 = vadd.f32 %v3559_v45, %v9474_v60  ;;  %3899 = vmatpush.bf16.msra.mxu2 %v7071_v14  ;;  %v5672_v60 = vld [vmem:[%s11619_s1 + $0x28] sm:$0xf0]  ;;  %v7730_v14 = vld [vmem:[%s11619_s1 + $0xb04] sm:$0xf0]  ;;  %v7764_v45 = vld [vmem:[%s11619_s1 + $0xc14] sm:$0xf0] }
 0x167   : > { %v5675_v27 = vor.u32 %v7381_v24, %v5672_v60  ;;  %v7063_v58 = vor.u32 %v7730_v14, %v7062_v29  ;;  %v9772_v60 = vor.u32 %v7348_v56, %v5526_v59  ;;  %v5536_v29 = vld [vmem:[%s8137_s12 + $0x244] sm:$0xf0]  ;;  %v7379_v14 = vld [vmem:[%s11619_s1 + $0x14] sm:$0xf]  ;;  %v5664_v50 = vld [vmem:[%s11619_s1 + $0x18] sm:$0xf0]  ;;  %v9784_v56 = vor.u32 %v7336_v34, %v5528_v25 }
 0x168   : > { %v3588_v35 = vpop.f32.mrf.mxu3  ;;  %v3619_v26 = vpop.f32.mrf.mxu0  ;;  %v5776_v25 = vld [vmem:[%s11619_s1 + $0xf8] sm:$0xf0] }
 0x169   : > { %v3589_v30 = vadd.f32 %v3588_v35, %v3560_v42  ;;  %v7337_v42 = vld [vmem:[%s8137_s12 + $0x1e4] sm:$0xf]  ;;  %3985 = vmatpush.bf16.msra.mxu1 %v5675_v27  ;;  %v7127_v35 = vor.u32 %v7746_v19, %v7126_v37  ;;  %11738 = vst [vmem:[#allocation53_spill] sm:$0xff] %v9772_v60  ;;  %v9782_v37 = vor.u32 %v7349_v41, %v5534_v22  ;;  %v5656_v41 = vld [vmem:[%s11619_s1 + $0x8] sm:$0xf0] }
 0x16a   : > { %v3648_v52 = vpop.f32.mrf.mxu1  ;;  %3900 = vmatpush.bf16.msra.mxu2 %v7063_v58  ;;  %11740 = vst [vmem:[#allocation55_spill] sm:$0xff] %v9784_v56  ;;  %v7762_v58 = vld [vmem:[%s11619_s1 + $0xc04] sm:$0xf0] }
 0x16b   : > { %v3618_v55 = vadd.f32 %v3617_v12, %v3589_v30  ;;  %v7198_v12 = vld [vmem:[%s11619_s1 + $0xc10] sm:$0xf]  ;;  %11739 = vst [vmem:[#allocation54_spill] sm:$0xff] %v9782_v37  ;;  %3929 = vmatpush.bf16.msra.mxu3 %v7127_v35  ;;  %v5840_v35 = vld [vmem:[%s11619_s1 + $0x178] sm:$0xf0] }
 0x16c   : > { %v7199_v51 = vor.u32 %v7764_v45, %v7198_v12  ;;  %v9792_v12 = vor.u32 %v7337_v42, %v5536_v29 }
 0x16d   : > { %v9770_v30 = vadd.f32 %v3646_v54, %v3618_v55  ;;  %v3561_v24 = vpop.f32.mrf.mxu2  ;;  %v5667_v54 = vor.u32 %v7379_v14, %v5664_v50  ;;  %v7190_v55 = vld [vmem:[%s11619_s1 + $0xc00] sm:$0xf]  ;;  %v7377_v50 = vld [vmem:[%s11619_s1 + $0x4] sm:$0xf] }
 0x16e   : > { %v3562_v20 = vadd.f32 %v3561_v24, %v9520_v44  ;;  %3957 = vmatpush.bf16.msra.mxu0 %v7199_v51  ;;  %11741 = vst [vmem:[#allocation56_spill] sm:$0xff] %v9792_v12  ;;  %v7191_v44 = vor.u32 %v7762_v58, %v7190_v55  ;;  %v5659_v34 = vor.u32 %v7377_v50, %v5656_v41  ;;  %v5634_v50 = vld [vmem:[%s8137_s12 + $0x2a8] sm:$0xf]  ;;  %v7374_v41 = vld [vmem:[%s8137_s12 + $0x308] sm:$0xf0] }
 0x16f   : > { %3986 = vmatpush.bf16.msra.mxu1 %v5667_v54 }
 0x170   : > { %v3590_v27 = vpop.f32.mrf.mxu3  ;;  %v3622_v59 = vpop.f32.mrf.mxu0 }
 0x171   : > { %v3591_v19 = vadd.f32 %v3590_v27, %v3562_v20  ;;  %v7407_v20 = vld [vmem:[%s11619_s1 + $0xf4] sm:$0xf] }
 0x172   : > { %v3651_v22 = vpop.f32.mrf.mxu1  ;;  %3795 = vmatmul.bf16.gmra.mxu2 %v9772_v60  ;;  %3958 = vmatpush.bf16.msra.mxu0 %v7191_v44  ;;  %v5779_v42 = vor.u32 %v7407_v20, %v5776_v25  ;;  %v7373_v44 = vld [vmem:[%s8137_s12 + $0x300] sm:$0xf0]  ;;  %v5832_v25 = vld [vmem:[%s11619_s1 + $0x168] sm:$0xf0]  ;;  %v9850_v60 = vor.u32 %v7374_v41, %v5634_v50  ;;  %v7419_v41 = vld [vmem:[%s11619_s1 + $0x154] sm:$0xf] }
 0x173   : > { %v3620_v45 = vadd.f32 %v3619_v26, %v3591_v19  ;;  %3853 = vmatmul.bf16.gmra.mxu0 %v9782_v37  ;;  %v7423_v26 = vld [vmem:[%s11619_s1 + $0x174] sm:$0xf]  ;;  %3987 = vmatpush.bf16.msra.mxu1 %v5659_v34  ;;  %v5626_v19 = vld [vmem:[%s8137_s12 + $0x2a0] sm:$0xf]  ;;  %v7421_v34 = vld [vmem:[%s11619_s1 + $0x164] sm:$0xf] }
 0x174   : > { %v5843_v29 = vor.u32 %v7423_v26, %v5840_v35  ;;  %4009 = vmatpush.bf16.msrb.mxu2 %v5779_v42  ;;  %v5904_v26 = vld [vmem:[%s11619_s1 + $0x1f8] sm:$0xf0]  ;;  %v7361_v42 = vld [vmem:[%s8137_s12 + $0x2a4] sm:$0xf]  ;;  %v5628_v35 = vld [vmem:[%s8137_s12 + $0x304] sm:$0xf0]  ;;  %v9848_v37 = vor.u32 %v7373_v44, %v5626_v19 }
 0x175   : > { %3824 = vmatmul.bf16.gmra.mxu3 %v9784_v56  ;;  %3882 = vmatmul.bf16.gmra.mxu1 %v9792_v12  ;;  %v9816_v51 = vadd.f32 %v3648_v52, %v3620_v45  ;;  %v3564_v24 = vpop.f32.mrf.mxu2  ;;  %v7405_v45 = vld [vmem:[%s11619_s1 + $0xe4] sm:$0xf]  ;;  %11743 = vst [vmem:[#allocation58_spill] sm:$0xff] %v9850_v60  ;;  %v9852_v49 = vor.u32 %v7361_v42, %v5628_v35  ;;  %v5968_v19 = vld [vmem:[%s11619_s1 + $0x278] sm:$0xf0] }
 0x176   : > { %v3565_v14 = vadd.f32 %v3564_v24, %v9547_v28  ;;  %4038 = vmatpush.bf16.msrb.mxu3 %v5843_v29  ;;  %v5768_v28 = vld [vmem:[%s11619_s1 + $0xe8] sm:$0xf0]  ;;  %v5835_v24 = vor.u32 %v7421_v34, %v5832_v25  ;;  %11742 = vst [vmem:[#allocation57_spill] sm:$0xff] %v9848_v37 }
 0x177   : > { %v5771_v20 = vor.u32 %v7405_v45, %v5768_v28  ;;  %v5636_v45 = vld [vmem:[%s8137_s12 + $0x30c] sm:$0xf0] }
 0x178   : > { %v3593_v27 = vpop.f32.mrf.mxu3  ;;  %v3624_v54 = vpop.f32.mrf.mxu0 }
 0x179   : > { %v3594_v55 = vadd.f32 %v3593_v27, %v3565_v14  ;;  %4010 = vmatpush.bf16.msrb.mxu2 %v5771_v20  ;;  %v5824_v20 = vld [vmem:[%s11619_s1 + $0x158] sm:$0xf0] }
 0x17a   : > { %v3653_v58 = vpop.f32.mrf.mxu1  ;;  %4039 = vmatpush.bf16.msrb.mxu3 %v5835_v24  ;;  %v5827_v35 = vor.u32 %v7419_v41, %v5824_v20  ;;  %v5896_v24 = vld [vmem:[%s11619_s1 + $0x1e8] sm:$0xf0] }
 0x17b   : > { %v3623_v52 = vadd.f32 %v3622_v59, %v3594_v55  ;;  %v7439_v59 = vld [vmem:[%s11619_s1 + $0x1f4] sm:$0xf]  ;;  %v7362_v55 = vld [vmem:[%s8137_s12 + $0x2ac] sm:$0xf] }
 0x17c   : > { %v5907_v29 = vor.u32 %v7439_v59, %v5904_v26  ;;  %v9854_v25 = vor.u32 %v7362_v55, %v5636_v45  ;;  %v7437_v59 = vld [vmem:[%s11619_s1 + $0x1e4] sm:$0xf]  ;;  %v5752_v20 = vld [vmem:[%s11619_s1 + $0xc8] sm:$0xf0] }
 0x17d   : > { %v9843_v14 = vadd.f32 %v3651_v22, %v3623_v52  ;;  %v3566_v27 = vpop.f32.mrf.mxu2  ;;  %v5899_v55 = vor.u32 %v7437_v59, %v5896_v24  ;;  %v5816_v59 = vld [vmem:[%s11619_s1 + $0x148] sm:$0xf0] }
 0x17e   : > { %v3567_v28 = vadd.f32 %v3566_v27, %v9585_v53  ;;  %4067 = vmatpush.bf16.msrb.mxu0 %v5907_v29  ;;  %11744 = vst [vmem:[#allocation59_spill] sm:$0xff] %v9854_v25  ;;  %v7455_v53 = vld [vmem:[%s11619_s1 + $0x274] sm:$0xf]  ;;  %4040 = vmatpush.bf16.msrb.mxu3 %v5827_v35 }
 0x17f   : > { %v5971_v44 = vor.u32 %v7455_v53, %v5968_v19  ;;  %v5350_v53 = vld [vmem:[%s8137_s12 + $0x60] sm:$0xf]  ;;  %v7301_v19 = vld [vmem:[%s8137_s12 + $0xc0] sm:$0xf0] }
 0x180   : > { %v3595_v12 = vpop.f32.mrf.mxu3  ;;  %v3627_v56 = vpop.f32.mrf.mxu0 }
 0x181   : > { %v3596_v34 = vadd.f32 %v3595_v12, %v3567_v28  ;;  %v7403_v12 = vld [vmem:[%s11619_s1 + $0xd4] sm:$0xf]  ;;  %4096 = vmatpush.bf16.msrb.mxu1 %v5971_v44 }
 0x182   : > { %v3656_v22 = vpop.f32.mrf.mxu1  ;;  %3800 = vmatmul.bf16.gmra.mxu2 %v9848_v37  ;;  %4068 = vmatpush.bf16.msrb.mxu0 %v5899_v55 }
 0x183   : > { %v3625_v52 = vadd.f32 %v3624_v54, %v3596_v34  ;;  %3858 = vmatmul.bf16.gmra.mxu0 %v9850_v60  ;;  %v5760_v54 = vld [vmem:[%s11619_s1 + $0xd8] sm:$0xf0]  ;;  %v5342_v34 = vld [vmem:[%s8137_s12 + $0x58] sm:$0xf] }
 0x184   : > { %v5763_v50 = vor.u32 %v7403_v12, %v5760_v54  ;;  %v7288_v12 = vld [vmem:[%s8137_s12 + $0x5c] sm:$0xf]  ;;  %v7453_v54 = vld [vmem:[%s11619_s1 + $0x264] sm:$0xf] }
 0x185   : > { %3829 = vmatmul.bf16.gmra.mxu3 %v9852_v49  ;;  %3887 = vmatmul.bf16.gmra.mxu1 %v9854_v25  ;;  %v9881_v26 = vadd.f32 %v3653_v58, %v3625_v52  ;;  %v3569_v42 = vpop.f32.mrf.mxu2  ;;  %v7300_v52 = vld [vmem:[%s8137_s12 + $0xb8] sm:$0xf0] }
 0x186   : > { %v3570_v29 = vadd.f32 %v3569_v42, %v9621_v43  ;;  %4011 = vmatpush.bf16.msrb.mxu2 %v5763_v50  ;;  %v5960_v43 = vld [vmem:[%s11619_s1 + $0x268] sm:$0xf0]  ;;  %v7401_v50 = vld [vmem:[%s11619_s1 + $0xc4] sm:$0xf]  ;;  %v5344_v42 = vld [vmem:[%s8137_s12 + $0xbc] sm:$0xf0]  ;;  %v9920_v60 = vor.u32 %v7300_v52, %v5342_v34 }
 0x187   : > { %v5963_v41 = vor.u32 %v7453_v54, %v5960_v43  ;;  %v5755_v35 = vor.u32 %v7401_v50, %v5752_v20  ;;  %v9922_v50 = vor.u32 %v7301_v19, %v5350_v53  ;;  %v5952_v34 = vld [vmem:[%s11619_s1 + $0x258] sm:$0xf0]  ;;  %v7415_v19 = vld [vmem:[%s11619_s1 + $0x134] sm:$0xf] }
 0x188   : > { %v3598_v27 = vpop.f32.mrf.mxu3  ;;  %v3629_v45 = vpop.f32.mrf.mxu0  ;;  %11745 = vst [vmem:[#allocation60_spill] sm:$0xff] %v9920_v60 }
 0x189   : > { %v3599_v28 = vadd.f32 %v3598_v27, %v3570_v29  ;;  %v7435_v29 = vld [vmem:[%s11619_s1 + $0x1d4] sm:$0xf]  ;;  %v5888_v27 = vld [vmem:[%s11619_s1 + $0x1d8] sm:$0xf0]  ;;  %4097 = vmatpush.bf16.msrb.mxu1 %v5963_v41  ;;  %11746 = vst [vmem:[#allocation61_spill] sm:$0xff] %v9922_v50 }
 0x18a   : > { %v3658_v58 = vpop.f32.mrf.mxu1  ;;  %v5891_v54 = vor.u32 %v7435_v29, %v5888_v27  ;;  %4012 = vmatpush.bf16.msrb.mxu2 %v5755_v35  ;;  %v5880_v35 = vld [vmem:[%s11619_s1 + $0x1c8] sm:$0xf0] }
 0x18b   : > { %v3628_v44 = vadd.f32 %v3627_v56, %v3599_v28  ;;  %v7417_v56 = vld [vmem:[%s11619_s1 + $0x144] sm:$0xf] }
 0x18c   : > { %v5819_v24 = vor.u32 %v7417_v56, %v5816_v59  ;;  %v9924_v56 = vor.u32 %v7288_v12, %v5344_v42  ;;  %4069 = vmatpush.bf16.msrb.mxu0 %v5891_v54  ;;  %v7433_v12 = vld [vmem:[%s11619_s1 + $0x1c4] sm:$0xf] }
 0x18d   : > { %v9917_v55 = vadd.f32 %v3656_v22, %v3628_v44  ;;  %v3571_v28 = vpop.f32.mrf.mxu2  ;;  %v5808_v44 = vld [vmem:[%s11619_s1 + $0x138] sm:$0xf0]  ;;  %v5883_v27 = vor.u32 %v7433_v12, %v5880_v35  ;;  %v5444_v12 = vld [vmem:[%s8137_s12 + $0x184] sm:$0xf0]  ;;  %v7431_v35 = vld [vmem:[%s11619_s1 + $0x1b4] sm:$0xf] }
 0x18e   : > { %v3572_v43 = vadd.f32 %v3571_v28, %v9659_v13  ;;  %4041 = vmatpush.bf16.msrb.mxu3 %v5819_v24  ;;  %v7451_v13 = vld [vmem:[%s11619_s1 + $0x254] sm:$0xf] }
 0x18f   : > { %v5955_v52 = vor.u32 %v7451_v13, %v5952_v34  ;;  %v7326_v13 = vld [vmem:[%s8137_s12 + $0x188] sm:$0xf0] }
 0x190   : > { %v3600_v25 = vpop.f32.mrf.mxu3  ;;  %v3728_v20 = vpop.f32.mrf.mxu0  ;;  %4070 = vmatpush.bf16.msrb.mxu0 %v5883_v27 }
 0x191   : > { %v3601_v59 = vadd.f32 %v3600_v25, %v3572_v43  ;;  %v7399_v25 = vld [vmem:[%s11619_s1 + $0xb4] sm:$0xf]  ;;  %4098 = vmatpush.bf16.msrb.mxu1 %v5955_v52  ;;  %v5442_v43 = vld [vmem:[%s8137_s12 + $0x120] sm:$0xf]  ;;  %v7313_v52 = vld [vmem:[%s8137_s12 + $0x124] sm:$0xf] }
 0x192   : > { %v3757_v37 = vpop.f32.mrf.mxu1  ;;  %3901 = vmatmul.bf16.vlgmr.msra.gmra.mxu2 %v9920_v60 }
 0x193   : > { %v3630_v22 = vadd.f32 %v3629_v45, %v3601_v59  ;;  %3959 = vmatmul.bf16.vlgmr.msra.gmra.mxu0 %v9922_v50  ;;  %v5744_v45 = vld [vmem:[%s11619_s1 + $0xb8] sm:$0xf0]  ;;  %v7325_v59 = vld [vmem:[%s8137_s12 + $0x180] sm:$0xf0] }
 0x194   : > { %v5747_v53 = vor.u32 %v7399_v25, %v5744_v45  ;;  %v7449_v25 = vld [vmem:[%s11619_s1 + $0x244] sm:$0xf]  ;;  %v9990_v50 = vor.u32 %v7325_v59, %v5442_v43  ;;  %v5936_v43 = vld [vmem:[%s11619_s1 + $0x238] sm:$0xf0] }
 0x195   : > { %3930 = vmatmul.bf16.vlgmr.msra.gmra.mxu3 %v9924_v56  ;;  %3988 = vmatmul.bf16.vlgmr.msra.gmra.mxu1 %v8182_v4  ;;  %v9951_v41 = vadd.f32 %v3658_v58, %v3630_v22  ;;  %v3670_v42 = vpop.f32.mrf.mxu2  ;;  %v5811_v4 = vor.u32 %v7415_v19, %v5808_v44  ;;  %v5450_v22 = vld [vmem:[%s8137_s12 + $0x128] sm:$0xf]  ;;  %v7397_v45 = vld [vmem:[%s11619_s1 + $0xa4] sm:$0xf]  ;;  %v5736_v19 = vld [vmem:[%s11619_s1 + $0xa8] sm:$0xf0] }
 0x196   : > { %v3671_v24 = vadd.f32 %v3670_v42, %v9695_v5  ;;  %4013 = vmatpush.bf16.msrb.mxu2 %v5747_v53  ;;  %v5944_v5 = vld [vmem:[%s11619_s1 + $0x248] sm:$0xf0]  ;;  %v5739_v42 = vor.u32 %v7397_v45, %v5736_v19  ;;  %11747 = vst [vmem:[#allocation62_spill] sm:$0xff] %v9990_v50  ;;  %v9992_v45 = vor.u32 %v7326_v13, %v5450_v22  ;;  %v7395_v22 = vld [vmem:[%s11619_s1 + $0x94] sm:$0xf] }
 0x197   : > { %4042 = vmatpush.bf16.msrb.mxu3 %v5811_v4  ;;  %v5947_v53 = vor.u32 %v7449_v25, %v5944_v5  ;;  %v5800_v44 = vld [vmem:[%s11619_s1 + $0x128] sm:$0xf0] }
 0x198   : > { %v3699_v29 = vpop.f32.mrf.mxu3  ;;  %v3730_v28 = vpop.f32.mrf.mxu0  ;;  %11748 = vst [vmem:[#allocation63_spill] sm:$0xff] %v9992_v45 }
 0x199   : > { %v3700_v54 = vadd.f32 %v3699_v29, %v3671_v24  ;;  %v5872_v24 = vld [vmem:[%s11619_s1 + $0x1b8] sm:$0xf0]  ;;  %4099 = vmatpush.bf16.msrb.mxu1 %v5947_v53  ;;  %v7429_v53 = vld [vmem:[%s11619_s1 + $0x1a4] sm:$0xf] }
 0x19a   : > { %v3759_v58 = vpop.f32.mrf.mxu1  ;;  %4014 = vmatpush.bf16.msrb.mxu2 %v5739_v42 }
 0x19b   : > { %v3729_v34 = vadd.f32 %v3728_v20, %v3700_v54  ;;  %v7413_v20 = vld [vmem:[%s11619_s1 + $0x124] sm:$0xf]  ;;  %v5875_v54 = vor.u32 %v7431_v35, %v5872_v24 }
 0x19c   : > { %v5803_v4 = vor.u32 %v7413_v20, %v5800_v44  ;;  %v9994_v20 = vor.u32 %v7313_v52, %v5444_v12  ;;  %v5792_v52 = vld [vmem:[%s11619_s1 + $0x118] sm:$0xf0] }
 0x19d   : > { %v9987_v29 = vadd.f32 %v3757_v37, %v3729_v34  ;;  %v3672_v27 = vpop.f32.mrf.mxu2  ;;  %4071 = vmatpush.bf16.msrb.mxu0 %v5875_v54  ;;  %v7411_v34 = vld [vmem:[%s11619_s1 + $0x114] sm:$0xf] }
 0x19e   : > { %v3673_v25 = vadd.f32 %v3672_v27, %v9733_v36  ;;  %4043 = vmatpush.bf16.msrb.mxu3 %v5803_v4  ;;  %v7447_v36 = vld [vmem:[%s11619_s1 + $0x234] sm:$0xf]  ;;  %v5864_v4 = vld [vmem:[%s11619_s1 + $0x1a8] sm:$0xf0] }
 0x19f   : > { %v5939_v59 = vor.u32 %v7447_v36, %v5936_v43  ;;  %v5867_v27 = vor.u32 %v7429_v53, %v5864_v4  ;;  %v7351_v36 = vld [vmem:[%s8137_s12 + $0x250] sm:$0xf0]  ;;  %v7445_v43 = vld [vmem:[%s11619_s1 + $0x224] sm:$0xf]  ;;  %v5784_v53 = vld [vmem:[%s11619_s1 + $0x108] sm:$0xf0] }
 0x1a0   : > { %v3701_v5 = vpop.f32.mrf.mxu3  ;;  %v3733_v19 = vpop.f32.mrf.mxu0  ;;  %v5544_v4 = vld [vmem:[%s8137_s12 + $0x24c] sm:$0xf0] }
 0x1a1   : > { %v3702_v44 = vadd.f32 %v3701_v5, %v3673_v25  ;;  %4100 = vmatpush.bf16.msrb.mxu1 %v5939_v59  ;;  %v5542_v5 = vld [vmem:[%s8137_s12 + $0x1e8] sm:$0xf]  ;;  %4072 = vmatpush.bf16.msrb.mxu0 %v5867_v27 }
 0x1a2   : > { %v3762_v60 = vpop.f32.mrf.mxu1  ;;  %3906 = vmatmul.bf16.gmra.mxu2 %v9990_v50 }
 0x1a3   : > { %v3731_v37 = vadd.f32 %v3730_v28, %v3702_v44  ;;  %3964 = vmatmul.bf16.gmra.mxu0 %v9992_v45  ;;  %v5728_v28 = vld [vmem:[%s11619_s1 + $0x98] sm:$0xf0] }
 0x1a4   : > { %v5731_v13 = vor.u32 %v7395_v22, %v5728_v28  ;;  %v7393_v28 = vld [vmem:[%s11619_s1 + $0x84] sm:$0xf] }
 0x1a5   : > { %3935 = vmatmul.bf16.gmra.mxu3 %v9994_v20  ;;  %3993 = vmatmul.bf16.gmra.mxu1 %v8298_v0  ;;  %v10021_v12 = vadd.f32 %v3759_v58, %v3731_v37  ;;  %v3675_v42 = vpop.f32.mrf.mxu2  ;;  %v5795_v0 = vor.u32 %v7411_v34, %v5792_v52  ;;  %v7350_v58 = vld [vmem:[%s8137_s12 + $0x248] sm:$0xf0]  ;;  %v5550_v37 = vld [vmem:[%s8137_s12 + $0x1f0] sm:$0xf]  ;;  %v7409_v34 = vld [vmem:[%s11619_s1 + $0x104] sm:$0xf] }
 0x1a6   : > { %v3676_v35 = vadd.f32 %v3675_v42, %v9770_v30  ;;  %4015 = vmatpush.bf16.msrb.mxu2 %v5731_v13  ;;  %v5928_v30 = vld [vmem:[%s11619_s1 + $0x228] sm:$0xf0]  ;;  %v5856_v42 = vld [vmem:[%s11619_s1 + $0x198] sm:$0xf0] }
 0x1a7   : > { %4044 = vmatpush.bf16.msrb.mxu3 %v5795_v0  ;;  %v5931_v22 = vor.u32 %v7445_v43, %v5928_v30  ;;  %v5720_v13 = vld [vmem:[%s11619_s1 + $0x88] sm:$0xf0]  ;;  %v10059_v43 = vor.u32 %v7350_v58, %v5542_v5  ;;  %v7443_v30 = vld [vmem:[%s11619_s1 + $0x214] sm:$0xf]  ;;  %v7425_v58 = vld [vmem:[%s11619_s1 + $0x184] sm:$0xf] }
 0x1a8   : > { %v3704_v24 = vpop.f32.mrf.mxu3  ;;  %v3735_v54 = vpop.f32.mrf.mxu0  ;;  %v5723_v52 = vor.u32 %v7393_v28, %v5720_v13  ;;  %v7338_v0 = vld [vmem:[%s8137_s12 + $0x1ec] sm:$0xf]  ;;  %v5920_v28 = vld [vmem:[%s11619_s1 + $0x218] sm:$0xf0] }
 0x1a9   : > { %v3705_v25 = vadd.f32 %v3704_v24, %v3676_v35  ;;  %4101 = vmatpush.bf16.msrb.mxu1 %v5931_v22  ;;  %v5787_v35 = vor.u32 %v7409_v34, %v5784_v53  ;;  %11749 = vst [vmem:[#allocation64_spill] sm:$0xff] %v10059_v43  ;;  %v10068_v22 = vor.u32 %v7351_v36, %v5550_v37  ;;  %v5848_v34 = vld [vmem:[%s11619_s1 + $0x188] sm:$0xf0]  ;;  %v7441_v37 = vld [vmem:[%s11619_s1 + $0x204] sm:$0xf] }
 0x1aa   : > { %v3764_v44 = vpop.f32.mrf.mxu1  ;;  %4016 = vmatpush.bf16.msrb.mxu2 %v5723_v52  ;;  %v10070_v5 = vor.u32 %v7338_v0, %v5544_v4  ;;  %v5912_v36 = vld [vmem:[%s11619_s1 + $0x208] sm:$0xf0]  ;;  %v6032_v0 = vld [vmem:[%s11619_s1 + $0x2f8] sm:$0xf0] }
 0x1ab   : > { %v3734_v59 = vadd.f32 %v3733_v19, %v3705_v25  ;;  %v7427_v19 = vld [vmem:[%s11619_s1 + $0x194] sm:$0xf]  ;;  %11750 = vst [vmem:[#allocation65_spill] sm:$0xff] %v10068_v22  ;;  %4045 = vmatpush.bf16.msrb.mxu3 %v5787_v35  ;;  %v6096_v35 = vld [vmem:[%s11619_s1 + $0x378] sm:$0xf0] }
 0x1ac   : > { %v5859_v24 = vor.u32 %v7427_v19, %v5856_v42  ;;  %11751 = vst [vmem:[#allocation66_spill] sm:$0xff] %v10070_v5  ;;  %v5915_v42 = vor.u32 %v7441_v37, %v5912_v36  ;;  %v7376_v37 = vld [vmem:[%s8137_s12 + $0x318] sm:$0xf0] }
 0x1ad   : > { %v10057_v27 = vadd.f32 %v3762_v60, %v3734_v59  ;;  %v3677_v25 = vpop.f32.mrf.mxu2  ;;  %v5923_v60 = vor.u32 %v7443_v30, %v5920_v28 }
 0x1ae   : > { %v3678_v13 = vadd.f32 %v3677_v25, %v9816_v51  ;;  %4073 = vmatpush.bf16.msrb.mxu0 %v5859_v24  ;;  %v5851_v51 = vor.u32 %v7425_v58, %v5848_v34  ;;  %v5642_v34 = vld [vmem:[%s8137_s12 + $0x2b0] sm:$0xf] }
 0x1af   : > { %4102 = vmatpush.bf16.msrb.mxu1 %v5923_v60 }
 0x1b0   : > { %v3706_v45 = vpop.f32.mrf.mxu3  ;;  %v3738_v59 = vpop.f32.mrf.mxu0 }
 0x1b1   : > { %v3707_v52 = vadd.f32 %v3706_v45, %v3678_v13  ;;  %v7471_v45 = vld [vmem:[%s11619_s1 + $0x2f4] sm:$0xf] }
 0x1b2   : > { %v3767_v53 = vpop.f32.mrf.mxu1  ;;  %3911 = vmatmul.bf16.gmra.mxu2 %v10059_v43  ;;  %4074 = vmatpush.bf16.msrb.mxu0 %v5851_v51  ;;  %v6035_v4 = vor.u32 %v7471_v45, %v6032_v0  ;;  %v5650_v51 = vld [vmem:[%s8137_s12 + $0x2b8] sm:$0xf]  ;;  %v6088_v45 = vld [vmem:[%s11619_s1 + $0x368] sm:$0xf0]  ;;  %v6160_v0 = vld [vmem:[%s11619_s1 + $0x3f8] sm:$0xf0] }
 0x1b3   : > { %v3736_v19 = vadd.f32 %v3735_v54, %v3707_v52  ;;  %3969 = vmatmul.bf16.gmra.mxu0 %v10068_v22  ;;  %v7487_v54 = vld [vmem:[%s11619_s1 + $0x374] sm:$0xf]  ;;  %4103 = vmatpush.bf16.msrb.mxu1 %v5915_v42 }
 0x1b4   : > { %v6099_v30 = vor.u32 %v7487_v54, %v6096_v35  ;;  %4125 = vmatpush.bf16.msra.mxu2 %v6035_v4  ;;  %v7375_v52 = vld [vmem:[%s8137_s12 + $0x310] sm:$0xf0]  ;;  %v5644_v4 = vld [vmem:[%s8137_s12 + $0x314] sm:$0xf0] }
 0x1b5   : > { %3940 = vmatmul.bf16.gmra.mxu3 %v10070_v5  ;;  %3998 = vmatmul.bf16.gmra.mxu1 %v8180_v3  ;;  %v10100_v24 = vadd.f32 %v3764_v44, %v3736_v19  ;;  %v3680_v25 = vpop.f32.mrf.mxu2  ;;  %v7469_v44 = vld [vmem:[%s11619_s1 + $0x2e4] sm:$0xf]  ;;  %v7363_v54 = vld [vmem:[%s8137_s12 + $0x2b4] sm:$0xf] }
 0x1b6   : > { %v3681_v28 = vadd.f32 %v3680_v25, %v9843_v14  ;;  %4154 = vmatpush.bf16.msra.mxu3 %v6099_v30  ;;  %v6024_v14 = vld [vmem:[%s11619_s1 + $0x2e8] sm:$0xf0]  ;;  %v7485_v19 = vld [vmem:[%s11619_s1 + $0x364] sm:$0xf]  ;;  %v10134_v43 = vor.u32 %v7363_v54, %v5644_v4 }
 0x1b7   : > { %v6027_v42 = vor.u32 %v7469_v44, %v6024_v14  ;;  %v6091_v35 = vor.u32 %v7485_v19, %v6088_v45  ;;  %v10130_v44 = vor.u32 %v7375_v52, %v5642_v34  ;;  %v10132_v14 = vor.u32 %v7376_v37, %v5650_v51  ;;  %v7467_v52 = vld [vmem:[%s11619_s1 + $0x2d4] sm:$0xf]  ;;  %v6080_v37 = vld [vmem:[%s11619_s1 + $0x358] sm:$0xf0] }
 0x1b8   : > { %v3709_v13 = vpop.f32.mrf.mxu3  ;;  %v3740_v60 = vpop.f32.mrf.mxu0 }
 0x1b9   : > { %v3710_v3 = vadd.f32 %v3709_v13, %v3681_v28  ;;  %4126 = vmatpush.bf16.msra.mxu2 %v6027_v42  ;;  %v6152_v42 = vld [vmem:[%s11619_s1 + $0x3e8] sm:$0xf0] }
 0x1ba   : > { %v3769_v58 = vpop.f32.mrf.mxu1  ;;  %4155 = vmatpush.bf16.msra.mxu3 %v6091_v35 }
 0x1bb   : > { %v3739_v36 = vadd.f32 %v3738_v59, %v3710_v3  ;;  %v7503_v59 = vld [vmem:[%s11619_s1 + $0x3f4] sm:$0xf] }
 0x1bc   : > { %v6163_v25 = vor.u32 %v7503_v59, %v6160_v0 }
 0x1bd   : > { %v10127_v30 = vadd.f32 %v3767_v53, %v3739_v36  ;;  %v3682_v28 = vpop.f32.mrf.mxu2  ;;  %v6224_v53 = vld [vmem:[%s11619_s1 + $0x478] sm:$0xf0]  ;;  %v7501_v36 = vld [vmem:[%s11619_s1 + $0x3e4] sm:$0xf] }
 0x1be   : > { %v3683_v13 = vadd.f32 %v3682_v28, %v9881_v26  ;;  %4183 = vmatpush.bf16.msra.mxu0 %v6163_v25  ;;  %v7519_v26 = vld [vmem:[%s11619_s1 + $0x474] sm:$0xf]  ;;  %v6155_v54 = vor.u32 %v7501_v36, %v6152_v42 }
 0x1bf   : > { %v6227_v34 = vor.u32 %v7519_v26, %v6224_v53  ;;  %v6008_v26 = vld [vmem:[%s11619_s1 + $0x2c8] sm:$0xf0] }
 0x1c0   : > { %v3711_v3 = vpop.f32.mrf.mxu3  ;;  %v3743_v22 = vpop.f32.mrf.mxu0  ;;  %v6072_v53 = vld [vmem:[%s11619_s1 + $0x348] sm:$0xf0] }
 0x1c1   : > { %v3712_v5 = vadd.f32 %v3711_v3, %v3683_v13  ;;  %4212 = vmatpush.bf16.msra.mxu1 %v6227_v34  ;;  %v7517_v3 = vld [vmem:[%s11619_s1 + $0x464] sm:$0xf] }
 0x1c2   : > { %v3772_v50 = vpop.f32.mrf.mxu1  ;;  %3916 = vmatmul.bf16.gmra.mxu2 %v10130_v44  ;;  %4184 = vmatpush.bf16.msra.mxu0 %v6155_v54 }
 0x1c3   : > { %v3741_v19 = vadd.f32 %v3740_v60, %v3712_v5  ;;  %3974 = vmatmul.bf16.gmra.mxu0 %v10132_v14  ;;  %v6016_v5 = vld [vmem:[%s11619_s1 + $0x2d8] sm:$0xf0]  ;;  %v7483_v60 = vld [vmem:[%s11619_s1 + $0x354] sm:$0xf] }
 0x1c4   : > { %v6019_v51 = vor.u32 %v7467_v52, %v6016_v5  ;;  %v6083_v0 = vor.u32 %v7483_v60, %v6080_v37  ;;  %v7499_v5 = vld [vmem:[%s11619_s1 + $0x3d4] sm:$0xf]  ;;  %v6144_v60 = vld [vmem:[%s11619_s1 + $0x3d8] sm:$0xf0] }
 0x1c5   : > { %3945 = vmatmul.bf16.gmra.mxu3 %v10134_v43  ;;  %4003 = vmatmul.bf16.gmra.mxu1 %v8296_v63  ;;  %v10164_v45 = vadd.f32 %v3769_v58, %v3741_v19  ;;  %v3685_v59 = vpop.f32.mrf.mxu2  ;;  %v6216_v58 = vld [vmem:[%s11619_s1 + $0x468] sm:$0xf0]  ;;  %v6147_v36 = vor.u32 %v7499_v5, %v6144_v60 }
 0x1c6   : > { %v3686_v63 = vadd.f32 %v3685_v59, %v9917_v55  ;;  %4127 = vmatpush.bf16.msra.mxu2 %v6019_v51  ;;  %4156 = vmatpush.bf16.msra.mxu3 %v6083_v0  ;;  %v7465_v55 = vld [vmem:[%s11619_s1 + $0x2c4] sm:$0xf]  ;;  %v6219_v19 = vor.u32 %v7517_v3, %v6216_v58  ;;  %v6136_v58 = vld [vmem:[%s11619_s1 + $0x3c8] sm:$0xf0] }
 0x1c7   : > { %v6011_v34 = vor.u32 %v7465_v55, %v6008_v26  ;;  %4185 = vmatpush.bf16.msra.mxu0 %v6147_v36  ;;  %v7497_v3 = vld [vmem:[%s11619_s1 + $0x3c4] sm:$0xf] }
 0x1c8   : > { %v3714_v4 = vpop.f32.mrf.mxu3  ;;  %v3745_v35 = vpop.f32.mrf.mxu0  ;;  %4213 = vmatpush.bf16.msra.mxu1 %v6219_v19 }
 0x1c9   : > { %v3715_v25 = vadd.f32 %v3714_v4, %v3686_v63 }
 0x1ca   : > { %v3774_v28 = vpop.f32.mrf.mxu1  ;;  %4128 = vmatpush.bf16.msra.mxu2 %v6011_v34 }
 0x1cb   : > { %v3744_v13 = vadd.f32 %v3743_v22, %v3715_v25  ;;  %v7481_v22 = vld [vmem:[%s11619_s1 + $0x344] sm:$0xf] }
 0x1cc   : > { %v6075_v52 = vor.u32 %v7481_v22, %v6072_v53  ;;  %v6139_v22 = vor.u32 %v7497_v3, %v6136_v58 }
 0x1cd   : > { %v10191_v51 = vadd.f32 %v3772_v50, %v3744_v13  ;;  %v3687_v37 = vpop.f32.mrf.mxu2  ;;  %v7515_v50 = vld [vmem:[%s11619_s1 + $0x454] sm:$0xf] }
 0x1ce   : > { %v3688_v42 = vadd.f32 %v3687_v37, %v9951_v41  ;;  %4157 = vmatpush.bf16.msra.mxu3 %v6075_v52  ;;  %v6208_v41 = vld [vmem:[%s11619_s1 + $0x458] sm:$0xf0]  ;;  %v7463_v13 = vld [vmem:[%s11619_s1 + $0x2b4] sm:$0xf]  ;;  %4186 = vmatpush.bf16.msra.mxu0 %v6139_v22  ;;  %v7513_v37 = vld [vmem:[%s11619_s1 + $0x444] sm:$0xf] }
 0x1cf   : > { %v6211_v25 = vor.u32 %v7515_v50, %v6208_v41  ;;  %v7495_v50 = vld [vmem:[%s11619_s1 + $0x3b4] sm:$0xf]  ;;  %v6128_v41 = vld [vmem:[%s11619_s1 + $0x3b8] sm:$0xf0] }
 0x1d0   : > { %v3716_v59 = vpop.f32.mrf.mxu3  ;;  %v3844_v0 = vpop.f32.mrf.mxu0  ;;  %v7459_v22 = vld [vmem:[%s11619_s1 + $0x294] sm:$0xf] }
 0x1d1   : > { %v3717_v54 = vadd.f32 %v3716_v59, %v3688_v42  ;;  %4214 = vmatpush.bf16.msra.mxu1 %v6211_v25  ;;  %v5992_v42 = vld [vmem:[%s11619_s1 + $0x2a8] sm:$0xf0]  ;;  %v7477_v59 = vld [vmem:[%s11619_s1 + $0x324] sm:$0xf] }
 0x1d2   : > { %v3873_v63 = vpop.f32.mrf.mxu1  ;;  %4017 = vmatmul.bf16.vlgmr.msrb.gmra.mxu2 %v8195_v10  ;;  %v6000_v10 = vld [vmem:[%s11619_s1 + $0x2b8] sm:$0xf0] }
 0x1d3   : > { %v3746_v4 = vadd.f32 %v3745_v35, %v3717_v54  ;;  %4075 = vmatmul.bf16.vlgmr.msrb.gmra.mxu0 %v8431_v15  ;;  %v7479_v15 = vld [vmem:[%s11619_s1 + $0x334] sm:$0xf]  ;;  %v6003_v35 = vor.u32 %v7463_v13, %v6000_v10  ;;  %v6131_v10 = vor.u32 %v7495_v50, %v6128_v41  ;;  %v5976_v50 = vld [vmem:[%s11619_s1 + $0x288] sm:$0xf0]  ;;  %v7473_v41 = vld [vmem:[%s11619_s1 + $0x304] sm:$0xf] }
 0x1d5   : > { %4046 = vmatmul.bf16.vlgmr.msrb.gmra.mxu3 %v8418_v7  ;;  %4104 = vmatmul.bf16.vlgmr.msrb.gmra.mxu1 %v8420_v11  ;;  %v6064_v7 = vld [vmem:[%s11619_s1 + $0x338] sm:$0xf0]  ;;  %v10222_v55 = vadd.f32 %v3774_v28, %v3746_v4  ;;  %v3786_v19 = vpop.f32.mrf.mxu2  ;;  %v6200_v28 = vld [vmem:[%s11619_s1 + $0x448] sm:$0xf0] }
 0x1d6   : > { %v6067_v26 = vor.u32 %v7479_v15, %v6064_v7  ;;  %v3787_v11 = vadd.f32 %v3786_v19, %v9987_v29  ;;  %4129 = vmatpush.bf16.msra.mxu2 %v6003_v35  ;;  %v7461_v29 = vld [vmem:[%s11619_s1 + $0x2a4] sm:$0xf]  ;;  %v6203_v36 = vor.u32 %v7513_v37, %v6200_v28  ;;  %4187 = vmatpush.bf16.msra.mxu0 %v6131_v10  ;;  %v6040_v10 = vld [vmem:[%s11619_s1 + $0x308] sm:$0xf0] }
 0x1d7   : > { %v5995_v54 = vor.u32 %v7461_v29, %v5992_v42 }
 0x1d8   : > { %v3815_v53 = vpop.f32.mrf.mxu3  ;;  %v3846_v34 = vpop.f32.mrf.mxu0  ;;  %4158 = vmatpush.bf16.msra.mxu3 %v6067_v26  ;;  %4215 = vmatpush.bf16.msra.mxu1 %v6203_v36 }
 0x1d9   : > { %v3816_v52 = vadd.f32 %v3815_v53, %v3787_v11  ;;  %v7493_v53 = vld [vmem:[%s11619_s1 + $0x3a4] sm:$0xf] }
 0x1da   : > { %v3875_v5 = vpop.f32.mrf.mxu1  ;;  %4130 = vmatpush.bf16.msra.mxu2 %v5995_v54 }
 0x1db   : > { %v3845_v60 = vadd.f32 %v3844_v0, %v3816_v52  ;;  %v6056_v0 = vld [vmem:[%s11619_s1 + $0x328] sm:$0xf0] }
 0x1dc   : > { %v6059_v4 = vor.u32 %v7477_v59, %v6056_v0  ;;  %v7509_v0 = vld [vmem:[%s11619_s1 + $0x424] sm:$0xf] }
 0x1dd   : > { %v10249_v25 = vadd.f32 %v3873_v63, %v3845_v60  ;;  %v3788_v13 = vpop.f32.mrf.mxu2  ;;  %v7511_v63 = vld [vmem:[%s11619_s1 + $0x434] sm:$0xf] }
 0x1de   : > { %v3789_v15 = vadd.f32 %v3788_v13, %v10021_v12  ;;  %4159 = vmatpush.bf16.msra.mxu3 %v6059_v4  ;;  %v6192_v12 = vld [vmem:[%s11619_s1 + $0x438] sm:$0xf0] }
 0x1df   : > { %v6195_v26 = vor.u32 %v7511_v63, %v6192_v12  ;;  %v7507_v12 = vld [vmem:[%s11619_s1 + $0x414] sm:$0xf] }
 0x1e0   : > { %v3817_v35 = vpop.f32.mrf.mxu3  ;;  %v3849_v7 = vpop.f32.mrf.mxu0 }
 0x1e1   : > { %v3818_v3 = vadd.f32 %v3817_v35, %v3789_v15  ;;  %4216 = vmatpush.bf16.msra.mxu1 %v6195_v26  ;;  %v7491_v15 = vld [vmem:[%s11619_s1 + $0x394] sm:$0xf]  ;;  %v6112_v35 = vld [vmem:[%s11619_s1 + $0x398] sm:$0xf0] }
 0x1e2   : > { %v3878_v58 = vpop.f32.mrf.mxu1  ;;  %4022 = vmatmul.bf16.gmra.mxu2 %v8311_v9  ;;  %v5984_v9 = vld [vmem:[%s11619_s1 + $0x298] sm:$0xf0] }
 0x1e3   : > { %v3847_v19 = vadd.f32 %v3846_v34, %v3818_v3  ;;  %4080 = vmatmul.bf16.gmra.mxu0 %v8541_v21  ;;  %v7475_v21 = vld [vmem:[%s11619_s1 + $0x314] sm:$0xf]  ;;  %v5987_v11 = vor.u32 %v7459_v22, %v5984_v9  ;;  %v6120_v34 = vld [vmem:[%s11619_s1 + $0x3a8] sm:$0xf0]  ;;  %v6115_v3 = vor.u32 %v7491_v15, %v6112_v35  ;;  %v6176_v26 = vld [vmem:[%s11619_s1 + $0x418] sm:$0xf0] }
 0x1e4   : > { %v6123_v28 = vor.u32 %v7493_v53, %v6120_v34 }
 0x1e5   : > { %4051 = vmatmul.bf16.gmra.mxu3 %v8531_v16  ;;  %4109 = vmatmul.bf16.gmra.mxu1 %v8533_v18  ;;  %v6048_v16 = vld [vmem:[%s11619_s1 + $0x318] sm:$0xf0]  ;;  %v10280_v52 = vadd.f32 %v3875_v5, %v3847_v19  ;;  %v3791_v60 = vpop.f32.mrf.mxu2  ;;  %v6184_v5 = vld [vmem:[%s11619_s1 + $0x428] sm:$0xf0] }
 0x1e6   : > { %v6051_v37 = vor.u32 %v7475_v21, %v6048_v16  ;;  %v3792_v18 = vadd.f32 %v3791_v60, %v10057_v27  ;;  %4131 = vmatpush.bf16.msra.mxu2 %v5987_v11  ;;  %4188 = vmatpush.bf16.msra.mxu0 %v6123_v28  ;;  %v6187_v4 = vor.u32 %v7509_v0, %v6184_v5  ;;  %v7457_v27 = vld [vmem:[%s11619_s1 + $0x284] sm:$0xf]  ;;  %v6104_v16 = vld [vmem:[%s11619_s1 + $0x388] sm:$0xf0] }
 0x1e7   : > { %v5979_v13 = vor.u32 %v7457_v27, %v5976_v50  ;;  %v6179_v21 = vor.u32 %v7507_v12, %v6176_v26 }
 0x1e8   : > { %v3820_v29 = vpop.f32.mrf.mxu3  ;;  %v3851_v36 = vpop.f32.mrf.mxu0  ;;  %4160 = vmatpush.bf16.msra.mxu3 %v6051_v37  ;;  %4217 = vmatpush.bf16.msra.mxu1 %v6187_v4  ;;  %v6168_v37 = vld [vmem:[%s11619_s1 + $0x408] sm:$0xf0] }
 0x1e9   : > { %v3821_v42 = vadd.f32 %v3820_v29, %v3792_v18  ;;  %v7535_v29 = vld [vmem:[%s11619_s1 + $0x4f4] sm:$0xf] }
 0x1ea   : > { %v3880_v59 = vpop.f32.mrf.mxu1  ;;  %4132 = vmatpush.bf16.msra.mxu2 %v5979_v13  ;;  %4189 = vmatpush.bf16.msra.mxu0 %v6115_v3  ;;  %v7533_v13 = vld [vmem:[%s11619_s1 + $0x4e4] sm:$0xf]  ;;  %v7567_v3 = vld [vmem:[%s11619_s1 + $0x5f4] sm:$0xf] }
 0x1eb   : > { %v3850_v54 = vadd.f32 %v3849_v7, %v3821_v42  ;;  %v6043_v7 = vor.u32 %v7473_v41, %v6040_v10  ;;  %v6288_v42 = vld [vmem:[%s11619_s1 + $0x4f8] sm:$0xf0]  ;;  %v7549_v10 = vld [vmem:[%s11619_s1 + $0x564] sm:$0xf] }
 0x1ec   : > { %4218 = vmatpush.bf16.msra.mxu1 %v6179_v21  ;;  %v6291_v0 = vor.u32 %v7535_v29, %v6288_v42  ;;  %v7565_v42 = vld [vmem:[%s11619_s1 + $0x5e4] sm:$0xf] }
 0x1ed   : > { %v10307_v19 = vadd.f32 %v3878_v58, %v3850_v54  ;;  %v3793_v63 = vpop.f32.mrf.mxu2  ;;  %4161 = vmatpush.bf16.msra.mxu3 %v6043_v7  ;;  %v7489_v58 = vld [vmem:[%s11619_s1 + $0x384] sm:$0xf]  ;;  %v6344_v7 = vld [vmem:[%s11619_s1 + $0x568] sm:$0xf0] }
 0x1ee   : > { %v3794_v22 = vadd.f32 %v3793_v63, %v10100_v24  ;;  %v6107_v34 = vor.u32 %v7489_v58, %v6104_v16  ;;  %v7505_v24 = vld [vmem:[%s11619_s1 + $0x404] sm:$0xf]  ;;  %4241 = vmatpush.bf16.msrb.mxu2 %v6291_v0  ;;  %v6416_v63 = vld [vmem:[%s11619_s1 + $0x5f8] sm:$0xf0]  ;;  %v6408_v0 = vld [vmem:[%s11619_s1 + $0x5e8] sm:$0xf0] }
 0x1ef   : > { %v6171_v18 = vor.u32 %v7505_v24, %v6168_v37  ;;  %v6336_v24 = vld [vmem:[%s11619_s1 + $0x558] sm:$0xf0] }
 0x1f0   : > { %v3822_v9 = vpop.f32.mrf.mxu3  ;;  %v3854_v11 = vpop.f32.mrf.mxu0  ;;  %4190 = vmatpush.bf16.msra.mxu0 %v6107_v34  ;;  %v7531_v34 = vld [vmem:[%s11619_s1 + $0x4d4] sm:$0xf] }
 0x1f1   : > { %v3823_v53 = vadd.f32 %v3822_v9, %v3794_v22  ;;  %4219 = vmatpush.bf16.msra.mxu1 %v6171_v18  ;;  %v6347_v22 = vor.u32 %v7549_v10, %v6344_v7  ;;  %v6419_v9 = vor.u32 %v7567_v3, %v6416_v63  ;;  %v6328_v10 = vld [vmem:[%s11619_s1 + $0x548] sm:$0xf0]  ;;  %v7563_v63 = vld [vmem:[%s11619_s1 + $0x5d4] sm:$0xf] }
 0x1f2   : > { %v3883_v60 = vpop.f32.mrf.mxu1  ;;  %4027 = vmatmul.bf16.gmra.mxu2 %v8193_v8  ;;  %v7551_v8 = vld [vmem:[%s11619_s1 + $0x574] sm:$0xf] }
 0x1f3   : > { %v3852_v28 = vadd.f32 %v3851_v36, %v3823_v53  ;;  %4085 = vmatmul.bf16.gmra.mxu0 %v8615_v1  ;;  %v6480_v53 = vld [vmem:[%s11619_s1 + $0x678] sm:$0xf0] }
 0x1f4   : > { %4299 = vmatpush.bf16.msrb.mxu0 %v6419_v9 }
 0x1f5   : > { %4056 = vmatmul.bf16.gmra.mxu3 %v8611_v61  ;;  %4114 = vmatmul.bf16.gmra.mxu1 %v8613_v62  ;;  %v6352_v61 = vld [vmem:[%s11619_s1 + $0x578] sm:$0xf0]  ;;  %v10344_v1 = vadd.f32 %v3880_v59, %v3852_v28  ;;  %v3796_v36 = vpop.f32.mrf.mxu2  ;;  %v6280_v59 = vld [vmem:[%s11619_s1 + $0x4e8] sm:$0xf0] }
 0x1f6   : > { %v6355_v5 = vor.u32 %v7551_v8, %v6352_v61  ;;  %v3797_v54 = vadd.f32 %v3796_v36, %v10127_v30  ;;  %v6283_v35 = vor.u32 %v7533_v13, %v6280_v59  ;;  %v6411_v61 = vor.u32 %v7565_v42, %v6408_v0  ;;  %v6264_v13 = vld [vmem:[%s11619_s1 + $0x4c8] sm:$0xf0]  ;;  %v7545_v59 = vld [vmem:[%s11619_s1 + $0x544] sm:$0xf] }
 0x1f7   : > { %v6331_v3 = vor.u32 %v7545_v59, %v6328_v10  ;;  %v7577_v42 = vld [vmem:[%s11619_s1 + $0x644] sm:$0xf]  ;;  %v6456_v0 = vld [vmem:[%s11619_s1 + $0x648] sm:$0xf0] }
 0x1f8   : > { %v3825_v4 = vpop.f32.mrf.mxu3  ;;  %v3856_v27 = vpop.f32.mrf.mxu0  ;;  %4270 = vmatpush.bf16.msrb.mxu3 %v6355_v5  ;;  %4242 = vmatpush.bf16.msrb.mxu2 %v6283_v35 }
 0x1f9   : > { %v3826_v62 = vadd.f32 %v3825_v4, %v3797_v54  ;;  %4300 = vmatpush.bf16.msrb.mxu0 %v6411_v61  ;;  %v7581_v54 = vld [vmem:[%s11619_s1 + $0x664] sm:$0xf]  ;;  %v6472_v4 = vld [vmem:[%s11619_s1 + $0x668] sm:$0xf0]  ;;  %v6459_v61 = vor.u32 %v7577_v42, %v6456_v0 }
 0x1fa   : > { %v3885_v50 = vpop.f32.mrf.mxu1  ;;  %v7537_v42 = vld [vmem:[%s11619_s1 + $0x504] sm:$0xf]  ;;  %v6296_v0 = vld [vmem:[%s11619_s1 + $0x508] sm:$0xf0] }
 0x1fb   : > { %v3855_v41 = vadd.f32 %v3854_v11, %v3826_v62 }
 0x1fc   : > { %4271 = vmatpush.bf16.msrb.mxu3 %v6347_v22 }
 0x1fd   : > { %v10356_v30 = vadd.f32 %v3883_v60, %v3855_v41  ;;  %v3798_v15 = vpop.f32.mrf.mxu2  ;;  %v6475_v41 = vor.u32 %v7581_v54, %v6472_v4 }
 0x1fe   : > { %v3799_v12 = vadd.f32 %v3798_v15, %v10164_v45  ;;  %v7583_v45 = vld [vmem:[%s11619_s1 + $0x674] sm:$0xf] }
 0x200   : > { %v3827_v26 = vpop.f32.mrf.mxu3  ;;  %v3859_v21 = vpop.f32.mrf.mxu0 }
 0x201   : > { %v3828_v11 = vadd.f32 %v3827_v26, %v3799_v12  ;;  %v6400_v12 = vld [vmem:[%s11619_s1 + $0x5d8] sm:$0xf0] }
 0x202   : > { %v3888_v58 = vpop.f32.mrf.mxu1  ;;  %4032 = vmatmul.bf16.gmra.mxu2 %v8309_v6  ;;  %v6403_v22 = vor.u32 %v7563_v63, %v6400_v12  ;;  %v6448_v63 = vld [vmem:[%s11619_s1 + $0x638] sm:$0xf0] }
 0x203   : > { %v3857_v16 = vadd.f32 %v3856_v27, %v3828_v11  ;;  %4090 = vmatmul.bf16.gmra.mxu0 %v8677_v48  ;;  %v6483_v48 = vor.u32 %v7583_v45, %v6480_v53  ;;  %v7529_v27 = vld [vmem:[%s11619_s1 + $0x4c4] sm:$0xf]  ;;  %v7579_v11 = vld [vmem:[%s11619_s1 + $0x654] sm:$0xf]  ;;  %v6320_v53 = vld [vmem:[%s11619_s1 + $0x538] sm:$0xf0] }
 0x204   : > { %v6267_v7 = vor.u32 %v7529_v27, %v6264_v13  ;;  %4301 = vmatpush.bf16.msrb.mxu0 %v6403_v22  ;;  %v6384_v13 = vld [vmem:[%s11619_s1 + $0x5b8] sm:$0xf0] }
 0x205   : > { %4061 = vmatmul.bf16.gmra.mxu3 %v8673_v46  ;;  %4119 = vmatmul.bf16.gmra.mxu1 %v8675_v47  ;;  %v10381_v60 = vadd.f32 %v3885_v50, %v3857_v16  ;;  %v3801_v6 = vpop.f32.mrf.mxu2  ;;  %v6272_v46 = vld [vmem:[%s11619_s1 + $0x4d8] sm:$0xf0]  ;;  %v7547_v47 = vld [vmem:[%s11619_s1 + $0x554] sm:$0xf] }
 0x206   : > { %v3802_v37 = vadd.f32 %v3801_v6, %v10191_v51  ;;  %v6275_v18 = vor.u32 %v7531_v34, %v6272_v46  ;;  %v6339_v29 = vor.u32 %v7547_v47, %v6336_v24  ;;  %4328 = vmatpush.bf16.msrb.mxu1 %v6483_v48  ;;  %v7527_v16 = vld [vmem:[%s11619_s1 + $0x4b4] sm:$0xf]  ;;  %v7561_v47 = vld [vmem:[%s11619_s1 + $0x5c4] sm:$0xf]  ;;  %v6392_v24 = vld [vmem:[%s11619_s1 + $0x5c8] sm:$0xf0] }
 0x208   : > { %v3830_v28 = vpop.f32.mrf.mxu3  ;;  %v3861_v8 = vpop.f32.mrf.mxu0  ;;  %4243 = vmatpush.bf16.msrb.mxu2 %v6275_v18  ;;  %4272 = vmatpush.bf16.msrb.mxu3 %v6339_v29 }
 0x209   : > { %v3831_v36 = vadd.f32 %v3830_v28, %v3802_v37  ;;  %v6395_v28 = vor.u32 %v7561_v47, %v6392_v24  ;;  %v7521_v47 = vld [vmem:[%s11619_s1 + $0x484] sm:$0xf]  ;;  %v6232_v24 = vld [vmem:[%s11619_s1 + $0x488] sm:$0xf0] }
 0x20a   : > { %v3890_v5 = vpop.f32.mrf.mxu1  ;;  %4329 = vmatpush.bf16.msrb.mxu1 %v6475_v41  ;;  %v7559_v41 = vld [vmem:[%s11619_s1 + $0x5b4] sm:$0xf] }
 0x20b   : > { %v3860_v51 = vadd.f32 %v3859_v21, %v3831_v36  ;;  %4302 = vmatpush.bf16.msrb.mxu0 %v6395_v28  ;;  %v7525_v36 = vld [vmem:[%s11619_s1 + $0x4a4] sm:$0xf] }
 0x20c   : > { %4244 = vmatpush.bf16.msrb.mxu2 %v6267_v7  ;;  %4273 = vmatpush.bf16.msrb.mxu3 %v6331_v3  ;;  %v7575_v3 = vld [vmem:[%s11619_s1 + $0x634] sm:$0xf] }
 0x20d   : > { %v10408_v62 = vadd.f32 %v3888_v58, %v3860_v51  ;;  %v3803_v50 = vpop.f32.mrf.mxu2  ;;  %v6464_v58 = vld [vmem:[%s11619_s1 + $0x658] sm:$0xf0]  ;;  %v7541_v51 = vld [vmem:[%s11619_s1 + $0x524] sm:$0xf] }
 0x20e   : > { %v3804_v15 = vadd.f32 %v3803_v50, %v10222_v55  ;;  %v6312_v50 = vld [vmem:[%s11619_s1 + $0x528] sm:$0xf0] }
 0x20f   : > { %v6315_v10 = vor.u32 %v7541_v51, %v6312_v50  ;;  %v6432_v51 = vld [vmem:[%s11619_s1 + $0x618] sm:$0xf0]  ;;  %v6360_v50 = vld [vmem:[%s11619_s1 + $0x588] sm:$0xf0] }
 0x210   : > { %v3832_v35 = vpop.f32.mrf.mxu3  ;;  %v3960_v26 = vpop.f32.mrf.mxu0 }
 0x211   : > { %v3833_v9 = vadd.f32 %v3832_v35, %v3804_v15  ;;  %v6387_v15 = vor.u32 %v7559_v41, %v6384_v13 }
 0x212   : > { %v10426_v21 = vpop.f32.mrf.mxu1  ;;  %4133 = vmatmul.bf16.vlgmr.msra.gmra.mxu2 %v8433_v17 }
 0x213   : > { %v3862_v55 = vadd.f32 %v3861_v8, %v3833_v9  ;;  %4191 = vmatmul.bf16.vlgmr.msra.gmra.mxu0 %v8745_v40  ;;  %v6467_v40 = vor.u32 %v7579_v11, %v6464_v58  ;;  %v7557_v11 = vld [vmem:[%s11619_s1 + $0x5a4] sm:$0xf]  ;;  %v6376_v58 = vld [vmem:[%s11619_s1 + $0x5a8] sm:$0xf0] }
 0x214   : > { %4303 = vmatpush.bf16.msrb.mxu0 %v6387_v15 }
 0x215   : > { %4162 = vmatmul.bf16.vlgmr.msra.gmra.mxu3 %v8741_v38  ;;  %4220 = vmatmul.bf16.vlgmr.msra.gmra.mxu1 %v8743_v39  ;;  %v10441_v45 = vadd.f32 %v3890_v5, %v3862_v55  ;;  %v3902_v17 = vpop.f32.mrf.mxu2  ;;  %v6256_v38 = vld [vmem:[%s11619_s1 + $0x4b8] sm:$0xf0]  ;;  %v7543_v39 = vld [vmem:[%s11619_s1 + $0x534] sm:$0xf]  ;;  %v6248_v5 = vld [vmem:[%s11619_s1 + $0x4a8] sm:$0xf0] }
 0x216   : > { %v3903_v34 = vadd.f32 %v3902_v17, %v10249_v25  ;;  %v6259_v48 = vor.u32 %v7527_v16, %v6256_v38  ;;  %v6323_v46 = vor.u32 %v7543_v39, %v6320_v53  ;;  %4330 = vmatpush.bf16.msrb.mxu1 %v6467_v40  ;;  %v6251_v27 = vor.u32 %v7525_v36, %v6248_v5  ;;  %v6304_v55 = vld [vmem:[%s11619_s1 + $0x518] sm:$0xf0]  ;;  %v7573_v39 = vld [vmem:[%s11619_s1 + $0x624] sm:$0xf]  ;;  %v6440_v53 = vld [vmem:[%s11619_s1 + $0x628] sm:$0xf0] }
 0x217   : > { %v6379_v40 = vor.u32 %v7557_v11, %v6376_v58  ;;  %v6299_v5 = vor.u32 %v7537_v42, %v6296_v0 }
 0x218   : > { %v3931_v6 = vpop.f32.mrf.mxu3  ;;  %v3962_v37 = vpop.f32.mrf.mxu0  ;;  %4245 = vmatpush.bf16.msrb.mxu2 %v6259_v48  ;;  %4274 = vmatpush.bf16.msrb.mxu3 %v6323_v46  ;;  %v7555_v48 = vld [vmem:[%s11619_s1 + $0x594] sm:$0xf]  ;;  %v6368_v46 = vld [vmem:[%s11619_s1 + $0x598] sm:$0xf0] }
 0x219   : > { %v3932_v18 = vadd.f32 %v3931_v6, %v3903_v34  ;;  %4304 = vmatpush.bf16.msrb.mxu0 %v6379_v40  ;;  %v6443_v6 = vor.u32 %v7573_v39, %v6440_v53  ;;  %v7597_v40 = vld [vmem:[%s11619_s1 + $0x6e4] sm:$0xf]  ;;  %v6600_v53 = vld [vmem:[%s11619_s1 + $0x768] sm:$0xf0] }
 0x21a   : > { %v10459_v29 = vpop.f32.mrf.mxu1  ;;  %4331 = vmatpush.bf16.msrb.mxu1 %v6459_v61 }
 0x21b   : > { %v10461_v25 = vadd.f32 %v3960_v26, %v3932_v18  ;;  %v6451_v26 = vor.u32 %v7575_v3, %v6448_v63  ;;  %v6235_v18 = vor.u32 %v7521_v47, %v6232_v24  ;;  %v11753_v63 = vld [vmem:[#allocation6_spill] sm:$0xff] }
 0x21c   : > { %4246 = vmatpush.bf16.msrb.mxu2 %v6251_v27  ;;  %4275 = vmatpush.bf16.msrb.mxu3 %v6315_v10  ;;  %v7553_v27 = vld [vmem:[%s11619_s1 + $0x584] sm:$0xf]  ;;  %v6424_v10 = vld [vmem:[%s11619_s1 + $0x608] sm:$0xf0] }
 0x21d   : > { %v3904_v8 = vpop.f32.mrf.mxu2 }
 0x21e   : > { %v3905_v54 = vadd.f32 %v3904_v8, %v10280_v52  ;;  %4332 = vmatpush.bf16.msrb.mxu1 %v6451_v26  ;;  %v7571_v8 = vld [vmem:[%s11619_s1 + $0x614] sm:$0xf] }
 0x21f   : > { %v7599_v26 = vld [vmem:[%s11619_s1 + $0x6f4] sm:$0xf] }
 0x220   : > { %v3933_v4 = vpop.f32.mrf.mxu3  ;;  %v3965_v59 = vpop.f32.mrf.mxu0 }
 0x221   : > { %v3934_v35 = vadd.f32 %v3933_v4, %v3905_v54  ;;  %v6435_v4 = vor.u32 %v7571_v8, %v6432_v51  ;;  %v11757_v51 = vld [vmem:[#allocation10_spill] sm:$0xff] }
 0x222   : > { %v10488_v52 = vpop.f32.mrf.mxu1  ;;  %4138 = vmatmul.bf16.gmra.mxu2 %v8543_v23  ;;  %v7523_v23 = vld [vmem:[%s11619_s1 + $0x494] sm:$0xf]  ;;  %4333 = vmatpush.bf16.msrb.mxu1 %v6443_v6 }
 0x223   : > { %v10490_v7 = vadd.f32 %v3962_v37, %v3934_v35  ;;  %4196 = vmatmul.bf16.gmra.mxu0 %v8807_v33  ;;  %v6371_v37 = vor.u32 %v7555_v48, %v6368_v46  ;;  %v11752_v35 = vld [vmem:[#allocation8_spill] sm:$0xff]  ;;  %v7631_v6 = vld [vmem:[%s11619_s1 + $0x7f4] sm:$0xf]  ;;  %v6672_v48 = vld [vmem:[%s11619_s1 + $0x7f8] sm:$0xf0] }
 0x224   : > { %v6675_v47 = vor.u32 %v7631_v6, %v6672_v48 }
 0x225   : > { %4167 = vmatmul.bf16.gmra.mxu3 %v8803_v31  ;;  %4225 = vmatmul.bf16.gmra.mxu1 %v8805_v32  ;;  %v3907_v12 = vpop.f32.mrf.mxu2  ;;  %v6240_v31 = vld [vmem:[%s11619_s1 + $0x498] sm:$0xf0]  ;;  %v7539_v32 = vld [vmem:[%s11619_s1 + $0x514] sm:$0xf] }
 0x226   : > { %v3908_v33 = vadd.f32 %v3907_v12, %v10307_v19  ;;  %v6243_v9 = vor.u32 %v7523_v23, %v6240_v31  ;;  %v6307_v17 = vor.u32 %v7539_v32, %v6304_v55  ;;  %4305 = vmatpush.bf16.msrb.mxu0 %v6371_v37  ;;  %4334 = vmatpush.bf16.msrb.mxu1 %v6435_v4  ;;  %v11754_v12 = vld [vmem:[#allocation7_spill] sm:$0xff]  ;;  %v6544_v23 = vld [vmem:[%s11619_s1 + $0x6f8] sm:$0xf0]  ;;  %v7595_v4 = vld [vmem:[%s11619_s1 + $0x6d4] sm:$0xf] }
 0x227   : > { %v6547_v32 = vor.u32 %v7599_v26, %v6544_v23 }
 0x228   : > { %v3936_v22 = vpop.f32.mrf.mxu3  ;;  %v3967_v16 = vpop.f32.mrf.mxu0  ;;  %4247 = vmatpush.bf16.msrb.mxu2 %v6243_v9  ;;  %4276 = vmatpush.bf16.msrb.mxu3 %v6307_v17 }
 0x229   : > { %v3937_v38 = vadd.f32 %v3936_v22, %v3908_v33  ;;  %v6608_v33 = vld [vmem:[%s11619_s1 + $0x778] sm:$0xf0] }
 0x22a   : > { %v10521_v19 = vpop.f32.mrf.mxu1 }
 0x22b   : > { %v10529_v34 = vadd.f32 %v3965_v59, %v3937_v38  ;;  %v7569_v59 = vld [vmem:[%s11619_s1 + $0x604] sm:$0xf]  ;;  %v6536_v38 = vld [vmem:[%s11619_s1 + $0x6e8] sm:$0xf0] }
 0x22c   : > { %4248 = vmatpush.bf16.msrb.mxu2 %v6235_v18  ;;  %4277 = vmatpush.bf16.msrb.mxu3 %v6299_v5  ;;  %v6427_v3 = vor.u32 %v7569_v59, %v6424_v10  ;;  %v6539_v39 = vor.u32 %v7597_v40, %v6536_v38  ;;  %v7647_v5 = vld [vmem:[%s11619_s1 + $0x874] sm:$0xf]  ;;  %v6592_v59 = vld [vmem:[%s11619_s1 + $0x758] sm:$0xf0]  ;;  %v7629_v10 = vld [vmem:[%s11619_s1 + $0x7e4] sm:$0xf] }
 0x22d   : > { %v3909_v28 = vpop.f32.mrf.mxu2  ;;  %v6584_v40 = vld [vmem:[%s11619_s1 + $0x748] sm:$0xf0] }
 0x22e   : > { %v3910_v61 = vadd.f32 %v3909_v28, %v10344_v1  ;;  %v6363_v1 = vor.u32 %v7553_v27, %v6360_v50  ;;  %4335 = vmatpush.bf16.msrb.mxu1 %v6427_v3  ;;  %v6528_v27 = vld [vmem:[%s11619_s1 + $0x6d8] sm:$0xf0]  ;;  %v7611_v50 = vld [vmem:[%s11619_s1 + $0x754] sm:$0xf] }
 0x22f   : > { %v6595_v3 = vor.u32 %v7611_v50, %v6592_v59  ;;  %v7607_v50 = vld [vmem:[%s11619_s1 + $0x734] sm:$0xf] }
 0x230   : > { %v3938_v36 = vpop.f32.mrf.mxu3  ;;  %v3970_v54 = vpop.f32.mrf.mxu0  ;;  %4306 = vmatpush.bf16.msrb.mxu0 %v6363_v1  ;;  %4357 = vmatpush.bf16.msra.mxu2 %v6547_v32  ;;  %v6531_v1 = vor.u32 %v7595_v4, %v6528_v27  ;;  %v7591_v4 = vld [vmem:[%s11619_s1 + $0x6b4] sm:$0xf]  ;;  %v6512_v27 = vld [vmem:[%s11619_s1 + $0x6b8] sm:$0xf0] }
 0x231   : > { %v3939_v41 = vadd.f32 %v3938_v36, %v3910_v61  ;;  %v11755_v61 = vld [vmem:[#allocation3_spill] sm:$0xff]  ;;  %v11756_v36 = vld [vmem:[#allocation12_spill] sm:$0xff]  ;;  %v6515_v59 = vor.u32 %v7591_v4, %v6512_v27  ;;  %v6704_v4 = vld [vmem:[%s11619_s1 + $0x838] sm:$0xf0] }
 0x232   : > { %v10562_v13 = vpop.f32.mrf.mxu1  ;;  %4143 = vmatmul.bf16.gmra.mxu2 %v8617_v2  ;;  %v7615_v2 = vld [vmem:[%s11619_s1 + $0x774] sm:$0xf]  ;;  %v11765_v27 = vld [vmem:[#allocation18_spill] sm:$0xff] }
 0x233   : > { %v10570_v15 = vadd.f32 %v3967_v16, %v3939_v41  ;;  %4201 = vmatmul.bf16.gmra.mxu0 %v11752_v35  ;;  %v6611_v55 = vor.u32 %v7615_v2, %v6608_v33  ;;  %v11758_v41 = vld [vmem:[#allocation11_spill] sm:$0xff] }
 0x234   : > { %4358 = vmatpush.bf16.msra.mxu2 %v6539_v39  ;;  %4415 = vmatpush.bf16.msra.mxu0 %v6675_v47  ;;  %v7627_v39 = vld [vmem:[%s11619_s1 + $0x7d4] sm:$0xf] }
 0x235   : > { %4172 = vmatmul.bf16.gmra.mxu3 %v11753_v63  ;;  %4230 = vmatmul.bf16.gmra.mxu1 %v11754_v12  ;;  %v3912_v31 = vpop.f32.mrf.mxu2  ;;  %v6664_v63 = vld [vmem:[%s11619_s1 + $0x7e8] sm:$0xf0] }
 0x236   : > { %v3913_v22 = vadd.f32 %v3912_v31, %v10356_v30  ;;  %4386 = vmatpush.bf16.msra.mxu3 %v6611_v55  ;;  %v7613_v30 = vld [vmem:[%s11619_s1 + $0x764] sm:$0xf]  ;;  %v6667_v23 = vor.u32 %v7629_v10, %v6664_v63  ;;  %v6576_v10 = vld [vmem:[%s11619_s1 + $0x738] sm:$0xf0] }
 0x237   : > { %v6603_v46 = vor.u32 %v7613_v30, %v6600_v53  ;;  %v6656_v53 = vld [vmem:[%s11619_s1 + $0x7d8] sm:$0xf0]  ;;  %v6579_v63 = vor.u32 %v7607_v50, %v6576_v10 }
 0x238   : > { %v3941_v9 = vpop.f32.mrf.mxu3  ;;  %v3972_v11 = vpop.f32.mrf.mxu0  ;;  %4359 = vmatpush.bf16.msra.mxu2 %v6531_v1  ;;  %4416 = vmatpush.bf16.msra.mxu0 %v6667_v23  ;;  %v6659_v48 = vor.u32 %v7627_v39, %v6656_v53  ;;  %v11762_v1 = vld [vmem:[#allocation15_spill] sm:$0xff] }
 0x239   : > { %v3942_v58 = vadd.f32 %v3941_v9, %v3913_v22  ;;  %v7645_v22 = vld [vmem:[%s11619_s1 + $0x864] sm:$0xf]  ;;  %v6728_v9 = vld [vmem:[%s11619_s1 + $0x868] sm:$0xf0] }
 0x23a   : > { %v10589_v16 = vpop.f32.mrf.mxu1  ;;  %4387 = vmatpush.bf16.msra.mxu3 %v6603_v46  ;;  %v6731_v55 = vor.u32 %v7645_v22, %v6728_v9 }
 0x23b   : > { %v10591_v17 = vadd.f32 %v3970_v54, %v3942_v58  ;;  %v7609_v58 = vld [vmem:[%s11619_s1 + $0x744] sm:$0xf] }
 0x23c   : > { %v6587_v30 = vor.u32 %v7609_v58, %v6584_v40  ;;  %4417 = vmatpush.bf16.msra.mxu0 %v6659_v48  ;;  %v6504_v40 = vld [vmem:[%s11619_s1 + $0x6a8] sm:$0xf0]  ;;  %v7623_v48 = vld [vmem:[%s11619_s1 + $0x7b4] sm:$0xf] }
 0x23d   : > { %v3914_v24 = vpop.f32.mrf.mxu2 }
 0x23e   : > { %v3915_v37 = vadd.f32 %v3914_v24, %v10381_v60  ;;  %v6736_v60 = vld [vmem:[%s11619_s1 + $0x878] sm:$0xf0]  ;;  %4388 = vmatpush.bf16.msra.mxu3 %v6595_v3 }
 0x23f   : > { %v6739_v54 = vor.u32 %v7647_v5, %v6736_v60  ;;  %v11760_v5 = vld [vmem:[#allocation16_spill] sm:$0xff]  ;;  %v6720_v60 = vld [vmem:[%s11619_s1 + $0x858] sm:$0xf0] }
 0x240   : > { %v3943_v28 = vpop.f32.mrf.mxu3  ;;  %v3975_v18 = vpop.f32.mrf.mxu0 }
 0x241   : > { %v3944_v42 = vadd.f32 %v3943_v28, %v3915_v37  ;;  %4444 = vmatpush.bf16.msra.mxu1 %v6739_v54  ;;  %v7887_v37 = vld [vmem:[%s11620_s2] sm:$0x3] }
 0x242   : > { %v10612_v0 = vpop.f32.mrf.mxu1  ;;  %4148 = vmatmul.bf16.gmra.mxu2 %v11755_v61  ;;  %4389 = vmatpush.bf16.msra.mxu3 %v6587_v30  ;;  %v10677_v28 = vperm.slane %v7887_v37, 1  ;;  %v6568_v30 = vld [vmem:[%s11619_s1 + $0x728] sm:$0xf0] }
 0x243   : > { %v10614_v8 = vadd.f32 %v3972_v11, %v3944_v42  ;;  %4206 = vmatmul.bf16.gmra.mxu0 %v11756_v36  ;;  %v6520_v11 = vld [vmem:[%s11619_s1 + $0x6c8] sm:$0xf0] }
 0x244   : > { %v11759_v36 = vld [vmem:[#allocation4_spill] sm:$0xff]  ;;  %v3992_v39 = vadd.f32 %v10459_v29, %v10677_v28  ;;  %v3995_v10 = vadd.f32 %v10488_v52, %v10677_v28 }
 0x245   : > { %4177 = vmatmul.bf16.gmra.mxu3 %v11757_v51  ;;  %4235 = vmatmul.bf16.gmra.mxu1 %v11758_v41  ;;  %v3917_v35 = vpop.f32.mrf.mxu2  ;;  %v11761_v51 = vld [vmem:[#allocation14_spill] sm:$0xff]  ;;  %v3990_v41 = vadd.f32 %v10426_v21, %v10677_v28 }
 0x246   : > { %v3918_v12 = vadd.f32 %v3917_v35, %v10408_v62  ;;  %v7593_v62 = vld [vmem:[%s11619_s1 + $0x6c4] sm:$0xf]  ;;  %4445 = vmatpush.bf16.msra.mxu1 %v6731_v55  ;;  %4390 = vmatpush.bf16.msra.mxu3 %v6579_v63  ;;  %v6712_v55 = vld [vmem:[%s11619_s1 + $0x848] sm:$0xf0]  ;;  %v6560_v63 = vld [vmem:[%s11619_s1 + $0x718] sm:$0xf0] }
 0x247   : > { %v6523_v38 = vor.u32 %v7593_v62, %v6520_v11  ;;  %v7625_v35 = vld [vmem:[%s11619_s1 + $0x7c4] sm:$0xf] }
 0x248   : > { %v3946_v26 = vpop.f32.mrf.mxu3  ;;  %v3977_v31 = vpop.f32.mrf.mxu0  ;;  %v7641_v62 = vld [vmem:[%s11619_s1 + $0x844] sm:$0xf] }
 0x249   : > { %v3947_v32 = vadd.f32 %v3946_v26, %v3918_v12  ;;  %4360 = vmatpush.bf16.msra.mxu2 %v6523_v38  ;;  %v6648_v12 = vld [vmem:[%s11619_s1 + $0x7c8] sm:$0xf0]  ;;  %v7589_v11 = vld [vmem:[%s11619_s1 + $0x6a4] sm:$0xf]  ;;  %v6715_v58 = vor.u32 %v7641_v62, %v6712_v55 }
 0x24a   : > { %v10645_v2 = vpop.f32.mrf.mxu1  ;;  %v6651_v23 = vor.u32 %v7625_v35, %v6648_v12  ;;  %v7605_v38 = vld [vmem:[%s11619_s1 + $0x724] sm:$0xf]  ;;  %v6507_v53 = vor.u32 %v7589_v11, %v6504_v40 }
 0x24b   : > { %v10647_v33 = vadd.f32 %v3975_v18, %v3947_v32  ;;  %v11766_v35 = vld [vmem:[#allocation19_spill] sm:$0xff] }
 0x24c   : > { %4418 = vmatpush.bf16.msra.mxu0 %v6651_v23  ;;  %v7621_v12 = vld [vmem:[%s11619_s1 + $0x7a4] sm:$0xf] }
 0x24d   : > { %v3919_v6 = vpop.f32.mrf.mxu2  ;;  %4361 = vmatpush.bf16.msra.mxu2 %v6515_v59  ;;  %v7603_v59 = vld [vmem:[%s11619_s1 + $0x714] sm:$0xf] }
 0x24e   : > { %v3920_v46 = vadd.f32 %v3919_v6, %v10441_v45  ;;  %v7643_v45 = vld [vmem:[%s11619_s1 + $0x854] sm:$0xf]  ;;  %v6571_v6 = vor.u32 %v7605_v38, %v6568_v30  ;;  %v6563_v52 = vor.u32 %v7603_v59, %v6560_v63  ;;  %v7585_v30 = vld [vmem:[%s11619_s1 + $0x684] sm:$0xf]  ;;  %v11768_v63 = vld [vmem:[#allocation24_spill] sm:$0xff] }
 0x24f   : > { %v6723_v54 = vor.u32 %v7643_v45, %v6720_v60  ;;  %v7633_v59 = vld [vmem:[%s11619_s1 + $0x804] sm:$0xf] }
 0x250   : > { %v3948_v47 = vpop.f32.mrf.mxu3  ;;  %v4076_v24 = vpop.f32.mrf.mxu0  ;;  %4391 = vmatpush.bf16.msra.mxu3 %v6571_v6 }
 0x251   : > { %v3949_v18 = vadd.f32 %v3948_v47, %v3920_v46  ;;  %4446 = vmatpush.bf16.msra.mxu1 %v6723_v54  ;;  %v6640_v46 = vld [vmem:[%s11619_s1 + $0x7b8] sm:$0xf0]  ;;  %4362 = vmatpush.bf16.msra.mxu2 %v6507_v53  ;;  %v11764_v54 = vld [vmem:[#allocation20_spill] sm:$0xff]  ;;  %v7601_v53 = vld [vmem:[%s11619_s1 + $0x704] sm:$0xf] }
 0x252   : > { %v4105_v42 = vpop.f32.mrf.mxu1  ;;  %4249 = vmatmul.bf16.vlgmr.msrb.gmra.mxu2 %v11759_v36  ;;  %v6643_v37 = vor.u32 %v7623_v48, %v6640_v46  ;;  %v6552_v48 = vld [vmem:[%s11619_s1 + $0x708] sm:$0xf0]  ;;  %v7619_v46 = vld [vmem:[%s11619_s1 + $0x794] sm:$0xf] }
 0x253   : > { %v10679_v61 = vadd.f32 %v3977_v31, %v3949_v18  ;;  %4307 = vmatmul.bf16.vlgmr.msrb.gmra.mxu0 %v11760_v5 }
 0x254   : > { %4419 = vmatpush.bf16.msra.mxu0 %v6643_v37  ;;  %4392 = vmatpush.bf16.msra.mxu3 %v6563_v52  ;;  %v3997_v37 = vadd.f32 %v10521_v19, %v10677_v28  ;;  %v6800_v52 = vld [vmem:[%s11619_s1 + $0x8f8] sm:$0xf0] }
 0x255   : > { %4278 = vmatmul.bf16.vlgmr.msrb.gmra.mxu3 %v11761_v51  ;;  %4336 = vmatmul.bf16.vlgmr.msrb.gmra.mxu1 %v11762_v1  ;;  %v4018_v3 = vpop.f32.mrf.mxu2  ;;  %v11763_v51 = vld [vmem:[#allocation5_spill] sm:$0xff]  ;;  %v6496_v1 = vld [vmem:[%s11619_s1 + $0x698] sm:$0xf0] }
 0x256   : > { %v4019_v26 = vadd.f32 %v4018_v3, %v3990_v41  ;;  %4447 = vmatpush.bf16.msra.mxu1 %v6715_v58  ;;  %v7587_v41 = vld [vmem:[%s11619_s1 + $0x694] sm:$0xf]  ;;  %v7637_v58 = vld [vmem:[%s11619_s1 + $0x824] sm:$0xf] }
 0x257   : > { %v6499_v3 = vor.u32 %v7587_v41, %v6496_v1 }
 0x258   : > { %v4047_v21 = vpop.f32.mrf.mxu3  ;;  %v4078_v31 = vpop.f32.mrf.mxu0 }
 0x259   : > { %v4048_v32 = vadd.f32 %v4047_v21, %v4019_v26  ;;  %v6632_v26 = vld [vmem:[%s11619_s1 + $0x7a8] sm:$0xf0]  ;;  %4363 = vmatpush.bf16.msra.mxu2 %v6499_v3  ;;  %v11767_v3 = vld [vmem:[#allocation9_spill] sm:$0xff] }
 0x25a   : > { %v4107_v22 = vpop.f32.mrf.mxu1 }
 0x25b   : > { %v4077_v9 = vadd.f32 %v4076_v24, %v4048_v32 }
 0x25d   : > { %v10737_v47 = vadd.f32 %v4105_v42, %v4077_v9  ;;  %v4020_v24 = vpop.f32.mrf.mxu2  ;;  %v7639_v42 = vld [vmem:[%s11619_s1 + $0x834] sm:$0xf] }
 0x25e   : > { %v4021_v18 = vadd.f32 %v4020_v24, %v3992_v39  ;;  %v6707_v50 = vor.u32 %v7639_v42, %v6704_v4  ;;  %v6488_v39 = vld [vmem:[%s11619_s1 + $0x688] sm:$0xf0]  ;;  %v6624_v24 = vld [vmem:[%s11619_s1 + $0x798] sm:$0xf0] }
 0x25f   : > { %v6491_v6 = vor.u32 %v7585_v30, %v6488_v39 }
 0x260   : > { %v4049_v36 = vpop.f32.mrf.mxu3  ;;  %v4081_v29 = vpop.f32.mrf.mxu0  ;;  %4448 = vmatpush.bf16.msra.mxu1 %v6707_v50 }
 0x261   : > { %v4050_v5 = vadd.f32 %v4049_v36, %v4021_v18  ;;  %v6555_v18 = vor.u32 %v7601_v53, %v6552_v48  ;;  %v6627_v36 = vor.u32 %v7619_v46, %v6624_v24  ;;  %4364 = vmatpush.bf16.msra.mxu2 %v6491_v6  ;;  %v7661_v48 = vld [vmem:[%s11619_s1 + $0x8e4] sm:$0xf] }
 0x262   : > { %v4110_v45 = vpop.f32.mrf.mxu1  ;;  %4254 = vmatmul.bf16.gmra.mxu2 %v11763_v51  ;;  %v6688_v51 = vld [vmem:[%s11619_s1 + $0x818] sm:$0xf0]  ;;  %v7677_v46 = vld [vmem:[%s11619_s1 + $0x964] sm:$0xf] }
 0x263   : > { %v4079_v60 = vadd.f32 %v4078_v31, %v4050_v5  ;;  %4312 = vmatmul.bf16.gmra.mxu0 %v11764_v54  ;;  %v6635_v31 = vor.u32 %v7621_v12, %v6632_v26  ;;  %4393 = vmatpush.bf16.msra.mxu3 %v6555_v18  ;;  %v11769_v26 = vld [vmem:[#allocation22_spill] sm:$0xff]  ;;  %v7695_v18 = vld [vmem:[%s11619_s1 + $0x9f4] sm:$0xf] }
 0x265   : > { %4283 = vmatmul.bf16.gmra.mxu3 %v11765_v27  ;;  %4341 = vmatmul.bf16.gmra.mxu1 %v11766_v35  ;;  %v10769_v21 = vadd.f32 %v4107_v22, %v4079_v60  ;;  %v4023_v23 = vpop.f32.mrf.mxu2  ;;  %v6696_v22 = vld [vmem:[%s11619_s1 + $0x828] sm:$0xf0]  ;;  %v7635_v60 = vld [vmem:[%s11619_s1 + $0x814] sm:$0xf] }
 0x266   : > { %v4024_v32 = vadd.f32 %v4023_v23, %v3995_v10  ;;  %4420 = vmatpush.bf16.msra.mxu0 %v6635_v31  ;;  %v6699_v38 = vor.u32 %v7637_v58, %v6696_v22  ;;  %v6691_v19 = vor.u32 %v7635_v60, %v6688_v51  ;;  %v6616_v27 = vld [vmem:[%s11619_s1 + $0x788] sm:$0xf0]  ;;  %v7663_v23 = vld [vmem:[%s11619_s1 + $0x8f4] sm:$0xf] }
 0x267   : > { %v6680_v10 = vld [vmem:[%s11619_s1 + $0x808] sm:$0xf0]  ;;  %v7679_v31 = vld [vmem:[%s11619_s1 + $0x974] sm:$0xf] }
 0x268   : > { %v4052_v9 = vpop.f32.mrf.mxu3  ;;  %v4083_v62 = vpop.f32.mrf.mxu0  ;;  %4449 = vmatpush.bf16.msra.mxu1 %v6699_v38  ;;  %v6683_v12 = vor.u32 %v7633_v59, %v6680_v10  ;;  %v11771_v59 = vld [vmem:[#allocation13_spill] sm:$0xff]  ;;  %v11772_v10 = vld [vmem:[#allocation28_spill] sm:$0xff] }
 0x269   : > { %v4053_v55 = vadd.f32 %v4052_v9, %v4024_v32  ;;  %v4000_v32 = vadd.f32 %v10562_v13, %v10677_v28  ;;  %v11770_v9 = vld [vmem:[#allocation23_spill] sm:$0xff] }
 0x26a   : > { %v4112_v11 = vpop.f32.mrf.mxu1  ;;  %4421 = vmatpush.bf16.msra.mxu0 %v6627_v36  ;;  %v6928_v36 = vld [vmem:[%s11619_s1 + $0x9f8] sm:$0xf0] }
 0x26b   : > { %v4082_v40 = vadd.f32 %v4081_v29, %v4053_v55  ;;  %v6864_v55 = vld [vmem:[%s11619_s1 + $0x978] sm:$0xf0]  ;;  %v6931_v51 = vor.u32 %v7695_v18, %v6928_v36  ;;  %v7673_v18 = vld [vmem:[%s11619_s1 + $0x944] sm:$0xf]  ;;  %v6840_v36 = vld [vmem:[%s11619_s1 + $0x948] sm:$0xf0] }
 0x26c   : > { %4450 = vmatpush.bf16.msra.mxu1 %v6691_v19 }
 0x26d   : > { %v10797_v29 = vadd.f32 %v4110_v45, %v4082_v40  ;;  %v4025_v5 = vpop.f32.mrf.mxu2  ;;  %v7617_v45 = vld [vmem:[%s11619_s1 + $0x784] sm:$0xf]  ;;  %v6867_v40 = vor.u32 %v7679_v31, %v6864_v55 }
 0x26e   : > { %v4026_v54 = vadd.f32 %v4025_v5, %v3997_v37  ;;  %v6619_v41 = vor.u32 %v7617_v45, %v6616_v27  ;;  %v6856_v37 = vld [vmem:[%s11619_s1 + $0x968] sm:$0xf0]  ;;  %v4002_v5 = vadd.f32 %v10589_v16, %v10677_v28  ;;  %v7711_v16 = vld [vmem:[%s11619_s1 + $0xa74] sm:$0xf] }
 0x26f   : > { %4502 = vmatpush.bf16.msrb.mxu3 %v6867_v40  ;;  %v6859_v60 = vor.u32 %v7677_v46, %v6856_v37  ;;  %v7657_v46 = vld [vmem:[%s11619_s1 + $0x8c4] sm:$0xf]  ;;  %v6776_v37 = vld [vmem:[%s11619_s1 + $0x8c8] sm:$0xf0] }
 0x270   : > { %v4054_v42 = vpop.f32.mrf.mxu3  ;;  %v4086_v4 = vpop.f32.mrf.mxu0  ;;  %4422 = vmatpush.bf16.msra.mxu0 %v6619_v41  ;;  %4451 = vmatpush.bf16.msra.mxu1 %v6683_v12  ;;  %v6784_v12 = vld [vmem:[%s11619_s1 + $0x8d8] sm:$0xf0] }
 0x271   : > { %v4055_v50 = vadd.f32 %v4054_v42, %v4026_v54 }
 0x272   : > { %v4115_v1 = vpop.f32.mrf.mxu1  ;;  %4259 = vmatmul.bf16.gmra.mxu2 %v11767_v3 }
 0x273   : > { %v4084_v35 = vadd.f32 %v4083_v62, %v4055_v50  ;;  %4317 = vmatmul.bf16.gmra.mxu0 %v11768_v63  ;;  %v6803_v62 = vor.u32 %v7663_v23, %v6800_v52  ;;  %4503 = vmatpush.bf16.msrb.mxu3 %v6859_v60  ;;  %v7659_v63 = vld [vmem:[%s11619_s1 + $0x8d4] sm:$0xf]  ;;  %v4005_v23 = vadd.f32 %v10612_v0, %v10677_v28  ;;  %v11774_v52 = vld [vmem:[#allocation27_spill] sm:$0xff] }
 0x274   : > { %4531 = vmatpush.bf16.msrb.mxu0 %v6931_v51  ;;  %v6787_v31 = vor.u32 %v7659_v63, %v6784_v12  ;;  %v6779_v60 = vor.u32 %v7657_v46, %v6776_v37  ;;  %v6843_v51 = vor.u32 %v7673_v18, %v6840_v36  ;;  %v11777_v63 = vld [vmem:[#allocation30_spill] sm:$0xff]  ;;  %v6760_v18 = vld [vmem:[%s11619_s1 + $0x8a8] sm:$0xf0]  ;;  %v7669_v36 = vld [vmem:[%s11619_s1 + $0x924] sm:$0xf] }
 0x275   : > { %4288 = vmatmul.bf16.gmra.mxu3 %v11769_v26  ;;  %4346 = vmatmul.bf16.gmra.mxu1 %v11770_v9  ;;  %v10835_v58 = vadd.f32 %v4112_v11, %v4084_v35  ;;  %v4028_v22 = vpop.f32.mrf.mxu2  ;;  %v6792_v11 = vld [vmem:[%s11619_s1 + $0x8e8] sm:$0xf0]  ;;  %v11773_v35 = vld [vmem:[#allocation26_spill] sm:$0xff]  ;;  %v7675_v26 = vld [vmem:[%s11619_s1 + $0x954] sm:$0xf] }
 0x276   : > { %v4029_v38 = vadd.f32 %v4028_v22, %v4000_v32  ;;  %4473 = vmatpush.bf16.msrb.mxu2 %v6803_v62  ;;  %v6795_v24 = vor.u32 %v7661_v48, %v6792_v11  ;;  %v6848_v32 = vld [vmem:[%s11619_s1 + $0x958] sm:$0xf0]  ;;  %v7693_v9 = vld [vmem:[%s11619_s1 + $0x9e4] sm:$0xf]  ;;  %v6920_v62 = vld [vmem:[%s11619_s1 + $0x9e8] sm:$0xf0] }
 0x277   : > { %v6851_v0 = vor.u32 %v7675_v26, %v6848_v32  ;;  %v6923_v40 = vor.u32 %v7693_v9, %v6920_v62  ;;  %v7709_v11 = vld [vmem:[%s11619_s1 + $0xa64] sm:$0xf]  ;;  %v7655_v26 = vld [vmem:[%s11619_s1 + $0x8b4] sm:$0xf]  ;;  %v6832_v9 = vld [vmem:[%s11619_s1 + $0x938] sm:$0xf0] }
 0x278   : > { %v4057_v30 = vpop.f32.mrf.mxu3  ;;  %v4088_v39 = vpop.f32.mrf.mxu0  ;;  %v7689_v62 = vld [vmem:[%s11619_s1 + $0x9c4] sm:$0xf] }
 0x279   : > { %v4058_v53 = vadd.f32 %v4057_v30, %v4029_v38  ;;  %4504 = vmatpush.bf16.msrb.mxu3 %v6851_v0  ;;  %4532 = vmatpush.bf16.msrb.mxu0 %v6923_v40 }
 0x27a   : > { %v4117_v6 = vpop.f32.mrf.mxu1  ;;  %4474 = vmatpush.bf16.msrb.mxu2 %v6795_v24 }
 0x27b   : > { %v4087_v13 = vadd.f32 %v4086_v4, %v4058_v53 }
 0x27d   : > { %v10857_v54 = vadd.f32 %v4115_v1, %v4087_v13  ;;  %v4030_v42 = vpop.f32.mrf.mxu2  ;;  %v6992_v1 = vld [vmem:[%s11619_s1 + $0xa78] sm:$0xf0]  ;;  %4505 = vmatpush.bf16.msrb.mxu3 %v6843_v51 }
 0x27e   : > { %v4031_v19 = vadd.f32 %v4030_v42, %v4002_v5  ;;  %v6995_v3 = vor.u32 %v7711_v16, %v6992_v1  ;;  %4475 = vmatpush.bf16.msrb.mxu2 %v6787_v31  ;;  %v4007_v5 = vadd.f32 %v10645_v2, %v10677_v28  ;;  %v7691_v42 = vld [vmem:[%s11619_s1 + $0x9d4] sm:$0xf]  ;;  %v11778_v31 = vld [vmem:[#allocation31_spill] sm:$0xff] }
 0x27f   : > { %v11775_v1 = vld [vmem:[#allocation17_spill] sm:$0xff] }
 0x280   : > { %v4059_v4 = vpop.f32.mrf.mxu3  ;;  %v4091_v45 = vpop.f32.mrf.mxu0  ;;  %4560 = vmatpush.bf16.msrb.mxu1 %v6995_v3  ;;  %v6976_v3 = vld [vmem:[%s11619_s1 + $0xa58] sm:$0xf0] }
 0x281   : > { %v4060_v27 = vadd.f32 %v4059_v4, %v4031_v19  ;;  %v6912_v19 = vld [vmem:[%s11619_s1 + $0x9d8] sm:$0xf0] }
 0x282   : > { %v4120_v50 = vpop.f32.mrf.mxu1  ;;  %4264 = vmatmul.bf16.gmra.mxu2 %v11771_v59 }
 0x283   : > { %v4089_v41 = vadd.f32 %v4088_v39, %v4060_v27  ;;  %4322 = vmatmul.bf16.gmra.mxu0 %v11772_v10  ;;  %v6915_v27 = vor.u32 %v7691_v42, %v6912_v19  ;;  %4476 = vmatpush.bf16.msrb.mxu2 %v6779_v60  ;;  %v7687_v42 = vld [vmem:[%s11619_s1 + $0x9b4] sm:$0xf]  ;;  %v6896_v19 = vld [vmem:[%s11619_s1 + $0x9b8] sm:$0xf0] }
 0x285   : > { %4293 = vmatmul.bf16.gmra.mxu3 %v11773_v35  ;;  %4351 = vmatmul.bf16.gmra.mxu1 %v11774_v52  ;;  %v10889_v55 = vadd.f32 %v4117_v6, %v4089_v41  ;;  %v4033_v22 = vpop.f32.mrf.mxu2  ;;  %v6984_v6 = vld [vmem:[%s11619_s1 + $0xa68] sm:$0xf0]  ;;  %v7671_v52 = vld [vmem:[%s11619_s1 + $0x934] sm:$0xf] }
 0x286   : > { %v4034_v38 = vadd.f32 %v4033_v22, %v4005_v23  ;;  %v6987_v24 = vor.u32 %v7709_v11, %v6984_v6  ;;  %4533 = vmatpush.bf16.msrb.mxu0 %v6915_v27  ;;  %v11776_v35 = vld [vmem:[#allocation32_spill] sm:$0xff]  ;;  %v6768_v23 = vld [vmem:[%s11619_s1 + $0x8b8] sm:$0xf0] }
 0x287   : > { %v6771_v32 = vor.u32 %v7655_v26, %v6768_v23  ;;  %v6904_v22 = vld [vmem:[%s11619_s1 + $0x9c8] sm:$0xf0]  ;;  %v7651_v26 = vld [vmem:[%s11619_s1 + $0x894] sm:$0xf]  ;;  %v6752_v23 = vld [vmem:[%s11619_s1 + $0x898] sm:$0xf0] }
 0x288   : > { %v4062_v30 = vpop.f32.mrf.mxu3  ;;  %v4093_v39 = vpop.f32.mrf.mxu0  ;;  %4561 = vmatpush.bf16.msrb.mxu1 %v6987_v24  ;;  %v7705_v24 = vld [vmem:[%s11619_s1 + $0xa44] sm:$0xf] }
 0x289   : > { %v4063_v53 = vadd.f32 %v4062_v30, %v4034_v38  ;;  %v6835_v38 = vor.u32 %v7671_v52, %v6832_v9  ;;  %v6907_v30 = vor.u32 %v7689_v62, %v6904_v22  ;;  %4477 = vmatpush.bf16.msrb.mxu2 %v6771_v32  ;;  %v7667_v52 = vld [vmem:[%s11619_s1 + $0x914] sm:$0xf]  ;;  %v6755_v32 = vor.u32 %v7651_v26, %v6752_v23  ;;  %v6816_v9 = vld [vmem:[%s11619_s1 + $0x918] sm:$0xf0]  ;;  %v7685_v62 = vld [vmem:[%s11619_s1 + $0x9a4] sm:$0xf] }
 0x28a   : > { %v4122_v13 = vpop.f32.mrf.mxu1  ;;  %v6888_v22 = vld [vmem:[%s11619_s1 + $0x9a8] sm:$0xf0] }
 0x28b   : > { %v4092_v48 = vadd.f32 %v4091_v45, %v4063_v53  ;;  %4506 = vmatpush.bf16.msrb.mxu3 %v6835_v38  ;;  %4534 = vmatpush.bf16.msrb.mxu0 %v6907_v30  ;;  %v6819_v30 = vor.u32 %v7667_v52, %v6816_v9  ;;  %v6936_v26 = vld [vmem:[%s11619_s1 + $0xa08] sm:$0xf0]  ;;  %v11783_v52 = vld [vmem:[#allocation25_spill] sm:$0xff]  ;;  %v11785_v9 = vld [vmem:[#allocation38_spill] sm:$0xff] }
 0x28d   : > { %v10917_v4 = vadd.f32 %v4120_v50, %v4092_v48  ;;  %v4035_v45 = vpop.f32.mrf.mxu2  ;;  %v7707_v50 = vld [vmem:[%s11619_s1 + $0xa54] sm:$0xf] }
 0x28e   : > { %v4036_v41 = vadd.f32 %v4035_v45, %v4007_v5  ;;  %v6979_v12 = vor.u32 %v7707_v50, %v6976_v3  ;;  %v6824_v5 = vld [vmem:[%s11619_s1 + $0x928] sm:$0xf0]  ;;  %v11779_v50 = vld [vmem:[#allocation21_spill] sm:$0xff] }
 0x28f   : > { %v6827_v51 = vor.u32 %v7669_v36, %v6824_v5  ;;  %v11780_v3 = vld [vmem:[#allocation36_spill] sm:$0xff]  ;;  %v7665_v36 = vld [vmem:[%s11619_s1 + $0x904] sm:$0xf] }
 0x290   : > { %v4064_v59 = vpop.f32.mrf.mxu3  ;;  %v4192_v2 = vpop.f32.mrf.mxu0  ;;  %4562 = vmatpush.bf16.msrb.mxu1 %v6979_v12 }
 0x291   : > { %v4065_v28 = vadd.f32 %v4064_v59, %v4036_v41  ;;  %v6899_v41 = vor.u32 %v7687_v42, %v6896_v19  ;;  %4507 = vmatpush.bf16.msrb.mxu3 %v6827_v51  ;;  %v7683_v51 = vld [vmem:[%s11619_s1 + $0x994] sm:$0xf]  ;;  %v6880_v42 = vld [vmem:[%s11619_s1 + $0x998] sm:$0xf0] }
 0x292   : > { %v4221_v10 = vpop.f32.mrf.mxu1  ;;  %4365 = vmatmul.bf16.vlgmr.msra.gmra.mxu2 %v11775_v1 }
 0x293   : > { %v4094_v16 = vadd.f32 %v4093_v39, %v4065_v28  ;;  %4423 = vmatmul.bf16.vlgmr.msra.gmra.mxu0 %v11776_v35 }
 0x294   : > { %4535 = vmatpush.bf16.msrb.mxu0 %v6899_v41 }
 0x295   : > { %4394 = vmatmul.bf16.vlgmr.msra.gmra.mxu3 %v11777_v63  ;;  %4452 = vmatmul.bf16.vlgmr.msra.gmra.mxu1 %v11778_v31  ;;  %v10947_v0 = vadd.f32 %v4122_v13, %v4094_v16  ;;  %v4134_v40 = vpop.f32.mrf.mxu2  ;;  %v6968_v13 = vld [vmem:[%s11619_s1 + $0xa48] sm:$0xf0]  ;;  %v11781_v63 = vld [vmem:[#allocation34_spill] sm:$0xff]  ;;  %v11782_v31 = vld [vmem:[#allocation35_spill] sm:$0xff] }
 0x296   : > { %v4135_v39 = vadd.f32 %v4134_v40, %v10737_v47  ;;  %v7653_v47 = vld [vmem:[%s11619_s1 + $0x8a4] sm:$0xf]  ;;  %v6971_v37 = vor.u32 %v7705_v24, %v6968_v13  ;;  %4508 = vmatpush.bf16.msrb.mxu3 %v6819_v30 }
 0x297   : > { %v6763_v60 = vor.u32 %v7653_v47, %v6760_v18  ;;  %v7701_v13 = vld [vmem:[%s11619_s1 + $0xa24] sm:$0xf]  ;;  %v6744_v18 = vld [vmem:[%s11619_s1 + $0x888] sm:$0xf0] }
 0x298   : > { %v4163_v53 = vpop.f32.mrf.mxu3  ;;  %v4194_v48 = vpop.f32.mrf.mxu0  ;;  %4563 = vmatpush.bf16.msrb.mxu1 %v6971_v37  ;;  %v11786_v30 = vld [vmem:[#allocation39_spill] sm:$0xff] }
 0x299   : > { %v4164_v11 = vadd.f32 %v4163_v53, %v4135_v39  ;;  %4478 = vmatpush.bf16.msrb.mxu2 %v6763_v60  ;;  %v6891_v39 = vor.u32 %v7685_v62, %v6888_v22  ;;  %v6808_v60 = vld [vmem:[%s11619_s1 + $0x908] sm:$0xf0]  ;;  %v7727_v62 = vld [vmem:[%s11619_s1 + $0xaf4] sm:$0xf]  ;;  %v7056_v22 = vld [vmem:[%s11619_s1 + $0xaf8] sm:$0xf0] }
 0x29a   : > { %v4223_v6 = vpop.f32.mrf.mxu1  ;;  %v6811_v19 = vor.u32 %v7665_v36, %v6808_v60  ;;  %v7725_v36 = vld [vmem:[%s11619_s1 + $0xae4] sm:$0xf]  ;;  %v7112_v60 = vld [vmem:[%s11619_s1 + $0xb68] sm:$0xf0] }
 0x29b   : > { %v4193_v46 = vadd.f32 %v4192_v2, %v4164_v11  ;;  %4536 = vmatpush.bf16.msrb.mxu0 %v6891_v39  ;;  %v7059_v39 = vor.u32 %v7727_v62, %v7056_v22  ;;  %v7757_v62 = vld [vmem:[%s11619_s1 + $0xbe4] sm:$0xf]  ;;  %v7176_v22 = vld [vmem:[%s11619_s1 + $0xbe8] sm:$0xf0] }
 0x29c   : > { %4509 = vmatpush.bf16.msrb.mxu3 %v6811_v19 }
 0x29d   : > { %v10974_v45 = vadd.f32 %v4221_v10, %v4193_v46  ;;  %v4136_v27 = vpop.f32.mrf.mxu2  ;;  %v7703_v10 = vld [vmem:[%s11619_s1 + $0xa34] sm:$0xf]  ;;  %4479 = vmatpush.bf16.msrb.mxu2 %v6755_v32 }
 0x29e   : > { %v4137_v59 = vadd.f32 %v4136_v27, %v10769_v21  ;;  %v6960_v21 = vld [vmem:[%s11619_s1 + $0xa38] sm:$0xf0]  ;;  %v6883_v27 = vor.u32 %v7683_v51, %v6880_v42  ;;  %v7759_v51 = vld [vmem:[%s11619_s1 + $0xbf4] sm:$0xf] }
 0x29f   : > { %v6963_v12 = vor.u32 %v7703_v10, %v6960_v21  ;;  %v6872_v10 = vld [vmem:[%s11619_s1 + $0x988] sm:$0xf0]  ;;  %v7184_v42 = vld [vmem:[%s11619_s1 + $0xbf8] sm:$0xf0] }
 0x2a0   : > { %v4165_v2 = vpop.f32.mrf.mxu3  ;;  %v4197_v28 = vpop.f32.mrf.mxu0  ;;  %4537 = vmatpush.bf16.msrb.mxu0 %v6883_v27  ;;  %v7187_v27 = vor.u32 %v7759_v51, %v7184_v42  ;;  %v7755_v42 = vld [vmem:[%s11619_s1 + $0xbd4] sm:$0xf] }
 0x2a1   : > { %v4166_v16 = vadd.f32 %v4165_v2, %v4137_v59  ;;  %4564 = vmatpush.bf16.msrb.mxu1 %v6963_v12  ;;  %v7699_v2 = vld [vmem:[%s11619_s1 + $0xa14] sm:$0xf] }
 0x2a2   : > { %v4226_v1 = vpop.f32.mrf.mxu1  ;;  %4370 = vmatmul.bf16.gmra.mxu2 %v11779_v50 }
 0x2a3   : > { %v4195_v35 = vadd.f32 %v4194_v48, %v4166_v16  ;;  %4428 = vmatmul.bf16.gmra.mxu0 %v11780_v3 }
 0x2a5   : > { %4399 = vmatmul.bf16.gmra.mxu3 %v11781_v63  ;;  %4457 = vmatmul.bf16.gmra.mxu1 %v11782_v31  ;;  %v11005_v40 = vadd.f32 %v4223_v6, %v4195_v35  ;;  %v4139_v38 = vpop.f32.mrf.mxu2  ;;  %v6952_v6 = vld [vmem:[%s11619_s1 + $0xa28] sm:$0xf0] }
 0x2a6   : > { %v4140_v53 = vadd.f32 %v4139_v38, %v10797_v29  ;;  %v6955_v37 = vor.u32 %v7701_v13, %v6952_v6  ;;  %v7649_v29 = vld [vmem:[%s11619_s1 + $0x884] sm:$0xf]  ;;  %v11784_v31 = vld [vmem:[#allocation40_spill] sm:$0xff]  ;;  %v7743_v38 = vld [vmem:[%s11619_s1 + $0xb74] sm:$0xf] }
 0x2a7   : > { %v6747_v5 = vor.u32 %v7649_v29, %v6744_v18 }
 0x2a8   : > { %v4168_v48 = vpop.f32.mrf.mxu3  ;;  %v4199_v11 = vpop.f32.mrf.mxu0  ;;  %4565 = vmatpush.bf16.msrb.mxu1 %v6955_v37 }
 0x2a9   : > { %v4169_v46 = vadd.f32 %v4168_v48, %v4140_v53  ;;  %4480 = vmatpush.bf16.msrb.mxu2 %v6747_v5  ;;  %v7120_v53 = vld [vmem:[%s11619_s1 + $0xb78] sm:$0xf0]  ;;  %v7741_v5 = vld [vmem:[%s11619_s1 + $0xb64] sm:$0xf] }
 0x2aa   : > { %v4228_v24 = vpop.f32.mrf.mxu1  ;;  %v7115_v19 = vor.u32 %v7741_v5, %v7112_v60  ;;  %v7737_v5 = vld [vmem:[%s11619_s1 + $0xb44] sm:$0xf] }
 0x2ab   : > { %v4198_v47 = vadd.f32 %v4197_v28, %v4169_v46  ;;  %v6944_v28 = vld [vmem:[%s11619_s1 + $0xa18] sm:$0xf0]  ;;  %v7123_v46 = vor.u32 %v7743_v38, %v7120_v53  ;;  %v7179_v53 = vor.u32 %v7757_v62, %v7176_v22  ;;  %v7753_v62 = vld [vmem:[%s11619_s1 + $0xbc4] sm:$0xf]  ;;  %v7160_v22 = vld [vmem:[%s11619_s1 + $0xbc8] sm:$0xf0] }
 0x2ac   : > { %v6947_v50 = vor.u32 %v7699_v2, %v6944_v28 }
 0x2ad   : > { %v11032_v41 = vadd.f32 %v4226_v1, %v4198_v47  ;;  %v4141_v59 = vpop.f32.mrf.mxu2  ;;  %v7681_v1 = vld [vmem:[%s11619_s1 + $0x984] sm:$0xf]  ;;  %4589 = vmatpush.bf16.msra.mxu2 %v7059_v39  ;;  %4618 = vmatpush.bf16.msra.mxu3 %v7123_v46 }
 0x2ae   : > { %v4142_v16 = vadd.f32 %v4141_v59, %v10835_v58  ;;  %4566 = vmatpush.bf16.msrb.mxu1 %v6947_v50  ;;  %v6875_v63 = vor.u32 %v7681_v1, %v6872_v10  ;;  %v7697_v58 = vld [vmem:[%s11619_s1 + $0xa04] sm:$0xf]  ;;  %v11787_v10 = vld [vmem:[#allocation29_spill] sm:$0xff] }
 0x2af   : > { %v6939_v32 = vor.u32 %v7697_v58, %v6936_v26  ;;  %v7723_v26 = vld [vmem:[%s11619_s1 + $0xad4] sm:$0xf] }
 0x2b0   : > { %v4170_v35 = vpop.f32.mrf.mxu3  ;;  %v4202_v3 = vpop.f32.mrf.mxu0  ;;  %4538 = vmatpush.bf16.msrb.mxu0 %v6875_v63  ;;  %v7775_v63 = vld [vmem:[%s11619_s1 + $0xc74] sm:$0xf] }
 0x2b1   : > { %v4171_v21 = vadd.f32 %v4170_v35, %v4142_v16  ;;  %4619 = vmatpush.bf16.msra.mxu3 %v7115_v19  ;;  %v7168_v19 = vld [vmem:[%s11619_s1 + $0xbd8] sm:$0xf0] }
 0x2b2   : > { %v4231_v12 = vpop.f32.mrf.mxu1  ;;  %4375 = vmatmul.bf16.gmra.mxu2 %v11783_v52  ;;  %4567 = vmatpush.bf16.msrb.mxu1 %v6939_v32  ;;  %v7739_v52 = vld [vmem:[%s11619_s1 + $0xb54] sm:$0xf] }
 0x2b3   : > { %v4200_v23 = vadd.f32 %v4199_v11, %v4171_v21  ;;  %4433 = vmatmul.bf16.gmra.mxu0 %v11784_v31  ;;  %v11788_v21 = vld [vmem:[#allocation44_spill] sm:$0xff]  ;;  %v11790_v31 = vld [vmem:[#allocation43_spill] sm:$0xff] }
 0x2b4   : > { %4647 = vmatpush.bf16.msra.mxu0 %v7187_v27 }
 0x2b5   : > { %4404 = vmatmul.bf16.gmra.mxu3 %v11785_v9  ;;  %4462 = vmatmul.bf16.gmra.mxu1 %v11786_v30  ;;  %v11069_v48 = vadd.f32 %v4228_v24, %v4200_v23  ;;  %v4144_v11 = vpop.f32.mrf.mxu2  ;;  %v7048_v24 = vld [vmem:[%s11619_s1 + $0xae8] sm:$0xf0]  ;;  %v7040_v23 = vld [vmem:[%s11619_s1 + $0xad8] sm:$0xf0] }
 0x2b6   : > { %v4145_v13 = vadd.f32 %v4144_v11, %v10857_v54  ;;  %v7051_v54 = vor.u32 %v7725_v36, %v7048_v24  ;;  %v7043_v32 = vor.u32 %v7723_v26, %v7040_v23  ;;  %v7104_v9 = vld [vmem:[%s11619_s1 + $0xb58] sm:$0xf0]  ;;  %v7032_v24 = vld [vmem:[%s11619_s1 + $0xac8] sm:$0xf0]  ;;  %v7719_v26 = vld [vmem:[%s11619_s1 + $0xab4] sm:$0xf] }
 0x2b7   : > { %v7107_v39 = vor.u32 %v7739_v52, %v7104_v9  ;;  %v7024_v23 = vld [vmem:[%s11619_s1 + $0xab8] sm:$0xf0]  ;;  %v7735_v52 = vld [vmem:[%s11619_s1 + $0xb34] sm:$0xf] }
 0x2b8   : > { %v4173_v6 = vpop.f32.mrf.mxu3  ;;  %v4204_v47 = vpop.f32.mrf.mxu0  ;;  %4590 = vmatpush.bf16.msra.mxu2 %v7051_v54  ;;  %4648 = vmatpush.bf16.msra.mxu0 %v7179_v53  ;;  %v7096_v54 = vld [vmem:[%s11619_s1 + $0xb48] sm:$0xf0]  ;;  %v7088_v9 = vld [vmem:[%s11619_s1 + $0xb38] sm:$0xf0] }
 0x2b9   : > { %v4174_v37 = vadd.f32 %v4173_v6, %v4145_v13  ;;  %4620 = vmatpush.bf16.msra.mxu3 %v7107_v39  ;;  %v7099_v51 = vor.u32 %v7737_v5, %v7096_v54  ;;  %v7091_v53 = vor.u32 %v7735_v52, %v7088_v9  ;;  %v7733_v5 = vld [vmem:[%s11619_s1 + $0xb24] sm:$0xf]  ;;  %v7080_v54 = vld [vmem:[%s11619_s1 + $0xb28] sm:$0xf0] }
 0x2ba   : > { %v4233_v29 = vpop.f32.mrf.mxu1  ;;  %v7144_v9 = vld [vmem:[%s11619_s1 + $0xba8] sm:$0xf0] }
 0x2bb   : > { %v4203_v18 = vadd.f32 %v4202_v3, %v4174_v37 }
 0x2bc   : > { %4591 = vmatpush.bf16.msra.mxu2 %v7043_v32  ;;  %v7027_v32 = vor.u32 %v7719_v26, %v7024_v23  ;;  %v7008_v26 = vld [vmem:[%s11619_s1 + $0xa98] sm:$0xf0]  ;;  %v11797_v23 = vld [vmem:[#allocation51_spill] sm:$0xff] }
 0x2bd   : > { %v11090_v59 = vadd.f32 %v4231_v12, %v4203_v18  ;;  %v4146_v2 = vpop.f32.mrf.mxu2  ;;  %v7248_v12 = vld [vmem:[%s11619_s1 + $0xc78] sm:$0xf0]  ;;  %v7773_v18 = vld [vmem:[%s11619_s1 + $0xc64] sm:$0xf]  ;;  %4621 = vmatpush.bf16.msra.mxu3 %v7099_v51  ;;  %v7083_v51 = vor.u32 %v7733_v5, %v7080_v54  ;;  %v7064_v5 = vld [vmem:[%s11619_s1 + $0xb08] sm:$0xf0] }
 0x2be   : > { %v4147_v28 = vadd.f32 %v4146_v2, %v10889_v55  ;;  %v11789_v55 = vld [vmem:[#allocation42_spill] sm:$0xff]  ;;  %v7251_v58 = vor.u32 %v7775_v63, %v7248_v12  ;;  %v11791_v63 = vld [vmem:[#allocation33_spill] sm:$0xff]  ;;  %v11792_v12 = vld [vmem:[#allocation48_spill] sm:$0xff] }
 0x2bf   : > { %v7747_v54 = vld [vmem:[%s11619_s1 + $0xb94] sm:$0xf] }
 0x2c0   : > { %v4175_v16 = vpop.f32.mrf.mxu3  ;;  %v4207_v35 = vpop.f32.mrf.mxu0  ;;  %4676 = vmatpush.bf16.msra.mxu1 %v7251_v58 }
 0x2c1   : > { %v4176_v50 = vadd.f32 %v4175_v16, %v4147_v28  ;;  %v7171_v28 = vor.u32 %v7755_v42, %v7168_v19  ;;  %4622 = vmatpush.bf16.msra.mxu3 %v7091_v53  ;;  %v7751_v42 = vld [vmem:[%s11619_s1 + $0xbb4] sm:$0xf]  ;;  %v7152_v19 = vld [vmem:[%s11619_s1 + $0xbb8] sm:$0xf0] }
 0x2c2   : > { %v4236_v3 = vpop.f32.mrf.mxu1  ;;  %4380 = vmatmul.bf16.gmra.mxu2 %v11787_v10 }
 0x2c3   : > { %v4205_v1 = vadd.f32 %v4204_v47, %v4176_v50  ;;  %4438 = vmatmul.bf16.gmra.mxu0 %v11788_v21 }
 0x2c4   : > { %4649 = vmatpush.bf16.msra.mxu0 %v7171_v28 }
 0x2c5   : > { %4409 = vmatmul.bf16.gmra.mxu3 %v11789_v55  ;;  %4467 = vmatmul.bf16.gmra.mxu1 %v11790_v31  ;;  %v11121_v38 = vadd.f32 %v4233_v29, %v4205_v1  ;;  %v4149_v30 = vpop.f32.mrf.mxu2  ;;  %v7240_v29 = vld [vmem:[%s11619_s1 + $0xc68] sm:$0xf0]  ;;  %v11793_v55 = vld [vmem:[#allocation46_spill] sm:$0xff]  ;;  %v11794_v31 = vld [vmem:[#allocation47_spill] sm:$0xff] }
 0x2c6   : > { %v4150_v11 = vadd.f32 %v4149_v30, %v10917_v4  ;;  %v7721_v4 = vld [vmem:[%s11619_s1 + $0xac4] sm:$0xf]  ;;  %v7243_v36 = vor.u32 %v7773_v18, %v7240_v29  ;;  %4623 = vmatpush.bf16.msra.mxu3 %v7083_v51 }
 0x2c7   : > { %v7035_v60 = vor.u32 %v7721_v4, %v7032_v24  ;;  %v7769_v4 = vld [vmem:[%s11619_s1 + $0xc44] sm:$0xf]  ;;  %v7016_v24 = vld [vmem:[%s11619_s1 + $0xaa8] sm:$0xf0] }
 0x2c8   : > { %v4178_v46 = vpop.f32.mrf.mxu3  ;;  %v4209_v13 = vpop.f32.mrf.mxu0  ;;  %4677 = vmatpush.bf16.msra.mxu1 %v7243_v36 }
 0x2c9   : > { %v4179_v6 = vadd.f32 %v4178_v46, %v4150_v11  ;;  %4592 = vmatpush.bf16.msra.mxu2 %v7035_v60  ;;  %v7163_v11 = vor.u32 %v7753_v62, %v7160_v22 }
 0x2ca   : > { %v4238_v47 = vpop.f32.mrf.mxu1 }
 0x2cb   : > { %v4208_v37 = vadd.f32 %v4207_v35, %v4179_v6  ;;  %4650 = vmatpush.bf16.msra.mxu0 %v7163_v11 }
 0x2cd   : > { %v11148_v27 = vadd.f32 %v4236_v3, %v4208_v37  ;;  %v4151_v2 = vpop.f32.mrf.mxu2  ;;  %v7771_v3 = vld [vmem:[%s11619_s1 + $0xc54] sm:$0xf]  ;;  %4593 = vmatpush.bf16.msra.mxu2 %v7027_v32  ;;  %v7749_v32 = vld [vmem:[%s11619_s1 + $0xba4] sm:$0xf] }
 0x2ce   : > { %v4152_v16 = vadd.f32 %v4151_v2, %v10947_v0  ;;  %v7232_v0 = vld [vmem:[%s11619_s1 + $0xc58] sm:$0xf0]  ;;  %v7147_v53 = vor.u32 %v7749_v32, %v7144_v9 }
 0x2cf   : > { %v7235_v58 = vor.u32 %v7771_v3, %v7232_v0  ;;  %v11795_v3 = vld [vmem:[#allocation37_spill] sm:$0xff]  ;;  %v11796_v0 = vld [vmem:[#allocation50_spill] sm:$0xff] }
 0x2d0   : > { %v4180_v35 = vpop.f32.mrf.mxu3  ;;  %v4308_v50 = vpop.f32.mrf.mxu0 }
 0x2d1   : > { %v4181_v1 = vadd.f32 %v4180_v35, %v4152_v16  ;;  %4678 = vmatpush.bf16.msra.mxu1 %v7235_v58  ;;  %v7155_v16 = vor.u32 %v7751_v42, %v7152_v19  ;;  %v7715_v58 = vld [vmem:[%s11619_s1 + $0xa94] sm:$0xf] }
 0x2d2   : > { %v4337_v10 = vpop.f32.mrf.mxu1  ;;  %4481 = vmatmul.bf16.vlgmr.msrb.gmra.mxu2 %v11791_v63  ;;  %v7011_v52 = vor.u32 %v7715_v58, %v7008_v26  ;;  %v11798_v26 = vld [vmem:[#allocation41_spill] sm:$0xff] }
 0x2d3   : > { %v4210_v21 = vadd.f32 %v4209_v13, %v4181_v1  ;;  %4539 = vmatmul.bf16.vlgmr.msrb.gmra.mxu0 %v11792_v12 }
 0x2d4   : > { %4651 = vmatpush.bf16.msra.mxu0 %v7155_v16  ;;  %v7763_v16 = vld [vmem:[%s11619_s1 + $0xc14] sm:$0xf] }
 0x2d5   : > { %4510 = vmatmul.bf16.vlgmr.msrb.gmra.mxu3 %v11793_v55  ;;  %4568 = vmatmul.bf16.vlgmr.msrb.gmra.mxu1 %v11794_v31  ;;  %v11179_v30 = vadd.f32 %v4238_v47, %v4210_v21  ;;  %v4250_v39 = vpop.f32.mrf.mxu2  ;;  %v7224_v47 = vld [vmem:[%s11619_s1 + $0xc48] sm:$0xf0]  ;;  %v7072_v31 = vld [vmem:[%s11619_s1 + $0xb18] sm:$0xf0] }
 0x2d6   : > { %v4251_v46 = vadd.f32 %v4250_v39, %v10974_v45  ;;  %v7717_v45 = vld [vmem:[%s11619_s1 + $0xaa4] sm:$0xf]  ;;  %v7227_v36 = vor.u32 %v7769_v4, %v7224_v47 }
 0x2d7   : > { %v7019_v60 = vor.u32 %v7717_v45, %v7016_v24  ;;  %v7000_v45 = vld [vmem:[%s11619_s1 + $0xa88] sm:$0xf0] }
 0x2d8   : > { %v4279_v13 = vpop.f32.mrf.mxu3  ;;  %v4310_v6 = vpop.f32.mrf.mxu0  ;;  %4679 = vmatpush.bf16.msra.mxu1 %v7227_v36  ;;  %4652 = vmatpush.bf16.msra.mxu0 %v7147_v53  ;;  %v7729_v36 = vld [vmem:[%s11619_s1 + $0xb04] sm:$0xf] }
 0x2d9   : > { %v4280_v37 = vadd.f32 %v4279_v13, %v4251_v46  ;;  %4594 = vmatpush.bf16.msra.mxu2 %v7019_v60  ;;  %v7136_v60 = vld [vmem:[%s11619_s1 + $0xb98] sm:$0xf0]  ;;  %v7067_v51 = vor.u32 %v7729_v36, %v7064_v5  ;;  %v11802_v36 = vld [vmem:[#allocation45_spill] sm:$0xff] }
 0x2da   : > { %v4339_v18 = vpop.f32.mrf.mxu1  ;;  %v7139_v42 = vor.u32 %v7747_v54, %v7136_v60 }
 0x2db   : > { %v4309_v29 = vadd.f32 %v4308_v50, %v4280_v37 }
 0x2dc   : > { %4653 = vmatpush.bf16.msra.mxu0 %v7139_v42 }
 0x2dd   : > { %v11206_v2 = vadd.f32 %v4337_v10, %v4309_v29  ;;  %v4252_v28 = vpop.f32.mrf.mxu2  ;;  %v7767_v10 = vld [vmem:[%s11619_s1 + $0xc34] sm:$0xf]  ;;  %4595 = vmatpush.bf16.msra.mxu2 %v7011_v52  ;;  %v7765_v29 = vld [vmem:[%s11619_s1 + $0xc24] sm:$0xf] }
 0x2de   : > { %v4253_v35 = vadd.f32 %v4252_v28, %v11005_v40  ;;  %v7216_v40 = vld [vmem:[%s11619_s1 + $0xc38] sm:$0xf0]  ;;  %v11800_v52 = vld [vmem:[#allocation53_spill] sm:$0xff] }
 0x2df   : > { %v7219_v55 = vor.u32 %v7767_v10, %v7216_v40 }
 0x2e0   : > { %v4281_v50 = vpop.f32.mrf.mxu3  ;;  %v4313_v1 = vpop.f32.mrf.mxu0 }
 0x2e1   : > { %v4282_v21 = vadd.f32 %v4281_v50, %v4253_v35  ;;  %4680 = vmatpush.bf16.msra.mxu1 %v7219_v55  ;;  %v7200_v35 = vld [vmem:[%s11619_s1 + $0xc18] sm:$0xf0]  ;;  %v7192_v55 = vld [vmem:[%s11619_s1 + $0xc08] sm:$0xf0] }
 0x2e2   : > { %v4342_v63 = vpop.f32.mrf.mxu1  ;;  %4486 = vmatmul.bf16.gmra.mxu2 %v11795_v3  ;;  %v7128_v3 = vld [vmem:[%s11619_s1 + $0xb88] sm:$0xf0] }
 0x2e3   : > { %v4311_v12 = vadd.f32 %v4310_v6, %v4282_v21  ;;  %4544 = vmatmul.bf16.gmra.mxu0 %v9704_v57  ;;  %v7731_v57 = vld [vmem:[%s11619_s1 + $0xb14] sm:$0xf]  ;;  %v7203_v21 = vor.u32 %v7763_v16, %v7200_v35 }
 0x2e4   : > { %v7075_v39 = vor.u32 %v7731_v57, %v7072_v31  ;;  %v11799_v57 = vld [vmem:[#allocation55_spill] sm:$0xff]  ;;  %v11801_v31 = vld [vmem:[#allocation54_spill] sm:$0xff] }
 0x2e5   : > { %4515 = vmatmul.bf16.gmra.mxu3 %v11796_v0  ;;  %4573 = vmatmul.bf16.gmra.mxu1 %v11797_v23  ;;  %v11237_v62 = vadd.f32 %v4339_v18, %v4311_v12  ;;  %v4255_v22 = vpop.f32.mrf.mxu2  ;;  %v7208_v18 = vld [vmem:[%s11619_s1 + $0xc28] sm:$0xf0] }
 0x2e6   : > { %v4256_v11 = vadd.f32 %v4255_v22, %v11032_v41  ;;  %4624 = vmatpush.bf16.msra.mxu3 %v7075_v39  ;;  %v7211_v47 = vor.u32 %v7765_v29, %v7208_v18  ;;  %v7713_v41 = vld [vmem:[%s11619_s1 + $0xa84] sm:$0xf] }
 0x2e7   : > { %v7003_v24 = vor.u32 %v7713_v41, %v7000_v45 }
 0x2e8   : > { %v4284_v46 = vpop.f32.mrf.mxu3  ;;  %v4315_v13 = vpop.f32.mrf.mxu0  ;;  %4681 = vmatpush.bf16.msra.mxu1 %v7211_v47 }
 0x2e9   : > { %v4285_v6 = vadd.f32 %v4284_v46, %v4256_v11  ;;  %4596 = vmatpush.bf16.msra.mxu2 %v7003_v24  ;;  %v11804_v24 = vld [vmem:[#allocation58_spill] sm:$0xff] }
 0x2ea   : > { %v4344_v37 = vpop.f32.mrf.mxu1  ;;  %4625 = vmatpush.bf16.msra.mxu3 %v7067_v51 }
 0x2eb   : > { %v4314_v4 = vadd.f32 %v4313_v1, %v4285_v6 }
 0x2ec   : > { %4682 = vmatpush.bf16.msra.mxu1 %v7203_v21 }
 0x2ed   : > { %v11264_v19 = vadd.f32 %v4342_v63, %v4314_v4  ;;  %v4257_v28 = vpop.f32.mrf.mxu2  ;;  %v7745_v63 = vld [vmem:[%s11619_s1 + $0xb84] sm:$0xf] }
 0x2ee   : > { %v4258_v50 = vadd.f32 %v4257_v28, %v11069_v48  ;;  %v7131_v40 = vor.u32 %v7745_v63, %v7128_v3  ;;  %v7761_v48 = vld [vmem:[%s11619_s1 + $0xc04] sm:$0xf] }
 0x2ef   : > { %v7195_v23 = vor.u32 %v7761_v48, %v7192_v55 }
 0x2f0   : > { %v4286_v1 = vpop.f32.mrf.mxu3  ;;  %v4318_v12 = vpop.f32.mrf.mxu0  ;;  %4654 = vmatpush.bf16.msra.mxu0 %v7131_v40  ;;  %v11807_v40 = vld [vmem:[#allocation61_spill] sm:$0xff] }
 0x2f1   : > { %v4287_v10 = vadd.f32 %v4286_v1, %v4258_v50  ;;  %4683 = vmatpush.bf16.msra.mxu1 %v7195_v23 }
 0x2f2   : > { %v4347_v0 = vpop.f32.mrf.mxu1  ;;  %4491 = vmatmul.bf16.gmra.mxu2 %v11798_v26 }
 0x2f3   : > { %v4316_v58 = vadd.f32 %v4315_v13, %v4287_v10  ;;  %4549 = vmatmul.bf16.gmra.mxu0 %v11799_v57  ;;  %v11805_v10 = vld [vmem:[#allocation49_spill] sm:$0xff] }
 0x2f5   : > { %4520 = vmatmul.bf16.gmra.mxu3 %v11800_v52  ;;  %4578 = vmatmul.bf16.gmra.mxu1 %v11801_v31  ;;  %v11289_v32 = vadd.f32 %v4344_v37, %v4316_v58  ;;  %v4260_v9 = vpop.f32.mrf.mxu2 }
 0x2f6   : > { %v4261_v22 = vadd.f32 %v4260_v9, %v11090_v59  ;;  %v11803_v59 = vld [vmem:[#allocation57_spill] sm:$0xff] }
 0x2f8   : > { %v4289_v39 = vpop.f32.mrf.mxu3  ;;  %v4320_v53 = vpop.f32.mrf.mxu0 }
 0x2f9   : > { %v4290_v11 = vadd.f32 %v4289_v39, %v4261_v22 }
 0x2fa   : > { %v4349_v46 = vpop.f32.mrf.mxu1 }
 0x2fb   : > { %v4319_v13 = vadd.f32 %v4318_v12, %v4290_v11 }
 0x2fd   : > { %v11292_v6 = vadd.f32 %v4347_v0, %v4319_v13  ;;  %v4262_v29 = vpop.f32.mrf.mxu2  ;;  %v11810_v13 = vld [vmem:[#allocation63_spill] sm:$0xff] }
 0x2fe   : > { %v4263_v18 = vadd.f32 %v4262_v29, %v11121_v38 }
 0x300   : > { %v4291_v4 = vpop.f32.mrf.mxu3  ;;  %v4323_v47 = vpop.f32.mrf.mxu0 }
 0x301   : > { %v4292_v41 = vadd.f32 %v4291_v4, %v4263_v18 }
 0x302   : > { %v4352_v45 = vpop.f32.mrf.mxu1  ;;  %4496 = vmatmul.bf16.gmra.mxu2 %v11802_v36 }
 0x303   : > { %v4321_v37 = vadd.f32 %v4320_v53, %v4292_v41  ;;  %4554 = vmatmul.bf16.gmra.mxu0 %v9852_v49 }
 0x305   : > { %4525 = vmatmul.bf16.gmra.mxu3 %v11803_v59  ;;  %4583 = vmatmul.bf16.gmra.mxu1 %v11804_v24  ;;  %v11299_v5 = vadd.f32 %v4349_v46, %v4321_v37  ;;  %v4265_v54 = vpop.f32.mrf.mxu2  ;;  %v11808_v46 = vld [vmem:[#allocation52_spill] sm:$0xff] }
 0x306   : > { %v4266_v60 = vadd.f32 %v4265_v54, %v11148_v27  ;;  %v11806_v27 = vld [vmem:[#allocation60_spill] sm:$0xff] }
 0x308   : > { %v4294_v51 = vpop.f32.mrf.mxu3  ;;  %v4325_v38 = vpop.f32.mrf.mxu0 }
 0x309   : > { %v4295_v42 = vadd.f32 %v4294_v51, %v4266_v60 }
 0x30a   : > { %v4354_v28 = vpop.f32.mrf.mxu1 }
 0x30b   : > { %v4324_v16 = vadd.f32 %v4323_v47, %v4295_v42  ;;  %v11811_v42 = vld [vmem:[#allocation56_spill] sm:$0xff] }
 0x30d   : > { %v11302_v35 = vadd.f32 %v4352_v45, %v4324_v16  ;;  %v4267_v50 = vpop.f32.mrf.mxu2  ;;  %v11814_v16 = vld [vmem:[#allocation65_spill] sm:$0xff] }
 0x30e   : > { %v4268_v1 = vadd.f32 %v4267_v50, %v11179_v30 }
 0x310   : > { %v4296_v49 = vpop.f32.mrf.mxu3  ;;  %v4424_v21 = vpop.f32.mrf.mxu0 }
 0x311   : > { %v4297_v12 = vadd.f32 %v4296_v49, %v4268_v1 }
 0x312   : > { %v4453_v63 = vpop.f32.mrf.mxu1  ;;  %4597 = vmatmul.bf16.vlgmr.msra.gmra.mxu2 %v11805_v10 }
 0x313   : > { %v4326_v3 = vadd.f32 %v4325_v38, %v4297_v12  ;;  %4655 = vmatmul.bf16.vlgmr.msra.gmra.mxu0 %v9924_v56 }
 0x315   : > { %4626 = vmatmul.bf16.vlgmr.msra.gmra.mxu3 %v11806_v27  ;;  %4684 = vmatmul.bf16.vlgmr.msra.gmra.mxu1 %v11807_v40  ;;  %v11309_v0 = vadd.f32 %v4354_v28, %v4326_v3  ;;  %v4366_v48 = vpop.f32.mrf.mxu2  ;;  %v11812_v28 = vld [vmem:[#allocation66_spill] sm:$0xff] }
 0x316   : > { %v4367_v55 = vadd.f32 %v4366_v48, %v11206_v2  ;;  %v11809_v2 = vld [vmem:[#allocation62_spill] sm:$0xff] }
 0x318   : > { %v4395_v58 = vpop.f32.mrf.mxu3  ;;  %v4426_v30 = vpop.f32.mrf.mxu0 }
 0x319   : > { %v4396_v26 = vadd.f32 %v4395_v58, %v4367_v55 }
 0x31a   : > { %v4455_v57 = vpop.f32.mrf.mxu1 }
 0x31b   : > { %v4425_v23 = vadd.f32 %v4424_v21, %v4396_v26 }
 0x31d   : > { %v11312_v52 = vadd.f32 %v4453_v63, %v4425_v23  ;;  %v4368_v31 = vpop.f32.mrf.mxu2 }
 0x31e   : > { %v4369_v9 = vadd.f32 %v4368_v31, %v11237_v62 }
 0x320   : > { %v4397_v56 = vpop.f32.mrf.mxu3  ;;  %v4429_v22 = vpop.f32.mrf.mxu0 }
 0x321   : > { %v4398_v39 = vadd.f32 %v4397_v56, %v4369_v9 }
 0x322   : > { %v4458_v53 = vpop.f32.mrf.mxu1  ;;  %4602 = vmatmul.bf16.gmra.mxu2 %v11808_v46 }
 0x323   : > { %v4427_v11 = vadd.f32 %v4426_v30, %v4398_v39  ;;  %4660 = vmatmul.bf16.gmra.mxu0 %v9994_v20 }
 0x325   : > { %4631 = vmatmul.bf16.gmra.mxu3 %v11809_v2  ;;  %4689 = vmatmul.bf16.gmra.mxu1 %v11810_v13  ;;  %v11319_v29 = vadd.f32 %v4455_v57, %v4427_v11  ;;  %v4371_v18 = vpop.f32.mrf.mxu2  ;;  %v11815_v57 = vld [vmem:[#allocation59_spill] sm:$0xff] }
 0x326   : > { %v4372_v4 = vadd.f32 %v4371_v18, %v11264_v19  ;;  %v11813_v19 = vld [vmem:[#allocation64_spill] sm:$0xff] }
 0x328   : > { %v4400_v47 = vpop.f32.mrf.mxu3  ;;  %v4431_v62 = vpop.f32.mrf.mxu0 }
 0x329   : > { %v4401_v41 = vadd.f32 %v4400_v47, %v4372_v4 }
 0x32a   : > { %v4460_v45 = vpop.f32.mrf.mxu1 }
 0x32b   : > { %v4430_v37 = vadd.f32 %v4429_v22, %v4401_v41 }
 0x32d   : > { %v11322_v36 = vadd.f32 %v4458_v53, %v4430_v37  ;;  %v4373_v59 = vpop.f32.mrf.mxu2 }
 0x32e   : > { %v4374_v24 = vadd.f32 %v4373_v59, %v11289_v32 }
 0x330   : > { %v4402_v20 = vpop.f32.mrf.mxu3  ;;  %v4434_v54 = vpop.f32.mrf.mxu0 }
 0x331   : > { %v4403_v60 = vadd.f32 %v4402_v20, %v4374_v24 }
 0x332   : > { %v4463_v51 = vpop.f32.mrf.mxu1  ;;  %4607 = vmatmul.bf16.gmra.mxu2 %v11811_v42 }
 0x333   : > { %v4432_v38 = vadd.f32 %v4431_v62, %v4403_v60  ;;  %4665 = vmatmul.bf16.gmra.mxu0 %v11812_v28 }
 0x335   : > { %4636 = vmatmul.bf16.gmra.mxu3 %v11813_v19  ;;  %4694 = vmatmul.bf16.gmra.mxu1 %v11814_v16  ;;  %v11329_v50 = vadd.f32 %v4460_v45, %v4432_v38  ;;  %v4376_v1 = vpop.f32.mrf.mxu2 }
 0x336   : > { %v4377_v49 = vadd.f32 %v4376_v1, %v11292_v6 }
 0x338   : > { %v4405_v21 = vpop.f32.mrf.mxu3  ;;  %v4436_v32 = vpop.f32.mrf.mxu0 }
 0x339   : > { %v4406_v12 = vadd.f32 %v4405_v21, %v4377_v49 }
 0x33a   : > { %v4465_v63 = vpop.f32.mrf.mxu1 }
 0x33b   : > { %v4435_v3 = vadd.f32 %v4434_v54, %v4406_v12 }
 0x33d   : > { %v11332_v10 = vadd.f32 %v4463_v51, %v4435_v3  ;;  %v4378_v27 = vpop.f32.mrf.mxu2 }
 0x33e   : > { %v4379_v40 = vadd.f32 %v4378_v27, %v11299_v5 }
 0x340   : > { %v4407_v48 = vpop.f32.mrf.mxu3  ;;  %v4439_v55 = vpop.f32.mrf.mxu0 }
 0x341   : > { %v4408_v58 = vadd.f32 %v4407_v48, %v4379_v40 }
 0x342   : > { %v4468_v30 = vpop.f32.mrf.mxu1  ;;  %4612 = vmatmul.bf16.gmra.mxu2 %v11815_v57 }
 0x343   : > { %v4437_v26 = vadd.f32 %v4436_v32, %v4408_v58  ;;  %4670 = vmatmul.bf16.gmra.mxu0 %v10134_v43 }
 0x345   : > { %4641 = vmatmul.bf16.gmra.mxu3 %v10130_v44  ;;  %4699 = vmatmul.bf16.gmra.mxu1 %v10132_v14  ;;  %v11339_v6 = vadd.f32 %v4465_v63, %v4437_v26  ;;  %v4381_v23 = vpop.f32.mrf.mxu2 }
 0x346   : > { %v4382_v31 = vadd.f32 %v4381_v23, %v11302_v35 }
 0x348   : > { %v4410_v9 = vpop.f32.mrf.mxu3  ;;  %v4441_v5 = vpop.f32.mrf.mxu0 }
 0x349   : > { %v4411_v56 = vadd.f32 %v4410_v9, %v4382_v31 }
 0x34a   : > { %v4470_v22 = vpop.f32.mrf.mxu1 }
 0x34b   : > { %v4440_v39 = vadd.f32 %v4439_v55, %v4411_v56 }
 0x34d   : > { %v11342_v53 = vadd.f32 %v4468_v30, %v4440_v39  ;;  %v4383_v11 = vpop.f32.mrf.mxu2 }
 0x34e   : > { %v4384_v46 = vadd.f32 %v4383_v11, %v11309_v0 }
 0x350   : > { %v4412_v43 = vpop.f32.mrf.mxu3  ;;  %v4540_v2 = vpop.f32.mrf.mxu0 }
 0x351   : > { %v4413_v44 = vadd.f32 %v4412_v43, %v4384_v46 }
 0x352   : > { %v4569_v13 = vpop.f32.mrf.mxu1 }
 0x353   : > { %v4442_v14 = vadd.f32 %v4441_v5, %v4413_v44 }
 0x355   : > { %v11345_v18 = vadd.f32 %v4470_v22, %v4442_v14  ;;  %v4482_v4 = vpop.f32.mrf.mxu2 }
 0x356   : > { %v4483_v40 = vadd.f32 %v4482_v4, %v11312_v52 }
 0x358   : > { %v4511_v47 = vpop.f32.mrf.mxu3  ;;  %v4542_v35 = vpop.f32.mrf.mxu0 }
 0x359   : > { %v4512_v55 = vadd.f32 %v4511_v47, %v4483_v40 }
 0x35a   : > { %v4571_v62 = vpop.f32.mrf.mxu1 }
 0x35b   : > { %v4541_v57 = vadd.f32 %v4540_v2, %v4512_v55 }
 0x35d   : > { %v4484_v41 = vpop.f32.mrf.mxu2  ;;  %v4570_v5 = vadd.f32 %v4569_v13, %v4541_v57 }
 0x35e   : > { %v4485_v23 = vadd.f32 %v4484_v41, %v11319_v29  ;;  %v11386_v29 = vmax.f32 %v10461_v25, 0.0 }
 0x360   : > { %v4513_v45 = vpop.f32.mrf.mxu3  ;;  %v4545_v37 = vpop.f32.mrf.mxu0 }
 0x361   : > { %v4514_v9 = vadd.f32 %v4513_v45, %v4485_v23 }
 0x362   : > { %v4574_v59 = vpop.f32.mrf.mxu1 }
 0x363   : > { %v4543_v52 = vadd.f32 %v4542_v35, %v4514_v9  ;;  %v11397_v9 = vmax.f32 %v10490_v7, 0.0 }
 0x365   : > { %v4487_v24 = vpop.f32.mrf.mxu2  ;;  %v4572_v2 = vadd.f32 %v4571_v62, %v4543_v52 }
 0x366   : > { %v4488_v46 = vadd.f32 %v4487_v24, %v11322_v36 }
 0x368   : > { %v4516_v20 = vpop.f32.mrf.mxu3  ;;  %v11347_v54 = vpop.f32.mrf.mxu0 }
 0x369   : > { %v4517_v4 = vadd.f32 %v4516_v20, %v4488_v46 }
 0x36a   : > { %v11349_v0 = vpop.f32.mrf.mxu1 }
 0x36b   : > { %v4546_v35 = vadd.f32 %v4545_v37, %v4517_v4 }
 0x36d   : > { %v4489_v60 = vpop.f32.mrf.mxu2  ;;  %v4575_v23 = vadd.f32 %v4574_v59, %v4546_v35 }
 0x36e   : > { %v4490_v36 = vadd.f32 %v4489_v60, %v11329_v50 }
 0x370   : > { %v4518_v51 = vpop.f32.mrf.mxu3  ;;  %v11351_v38 = vpop.f32.mrf.mxu0 }
 0x371   : > { %v4519_v62 = vadd.f32 %v4518_v51, %v4490_v36 }
 0x372   : > { %v11353_v42 = vpop.f32.mrf.mxu1 }
 0x375   : > { %v4492_v28 = vpop.f32.mrf.mxu2 }
 0x378   : > { %v11355_v19 = vpop.f32.mrf.mxu3  ;;  %v11357_v16 = vpop.f32.mrf.mxu0 }
 0x37a   : > { %v11359_v1 = vpop.f32.mrf.mxu1 }
 0x37d   : > { %v11361_v49 = vpop.f32.mrf.mxu2 }
 0x37e   : > { %v4495_v4 = vadd.f32 %v11361_v49, %v11339_v6 }
 0x380   : > { %v11363_v21 = vpop.f32.mrf.mxu3  ;;  %v11365_v32 = vpop.f32.mrf.mxu0 }
 0x382   : > { %v11367_v12 = vpop.f32.mrf.mxu1 }
 0x385   : > { %v11369_v63 = vpop.f32.mrf.mxu2 }
 0x388   : > { %v11371_v3 = vpop.f32.mrf.mxu3  ;;  %v11373_v27 = vpop.f32.mrf.mxu0 }
 0x38a   : > { %v11376_v48 = vpop.f32.mrf.mxu1 }
 0x38d   : > { %v11378_v58 = vpop.f32.mrf.mxu2 }
 0x390   : > { %v11380_v30 = vpop.f32.mrf.mxu3  ;;  %v4656_v26 = vpop.f32.mrf.mxu0 }
 0x392   : > { %v4685_v31 = vpop.f32.mrf.mxu1 }
 0x395   : > { %v4598_v56 = vpop.f32.mrf.mxu2 }
 0x396   : > { %v4599_v22 = vadd.f32 %v4598_v56, %v4570_v5  ;;  %v4548_v5 = vadd.f32 %v11347_v54, %v4519_v62  ;;  %v4493_v56 = vadd.f32 %v4492_v28, %v11332_v10 }
 0x398   : > { %v4627_v39 = vpop.f32.mrf.mxu3  ;;  %v4658_v11 = vpop.f32.mrf.mxu0  ;;  %v4522_v7 = vadd.f32 %v11355_v19, %v4493_v56  ;;  %v4577_v46 = vadd.f32 %v11349_v0, %v4548_v5 }
 0x399   : > { %v4628_v43 = vadd.f32 %v4627_v39, %v4599_v22 }
 0x39a   : > { %v4687_v44 = vpop.f32.mrf.mxu1 }
 0x39b   : > { %v4657_v14 = vadd.f32 %v4656_v26, %v4628_v43 }
 0x39d   : > { %v4686_v47 = vadd.f32 %v4685_v31, %v4657_v14  ;;  %v4600_v40 = vpop.f32.mrf.mxu2  ;;  %v4551_v14 = vadd.f32 %v11351_v38, %v4522_v7  ;;  %v11422_v38 = vmax.f32 %v10570_v15, 0.0 }
 0x39e   : > { %v4601_v41 = vadd.f32 %v4600_v40, %v4572_v2 }
 0x39f   : > { %v11388_v13 = vmax.f32 %v4686_v47, 0.0 }
 0x3a0   : > { %v4629_v45 = vpop.f32.mrf.mxu3  ;;  %v4661_v55 = vpop.f32.mrf.mxu0 }
 0x3a1   : > { %v4721_v24 = vpack.c.bf16 %v11388_v13, %v11386_v29  ;;  %v4630_v26 = vadd.f32 %v4629_v45, %v4601_v41  ;;  %v4580_v41 = vadd.f32 %v11353_v42, %v4551_v14 }
 0x3a2   : > { %v4690_v20 = vpop.f32.mrf.mxu1 }
 0x3a3   : > { %4729 = vst [vmem:[%s11393_s15] sm:$0xff] %v4721_v24  ;;  %v4659_v25 = vadd.f32 %v4658_v11, %v4630_v26  ;;  %v4498_v24 = vadd.f32 %v11369_v63, %v11342_v53 }
 0x3a5   : > { %v4688_v57 = vadd.f32 %v4687_v44, %v4659_v25  ;;  %v4603_v31 = vpop.f32.mrf.mxu2  ;;  %v11409_v44 = vmax.f32 %v10529_v34, 0.0  ;;  %v4524_v34 = vadd.f32 %v11363_v21, %v4495_v4 }
 0x3a6   : > { %v4604_v50 = vadd.f32 %v4603_v31, %v4575_v23  ;;  %v11435_v23 = vmax.f32 %v10591_v17, 0.0 }
 0x3a7   : > { %v11399_v37 = vmax.f32 %v4688_v57, 0.0  ;;  %v4553_v36 = vadd.f32 %v11357_v16, %v4524_v34 }
 0x3a8   : > { %v4632_v60 = vpop.f32.mrf.mxu3  ;;  %v4663_v11 = vpop.f32.mrf.mxu0 }
 0x3a9   : > { %v4722_v22 = vpack.c.bf16 %v11399_v37, %v11397_v9  ;;  %v4633_v39 = vadd.f32 %v4632_v60, %v4604_v50  ;;  %v4582_v25 = vadd.f32 %v11359_v1, %v4553_v36  ;;  %v4500_v60 = vadd.f32 %v11378_v58, %v11345_v18 }
 0x3aa   : > { %v4692_v51 = vpop.f32.mrf.mxu1 }
 0x3ab   : > { %4730 = vst [vmem:[%s11393_s15 + $0x8] sm:$0xff] %v4722_v22  ;;  %v4662_v59 = vadd.f32 %v4661_v55, %v4633_v39  ;;  %v4529_v17 = vadd.f32 %v11380_v30, %v4500_v60 }
 0x3ad   : > { %v4691_v52 = vadd.f32 %v4690_v20, %v4662_v59  ;;  %v4605_v43 = vpop.f32.mrf.mxu2  ;;  %v4527_v20 = vadd.f32 %v11371_v3, %v4498_v24 }
 0x3ae   : > { %v4606_v10 = vadd.f32 %v4605_v43, %v4577_v46 }
 0x3af   : > { %v11411_v54 = vmax.f32 %v4691_v52, 0.0  ;;  %v4556_v50 = vadd.f32 %v11365_v32, %v4527_v20 }
 0x3b0   : > { %v4634_v28 = vpop.f32.mrf.mxu3  ;;  %v4666_v2 = vpop.f32.mrf.mxu0 }
 0x3b1   : > { %v4723_v47 = vpack.c.bf16 %v11411_v54, %v11409_v44  ;;  %v4635_v19 = vadd.f32 %v4634_v28, %v4606_v10  ;;  %v4585_v22 = vadd.f32 %v11367_v12, %v4556_v50  ;;  %v11458_v10 = vmax.f32 %v10647_v33, 0.0 }
 0x3b2   : > { %v4695_v45 = vpop.f32.mrf.mxu1 }
 0x3b3   : > { %4731 = vst [vmem:[%s11393_s15 + $0x10] sm:$0xff] %v4723_v47  ;;  %v4664_v0 = vadd.f32 %v4663_v11, %v4635_v19  ;;  %v11448_v11 = vmax.f32 %v10614_v8, 0.0 }
 0x3b5   : > { %v4693_v40 = vadd.f32 %v4692_v51, %v4664_v0  ;;  %v4608_v55 = vpop.f32.mrf.mxu2  ;;  %v4558_v51 = vadd.f32 %v11373_v27, %v4529_v17 }
 0x3b6   : > { %v4609_v6 = vadd.f32 %v4608_v55, %v4580_v41 }
 0x3b7   : > { %v11424_v35 = vmax.f32 %v4693_v40, 0.0  ;;  %v4587_v43 = vadd.f32 %v11376_v48, %v4558_v51  ;;  %v11466_v48 = vmax.f32 %v10679_v61, 0.0 }
 0x3b8   : > { %v4637_v49 = vpop.f32.mrf.mxu3  ;;  %v4668_v62 = vpop.f32.mrf.mxu0 }
 0x3b9   : > { %v4724_v21 = vpack.c.bf16 %v11424_v35, %v11422_v38  ;;  %v4638_v26 = vadd.f32 %v4637_v49, %v4609_v6 }
 0x3ba   : > { %v4697_v31 = vpop.f32.mrf.mxu1 }
 0x3bb   : > { %4732 = vst [vmem:[%s11393_s15 + $0x18] sm:$0xff] %v4724_v21  ;;  %v4667_v42 = vadd.f32 %v4666_v2, %v4638_v26 }
 0x3bd   : > { %v4696_v15 = vadd.f32 %v4695_v45, %v4667_v42  ;;  %v4610_v57 = vpop.f32.mrf.mxu2 }
 0x3be   : > { %v4611_v53 = vadd.f32 %v4610_v57, %v4582_v25 }
 0x3bf   : > { %v11437_v16 = vmax.f32 %v4696_v15, 0.0 }
 0x3c0   : > { %v4639_v63 = vpop.f32.mrf.mxu3  ;;  %v4671_v58 = vpop.f32.mrf.mxu0 }
 0x3c1   : > { %v4725_v3 = vpack.c.bf16 %v11437_v16, %v11435_v23  ;;  %v4640_v5 = vadd.f32 %v4639_v63, %v4611_v53 }
 0x3c2   : > { %v4700_v30 = vpop.f32.mrf.mxu1 }
 0x3c3   : > { %4733 = vst [vmem:[%s11393_s15 + $0x20] sm:$0xff] %v4725_v3  ;;  %v4669_v1 = vadd.f32 %v4668_v62, %v4640_v5 }
 0x3c5   : > { %v4698_v56 = vadd.f32 %v4697_v31, %v4669_v1  ;;  %v4613_v39 = vpop.f32.mrf.mxu2 }
 0x3c6   : > { %v4614_v59 = vadd.f32 %v4613_v39, %v4585_v22 }
 0x3c7   : > { %v11450_v32 = vmax.f32 %v4698_v56, 0.0 }
 0x3c8   : > { %v4642_v18 = vpop.f32.mrf.mxu3  ;;  %v4673_v19 = vpop.f32.mrf.mxu0 }
 0x3c9   : > { %v4726_v7 = vpack.c.bf16 %v11450_v32, %v11448_v11  ;;  %v4643_v52 = vadd.f32 %v4642_v18, %v4614_v59 }
 0x3ca   : > { %v4702_v2 = vpop.f32.mrf.mxu1 }
 0x3cb   : > { %4734 = vst [vmem:[%s11393_s15 + $0x28] sm:$0xff] %v4726_v7  ;;  %v4672_v46 = vadd.f32 %v4671_v58, %v4643_v52 }
 0x3cd   : > { %v4701_v12 = vadd.f32 %v4700_v30, %v4672_v46  ;;  %v4615_v8 = vpop.f32.mrf.mxu2 }
 0x3ce   : > { %v4616_v14 = vadd.f32 %v4615_v8, %v4587_v43 }
 0x3cf   : > { %v11460_v28 = vmax.f32 %v4701_v12, 0.0 }
 0x3d0   : > { %v4644_v27 = vpop.f32.mrf.mxu3 }
 0x3d1   : > { %v4727_v4 = vpack.c.bf16 %v11460_v28, %v11458_v10  ;;  %v4645_v47 = vadd.f32 %v4644_v27, %v4616_v14 }
 0x3d3   : > { %4735 = vst [vmem:[%s11393_s15 + $0x30] sm:$0xff] %v4727_v4  ;;  %v4674_v0 = vadd.f32 %v4673_v19, %v4645_v47 }
 0x3d5   : > { %v4703_v34 = vadd.f32 %v4702_v2, %v4674_v0 }
 0x3d7   : > { %v11468_v40 = vmax.f32 %v4703_v34, 0.0  ;;  %4740 = sbr.rel (%p101_p2) target bundleno = 1021 (0x3fd), region = 36 }
 0x3d9   : > { %v4728_v33 = vpack.c.bf16 %v11468_v40, %v11466_v48 }
 0x3db   : > { %4736 = vst [vmem:[%s11393_s15 + $0x38] sm:$0xff] %v4728_v33 }
 0x3dc   : > { %v4741_v41 = vadd.f32 %v11397_v9, %v11386_v29  ;;  %v4754_v45 = vadd.f32 %v11399_v37, %v11388_v13  ;;  %v4779_v6 = vmul.f32 %v11386_v29, %v11386_v29  ;;  %v4781_v49 = vmul.f32 %v11397_v9, %v11397_v9 }
 0x3dd   : > { %v4780_v36 = vmul.f32 %v11388_v13, %v11388_v13  ;;  %v4782_v24 = vmul.f32 %v11399_v37, %v11399_v37  ;;  %v4783_v42 = vmul.f32 %v11409_v44, %v11409_v44  ;;  %v4784_v20 = vmul.f32 %v11411_v54, %v11411_v54 }
 0x3de   : > { %v4742_v55 = vadd.f32 %v4741_v41, %v11409_v44  ;;  %v4755_v61 = vadd.f32 %v4754_v45, %v11411_v54  ;;  %v4785_v62 = vmul.f32 %v11422_v38, %v11422_v38  ;;  %v4795_v57 = vadd.f32 %v4781_v49, %v4779_v6 }
 0x3df   : > { %v4786_v53 = vmul.f32 %v11424_v35, %v11424_v35  ;;  %v4808_v63 = vadd.f32 %v4782_v24, %v4780_v36  ;;  %v4787_v60 = vmul.f32 %v11435_v23, %v11435_v23  ;;  %v4788_v5 = vmul.f32 %v11437_v16, %v11437_v16 }
 0x3e0   : > { %v4743_v21 = vadd.f32 %v4742_v55, %v11422_v38  ;;  %v4756_v26 = vadd.f32 %v4755_v61, %v11424_v35  ;;  %v4796_v3 = vadd.f32 %v4795_v57, %v4783_v42  ;;  %v4789_v22 = vmul.f32 %v11448_v11, %v11448_v11 }
 0x3e1   : > { %v4809_v1 = vadd.f32 %v4808_v63, %v4784_v20  ;;  %v4790_v59 = vmul.f32 %v11450_v32, %v11450_v32  ;;  %v4791_v7 = vmul.f32 %v11458_v10, %v11458_v10  ;;  %v4792_v30 = vmul.f32 %v11460_v28, %v11460_v28 }
 0x3e2   : > { %v4744_v15 = vadd.f32 %v4743_v21, %v11435_v23  ;;  %v4757_v25 = vadd.f32 %v4756_v26, %v11437_v16  ;;  %v4797_v39 = vadd.f32 %v4796_v3, %v4785_v62  ;;  %v4793_v8 = vmul.f32 %v11466_v48, %v11466_v48 }
 0x3e3   : > { %v4810_v18 = vadd.f32 %v4809_v1, %v4786_v53  ;;  %v4794_v27 = vmul.f32 %v11468_v40, %v11468_v40  ;;  %v4773_v21 = vlaneseq  ;;  %vm4770_vm0 = vcmask 1040384  }
 0x3e4   : > { %v4745_v31 = vadd.f32 %v4744_v15, %v11448_v11  ;;  %v4758_v50 = vadd.f32 %v4757_v25, %v11450_v32  ;;  %v4798_v52 = vadd.f32 %v4797_v39, %v4787_v60 }
 0x3e5   : > { %v4811_v46 = vadd.f32 %v4810_v18, %v4788_v5  ;;  %vm4775_vm1 = vcmp.lt.s32.totalorder %v4773_v21, 256 }
 0x3e6   : > { %v4746_v17 = vadd.f32 %v4745_v31, %v11458_v10  ;;  %v4759_v56 = vadd.f32 %v4758_v50, %v11460_v28  ;;  %v4799_v14 = vadd.f32 %v4798_v52, %v4789_v22 }
 0x3e7   : > { %v4812_v4 = vadd.f32 %v4811_v46, %v4790_v59 }
 0x3e8   : > { %v4747_v58 = vadd.f32 %v4746_v17, %v11466_v48  ;;  %v4760_v51 = vadd.f32 %v4759_v56, %v11468_v40  ;;  %v4800_v0 = vadd.f32 %v4799_v14, %v4791_v7 }
 0x3e9   : > { %v4813_v2 = vadd.f32 %v4812_v4, %v4792_v30 }
 0x3ea   : > { %v4748_v12 = vrot.slane %v4747_v58, 4  ;;  %v4761_v43 = vrot.slane %v4760_v51, 4  ;;  %v4801_v41 = vadd.f32 %v4800_v0, %v4793_v8 }
 0x3eb   : > { %v4814_v45 = vadd.f32 %v4813_v2, %v4794_v27 }
 0x3ec   : > { %v4749_v47 = vadd.f32 %v4748_v12, %v4747_v58  ;;  %v4762_v19 = vadd.f32 %v4761_v43, %v4760_v51  ;;  %v4802_v6 = vrot.slane %v4801_v41, 4 }
 0x3ed   : > { %v4815_v49 = vrot.slane %v4814_v45, 4 }
 0x3ee   : > { %v4750_v34 = vrot.slane %v4749_v47, 2  ;;  %v4763_v33 = vrot.slane %v4762_v19, 2  ;;  %v4803_v26 = vadd.f32 %v4802_v6, %v4801_v41 }
 0x3ef   : > { %v4816_v42 = vadd.f32 %v4815_v49, %v4814_v45 }
 0x3f0   : > { %v4751_v55 = vadd.f32 %v4750_v34, %v4749_v47  ;;  %v4764_v61 = vadd.f32 %v4763_v33, %v4762_v19  ;;  %v4804_v25 = vrot.slane %v4803_v26, 2 }
 0x3f1   : > { %v4817_v62 = vrot.slane %v4816_v42, 2 }
 0x3f2   : > { %v4752_v36 = vrot.slane %v4751_v55, 1  ;;  %v4765_v24 = vrot.slane %v4764_v61, 1  ;;  %v4805_v53 = vadd.f32 %v4804_v25, %v4803_v26 }
 0x3f3   : > { %v4818_v63 = vadd.f32 %v4817_v62, %v4816_v42 }
 0x3f4   : > { %v4753_v20 = vadd.f32 %v4752_v36, %v4751_v55  ;;  %v4766_v15 = vadd.f32 %v4765_v24, %v4764_v61  ;;  %v4806_v50 = vrot.slane %v4805_v53, 1 }
 0x3f5   : > { %v4819_v60 = vrot.slane %v4818_v63, 1 }
 0x3f6   : > { %v4769_v57 = vrot.slane %v4766_v15, 7  ;;  %v4807_v3 = vadd.f32 %v4806_v50, %v4805_v53 }
 0x3f7   : > { %v4820_v5 = vadd.f32 %v4819_v60, %v4818_v63 }
 0x3f8   : > { %v4771_v31 = vsel %vm4770_vm0, %v4753_v20, %v4769_v57 }
 0x3f9   : > { %4777 = vst.msk [vmem:[%s8073_s6] ss:$8 sm:$0x3] %vm4775_vm1, %v4771_v31  ;;  %v4823_v1 = vrot.slane %v4820_v5, 7 }
 0x3fb   : > { %v4824_v17 = vsel %vm4770_vm0, %v4807_v3, %v4823_v1 }
 0x3fc   : > { %7253 = vst.msk [vmem:[%s8073_s6 + $0x1] ss:$8 sm:$0x3] %vm4775_vm1, %v4824_v17 }
 0x3fd PF: > { %p7254_p9 = scmp.ne.s32.totalorder %s8014_s18, 1 }
 0x3fe   : > { %s7255_s9 = sshll.u32 (!%p7254_p9), %s8014_s18, 6 }
 0x3ff   : > { %4832 = sbr.rel (%p7254_p9) target bundleno = 1074 (0x432), region = 40 }
 0x404   : > { %v4834_v56 = vlaneseq  ;;  %v4843_v39 = vstv %s7255_s9  ;;  %vm4905_vm10 = vcmask 1040384  }
 0x406   : > { %v4835_v22 = vshrl.u32 %v4834_v56, 7  ;;  %vm4910_vm11 = vcmp.lt.s32.totalorder %v4834_v56, 256 }
 0x408   : > { %v4836_v59 = vadd.s32 8, %v4835_v22  ;;  %v4837_v18 = vadd.s32 16, %v4835_v22  ;;  %v4838_v58 = vadd.s32 24, %v4835_v22  ;;  %v4839_v51 = vadd.s32 32, %v4835_v22 }
 0x409   : > { %v4840_v7 = vadd.s32 40, %v4835_v22  ;;  %v4844_v52 = vadd.s32 %v4843_v39, %v4835_v22  ;;  %v4841_v46 = vadd.s32 48, %v4835_v22  ;;  %v4842_v12 = vadd.s32 56, %v4835_v22 }
 0x40a   : > { %v4845_v30 = vadd.s32 %v4843_v39, %v4836_v59  ;;  %v4846_v43 = vadd.s32 %v4843_v39, %v4837_v18  ;;  %v4847_v8 = vadd.s32 %v4843_v39, %v4838_v58  ;;  %v4848_v14 = vadd.s32 %v4843_v39, %v4839_v51 }
 0x40b   : > { %v4849_v27 = vadd.s32 %v4843_v39, %v4840_v7  ;;  %vm4852_vm2 = vcmp.lt.s32.totalorder %v4844_v52, 98  ;;  %v4850_v4 = vadd.s32 %v4843_v39, %v4841_v46  ;;  %v4851_v47 = vadd.s32 %v4843_v39, %v4842_v12 }
 0x40c   : > { %vm4853_vm3 = vcmp.lt.s32.totalorder %v4845_v30, 98  ;;  %vm4854_vm4 = vcmp.lt.s32.totalorder %v4846_v43, 98  ;;  %v4860_v19 = vsel %vm4852_vm2, %v11386_v29, 0.0  ;;  %vm4855_vm5 = vcmp.lt.s32.totalorder %v4847_v8, 98 }
 0x40d   : > { %v4862_v0 = vsel %vm4853_vm3, %v11397_v9, 0.0  ;;  %v4861_v2 = vsel %vm4852_vm2, %v11388_v13, 0.0  ;;  %v4863_v34 = vsel %vm4853_vm3, %v11399_v37, 0.0  ;;  %vm4856_vm6 = vcmp.lt.s32.totalorder %v4848_v14, 98 }
 0x40e   : > { %v4876_v33 = vadd.f32 %v4862_v0, %v4860_v19  ;;  %vm4857_vm7 = vcmp.lt.s32.totalorder %v4849_v27, 98  ;;  %v4864_v41 = vsel %vm4854_vm4, %v11409_v44, 0.0  ;;  %v4889_v45 = vadd.f32 %v4863_v34, %v4861_v2 }
 0x40f   : > { %v4865_v55 = vsel %vm4854_vm4, %v11411_v54, 0.0  ;;  %v4866_v61 = vsel %vm4855_vm5, %v11422_v38, 0.0  ;;  %v4914_v29 = vmul.f32 %v4860_v19, %v4860_v19  ;;  %v4915_v9 = vmul.f32 %v4861_v2, %v4861_v2 }
 0x410   : > { %v4877_v6 = vadd.f32 %v4876_v33, %v4864_v41  ;;  %v4890_v49 = vadd.f32 %v4889_v45, %v4865_v55  ;;  %v4916_v36 = vmul.f32 %v4862_v0, %v4862_v0  ;;  %v4917_v24 = vmul.f32 %v4863_v34, %v4863_v34 }
 0x411   : > { %vm4858_vm8 = vcmp.lt.s32.totalorder %v4850_v4, 98  ;;  %vm4859_vm9 = vcmp.lt.s32.totalorder %v4851_v47, 98  ;;  %v4867_v13 = vsel %vm4855_vm5, %v11424_v35, 0.0  ;;  %v4868_v44 = vsel %vm4856_vm6, %v11435_v23, 0.0 }
 0x412   : > { %v4878_v37 = vadd.f32 %v4877_v6, %v4866_v61  ;;  %v4891_v21 = vadd.f32 %v4890_v49, %v4867_v13  ;;  %v4918_v54 = vmul.f32 %v4864_v41, %v4864_v41  ;;  %v4919_v26 = vmul.f32 %v4865_v55, %v4865_v55 }
 0x413   : > { %v4869_v38 = vsel %vm4856_vm6, %v11437_v16, 0.0  ;;  %v4870_v42 = vsel %vm4857_vm7, %v11448_v11, 0.0  ;;  %v4920_v15 = vmul.f32 %v4866_v61, %v4866_v61  ;;  %v4921_v62 = vmul.f32 %v4867_v13, %v4867_v13 }
 0x414   : > { %v4879_v20 = vadd.f32 %v4878_v37, %v4868_v44  ;;  %v4892_v25 = vadd.f32 %v4891_v21, %v4869_v38  ;;  %v4930_v57 = vadd.f32 %v4916_v36, %v4914_v29  ;;  %v4943_v53 = vadd.f32 %v4917_v24, %v4915_v9 }
 0x415   : > { %v4871_v35 = vsel %vm4857_vm7, %v11450_v32, 0.0  ;;  %v4872_v23 = vsel %vm4858_vm8, %v11458_v10, 0.0  ;;  %v4922_v31 = vmul.f32 %v4868_v44, %v4868_v44  ;;  %v4923_v60 = vmul.f32 %v4869_v38, %v4869_v38 }
 0x416   : > { %v4880_v63 = vadd.f32 %v4879_v20, %v4870_v42  ;;  %v4893_v50 = vadd.f32 %v4892_v25, %v4871_v35  ;;  %v4931_v16 = vadd.f32 %v4930_v57, %v4918_v54  ;;  %v4944_v3 = vadd.f32 %v4943_v53, %v4919_v26 }
 0x417   : > { %v4873_v11 = vsel %vm4858_vm8, %v11460_v28, 0.0  ;;  %v4874_v5 = vsel %vm4859_vm9, %v11466_v48, 0.0  ;;  %v4924_v17 = vmul.f32 %v4870_v42, %v4870_v42  ;;  %v4925_v39 = vmul.f32 %v4871_v35, %v4871_v35 }
 0x418   : > { %v4881_v1 = vadd.f32 %v4880_v63, %v4872_v23  ;;  %v4894_v22 = vadd.f32 %v4893_v50, %v4873_v11  ;;  %v4932_v32 = vadd.f32 %v4931_v16, %v4920_v15  ;;  %v4945_v59 = vadd.f32 %v4944_v3, %v4921_v62 }
 0x419   : > { %v4875_v10 = vsel %vm4859_vm9, %v11468_v40, 0.0  ;;  %v4926_v58 = vmul.f32 %v4872_v23, %v4872_v23  ;;  %v4927_v7 = vmul.f32 %v4873_v11, %v4873_v11  ;;  %v4928_v28 = vmul.f32 %v4874_v5, %v4874_v5 }
 0x41a   : > { %v4882_v18 = vadd.f32 %v4881_v1, %v4874_v5  ;;  %v4895_v51 = vadd.f32 %v4894_v22, %v4875_v10  ;;  %v4933_v52 = vadd.f32 %v4932_v32, %v4922_v31  ;;  %v4946_v30 = vadd.f32 %v4945_v59, %v4923_v60 }
 0x41b   : > { %v4929_v43 = vmul.f32 %v4875_v10, %v4875_v10 }
 0x41c   : > { %v4883_v46 = vrot.slane %v4882_v18, 4  ;;  %v4896_v12 = vrot.slane %v4895_v51, 4  ;;  %v4934_v48 = vadd.f32 %v4933_v52, %v4924_v17  ;;  %v4947_v8 = vadd.f32 %v4946_v30, %v4925_v39 }
 0x41e   : > { %v4884_v14 = vadd.f32 %v4883_v46, %v4882_v18  ;;  %v4897_v27 = vadd.f32 %v4896_v12, %v4895_v51  ;;  %v4935_v4 = vadd.f32 %v4934_v48, %v4926_v58  ;;  %v4948_v19 = vadd.f32 %v4947_v8, %v4927_v7 }
 0x420   : > { %v4885_v0 = vrot.slane %v4884_v14, 2  ;;  %v4898_v2 = vrot.slane %v4897_v27, 2  ;;  %v4936_v47 = vadd.f32 %v4935_v4, %v4928_v28  ;;  %v4949_v40 = vadd.f32 %v4948_v19, %v4929_v43 }
 0x422   : > { %v4886_v34 = vadd.f32 %v4885_v0, %v4884_v14  ;;  %v4899_v33 = vadd.f32 %v4898_v2, %v4897_v27  ;;  %v4937_v41 = vrot.slane %v4936_v47, 4  ;;  %v4950_v45 = vrot.slane %v4949_v40, 4 }
 0x424   : > { %v4887_v55 = vrot.slane %v4886_v34, 1  ;;  %v4900_v61 = vrot.slane %v4899_v33, 1  ;;  %v4938_v6 = vadd.f32 %v4937_v41, %v4936_v47  ;;  %v4951_v29 = vadd.f32 %v4950_v45, %v4949_v40 }
 0x426   : > { %v4888_v49 = vadd.f32 %v4887_v55, %v4886_v34  ;;  %v4901_v9 = vadd.f32 %v4900_v61, %v4899_v33  ;;  %v4939_v36 = vrot.slane %v4938_v6, 2  ;;  %v4952_v24 = vrot.slane %v4951_v29, 2 }
 0x428   : > { %v4904_v13 = vrot.slane %v4901_v9, 7  ;;  %v4940_v37 = vadd.f32 %v4939_v36, %v4938_v6  ;;  %v4953_v44 = vadd.f32 %v4952_v24, %v4951_v29 }
 0x42a   : > { %v4906_v21 = vsel %vm4905_vm10, %v4888_v49, %v4904_v13  ;;  %v4941_v54 = vrot.slane %v4940_v37, 1  ;;  %v4954_v26 = vrot.slane %v4953_v44, 1 }
 0x42b   : > { %4912 = vst.msk [vmem:[%s8073_s6] ss:$8 sm:$0x3] %vm4910_vm11, %v4906_v21 }
 0x42c   : > { %v4942_v38 = vadd.f32 %v4941_v54, %v4940_v37  ;;  %v4955_v42 = vadd.f32 %v4954_v26, %v4953_v44 }
 0x42e   : > { %v4958_v20 = vrot.slane %v4955_v42, 7 }
 0x430   : > { %v4959_v15 = vsel %vm4905_vm10, %v4942_v38, %v4958_v20 }
 0x431   : > { %7256 = vst.msk [vmem:[%s8073_s6 + $0x1] ss:$8 sm:$0x3] %vm4910_vm11, %v4959_v15 }
 0x432 PF: > { %4975 = sbr.rel (!%p8028_p4) target bundleno = 1121 (0x461), region = 44  ;;  %s4977_s10 = ssub.s32 (%p8028_p4), 13, %s8082_s11 }
 0x433   : > { %s7779_s13 = sshll.u32 (%p8028_p4), %s8014_s18, 6  ;;  %p4978_p10 = scmp.lt.s32.totalorder (%p8028_p4), %s4977_s10, 8 }
 0x434   : > { %s11564_s21 = scalar_lea.vmem (%p8028_p4), %s11621_s3, %s7779_s13  }
 0x437   : > { %s11824_s10 = smov (!%p4978_p10, %s4977_s10), 8 }
 0x438   : > { %s7777_s12 = sshll.u32 %s11824_s10, 3 }
 0x439   : > { %p7264_p11 = scmp.eq.s32.totalorder %s7777_s12, 0 }
 0x43a   : > { %s11570_s6 = sshrl.u32 (!%p7264_p11), %s11824_s10, 3 }
 0x43b   : > { %4988 = sbr.rel (%p7264_p11) target bundleno = 1121 (0x461), region = 48  ;;  %p7265_p12 = scmp.le.s32.totalorder (!%p7264_p11), %s11570_s6, 0 }
 0x440   : > { %5190 = sbr.rel (%p7265_p12) target bundleno = 1104 (0x450), region = 138  ;;  %s11816_s18 = smov (!%p7265_p12), %s11564_s21 }
 0x441   : > { %s11817_s23 = smov (!%p7265_p12), %s11393_s15  ;;  %s11579_s11 = smov (!%p7265_p12), 0  }
 0x442   : > { %s11581_s24 = smov (!%p7265_p12), 0  }
 0x445 LB: >> { %v5065_v56 = vld [vmem:[%s7950_s23] sm:$0xff]  ;;  %v5067_v25 = vld [vmem:[%s7950_s23 + $0x8] sm:$0xff]  ;;  %v5069_v62 = vld [vmem:[%s7950_s23 + $0x10] sm:$0xff]  ;;  %s5081_s25 = sadd.s32 1, %s7954_s11  ;;  %s5059_s24 = sadd.s32 1, %s7958_s24   ;;  %s7958_s24 = sphi %s11581_s24, %s5059_s24   ;;  %s7954_s11 = sphi %s11579_s11, %s11819_s11   ;;  %s7950_s23 = sphi %s11817_s23, %s5086_s23   ;;  %s7946_s18 = sphi %s11816_s18, %s11818_s18  }
 0x446   : >> { %5066 = vst [vmem:[%s7946_s18] sm:$0xff] %v5065_v56  ;;  %v5071_v57 = vld [vmem:[%s7950_s23 + $0x18] sm:$0xff]  ;;  %p5082_p13 = scmp.ge.s32.totalorder %s5081_s25, %s11570_s6  ;;  %v5073_v53 = vld [vmem:[%s7950_s23 + $0x20] sm:$0xff]  ;;  %v5075_v35 = vld [vmem:[%s7950_s23 + $0x28] sm:$0xff]  ;;  %p5058_p0 = scmp.ge.s32.totalorder %s5059_s24, %s11570_s6 }
 0x447   : >> { %5068 = vst [vmem:[%s7946_s18 + $0x8] sm:$0xff] %v5067_v25  ;;  %v5077_v23 = vld [vmem:[%s7950_s23 + $0x30] sm:$0xff]  ;;  %v5079_v63 = vld [vmem:[%s7950_s23 + $0x38] sm:$0xff] }
 0x448   : >> { %5070 = vst [vmem:[%s7946_s18 + $0x10] sm:$0xff] %v5069_v62  ;;  %s11826_s25 = smov (%p5082_p13, %s5081_s25), 0 }
 0x449   : >> { %5072 = vst [vmem:[%s7946_s18 + $0x18] sm:$0xff] %v5071_v57  ;;  %s7266_s17 = sshll.u32 %s11826_s25, 6  ;;  %s11819_s11 = smov %s11826_s25 }
 0x44a   : >> { %5074 = vst [vmem:[%s7946_s18 + $0x20] sm:$0xff] %v5073_v53  ;;  %s5086_s23 = scalar_lea.vmem %s11393_s15, %s7266_s17 [#allocation2]   ;;  %s5087_s26 = scalar_lea.vmem %s11564_s21, %s7266_s17  }
 0x44b   : >> { %5076 = vst [vmem:[%s7946_s18 + $0x28] sm:$0xff] %v5075_v35  ;;  %5061 = sbr.rel (!%p5058_p0) target bundleno = 1093 (0x445), region = 144 }
 0x44c   : >> { %5078 = vst [vmem:[%s7946_s18 + $0x30] sm:$0xff] %v5077_v23 }
 0x44d   : >> { %5080 = vst [vmem:[%s7946_s18 + $0x38] sm:$0xff] %v5079_v63  ;;  %s11818_s18 = smov %s5087_s26 }
 0x450 PF: > { %s11600_s27 = sand.u32 7, %s11824_s10   ;;  %s7780_s28 = sshll.u32 %s11570_s6, 6 }
 0x451   : > { %s5092_s29 = scalar_lea.vmem %s11393_s15, %s7780_s28 [#allocation2]   ;;  %s5094_s30 = scalar_lea.vmem %s11564_s21, %s7780_s28  }
 0x452   : > { %p7271_p1 = scmp.le.s32.totalorder %s11600_s27, 0 }
 0x453   : > { %s7960_s5 = smov (!%p7271_p1), %s5094_s30   ;;  %s7964_s7 = smov (!%p7271_p1), %s5092_s29  }
 0x454   : > { %5204 = sbr.rel (%p7271_p1) target bundleno = 1121 (0x461), region = 149  ;;  %s7968_s8 = smov (!%p7271_p1), 0  }
 0x455   : > { %s7972_s9 = smov (!%p7271_p1), 0  }
 0x459 LB: >> { %v5104_v31 = vld [vmem:[%s7966_s7] sm:$0xff]  ;;  %s5106_s10 = sadd.s32 1, %s7970_s8  ;;  %s5098_s9 = sadd.s32 1, %s7974_s9   ;;  %s7974_s9 = sphi %s7972_s9, %s5098_s9   ;;  %s7970_s8 = sphi %s7968_s8, %s7969_s8   ;;  %s7966_s7 = sphi %s7964_s7, %s5111_s7   ;;  %s7962_s5 = sphi %s7960_s5, %s5112_s5  }
 0x45a   : >> { %5105 = vst [vmem:[%s7962_s5] sm:$0xff] %v5104_v31  ;;  %p5107_p2 = scmp.ge.s32.totalorder %s5106_s10, %s11600_s27  ;;  %p5097_p3 = scmp.ge.s32.totalorder %s5098_s9, %s11600_s27 }
 0x45c   : >> { %s11828_s10 = smov (%p5107_p2, %s5106_s10), 0  ;;  %5100 = sbr.rel (!%p5097_p3) target bundleno = 1113 (0x459), region = 155 }
 0x45d   : >> { %s7272_s15 = sshll.u32 %s11828_s10, 3  ;;  %s7969_s8 = smov %s11828_s10  }
 0x45e   : >> { %s5111_s7 = scalar_lea.vmem %s5092_s29, %s7272_s15 [#allocation2]   ;;  %s5112_s5 = scalar_lea.vmem %s5094_s30, %s7272_s15  }
 0x461 PF: > { %p12_p4 = scmp.ge.s32.totalorder %s8016_s19, 4   ;;  %s11820_s15 = smov %s7938_s16 }
 0x462   : > { %s11821_s16 = smov %s8024_s22  ;;  %s11822_s17 = smov %s8016_s19 }
 0x463   :  { %14 = sbr.rel (!%p12_p4) target bundleno = 2 (0x2), region = 166 }

// kernel: mnist_rotdcf_forward.8
= control target key start
LH: loop header
LB: loop body
LE: loop exit
PB: predicated region body
PF: predicated region fallthrough
CT: control target
= control target key end

     0   :  { %vm1451_vm0 = vcmask 516096   ;;  %s2660_s1 = inlined_call_operand.vmem [shape: bf16[2304,64], index: 1, kind: input, shape index: {}]   ;;  %s2661_s0 = inlined_call_operand.vmem [shape: bf16[2,2304], index: 0, kind: input, shape index: {}]   ;;  %s2662_s2 = inlined_call_operand.vmem [shape: f32[1,64], index: 2, kind: input, shape index: {}]   ;;  %s2663_s3 = inlined_call_operand.vmem [shape: bf16[2,64], index: 3, kind: output, shape index: {}]  }
   0x1   :  { %v2040_v0 = vld [vmem:[%s2660_s1 + $0x38] sm:$0xff]  ;;  %v2039_v4 = vld [vmem:[%s2660_s1 + $0x30] sm:$0xff]  ;;  %v2038_v8 = vld [vmem:[%s2660_s1 + $0x28] sm:$0xff] }
   0x2   :  { %v2048_v1 = vld [vmem:[%s2660_s1 + $0x78] sm:$0xff]  ;;  %1215 = vmatpush.bf16.msra.mxu0 %v2040_v0  ;;  %v2047_v5 = vld [vmem:[%s2660_s1 + $0x70] sm:$0xff]  ;;  %v2046_v9 = vld [vmem:[%s2660_s1 + $0x68] sm:$0xff] }
   0x3   :  { %v2056_v2 = vld [vmem:[%s2660_s1 + $0xb8] sm:$0xff]  ;;  %1228 = vmatpush.bf16.msra.mxu1 %v2048_v1  ;;  %v2055_v6 = vld [vmem:[%s2660_s1 + $0xb0] sm:$0xff]  ;;  %v2054_v10 = vld [vmem:[%s2660_s1 + $0xa8] sm:$0xff] }
   0x4   :  { %v2064_v3 = vld [vmem:[%s2660_s1 + $0xf8] sm:$0xff]  ;;  %1241 = vmatpush.bf16.msra.mxu2 %v2056_v2  ;;  %v2063_v7 = vld [vmem:[%s2660_s1 + $0xf0] sm:$0xff]  ;;  %v2062_v11 = vld [vmem:[%s2660_s1 + $0xe8] sm:$0xff] }
   0x5   :  { %1254 = vmatpush.bf16.msra.mxu3 %v2064_v3  ;;  %v2037_v12 = vld [vmem:[%s2660_s1 + $0x20] sm:$0xff]  ;;  %v2036_v16 = vld [vmem:[%s2660_s1 + $0x18] sm:$0xff]  ;;  %v2035_v21 = vld [vmem:[%s2660_s1 + $0x10] sm:$0xff] }
   0x6   :  { %1216 = vmatpush.bf16.msra.mxu0 %v2039_v4  ;;  %v2045_v13 = vld [vmem:[%s2660_s1 + $0x60] sm:$0xff]  ;;  %v2044_v17 = vld [vmem:[%s2660_s1 + $0x58] sm:$0xff]  ;;  %v2043_v22 = vld [vmem:[%s2660_s1 + $0x50] sm:$0xff] }
   0x7   :  { %1229 = vmatpush.bf16.msra.mxu1 %v2047_v5  ;;  %v2053_v14 = vld [vmem:[%s2660_s1 + $0xa0] sm:$0xff]  ;;  %v2052_v18 = vld [vmem:[%s2660_s1 + $0x98] sm:$0xff]  ;;  %v2051_v23 = vld [vmem:[%s2660_s1 + $0x90] sm:$0xff] }
   0x8   :  { %1242 = vmatpush.bf16.msra.mxu2 %v2055_v6  ;;  %v2061_v15 = vld [vmem:[%s2660_s1 + $0xe0] sm:$0xff]  ;;  %v2060_v19 = vld [vmem:[%s2660_s1 + $0xd8] sm:$0xff]  ;;  %v2059_v24 = vld [vmem:[%s2660_s1 + $0xd0] sm:$0xff] }
   0x9   :  { %1255 = vmatpush.bf16.msra.mxu3 %v2063_v7  ;;  %v14_v20 = vld [vmem:[%s2661_s0] sm:$0xff]  ;;  %v2034_v25 = vld [vmem:[%s2660_s1 + $0x8] sm:$0xff]  ;;  %v2072_v32 = vld [vmem:[%s2660_s1 + $0x138] sm:$0xff] }
   0xa   :  { %1217 = vmatpush.bf16.msra.mxu0 %v2038_v8  ;;  %310 = vst [vmem:[#allocation1] ss:$9 sm:$0xff] %v14_v20  ;;  %v2042_v26 = vld [vmem:[%s2660_s1 + $0x48] sm:$0xff]  ;;  %v2033_v29 = vld [vmem:[%s2660_s1] sm:$0xff]  ;;  %v2080_v33 = vld [vmem:[%s2660_s1 + $0x178] sm:$0xff] }
   0xb   :  { %1230 = vmatpush.bf16.msra.mxu1 %v2046_v9  ;;  %v2050_v27 = vld [vmem:[%s2660_s1 + $0x88] sm:$0xff]  ;;  %v2041_v30 = vld [vmem:[%s2660_s1 + $0x40] sm:$0xff]  ;;  %v2088_v34 = vld [vmem:[%s2660_s1 + $0x1b8] sm:$0xff] }
   0xc   :  { %1243 = vmatpush.bf16.msra.mxu2 %v2054_v10  ;;  %v2058_v28 = vld [vmem:[%s2660_s1 + $0xc8] sm:$0xff]  ;;  %v2049_v31 = vld [vmem:[%s2660_s1 + $0x80] sm:$0xff]  ;;  %v2096_v36 = vld [vmem:[%s2660_s1 + $0x1f8] sm:$0xff] }
   0xd   :  { %1256 = vmatpush.bf16.msra.mxu3 %v2062_v11  ;;  %v2057_v35 = vld [vmem:[%s2660_s1 + $0xc0] sm:$0xff]  ;;  %v2071_v38 = vld [vmem:[%s2660_s1 + $0x130] sm:$0xff]  ;;  %v2070_v45 = vld [vmem:[%s2660_s1 + $0x128] sm:$0xff] }
   0xe   :  { %1218 = vmatpush.bf16.msra.mxu0 %v2037_v12  ;;  %v2079_v40 = vld [vmem:[%s2660_s1 + $0x170] sm:$0xff]  ;;  %v2078_v46 = vld [vmem:[%s2660_s1 + $0x168] sm:$0xff]  ;;  %v2069_v54 = vld [vmem:[%s2660_s1 + $0x120] sm:$0xff] }
   0xf   :  { %1231 = vmatpush.bf16.msra.mxu1 %v2045_v13  ;;  %v2087_v41 = vld [vmem:[%s2660_s1 + $0x1b0] sm:$0xff]  ;;  %v2086_v47 = vld [vmem:[%s2660_s1 + $0x1a8] sm:$0xff]  ;;  %v2077_v55 = vld [vmem:[%s2660_s1 + $0x160] sm:$0xff] }
  0x10   :  { %1244 = vmatpush.bf16.msra.mxu2 %v2053_v14  ;;  %v2095_v43 = vld [vmem:[%s2660_s1 + $0x1f0] sm:$0xff]  ;;  %v15_v48 = vld [vmem:[%s2661_s0 + $0x8] sm:$0xff]  ;;  %v2085_v56 = vld [vmem:[%s2660_s1 + $0x1a0] sm:$0xff] }
  0x11   :  { %1257 = vmatpush.bf16.msra.mxu3 %v2061_v15  ;;  %v311_v37 = vld [vmem:[#allocation1] sm:$0xff]  ;;  %v313_v39 = vld [vmem:[#allocation1 + $0x12] sm:$0xff]  ;;  %v312_v42 = vld [vmem:[#allocation1 + $0x9] sm:$0xff] }
  0x12   :  { %1219 = vmatpush.bf16.msra.mxu0 %v2036_v16  ;;  %v314_v44 = vld [vmem:[#allocation1 + $0x1b] sm:$0xff]  ;;  %v2094_v49 = vld [vmem:[%s2660_s1 + $0x1e8] sm:$0xff]  ;;  %v2067_v62 = vld [vmem:[%s2660_s1 + $0x110] sm:$0xff] }
  0x13   :  { %1232 = vmatpush.bf16.msra.mxu1 %v2044_v17  ;;  %v317_v50 = vld [vmem:[#allocation1 + $0x36] sm:$0xff]  ;;  %v315_v51 = vld [vmem:[#allocation1 + $0x24] sm:$0xff]  ;;  %v316_v53 = vld [vmem:[#allocation1 + $0x2d] sm:$0xff] }
  0x14   :  { %1245 = vmatpush.bf16.msra.mxu2 %v2052_v18  ;;  %v2336_v52 = vld [vmem:[#allocation1 + $0x3f] sm:$0xff]  ;;  %v2075_v63 = vld [vmem:[%s2660_s1 + $0x150] sm:$0xff]  ;;  %v2066_v2 = vld [vmem:[%s2660_s1 + $0x108] sm:$0xff] }
  0x15   :  { %1258 = vmatpush.bf16.msra.mxu3 %v2060_v19  ;;  %320 = vst [vmem:[#allocation1] ss:$9 sm:$0xff] %v15_v48  ;;  %v2093_v57 = vld [vmem:[%s2660_s1 + $0x1e0] sm:$0xff]  ;;  %v2068_v58 = vld [vmem:[%s2660_s1 + $0x118] sm:$0xff]  ;;  %v2083_v0 = vld [vmem:[%s2660_s1 + $0x190] sm:$0xff] }
  0x16   :  { %1220 = vmatpush.bf16.msra.mxu0 %v2035_v21  ;;  %v2076_v59 = vld [vmem:[%s2660_s1 + $0x158] sm:$0xff]  ;;  %v2091_v1 = vld [vmem:[%s2660_s1 + $0x1d0] sm:$0xff]  ;;  %v2074_v3 = vld [vmem:[%s2660_s1 + $0x148] sm:$0xff] }
  0x17   :  { %1233 = vmatpush.bf16.msra.mxu1 %v2043_v22  ;;  %v2084_v60 = vld [vmem:[%s2660_s1 + $0x198] sm:$0xff]  ;;  %v2082_v4 = vld [vmem:[%s2660_s1 + $0x188] sm:$0xff]  ;;  %v2065_v6 = vld [vmem:[%s2660_s1 + $0x100] sm:$0xff] }
  0x18   :  { %1246 = vmatpush.bf16.msra.mxu2 %v2051_v23  ;;  %v2092_v61 = vld [vmem:[%s2660_s1 + $0x1d8] sm:$0xff]  ;;  %v2090_v5 = vld [vmem:[%s2660_s1 + $0x1c8] sm:$0xff]  ;;  %v2073_v7 = vld [vmem:[%s2660_s1 + $0x140] sm:$0xff] }
  0x19   :  { %1259 = vmatpush.bf16.msra.mxu3 %v2059_v24  ;;  %v2081_v8 = vld [vmem:[%s2660_s1 + $0x180] sm:$0xff]  ;;  %v2104_v9 = vld [vmem:[%s2660_s1 + $0x238] sm:$0xff]  ;;  %v2103_v14 = vld [vmem:[%s2660_s1 + $0x230] sm:$0xff] }
  0x1a   :  { %1221 = vmatpush.bf16.msra.mxu0 %v2034_v25  ;;  %v2112_v10 = vld [vmem:[%s2660_s1 + $0x278] sm:$0xff]  ;;  %v2089_v12 = vld [vmem:[%s2660_s1 + $0x1c0] sm:$0xff]  ;;  %v2111_v15 = vld [vmem:[%s2660_s1 + $0x270] sm:$0xff] }
  0x1b   :  { %1234 = vmatpush.bf16.msra.mxu1 %v2042_v26  ;;  %v2120_v11 = vld [vmem:[%s2660_s1 + $0x2b8] sm:$0xff]  ;;  %v2119_v16 = vld [vmem:[%s2660_s1 + $0x2b0] sm:$0xff]  ;;  %v2102_v18 = vld [vmem:[%s2660_s1 + $0x228] sm:$0xff] }
  0x1c   :  { %1247 = vmatpush.bf16.msra.mxu2 %v2050_v27  ;;  %v2128_v13 = vld [vmem:[%s2660_s1 + $0x2f8] sm:$0xff]  ;;  %v2127_v17 = vld [vmem:[%s2660_s1 + $0x2f0] sm:$0xff]  ;;  %v2110_v19 = vld [vmem:[%s2660_s1 + $0x268] sm:$0xff] }
  0x1d   :  { %1260 = vmatpush.bf16.msra.mxu3 %v2058_v28  ;;  %v2118_v20 = vld [vmem:[%s2660_s1 + $0x2a8] sm:$0xff]  ;;  %v2101_v22 = vld [vmem:[%s2660_s1 + $0x220] sm:$0xff]  ;;  %v2100_v26 = vld [vmem:[%s2660_s1 + $0x218] sm:$0xff] }
  0x1e   :  { %1222 = vmatpush.bf16.msra.mxu0 %v2033_v29  ;;  %v2126_v21 = vld [vmem:[%s2660_s1 + $0x2e8] sm:$0xff]  ;;  %v2109_v23 = vld [vmem:[%s2660_s1 + $0x260] sm:$0xff]  ;;  %v2108_v27 = vld [vmem:[%s2660_s1 + $0x258] sm:$0xff] }
  0x1f   :  { %1235 = vmatpush.bf16.msra.mxu1 %v2041_v30  ;;  %v2117_v24 = vld [vmem:[%s2660_s1 + $0x2a0] sm:$0xff]  ;;  %v2116_v28 = vld [vmem:[%s2660_s1 + $0x298] sm:$0xff]  ;;  %v2099_v30 = vld [vmem:[%s2660_s1 + $0x210] sm:$0xff] }
  0x20   :  { %1248 = vmatpush.bf16.msra.mxu2 %v2049_v31  ;;  %v2125_v25 = vld [vmem:[%s2660_s1 + $0x2e0] sm:$0xff]  ;;  %v2124_v29 = vld [vmem:[%s2660_s1 + $0x2d8] sm:$0xff]  ;;  %v2107_v31 = vld [vmem:[%s2660_s1 + $0x250] sm:$0xff] }
  0x21   :  { %1261 = vmatpush.bf16.msra.mxu3 %v2057_v35  ;;  %1223 = vmatmul.bf16.vlgmr.msra.gmra.mxu0 %v311_v37  ;;  %v2106_v35 = vld [vmem:[%s2660_s1 + $0x248] sm:$0xff]  ;;  %v323_v48 = vld [vmem:[#allocation1 + $0x12] sm:$0xff] }
  0x22   :  { %1267 = vmatpush.bf16.msrb.mxu0 %v2072_v32  ;;  %1236 = vmatmul.bf16.vlgmr.msra.gmra.mxu1 %v312_v42  ;;  %v2115_v32 = vld [vmem:[%s2660_s1 + $0x290] sm:$0xff]  ;;  %v2122_v37 = vld [vmem:[%s2660_s1 + $0x2c8] sm:$0xff] }
  0x23   :  { %1280 = vmatpush.bf16.msrb.mxu1 %v2080_v33  ;;  %1249 = vmatmul.bf16.vlgmr.msra.gmra.mxu2 %v313_v39  ;;  %v2123_v33 = vld [vmem:[%s2660_s1 + $0x2d0] sm:$0xff]  ;;  %v2105_v39 = vld [vmem:[%s2660_s1 + $0x240] sm:$0xff] }
  0x24   :  { %1293 = vmatpush.bf16.msrb.mxu2 %v2088_v34  ;;  %1262 = vmatmul.bf16.vlgmr.msra.gmra.mxu3 %v314_v44  ;;  %v2098_v34 = vld [vmem:[%s2660_s1 + $0x208] sm:$0xff]  ;;  %v16_v42 = vld [vmem:[%s2661_s0 + $0x10] sm:$0x3]  ;;  %v2152_v44 = vld [vmem:[%s2660_s1 + $0x3b8] sm:$0xff] }
  0x25   :  { %1306 = vmatpush.bf16.msrb.mxu3 %v2096_v36  ;;  %v2114_v36 = vld [vmem:[%s2660_s1 + $0x288] sm:$0xff] }
  0x26   :  { %1268 = vmatpush.bf16.msrb.mxu0 %v2071_v38  ;;  %v2097_v38 = vld [vmem:[%s2660_s1 + $0x200] sm:$0xff] }
  0x27   :  { %1281 = vmatpush.bf16.msrb.mxu1 %v2079_v40  ;;  %v2113_v40 = vld [vmem:[%s2660_s1 + $0x280] sm:$0xff] }
  0x28   :  { %1294 = vmatpush.bf16.msrb.mxu2 %v2087_v41  ;;  %v2136_v41 = vld [vmem:[%s2660_s1 + $0x338] sm:$0xff] }
  0x29   :  { %1307 = vmatpush.bf16.msrb.mxu3 %v2095_v43  ;;  %v2144_v43 = vld [vmem:[%s2660_s1 + $0x378] sm:$0xff] }
  0x2a   :  { %1269 = vmatpush.bf16.msrb.mxu0 %v2070_v45  ;;  %v2121_v45 = vld [vmem:[%s2660_s1 + $0x2c0] sm:$0xff] }
  0x2b   :  { %1282 = vmatpush.bf16.msrb.mxu1 %v2078_v46  ;;  %v321_v46 = vld [vmem:[#allocation1] sm:$0xff] }
  0x2c   :  { %1295 = vmatpush.bf16.msrb.mxu2 %v2086_v47  ;;  %v2160_v47 = vld [vmem:[%s2660_s1 + $0x3f8] sm:$0xff] }
  0x2d   :  { %1308 = vmatpush.bf16.msrb.mxu3 %v2094_v49  ;;  %v322_v49 = vld [vmem:[#allocation1 + $0x9] sm:$0xff] }
  0x2e   :  { %1270 = vmatpush.bf16.msrb.mxu0 %v2069_v54  ;;  %v2518_v54 = vld [vmem:[#allocation1 + $0x36] sm:$0xff] }
  0x2f   :  { %1283 = vmatpush.bf16.msrb.mxu1 %v2077_v55  ;;  %v2520_v55 = vld [vmem:[#allocation1 + $0x2d] sm:$0xff] }
  0x30   :  { %1296 = vmatpush.bf16.msrb.mxu2 %v2085_v56  ;;  %v2522_v56 = vld [vmem:[#allocation1 + $0x3f] sm:$0xff] }
  0x31   :  { %1309 = vmatpush.bf16.msrb.mxu3 %v2093_v57  ;;  %v2151_v57 = vld [vmem:[%s2660_s1 + $0x3b0] sm:$0xff] }
  0x32   :  { %1271 = vmatpush.bf16.msrb.mxu0 %v2068_v58  ;;  %v2159_v58 = vld [vmem:[%s2660_s1 + $0x3f0] sm:$0xff] }
  0x33   :  { %1284 = vmatpush.bf16.msrb.mxu1 %v2076_v59  ;;  %v2134_v59 = vld [vmem:[%s2660_s1 + $0x328] sm:$0xff] }
  0x34   :  { %1297 = vmatpush.bf16.msrb.mxu2 %v2084_v60  ;;  %v2142_v60 = vld [vmem:[%s2660_s1 + $0x368] sm:$0xff] }
  0x35   :  { %1310 = vmatpush.bf16.msrb.mxu3 %v2092_v61  ;;  %v2150_v61 = vld [vmem:[%s2660_s1 + $0x3a8] sm:$0xff] }
  0x36   :  { %1272 = vmatpush.bf16.msrb.mxu0 %v2067_v62  ;;  %v2158_v62 = vld [vmem:[%s2660_s1 + $0x3e8] sm:$0xff] }
  0x37   :  { %1285 = vmatpush.bf16.msrb.mxu1 %v2075_v63  ;;  %v2133_v63 = vld [vmem:[%s2660_s1 + $0x320] sm:$0xff] }
  0x38   :  { %1298 = vmatpush.bf16.msrb.mxu2 %v2083_v0  ;;  %v2141_v0 = vld [vmem:[%s2660_s1 + $0x360] sm:$0xff] }
  0x39   :  { %1311 = vmatpush.bf16.msrb.mxu3 %v2091_v1  ;;  %v2149_v1 = vld [vmem:[%s2660_s1 + $0x3a0] sm:$0xff] }
  0x3a   :  { %1273 = vmatpush.bf16.msrb.mxu0 %v2066_v2  ;;  %v2157_v2 = vld [vmem:[%s2660_s1 + $0x3e0] sm:$0xff] }
  0x3b   :  { %1286 = vmatpush.bf16.msrb.mxu1 %v2074_v3  ;;  %v2132_v3 = vld [vmem:[%s2660_s1 + $0x318] sm:$0xff] }
  0x3c   :  { %1299 = vmatpush.bf16.msrb.mxu2 %v2082_v4  ;;  %v2140_v4 = vld [vmem:[%s2660_s1 + $0x358] sm:$0xff] }
  0x3d   :  { %1312 = vmatpush.bf16.msrb.mxu3 %v2090_v5  ;;  %v2148_v5 = vld [vmem:[%s2660_s1 + $0x398] sm:$0xff] }
  0x3e   :  { %1274 = vmatpush.bf16.msrb.mxu0 %v2065_v6  ;;  %v2156_v6 = vld [vmem:[%s2660_s1 + $0x3d8] sm:$0xff] }
  0x3f   :  { %1287 = vmatpush.bf16.msrb.mxu1 %v2073_v7  ;;  %v2131_v7 = vld [vmem:[%s2660_s1 + $0x310] sm:$0xff] }
  0x40   :  { %1300 = vmatpush.bf16.msrb.mxu2 %v2081_v8  ;;  %v2139_v8 = vld [vmem:[%s2660_s1 + $0x350] sm:$0xff] }
  0x41   :  { %1313 = vmatpush.bf16.msrb.mxu3 %v2089_v12  ;;  %1275 = vmatmul.bf16.vlgmr.msrb.gmra.mxu0 %v315_v51  ;;  %v324_v51 = vld [vmem:[#allocation1 + $0x1b] sm:$0xff]  ;;  %v2138_v12 = vld [vmem:[%s2660_s1 + $0x348] sm:$0xff] }
  0x42   :  { %1319 = vmatpush.bf16.msra.mxu0 %v2104_v9  ;;  %1288 = vmatmul.bf16.vlgmr.msrb.gmra.mxu1 %v316_v53  ;;  %v2516_v53 = vld [vmem:[#allocation1 + $0x24] sm:$0xff]  ;;  %v2147_v9 = vld [vmem:[%s2660_s1 + $0x390] sm:$0xff] }
  0x43   :  { %1332 = vmatpush.bf16.msra.mxu1 %v2112_v10  ;;  %1301 = vmatmul.bf16.vlgmr.msrb.gmra.mxu2 %v317_v50  ;;  %v2135_v50 = vld [vmem:[%s2660_s1 + $0x330] sm:$0xff]  ;;  %330 = vst [vmem:[#allocation1] ss:$9 sm:$0xff] %v16_v42 }
  0x44   :  { %1345 = vmatpush.bf16.msra.mxu2 %v2120_v11  ;;  %1314 = vmatmul.bf16.vlgmr.msrb.gmra.mxu3 %v2336_v52  ;;  %v2143_v52 = vld [vmem:[%s2660_s1 + $0x370] sm:$0xff]  ;;  %v2130_v11 = vld [vmem:[%s2660_s1 + $0x308] sm:$0xff] }
  0x45   :  { %1358 = vmatpush.bf16.msra.mxu3 %v2128_v13  ;;  %v2155_v10 = vld [vmem:[%s2660_s1 + $0x3d0] sm:$0xff]  ;;  %v2146_v13 = vld [vmem:[%s2660_s1 + $0x388] sm:$0xff] }
  0x46   :  { %1320 = vmatpush.bf16.msra.mxu0 %v2103_v14  ;;  %v2154_v14 = vld [vmem:[%s2660_s1 + $0x3c8] sm:$0xff] }
  0x47   :  { %1333 = vmatpush.bf16.msra.mxu1 %v2111_v15  ;;  %v2129_v15 = vld [vmem:[%s2660_s1 + $0x300] sm:$0xff] }
  0x48   :  { %1346 = vmatpush.bf16.msra.mxu2 %v2119_v16  ;;  %v2137_v16 = vld [vmem:[%s2660_s1 + $0x340] sm:$0xff] }
  0x49   :  { %1359 = vmatpush.bf16.msra.mxu3 %v2127_v17  ;;  %v2168_v17 = vld [vmem:[%s2660_s1 + $0x438] sm:$0xff] }
  0x4a   :  { %1321 = vmatpush.bf16.msra.mxu0 %v2102_v18  ;;  %v2145_v18 = vld [vmem:[%s2660_s1 + $0x380] sm:$0xff] }
  0x4b   :  { %1334 = vmatpush.bf16.msra.mxu1 %v2110_v19  ;;  %v2176_v19 = vld [vmem:[%s2660_s1 + $0x478] sm:$0xff] }
  0x4c   :  { %1347 = vmatpush.bf16.msra.mxu2 %v2118_v20  ;;  %v2153_v20 = vld [vmem:[%s2660_s1 + $0x3c0] sm:$0xff] }
  0x4d   :  { %1360 = vmatpush.bf16.msra.mxu3 %v2126_v21  ;;  %v2167_v21 = vld [vmem:[%s2660_s1 + $0x430] sm:$0xff] }
  0x4e   :  { %1322 = vmatpush.bf16.msra.mxu0 %v2101_v22  ;;  %v2175_v22 = vld [vmem:[%s2660_s1 + $0x470] sm:$0xff] }
  0x4f   :  { %1335 = vmatpush.bf16.msra.mxu1 %v2109_v23  ;;  %v2166_v23 = vld [vmem:[%s2660_s1 + $0x428] sm:$0xff] }
  0x50   :  { %1348 = vmatpush.bf16.msra.mxu2 %v2117_v24  ;;  %v2174_v24 = vld [vmem:[%s2660_s1 + $0x468] sm:$0xff] }
  0x51   :  { %1361 = vmatpush.bf16.msra.mxu3 %v2125_v25  ;;  %v2165_v25 = vld [vmem:[%s2660_s1 + $0x420] sm:$0xff] }
  0x52   :  { %1323 = vmatpush.bf16.msra.mxu0 %v2100_v26  ;;  %v2173_v26 = vld [vmem:[%s2660_s1 + $0x460] sm:$0xff] }
  0x53   :  { %1336 = vmatpush.bf16.msra.mxu1 %v2108_v27  ;;  %v2164_v27 = vld [vmem:[%s2660_s1 + $0x418] sm:$0xff] }
  0x54   :  { %1349 = vmatpush.bf16.msra.mxu2 %v2116_v28  ;;  %v2172_v28 = vld [vmem:[%s2660_s1 + $0x458] sm:$0xff] }
  0x55   :  { %1362 = vmatpush.bf16.msra.mxu3 %v2124_v29  ;;  %v2163_v29 = vld [vmem:[%s2660_s1 + $0x410] sm:$0xff] }
  0x56   :  { %1324 = vmatpush.bf16.msra.mxu0 %v2099_v30  ;;  %v2171_v30 = vld [vmem:[%s2660_s1 + $0x450] sm:$0xff] }
  0x57   :  { %1337 = vmatpush.bf16.msra.mxu1 %v2107_v31  ;;  %v2162_v31 = vld [vmem:[%s2660_s1 + $0x408] sm:$0xff] }
  0x58   :  { %1350 = vmatpush.bf16.msra.mxu2 %v2115_v32  ;;  %v2170_v32 = vld [vmem:[%s2660_s1 + $0x448] sm:$0xff] }
  0x59   :  { %1363 = vmatpush.bf16.msra.mxu3 %v2123_v33  ;;  %v2161_v33 = vld [vmem:[%s2660_s1 + $0x400] sm:$0xff] }
  0x5a   :  { %1325 = vmatpush.bf16.msra.mxu0 %v2098_v34  ;;  %v2169_v34 = vld [vmem:[%s2660_s1 + $0x440] sm:$0xff] }
  0x5b   :  { %1338 = vmatpush.bf16.msra.mxu1 %v2106_v35  ;;  %v331_v35 = vld [vmem:[#allocation1] sm:$0xff] }
  0x5c   :  { %1351 = vmatpush.bf16.msra.mxu2 %v2114_v36  ;;  %v332_v36 = vld [vmem:[#allocation1 + $0x9] sm:$0xff] }
  0x5d   :  { %1364 = vmatpush.bf16.msra.mxu3 %v2122_v37  ;;  %v2177_v37 = vld [vmem:[%s2662_s2] ss:$0 sm:$0xff] }
  0x5e   :  { %1326 = vmatpush.bf16.msra.mxu0 %v2097_v38 }
  0x5f   :  { %1339 = vmatpush.bf16.msra.mxu1 %v2105_v39 }
  0x60   :  { %1352 = vmatpush.bf16.msra.mxu2 %v2113_v40 }
  0x61   :  { %1365 = vmatpush.bf16.msra.mxu3 %v2121_v45  ;;  %1327 = vmatmul.bf16.vlgmr.msra.gmra.mxu0 %v321_v46 }
  0x62   :  { %1371 = vmatpush.bf16.msrb.mxu0 %v2136_v41  ;;  %1340 = vmatmul.bf16.vlgmr.msra.gmra.mxu1 %v322_v49 }
  0x63   :  { %1384 = vmatpush.bf16.msrb.mxu1 %v2144_v43  ;;  %1353 = vmatmul.bf16.vlgmr.msra.gmra.mxu2 %v323_v48 }
  0x64   :  { %1397 = vmatpush.bf16.msrb.mxu2 %v2152_v44  ;;  %1366 = vmatmul.bf16.vlgmr.msra.gmra.mxu3 %v324_v51 }
  0x65   :  { %1410 = vmatpush.bf16.msrb.mxu3 %v2160_v47 }
  0x66   :  { %1372 = vmatpush.bf16.msrb.mxu0 %v2135_v50 }
  0x67   :  { %1385 = vmatpush.bf16.msrb.mxu1 %v2143_v52 }
  0x68   :  { %1398 = vmatpush.bf16.msrb.mxu2 %v2151_v57 }
  0x69   :  { %1411 = vmatpush.bf16.msrb.mxu3 %v2159_v58 }
  0x6a   :  { %1373 = vmatpush.bf16.msrb.mxu0 %v2134_v59 }
  0x6b   :  { %1386 = vmatpush.bf16.msrb.mxu1 %v2142_v60 }
  0x6c   :  { %1399 = vmatpush.bf16.msrb.mxu2 %v2150_v61 }
  0x6d   :  { %1412 = vmatpush.bf16.msrb.mxu3 %v2158_v62 }
  0x6e   :  { %1374 = vmatpush.bf16.msrb.mxu0 %v2133_v63 }
  0x6f   :  { %1387 = vmatpush.bf16.msrb.mxu1 %v2141_v0 }
  0x70   :  { %1400 = vmatpush.bf16.msrb.mxu2 %v2149_v1 }
  0x71   :  { %1413 = vmatpush.bf16.msrb.mxu3 %v2157_v2 }
  0x72   :  { %1375 = vmatpush.bf16.msrb.mxu0 %v2132_v3 }
  0x73   :  { %1388 = vmatpush.bf16.msrb.mxu1 %v2140_v4 }
  0x74   :  { %1401 = vmatpush.bf16.msrb.mxu2 %v2148_v5 }
  0x75   :  { %1414 = vmatpush.bf16.msrb.mxu3 %v2156_v6 }
  0x76   :  { %1376 = vmatpush.bf16.msrb.mxu0 %v2131_v7 }
  0x77   :  { %1389 = vmatpush.bf16.msrb.mxu1 %v2139_v8 }
  0x78   :  { %1402 = vmatpush.bf16.msrb.mxu2 %v2147_v9 }
  0x79   :  { %1415 = vmatpush.bf16.msrb.mxu3 %v2155_v10 }
  0x7a   :  { %1377 = vmatpush.bf16.msrb.mxu0 %v2130_v11 }
  0x7b   :  { %1390 = vmatpush.bf16.msrb.mxu1 %v2138_v12 }
  0x7c   :  { %1403 = vmatpush.bf16.msrb.mxu2 %v2146_v13 }
  0x7d   :  { %1416 = vmatpush.bf16.msrb.mxu3 %v2154_v14 }
  0x7e   :  { %1378 = vmatpush.bf16.msrb.mxu0 %v2129_v15 }
  0x7f   :  { %1391 = vmatpush.bf16.msrb.mxu1 %v2137_v16 }
  0x80   :  { %1404 = vmatpush.bf16.msrb.mxu2 %v2145_v18 }
  0x81   :  { %1417 = vmatpush.bf16.msrb.mxu3 %v2153_v20  ;;  %1379 = vmatmul.bf16.vlgmr.msrb.gmra.mxu0 %v2516_v53 }
  0x82   :  { %1423 = vmatpush.bf16.msra.mxu0 %v2168_v17  ;;  %1392 = vmatmul.bf16.vlgmr.msrb.gmra.mxu1 %v2520_v55 }
  0x83   :  { %1436 = vmatpush.bf16.msra.mxu1 %v2176_v19  ;;  %1405 = vmatmul.bf16.vlgmr.msrb.gmra.mxu2 %v2518_v54 }
  0x84   :  { %1418 = vmatmul.bf16.vlgmr.msrb.gmra.mxu3 %v2522_v56 }
  0x86   :  { %1424 = vmatpush.bf16.msra.mxu0 %v2167_v21 }
  0x87   :  { %1437 = vmatpush.bf16.msra.mxu1 %v2175_v22 }
  0x8a   :  { %1425 = vmatpush.bf16.msra.mxu0 %v2166_v23 }
  0x8b   :  { %1438 = vmatpush.bf16.msra.mxu1 %v2174_v24 }
  0x8e   :  { %1426 = vmatpush.bf16.msra.mxu0 %v2165_v25 }
  0x8f   :  { %1439 = vmatpush.bf16.msra.mxu1 %v2173_v26 }
  0x92   :  { %1427 = vmatpush.bf16.msra.mxu0 %v2164_v27 }
  0x93   :  { %1440 = vmatpush.bf16.msra.mxu1 %v2172_v28 }
  0x96   :  { %1428 = vmatpush.bf16.msra.mxu0 %v2163_v29 }
  0x97   :  { %1441 = vmatpush.bf16.msra.mxu1 %v2171_v30 }
  0x9a   :  { %1429 = vmatpush.bf16.msra.mxu0 %v2162_v31 }
  0x9b   :  { %1442 = vmatpush.bf16.msra.mxu1 %v2170_v32 }
  0x9e   :  { %1430 = vmatpush.bf16.msra.mxu0 %v2161_v33  ;;  %v1224_v38 = vpop.f32.mrf.mxu0 }
  0x9f   :  { %1443 = vmatpush.bf16.msra.mxu1 %v2169_v34  ;;  %v1225_v39 = vadd.f32 %v2177_v37, %v1224_v38  ;;  %v1237_v40 = vpop.f32.mrf.mxu1 }
  0xa1   :  { %1431 = vmatmul.bf16.vlgmr.msra.gmra.mxu0 %v331_v35  ;;  %v1238_v41 = vadd.f32 %v1237_v40, %v1225_v39 }
  0xa2   :  { %1444 = vmatmul.bf16.vlgmr.msra.gmra.mxu1 %v332_v36 }
  0xa6   :  { %v1250_v42 = vpop.f32.mrf.mxu2  ;;  %v1226_v44 = vpop.f32.mrf.mxu0 }
  0xa7   :  { %v1251_v43 = vadd.f32 %v1250_v42, %v1238_v41  ;;  %v1263_v45 = vpop.f32.mrf.mxu3  ;;  %v1239_v46 = vpop.f32.mrf.mxu1 }
  0xa9   :  { %v1264_v47 = vadd.f32 %v1263_v45, %v1251_v43 }
  0xae   :  { %v1252_v48 = vpop.f32.mrf.mxu2 }
  0xaf   :  { %v1265_v49 = vpop.f32.mrf.mxu3 }
  0xbe   :  { %v1276_v50 = vpop.f32.mrf.mxu0 }
  0xbf   :  { %v1289_v51 = vpop.f32.mrf.mxu1  ;;  %v1277_v2 = vadd.f32 %v1276_v50, %v1264_v47 }
  0xc1   :  { %v1290_v3 = vadd.f32 %v1289_v51, %v1277_v2 }
  0xc6   :  { %v1302_v52 = vpop.f32.mrf.mxu2  ;;  %v1278_v54 = vpop.f32.mrf.mxu0 }
  0xc7   :  { %v1315_v53 = vpop.f32.mrf.mxu3  ;;  %v1291_v55 = vpop.f32.mrf.mxu1  ;;  %v1303_v4 = vadd.f32 %v1302_v52, %v1290_v3 }
  0xc9   :  { %v1316_v7 = vadd.f32 %v1315_v53, %v1303_v4 }
  0xce   :  { %v1304_v56 = vpop.f32.mrf.mxu2 }
  0xcf   :  { %v1317_v57 = vpop.f32.mrf.mxu3 }
  0xde   :  { %v1328_v58 = vpop.f32.mrf.mxu0 }
  0xdf   :  { %v1341_v59 = vpop.f32.mrf.mxu1  ;;  %v1329_v8 = vadd.f32 %v1328_v58, %v1316_v7 }
  0xe1   :  { %v1342_v13 = vadd.f32 %v1341_v59, %v1329_v8 }
  0xe6   :  { %v1354_v60 = vpop.f32.mrf.mxu2  ;;  %v1330_v61 = vpop.f32.mrf.mxu0 }
  0xe7   :  { %v1367_v62 = vpop.f32.mrf.mxu3  ;;  %v1343_v63 = vpop.f32.mrf.mxu1  ;;  %v1355_v14 = vadd.f32 %v1354_v60, %v1342_v13 }
  0xe9   :  { %v1368_v15 = vadd.f32 %v1367_v62, %v1355_v14 }
  0xee   :  { %v1356_v0 = vpop.f32.mrf.mxu2 }
  0xef   :  { %v1369_v1 = vpop.f32.mrf.mxu3 }
  0xfe   :  { %v1380_v5 = vpop.f32.mrf.mxu0 }
  0xff   :  { %v1393_v6 = vpop.f32.mrf.mxu1  ;;  %v1381_v18 = vadd.f32 %v1380_v5, %v1368_v15 }
 0x101   :  { %v1394_v19 = vadd.f32 %v1393_v6, %v1381_v18 }
 0x106   :  { %v1406_v9 = vpop.f32.mrf.mxu2  ;;  %v1382_v10 = vpop.f32.mrf.mxu0 }
 0x107   :  { %v1419_v11 = vpop.f32.mrf.mxu3  ;;  %v1395_v12 = vpop.f32.mrf.mxu1  ;;  %v1407_v20 = vadd.f32 %v1406_v9, %v1394_v19 }
 0x109   :  { %v1420_v21 = vadd.f32 %v1419_v11, %v1407_v20 }
 0x10e   :  { %v1408_v16 = vpop.f32.mrf.mxu2 }
 0x10f   :  { %v1421_v17 = vpop.f32.mrf.mxu3 }
 0x11e   :  { %v1432_v22 = vpop.f32.mrf.mxu0 }
 0x11f   :  { %v1433_v23 = vadd.f32 %v1432_v22, %v1420_v21  ;;  %v1445_v24 = vpop.f32.mrf.mxu1 }
 0x121   :  { %v1446_v25 = vadd.f32 %v1445_v24, %v1433_v23 }
 0x123   :  { %v1449_v26 = vmax.f32 %v1446_v25, 0.0 }
 0x125   :  { %v1450_v27 = vpack.c.bf16 %v1449_v26, %v1449_v26 }
 0x126   :  { %v1434_v28 = vpop.f32.mrf.mxu0 }
 0x127   :  { %1452 = vst.msk [vmem:[%s2663_s3] sm:$0x1] %vm1451_vm0, %v1450_v27  ;;  %v1447_v29 = vpop.f32.mrf.mxu1 }

// kernel: mnist_rotdcf_forward.9
= control target key start
LH: loop header
LB: loop body
LE: loop exit
PB: predicated region body
PF: predicated region fallthrough
CT: control target
= control target key end

     0   :  { %s179_s0 = inlined_call_operand.vmem [shape: bf16[2,64], index: 0, kind: input, shape index: {}]   ;;  %s180_s1 = inlined_call_operand.vmem [shape: bf16[64,10], index: 1, kind: input, shape index: {}]   ;;  %s181_s2 = inlined_call_operand.vmem [shape: f32[1,10], index: 2, kind: input, shape index: {}]   ;;  %s182_s3 = inlined_call_operand.hbm [shape: f32[2,10], index: 3, kind: output, shape index: {}]  }
   0x1   :  { %v108_v0 = vld [vmem:[%s180_s1 + $0x18] sm:$0xff]  ;;  %v107_v1 = vld [vmem:[%s180_s1 + $0x10] sm:$0xff] }
   0x2   :  { %61 = vmatpush.bf16.msra.mxu0 %v108_v0 }
   0x3   :  { %8 = vsyncpa [#allocation3], 0  ;;  %v106_v2 = vld [vmem:[%s180_s1 + $0x8] sm:$0xff]  ;;  %v105_v3 = vld [vmem:[%s180_s1] sm:$0xff]  ;;  %vm53_vm0 = vcmask 523264   ;;  %s137_s24 = smov [#allocation2]  }
   0x4   :  { %v16_v4 = vld [vmem:[%s179_s0] sm:$0x1]  ;;  %s77_s25 = sshll.u32 %s137_s24, 4  ;;  %s79_s28 = sshll.u32 %s182_s3, 4  ;;  %vm70_vm1 = vcmask 74752   ;;  %s78_s25 = int_to_ptr.vmem [resolvable:$true] %s77_s25  ;;  %s80_s28 = int_to_ptr.hbm [resolvable:$true] %s79_s28 }
   0x5   :  { %v110_v5 = vld [vmem:[%s181_s2] ss:$0 sm:$0xff] }
   0x6   :  { %62 = vmatpush.bf16.msra.mxu0 %v107_v1 }
   0xa   :  { %63 = vmatpush.bf16.msra.mxu0 %v106_v2 }
   0xe   :  { %64 = vmatpush.bf16.msra.mxu0 %v105_v3 }
  0x11   :  { %104 = vmatmul.msk.bf16.vlgmr.msra.gmra.mxu0 %vm53_vm0, %v16_v4 }
  0x8e   :  { %v66_v6 = vpop.f32.mrf.mxu0 }
  0x8f   :  { %v67_v7 = vadd.f32 %v110_v5, %v66_v6 }
  0x91   :  { %71 = vst.msk [vmem:[#allocation2] sm:$0x3] %vm70_vm1, %v67_v7 }
  0x92   :  { %82 = dma.vmem_to_hbm [thread:$0]  %s78_s25, 32, %s80_s28, [#allocation3]  }
  0x96   :  { %v68_v8 = vpop.f32.mrf.mxu0 }
  0x97   :  { %135 = dma.done.wait [#allocation3], 32  }
  0x98   :  { %136 = vsyncadd [#allocation3], 4294967264 }
  0x99   :  { %87 = vsyncpa [#allocation3], 1 }

</bundles_post_ra>
